<compile_context>
chip_gen: v6e
topology: v6e:2x2x1
jax: 0.10.0
libtpu: 0.0.40
codegen_flags: <defaults>
</compile_context>

<pallas_src>
import math

import numpy as np
import jax
import jax.numpy as jnp
from jax.experimental import pallas as pl
from jax.experimental.pallas import tpu as pltpu


# ----------------------------------------------------------------------------
# Constant 0/1 window-selection matrices (host-side, tiny: ~135 KB total)
# ----------------------------------------------------------------------------
def _window_selector(src, win, off_r, off_c):
    """(win*win, src*src) 0/1 matrix selecting the win x win window at offset
    (off_r, off_c) from a row-major src x src grid."""
    m = np.zeros((win * win, src * src), np.float32)
    for r in range(win):
        for c in range(win):
            m[r * win + c, (r + off_r) * src + (c + off_c)] = 1.0
    return m


# conv2: 9x9 window at offset (a, b) in {0,1}^2 of a 10x10 parity plane.
_SEL2 = np.stack([_window_selector(10, 9, a, b)
                  for a in range(2) for b in range(2)])        # (4, 81, 100)
# conv3: 7x7 window at offset (i, j) in {0,1,2}^2 of the 9x9 conv2 grid.
_SEL3 = np.stack([_window_selector(9, 7, i, j)
                  for i in range(3) for j in range(3)])        # (9, 49, 81)


# ----------------------------------------------------------------------------
# Pallas kernel 1: fused conv1 + conv2 + conv3 (bias + ReLU after each)
# ----------------------------------------------------------------------------
def _conv_stack_kernel(p1_ref, sel2_ref, sel3_ref, w1_ref, b1_ref,
                       w2_ref, b2_ref, w3_ref, b3_ref, o_ref):
    f32, bf16 = jnp.float32, jnp.bfloat16
    w1, b1 = w1_ref[...], b1_ref[...]

    # conv1 (8x8, stride 4): one matmul per stride-2 parity plane of the 20x20
    # output grid.  planes[p*2+q][m*10+n, :] == relu(conv1(x))[2m+p, 2n+q, :]
    planes = []
    for pq in range(4):
        h = jnp.dot(p1_ref[0, pq], w1, preferred_element_type=f32)
        planes.append(jnp.maximum(h + b1, 0.0).astype(bf16))   # (100, 32)

    # conv2 (4x4, stride 2): 16 taps.  Each tap's 9x9 window of the 20x20 grid
    # is a contiguous window of one parity plane; gather it on the MXU with a
    # constant 0/1 selection matrix (keeps every operand 2-D).
    b2 = b2_ref[...]
    acc2 = jnp.zeros((81, 64), f32)
    for i in range(4):
        for j in range(4):
            pq = (i % 2) * 2 + (j % 2)            # which parity plane
            ab = (i // 2) * 2 + (j // 2)          # window offset inside plane
            slab = jnp.dot(sel2_ref[ab], planes[pq],
                           preferred_element_type=f32)          # (81, 32)
            acc2 = acc2 + jnp.dot(slab.astype(bf16), w2_ref[i * 4 + j],
                                  preferred_element_type=f32)   # (81, 64)
    a2 = jnp.maximum(acc2 + b2, 0.0).astype(bf16)               # 9x9 raster

    # conv3 (3x3, stride 1): 9 shifted taps, same selection trick.
    b3 = b3_ref[...]
    acc3 = jnp.zeros((49, 32), f32)
    for i in range(3):
        for j in range(3):
            slab = jnp.dot(sel3_ref[i * 3 + j], a2,
                           preferred_element_type=f32)          # (49, 64)
            acc3 = acc3 + jnp.dot(slab.astype(bf16), w3_ref[i * 3 + j],
                                  preferred_element_type=f32)   # (49, 32)
    a3 = jnp.maximum(acc3 + b3, 0.0)                            # (h, w) raster

    o_ref[0] = a3.astype(o_ref.dtype)


# ----------------------------------------------------------------------------
# Pallas kernel 2: fused Linear(1568->hidden)+ReLU and critic head
# ----------------------------------------------------------------------------
def _head_kernel(x_ref, wf_ref, bf_ref, wc_ref, bc_ref, feat_ref, val_ref):
    h = jnp.dot(x_ref[...], wf_ref[...], preferred_element_type=jnp.float32)
    feat = jnp.maximum(h + bf_ref[...], 0.0)
    feat_ref[...] = feat
    # critic: hidden -> 1 as a lane reduction (avoids a width-1 matmul output)
    val_ref[...] = (jnp.sum(feat * wc_ref[...], axis=-1, keepdims=True)
                    + bc_ref[...])


# ----------------------------------------------------------------------------
# XLA glue: parity-ordered im2col for conv1 only (stride 4 on the raw frame)
# ----------------------------------------------------------------------------
def _conv1_patches(x_nhwc):
    """Returns (B, 4, 100, 64*C) with
       out[b, p*2+q, m*10+n, (i*8+j)*C + c] == x[b, 4*(2m+p)+i, 4*(2n+q)+j, c]
    i.e. conv1 patches whose rows are grouped into the four stride-2 parity
    planes of the 20x20 conv1 output grid."""
    B, H, W, C = x_nhwc.shape
    slabs = [x_nhwc[:, i:i + 77:4, j:j + 77:4, :]
             for i in range(8) for j in range(8)]       # each (B, 20, 20, C)
    t = jnp.concatenate(slabs, axis=-1)                 # (B, 20, 20, 64*C)
    t = t.reshape(B, 10, 2, 10, 2, 64 * C).transpose(0, 2, 4, 1, 3, 5)
    return t.reshape(B, 4, 100, 64 * C)


# ----------------------------------------------------------------------------
# Parameters: PyTorch-layout init + one-time repack for the kernels
# ----------------------------------------------------------------------------
def orthogonal(key, shape, gain=1.0):
    rows, cols = shape
    a = jax.random.normal(key, (max(rows, cols), min(rows, cols)), jnp.float32)
    q, r = jnp.linalg.qr(a)
    q = q * jnp.sign(jnp.diagonal(r))
    if rows < cols:
        q = q.T
    return (gain * q[:rows, :cols]).astype(jnp.float32)


def make_torch_style_params(key, num_inputs, hidden_size):
    ks = jax.random.split(key, 5)
    g = math.sqrt(2.0)  # relu gain
    return {
        "conv1_w": orthogonal(ks[0], (32, num_inputs * 64), g)
                   .reshape(32, num_inputs, 8, 8),
        "conv1_b": jnp.zeros((32,), jnp.float32),
        "conv2_w": orthogonal(ks[1], (64, 32 * 16), g).reshape(64, 32, 4, 4),
        "conv2_b": jnp.zeros((64,), jnp.float32),
        "conv3_w": orthogonal(ks[2], (32, 64 * 9), g).reshape(32, 64, 3, 3),
        "conv3_b": jnp.zeros((32,), jnp.float32),
        "fc_w": orthogonal(ks[3], (hidden_size, 32 * 49), g),   # (out, in)
        "fc_b": jnp.zeros((hidden_size,), jnp.float32),
        "critic_w": orthogonal(ks[4], (1, hidden_size), 1.0),   # (out, in)
        "critic_b": jnp.zeros((1,), jnp.float32),
    }


def prepare_kernel_params(p):
    """One-time repack: fold /255 into conv1_w, permute conv weights to the
    in-kernel (kh, kw, c) patch order, permute fc_w rows to the kernel's
    (h, w, c) flatten order, pre-transpose to (in, out), cast to bf16."""
    bf16, f32 = jnp.bfloat16, jnp.float32
    hidden = p["fc_w"].shape[0]
    w1 = (p["conv1_w"] / 255.0).transpose(2, 3, 1, 0).reshape(-1, 32)
    w2 = p["conv2_w"].transpose(2, 3, 1, 0).reshape(16, 32, 64)
    w3 = p["conv3_w"].transpose(2, 3, 1, 0).reshape(9, 64, 32)
    wf = (p["fc_w"].reshape(hidden, 32, 7, 7).transpose(2, 3, 1, 0)
          .reshape(49 * 32, hidden))
    return {
        "w1": w1.astype(bf16), "b1": p["conv1_b"].reshape(1, -1).astype(f32),
        "w2": w2.astype(bf16), "b2": p["conv2_b"].reshape(1, -1).astype(f32),
        "w3": w3.astype(bf16), "b3": p["conv3_b"].reshape(1, -1).astype(f32),
        "wf": wf.astype(bf16), "bf": p["fc_b"].reshape(1, -1).astype(f32),
        "wc": p["critic_w"].astype(f32),                    # (1, hidden)
        "bc": p["critic_b"].reshape(1, 1).astype(f32),
        "sel2": jnp.asarray(_SEL2, bf16), "sel3": jnp.asarray(_SEL3, bf16),
    }


# ----------------------------------------------------------------------------
# Forward pass (== ActorCriticCNN.forward with recurrent=False)
# ----------------------------------------------------------------------------
@jax.jit
def actor_critic_cnn_forward(kparams, inputs_nchw, rnn_hxs, masks):
    del masks  # only used by the (disabled) GRU branch
    B, C, H, W = inputs_nchw.shape
    assert (H, W) == (84, 84), "32*7*7 Linear in the module implies 84x84"
    hidden = kparams["wf"].shape[1]

    # XLA glue on the raw input only: NCHW -> NHWC, bf16, conv1 im2col.
    x = jnp.transpose(inputs_nchw, (0, 2, 3, 1)).astype(jnp.bfloat16)
    patches = _conv1_patches(x)                         # (B, 4, 100, 64*C)

    # Kernel 1: whole conv stack, grid over batch, weights resident in VMEM.
    conv_out = pl.pallas_call(
        _conv_stack_kernel,
        out_shape=jax.ShapeDtypeStruct((B, 49, 32), jnp.bfloat16),
        grid=(B,),
        in_specs=[
            pl.BlockSpec((1, 4, 100, 64 * C), lambda b: (b, 0, 0, 0)),
            pl.BlockSpec((4, 81, 100), lambda b: (0, 0, 0)),
            pl.BlockSpec((9, 49, 81), lambda b: (0, 0, 0)),
            pl.BlockSpec((64 * C, 32), lambda b: (0, 0)),
            pl.BlockSpec((1, 32), lambda b: (0, 0)),
            pl.BlockSpec((16, 32, 64), lambda b: (0, 0, 0)),
            pl.BlockSpec((1, 64), lambda b: (0, 0)),
            pl.BlockSpec((9, 64, 32), lambda b: (0, 0, 0)),
            pl.BlockSpec((1, 32), lambda b: (0, 0)),
        ],
        out_specs=pl.BlockSpec((1, 49, 32), lambda b: (b, 0, 0)),
        compiler_params=pltpu.CompilerParams(dimension_semantics=("parallel",)),
    )(patches, kparams["sel2"], kparams["sel3"],
      kparams["w1"], kparams["b1"], kparams["w2"], kparams["b2"],
      kparams["w3"], kparams["b3"])

    # Flatten in (h, w, c) order: free metadata reshape in HBM; fc_w rows were
    # permuted at init to match, so no activation/weight transpose is needed.
    x_flat = conv_out.reshape(B, 49 * 32)

    # Kernel 2: fused FC+ReLU and critic head (two outputs, one launch).
    blk = 8 if (B % 8 == 0) else B
    feat, value = pl.pallas_call(
        _head_kernel,
        out_shape=(jax.ShapeDtypeStruct((B, hidden), jnp.float32),
                   jax.ShapeDtypeStruct((B, 1), jnp.float32)),
        grid=(B // blk,),
        in_specs=[
            pl.BlockSpec((blk, 49 * 32), lambda b: (b, 0)),
            pl.BlockSpec((49 * 32, hidden), lambda b: (0, 0)),
            pl.BlockSpec((1, hidden), lambda b: (0, 0)),
            pl.BlockSpec((1, hidden), lambda b: (0, 0)),
            pl.BlockSpec((1, 1), lambda b: (0, 0)),
        ],
        out_specs=(pl.BlockSpec((blk, hidden), lambda b: (b, 0)),
                   pl.BlockSpec((blk, 1), lambda b: (b, 0))),
        compiler_params=pltpu.CompilerParams(dimension_semantics=("parallel",)),
    )(x_flat, kparams["wf"], kparams["bf"], kparams["wc"], kparams["bc"])

    # TODO(synk): recurrent (GRU) branch not implemented; module default is
    # recurrent=False so forward semantics are unchanged.
    return value, feat, rnn_hxs


# ----------------------------------------------------------------------------
# Plain-JAX f32 reference of the PyTorch module (for a correctness check)
# ----------------------------------------------------------------------------
def reference_forward(p, inputs_nchw):
    hp = jax.lax.Precision.HIGHEST
    x = inputs_nchw.astype(jnp.float32) / 255.0

    def conv(x, w, b, stride):
        y = jax.lax.conv_general_dilated(
            x, w, (stride, stride), "VALID",
            dimension_numbers=("NCHW", "OIHW", "NCHW"), precision=hp)
        return jax.nn.relu(y + b.reshape(1, -1, 1, 1))

    x = conv(x, p["conv1_w"], p["conv1_b"], 4)
    x = conv(x, p["conv2_w"], p["conv2_b"], 2)
    x = conv(x, p["conv3_w"], p["conv3_b"], 1)
    x = x.reshape(x.shape[0], -1)                         # NCHW flatten
    feat = jax.nn.relu(jnp.dot(x, p["fc_w"].T, precision=hp) + p["fc_b"])
    value = jnp.dot(feat, p["critic_w"].T, precision=hp) + p["critic_b"]
    return value, feat


if __name__ == "__main__":
    key = jax.random.PRNGKey(0)
    pkey, xkey = jax.random.split(key)

    num_inputs = 4          # stacked Atari frames
    hidden_size = 512
    batch = 2
    # spatial must be 84x84: the 32*7*7 Linear in the module implies it.
    inputs = jax.random.uniform(xkey, (batch, num_inputs, 84, 84),
                                minval=0.0, maxval=255.0, dtype=jnp.float32)
    rnn_hxs = jnp.zeros((batch, 1), jnp.float32)  # recurrent_hidden_state_size=1
    masks = jnp.ones((batch, 1), jnp.float32)

    torch_params = make_torch_style_params(pkey, num_inputs, hidden_size)
    kparams = prepare_kernel_params(torch_params)

    value, feat, hxs_out = actor_critic_cnn_forward(kparams, inputs,
                                                    rnn_hxs, masks)
    jax.block_until_ready((value, feat, hxs_out))

    # Shape + semantics checks against the f32 reference.  Tolerance is sized
    # for bf16 MXU inputs (f32 accumulation); a structural/permutation bug
    # would produce O(1) differences.
    value_ref, feat_ref = reference_forward(torch_params, inputs)
    assert value.shape == (batch, 1)
    assert feat.shape == (batch, hidden_size)
    assert hxs_out.shape == rnn_hxs.shape
    assert bool(jnp.all(feat >= 0.0))
    assert float(jnp.max(jnp.abs(feat - feat_ref))) < 0.25
    assert float(jnp.max(jnp.abs(value - value_ref))) < 0.25
    print("KERNEL_OK")
</pallas_src>

<mosaic_0001>
module attributes {stable_mosaic.version = 11 : i64} {
  func.func @_conv_stack_kernel(%arg0: i32, %arg1: memref<1x4x100x256xbf16, #tpu.memory_space<vmem>>, %arg2: memref<4x81x100xbf16, #tpu.memory_space<vmem>>, %arg3: memref<9x49x81xbf16, #tpu.memory_space<vmem>>, %arg4: memref<256x32xbf16, #tpu.memory_space<vmem>>, %arg5: memref<1x32xf32, #tpu.memory_space<vmem>>, %arg6: memref<16x32x64xbf16, #tpu.memory_space<vmem>>, %arg7: memref<1x64xf32, #tpu.memory_space<vmem>>, %arg8: memref<9x64x32xbf16, #tpu.memory_space<vmem>>, %arg9: memref<1x32xf32, #tpu.memory_space<vmem>>, %arg10: memref<1x49x32xbf16, #tpu.memory_space<vmem>>) attributes {dimension_semantics = [#tpu.dimension_semantics<parallel>], iteration_bounds = array<i64: 2>, scalar_prefetch = 0 : i64, scratch_operands = 0 : i64, tpu.core_type = #tpu.core_type<tc>, window_params = [{transform_indices = @transform_0, window_bounds = array<i64: 1, 4, 100, 256>}, {pipeline_mode = #tpu.pipeline_mode<synchronous>, transform_indices = @transform_1, window_bounds = array<i64: 4, 81, 100>}, {pipeline_mode = #tpu.pipeline_mode<synchronous>, transform_indices = @transform_2, window_bounds = array<i64: 9, 49, 81>}, {pipeline_mode = #tpu.pipeline_mode<synchronous>, transform_indices = @transform_3, window_bounds = array<i64: 256, 32>}, {pipeline_mode = #tpu.pipeline_mode<synchronous>, transform_indices = @transform_4, window_bounds = array<i64: 1, 32>}, {pipeline_mode = #tpu.pipeline_mode<synchronous>, transform_indices = @transform_5, window_bounds = array<i64: 16, 32, 64>}, {pipeline_mode = #tpu.pipeline_mode<synchronous>, transform_indices = @transform_6, window_bounds = array<i64: 1, 64>}, {pipeline_mode = #tpu.pipeline_mode<synchronous>, transform_indices = @transform_7, window_bounds = array<i64: 9, 64, 32>}, {pipeline_mode = #tpu.pipeline_mode<synchronous>, transform_indices = @transform_8, window_bounds = array<i64: 1, 32>}, {transform_indices = @transform_9, window_bounds = array<i64: 1, 49, 32>}]} {
    %c0 = arith.constant 0 : index
    %c0_0 = arith.constant 0 : index
    %0 = vector.load %arg4[%c0, %c0_0] : memref<256x32xbf16, #tpu.memory_space<vmem>>, vector<256x32xbf16>
    %c0_1 = arith.constant 0 : index
    %c0_2 = arith.constant 0 : index
    %1 = vector.load %arg5[%c0_1, %c0_2] : memref<1x32xf32, #tpu.memory_space<vmem>>, vector<1x32xf32>
    %c0_3 = arith.constant 0 : index
    %c0_4 = arith.constant 0 : index
    %c0_5 = arith.constant 0 : index
    %c0_6 = arith.constant 0 : index
    %2 = vector.load %arg1[%c0_3, %c0_4, %c0_5, %c0_6] : memref<1x4x100x256xbf16, #tpu.memory_space<vmem>>, vector<1x1x100x256xbf16>
    %3 = vector.shape_cast %2 : vector<1x1x100x256xbf16> to vector<100x256xbf16>
    %cst = arith.constant dense<0.000000e+00> : vector<100x32xf32>
    %4 = tpu.matmul %3, %0, %cst {dimension_numbers = #tpu.dot_dimension_numbers<[1], [0], [0], [1], [0, 0, 1, 1], [], []>} : vector<100x256xbf16>, vector<256x32xbf16>, vector<100x32xf32> -> vector<100x32xf32>
    %5 = vector.broadcast %1 : vector<1x32xf32> to vector<100x32xf32>
    %6 = arith.addf %4, %5 : vector<100x32xf32>
    %cst_7 = arith.constant 0.000000e+00 : f32
    %7 = vector.broadcast %cst_7 : f32 to vector<100x32xf32>
    %8 = arith.maximumf %6, %7 : vector<100x32xf32>
    %9 = arith.truncf %8 : vector<100x32xf32> to vector<100x32xbf16>
    %c0_8 = arith.constant 0 : index
    %c1 = arith.constant 1 : index
    %c0_9 = arith.constant 0 : index
    %c0_10 = arith.constant 0 : index
    %10 = vector.load %arg1[%c0_8, %c1, %c0_9, %c0_10] : memref<1x4x100x256xbf16, #tpu.memory_space<vmem>>, vector<1x1x100x256xbf16>
    %11 = vector.shape_cast %10 : vector<1x1x100x256xbf16> to vector<100x256xbf16>
    %cst_11 = arith.constant dense<0.000000e+00> : vector<100x32xf32>
    %12 = tpu.matmul %11, %0, %cst_11 {dimension_numbers = #tpu.dot_dimension_numbers<[1], [0], [0], [1], [0, 0, 1, 1], [], []>} : vector<100x256xbf16>, vector<256x32xbf16>, vector<100x32xf32> -> vector<100x32xf32>
    %13 = vector.broadcast %1 : vector<1x32xf32> to vector<100x32xf32>
    %14 = arith.addf %12, %13 : vector<100x32xf32>
    %cst_12 = arith.constant 0.000000e+00 : f32
    %15 = vector.broadcast %cst_12 : f32 to vector<100x32xf32>
    %16 = arith.maximumf %14, %15 : vector<100x32xf32>
    %17 = arith.truncf %16 : vector<100x32xf32> to vector<100x32xbf16>
    %c0_13 = arith.constant 0 : index
    %c2 = arith.constant 2 : index
    %c0_14 = arith.constant 0 : index
    %c0_15 = arith.constant 0 : index
    %18 = vector.load %arg1[%c0_13, %c2, %c0_14, %c0_15] : memref<1x4x100x256xbf16, #tpu.memory_space<vmem>>, vector<1x1x100x256xbf16>
    %19 = vector.shape_cast %18 : vector<1x1x100x256xbf16> to vector<100x256xbf16>
    %cst_16 = arith.constant dense<0.000000e+00> : vector<100x32xf32>
    %20 = tpu.matmul %19, %0, %cst_16 {dimension_numbers = #tpu.dot_dimension_numbers<[1], [0], [0], [1], [0, 0, 1, 1], [], []>} : vector<100x256xbf16>, vector<256x32xbf16>, vector<100x32xf32> -> vector<100x32xf32>
    %21 = vector.broadcast %1 : vector<1x32xf32> to vector<100x32xf32>
    %22 = arith.addf %20, %21 : vector<100x32xf32>
    %cst_17 = arith.constant 0.000000e+00 : f32
    %23 = vector.broadcast %cst_17 : f32 to vector<100x32xf32>
    %24 = arith.maximumf %22, %23 : vector<100x32xf32>
    %25 = arith.truncf %24 : vector<100x32xf32> to vector<100x32xbf16>
    %c0_18 = arith.constant 0 : index
    %c3 = arith.constant 3 : index
    %c0_19 = arith.constant 0 : index
    %c0_20 = arith.constant 0 : index
    %26 = vector.load %arg1[%c0_18, %c3, %c0_19, %c0_20] : memref<1x4x100x256xbf16, #tpu.memory_space<vmem>>, vector<1x1x100x256xbf16>
    %27 = vector.shape_cast %26 : vector<1x1x100x256xbf16> to vector<100x256xbf16>
    %cst_21 = arith.constant dense<0.000000e+00> : vector<100x32xf32>
    %28 = tpu.matmul %27, %0, %cst_21 {dimension_numbers = #tpu.dot_dimension_numbers<[1], [0], [0], [1], [0, 0, 1, 1], [], []>} : vector<100x256xbf16>, vector<256x32xbf16>, vector<100x32xf32> -> vector<100x32xf32>
    %29 = vector.broadcast %1 : vector<1x32xf32> to vector<100x32xf32>
    %30 = arith.addf %28, %29 : vector<100x32xf32>
    %cst_22 = arith.constant 0.000000e+00 : f32
    %31 = vector.broadcast %cst_22 : f32 to vector<100x32xf32>
    %32 = arith.maximumf %30, %31 : vector<100x32xf32>
    %33 = arith.truncf %32 : vector<100x32xf32> to vector<100x32xbf16>
    %c0_23 = arith.constant 0 : index
    %c0_24 = arith.constant 0 : index
    %34 = vector.load %arg7[%c0_23, %c0_24] : memref<1x64xf32, #tpu.memory_space<vmem>>, vector<1x64xf32>
    %cst_25 = arith.constant 0.000000e+00 : f32
    %35 = vector.broadcast %cst_25 : f32 to vector<81x64xf32>
    %c0_26 = arith.constant 0 : index
    %c0_27 = arith.constant 0 : index
    %c0_28 = arith.constant 0 : index
    %36 = vector.load %arg2[%c0_26, %c0_27, %c0_28] : memref<4x81x100xbf16, #tpu.memory_space<vmem>>, vector<1x81x100xbf16>
    %37 = vector.shape_cast %36 : vector<1x81x100xbf16> to vector<81x100xbf16>
    %cst_29 = arith.constant dense<0.000000e+00> : vector<81x32xf32>
    %38 = tpu.matmul %37, %9, %cst_29 {dimension_numbers = #tpu.dot_dimension_numbers<[1], [0], [0], [1], [0, 0, 1, 1], [], []>} : vector<81x100xbf16>, vector<100x32xbf16>, vector<81x32xf32> -> vector<81x32xf32>
    %39 = arith.truncf %38 : vector<81x32xf32> to vector<81x32xbf16>
    %c0_30 = arith.constant 0 : index
    %c0_31 = arith.constant 0 : index
    %c0_32 = arith.constant 0 : index
    %40 = vector.load %arg6[%c0_30, %c0_31, %c0_32] : memref<16x32x64xbf16, #tpu.memory_space<vmem>>, vector<1x32x64xbf16>
    %41 = vector.shape_cast %40 : vector<1x32x64xbf16> to vector<32x64xbf16>
    %cst_33 = arith.constant dense<0.000000e+00> : vector<81x64xf32>
    %42 = tpu.matmul %39, %41, %cst_33 {dimension_numbers = #tpu.dot_dimension_numbers<[1], [0], [0], [1], [0, 0, 1, 1], [], []>} : vector<81x32xbf16>, vector<32x64xbf16>, vector<81x64xf32> -> vector<81x64xf32>
    %43 = arith.addf %35, %42 : vector<81x64xf32>
    %c0_34 = arith.constant 0 : index
    %c0_35 = arith.constant 0 : index
    %c0_36 = arith.constant 0 : index
    %44 = vector.load %arg2[%c0_34, %c0_35, %c0_36] : memref<4x81x100xbf16, #tpu.memory_space<vmem>>, vector<1x81x100xbf16>
    %45 = vector.shape_cast %44 : vector<1x81x100xbf16> to vector<81x100xbf16>
    %cst_37 = arith.constant dense<0.000000e+00> : vector<81x32xf32>
    %46 = tpu.matmul %45, %17, %cst_37 {dimension_numbers = #tpu.dot_dimension_numbers<[1], [0], [0], [1], [0, 0, 1, 1], [], []>} : vector<81x100xbf16>, vector<100x32xbf16>, vector<81x32xf32> -> vector<81x32xf32>
    %47 = arith.truncf %46 : vector<81x32xf32> to vector<81x32xbf16>
    %c1_38 = arith.constant 1 : index
    %c0_39 = arith.constant 0 : index
    %c0_40 = arith.constant 0 : index
    %48 = vector.load %arg6[%c1_38, %c0_39, %c0_40] : memref<16x32x64xbf16, #tpu.memory_space<vmem>>, vector<1x32x64xbf16>
    %49 = vector.shape_cast %48 : vector<1x32x64xbf16> to vector<32x64xbf16>
    %cst_41 = arith.constant dense<0.000000e+00> : vector<81x64xf32>
    %50 = tpu.matmul %47, %49, %cst_41 {dimension_numbers = #tpu.dot_dimension_numbers<[1], [0], [0], [1], [0, 0, 1, 1], [], []>} : vector<81x32xbf16>, vector<32x64xbf16>, vector<81x64xf32> -> vector<81x64xf32>
    %51 = arith.addf %43, %50 : vector<81x64xf32>
    %c1_42 = arith.constant 1 : index
    %c0_43 = arith.constant 0 : index
    %c0_44 = arith.constant 0 : index
    %52 = vector.load %arg2[%c1_42, %c0_43, %c0_44] : memref<4x81x100xbf16, #tpu.memory_space<vmem>>, vector<1x81x100xbf16>
    %53 = vector.shape_cast %52 : vector<1x81x100xbf16> to vector<81x100xbf16>
    %cst_45 = arith.constant dense<0.000000e+00> : vector<81x32xf32>
    %54 = tpu.matmul %53, %9, %cst_45 {dimension_numbers = #tpu.dot_dimension_numbers<[1], [0], [0], [1], [0, 0, 1, 1], [], []>} : vector<81x100xbf16>, vector<100x32xbf16>, vector<81x32xf32> -> vector<81x32xf32>
    %55 = arith.truncf %54 : vector<81x32xf32> to vector<81x32xbf16>
    %c2_46 = arith.constant 2 : index
    %c0_47 = arith.constant 0 : index
    %c0_48 = arith.constant 0 : index
    %56 = vector.load %arg6[%c2_46, %c0_47, %c0_48] : memref<16x32x64xbf16, #tpu.memory_space<vmem>>, vector<1x32x64xbf16>
    %57 = vector.shape_cast %56 : vector<1x32x64xbf16> to vector<32x64xbf16>
    %cst_49 = arith.constant dense<0.000000e+00> : vector<81x64xf32>
    %58 = tpu.matmul %55, %57, %cst_49 {dimension_numbers = #tpu.dot_dimension_numbers<[1], [0], [0], [1], [0, 0, 1, 1], [], []>} : vector<81x32xbf16>, vector<32x64xbf16>, vector<81x64xf32> -> vector<81x64xf32>
    %59 = arith.addf %51, %58 : vector<81x64xf32>
    %c1_50 = arith.constant 1 : index
    %c0_51 = arith.constant 0 : index
    %c0_52 = arith.constant 0 : index
    %60 = vector.load %arg2[%c1_50, %c0_51, %c0_52] : memref<4x81x100xbf16, #tpu.memory_space<vmem>>, vector<1x81x100xbf16>
    %61 = vector.shape_cast %60 : vector<1x81x100xbf16> to vector<81x100xbf16>
    %cst_53 = arith.constant dense<0.000000e+00> : vector<81x32xf32>
    %62 = tpu.matmul %61, %17, %cst_53 {dimension_numbers = #tpu.dot_dimension_numbers<[1], [0], [0], [1], [0, 0, 1, 1], [], []>} : vector<81x100xbf16>, vector<100x32xbf16>, vector<81x32xf32> -> vector<81x32xf32>
    %63 = arith.truncf %62 : vector<81x32xf32> to vector<81x32xbf16>
    %c3_54 = arith.constant 3 : index
    %c0_55 = arith.constant 0 : index
    %c0_56 = arith.constant 0 : index
    %64 = vector.load %arg6[%c3_54, %c0_55, %c0_56] : memref<16x32x64xbf16, #tpu.memory_space<vmem>>, vector<1x32x64xbf16>
    %65 = vector.shape_cast %64 : vector<1x32x64xbf16> to vector<32x64xbf16>
    %cst_57 = arith.constant dense<0.000000e+00> : vector<81x64xf32>
    %66 = tpu.matmul %63, %65, %cst_57 {dimension_numbers = #tpu.dot_dimension_numbers<[1], [0], [0], [1], [0, 0, 1, 1], [], []>} : vector<81x32xbf16>, vector<32x64xbf16>, vector<81x64xf32> -> vector<81x64xf32>
    %67 = arith.addf %59, %66 : vector<81x64xf32>
    %c0_58 = arith.constant 0 : index
    %c0_59 = arith.constant 0 : index
    %c0_60 = arith.constant 0 : index
    %68 = vector.load %arg2[%c0_58, %c0_59, %c0_60] : memref<4x81x100xbf16, #tpu.memory_space<vmem>>, vector<1x81x100xbf16>
    %69 = vector.shape_cast %68 : vector<1x81x100xbf16> to vector<81x100xbf16>
    %cst_61 = arith.constant dense<0.000000e+00> : vector<81x32xf32>
    %70 = tpu.matmul %69, %25, %cst_61 {dimension_numbers = #tpu.dot_dimension_numbers<[1], [0], [0], [1], [0, 0, 1, 1], [], []>} : vector<81x100xbf16>, vector<100x32xbf16>, vector<81x32xf32> -> vector<81x32xf32>
    %71 = arith.truncf %70 : vector<81x32xf32> to vector<81x32xbf16>
    %c4 = arith.constant 4 : index
    %c0_62 = arith.constant 0 : index
    %c0_63 = arith.constant 0 : index
    %72 = vector.load %arg6[%c4, %c0_62, %c0_63] : memref<16x32x64xbf16, #tpu.memory_space<vmem>>, vector<1x32x64xbf16>
    %73 = vector.shape_cast %72 : vector<1x32x64xbf16> to vector<32x64xbf16>
    %cst_64 = arith.constant dense<0.000000e+00> : vector<81x64xf32>
    %74 = tpu.matmul %71, %73, %cst_64 {dimension_numbers = #tpu.dot_dimension_numbers<[1], [0], [0], [1], [0, 0, 1, 1], [], []>} : vector<81x32xbf16>, vector<32x64xbf16>, vector<81x64xf32> -> vector<81x64xf32>
    %75 = arith.addf %67, %74 : vector<81x64xf32>
    %c0_65 = arith.constant 0 : index
    %c0_66 = arith.constant 0 : index
    %c0_67 = arith.constant 0 : index
    %76 = vector.load %arg2[%c0_65, %c0_66, %c0_67] : memref<4x81x100xbf16, #tpu.memory_space<vmem>>, vector<1x81x100xbf16>
    %77 = vector.shape_cast %76 : vector<1x81x100xbf16> to vector<81x100xbf16>
    %cst_68 = arith.constant dense<0.000000e+00> : vector<81x32xf32>
    %78 = tpu.matmul %77, %33, %cst_68 {dimension_numbers = #tpu.dot_dimension_numbers<[1], [0], [0], [1], [0, 0, 1, 1], [], []>} : vector<81x100xbf16>, vector<100x32xbf16>, vector<81x32xf32> -> vector<81x32xf32>
    %79 = arith.truncf %78 : vector<81x32xf32> to vector<81x32xbf16>
    %c5 = arith.constant 5 : index
    %c0_69 = arith.constant 0 : index
    %c0_70 = arith.constant 0 : index
    %80 = vector.load %arg6[%c5, %c0_69, %c0_70] : memref<16x32x64xbf16, #tpu.memory_space<vmem>>, vector<1x32x64xbf16>
    %81 = vector.shape_cast %80 : vector<1x32x64xbf16> to vector<32x64xbf16>
    %cst_71 = arith.constant dense<0.000000e+00> : vector<81x64xf32>
    %82 = tpu.matmul %79, %81, %cst_71 {dimension_numbers = #tpu.dot_dimension_numbers<[1], [0], [0], [1], [0, 0, 1, 1], [], []>} : vector<81x32xbf16>, vector<32x64xbf16>, vector<81x64xf32> -> vector<81x64xf32>
    %83 = arith.addf %75, %82 : vector<81x64xf32>
    %c1_72 = arith.constant 1 : index
    %c0_73 = arith.constant 0 : index
    %c0_74 = arith.constant 0 : index
    %84 = vector.load %arg2[%c1_72, %c0_73, %c0_74] : memref<4x81x100xbf16, #tpu.memory_space<vmem>>, vector<1x81x100xbf16>
    %85 = vector.shape_cast %84 : vector<1x81x100xbf16> to vector<81x100xbf16>
    %cst_75 = arith.constant dense<0.000000e+00> : vector<81x32xf32>
    %86 = tpu.matmul %85, %25, %cst_75 {dimension_numbers = #tpu.dot_dimension_numbers<[1], [0], [0], [1], [0, 0, 1, 1], [], []>} : vector<81x100xbf16>, vector<100x32xbf16>, vector<81x32xf32> -> vector<81x32xf32>
    %87 = arith.truncf %86 : vector<81x32xf32> to vector<81x32xbf16>
    %c6 = arith.constant 6 : index
    %c0_76 = arith.constant 0 : index
    %c0_77 = arith.constant 0 : index
    %88 = vector.load %arg6[%c6, %c0_76, %c0_77] : memref<16x32x64xbf16, #tpu.memory_space<vmem>>, vector<1x32x64xbf16>
    %89 = vector.shape_cast %88 : vector<1x32x64xbf16> to vector<32x64xbf16>
    %cst_78 = arith.constant dense<0.000000e+00> : vector<81x64xf32>
    %90 = tpu.matmul %87, %89, %cst_78 {dimension_numbers = #tpu.dot_dimension_numbers<[1], [0], [0], [1], [0, 0, 1, 1], [], []>} : vector<81x32xbf16>, vector<32x64xbf16>, vector<81x64xf32> -> vector<81x64xf32>
    %91 = arith.addf %83, %90 : vector<81x64xf32>
    %c1_79 = arith.constant 1 : index
    %c0_80 = arith.constant 0 : index
    %c0_81 = arith.constant 0 : index
    %92 = vector.load %arg2[%c1_79, %c0_80, %c0_81] : memref<4x81x100xbf16, #tpu.memory_space<vmem>>, vector<1x81x100xbf16>
    %93 = vector.shape_cast %92 : vector<1x81x100xbf16> to vector<81x100xbf16>
    %cst_82 = arith.constant dense<0.000000e+00> : vector<81x32xf32>
    %94 = tpu.matmul %93, %33, %cst_82 {dimension_numbers = #tpu.dot_dimension_numbers<[1], [0], [0], [1], [0, 0, 1, 1], [], []>} : vector<81x100xbf16>, vector<100x32xbf16>, vector<81x32xf32> -> vector<81x32xf32>
    %95 = arith.truncf %94 : vector<81x32xf32> to vector<81x32xbf16>
    %c7 = arith.constant 7 : index
    %c0_83 = arith.constant 0 : index
    %c0_84 = arith.constant 0 : index
    %96 = vector.load %arg6[%c7, %c0_83, %c0_84] : memref<16x32x64xbf16, #tpu.memory_space<vmem>>, vector<1x32x64xbf16>
    %97 = vector.shape_cast %96 : vector<1x32x64xbf16> to vector<32x64xbf16>
    %cst_85 = arith.constant dense<0.000000e+00> : vector<81x64xf32>
    %98 = tpu.matmul %95, %97, %cst_85 {dimension_numbers = #tpu.dot_dimension_numbers<[1], [0], [0], [1], [0, 0, 1, 1], [], []>} : vector<81x32xbf16>, vector<32x64xbf16>, vector<81x64xf32> -> vector<81x64xf32>
    %99 = arith.addf %91, %98 : vector<81x64xf32>
    %c2_86 = arith.constant 2 : index
    %c0_87 = arith.constant 0 : index
    %c0_88 = arith.constant 0 : index
    %100 = vector.load %arg2[%c2_86, %c0_87, %c0_88] : memref<4x81x100xbf16, #tpu.memory_space<vmem>>, vector<1x81x100xbf16>
    %101 = vector.shape_cast %100 : vector<1x81x100xbf16> to vector<81x100xbf16>
    %cst_89 = arith.constant dense<0.000000e+00> : vector<81x32xf32>
    %102 = tpu.matmul %101, %9, %cst_89 {dimension_numbers = #tpu.dot_dimension_numbers<[1], [0], [0], [1], [0, 0, 1, 1], [], []>} : vector<81x100xbf16>, vector<100x32xbf16>, vector<81x32xf32> -> vector<81x32xf32>
    %103 = arith.truncf %102 : vector<81x32xf32> to vector<81x32xbf16>
    %c8 = arith.constant 8 : index
    %c0_90 = arith.constant 0 : index
    %c0_91 = arith.constant 0 : index
    %104 = vector.load %arg6[%c8, %c0_90, %c0_91] : memref<16x32x64xbf16, #tpu.memory_space<vmem>>, vector<1x32x64xbf16>
    %105 = vector.shape_cast %104 : vector<1x32x64xbf16> to vector<32x64xbf16>
    %cst_92 = arith.constant dense<0.000000e+00> : vector<81x64xf32>
    %106 = tpu.matmul %103, %105, %cst_92 {dimension_numbers = #tpu.dot_dimension_numbers<[1], [0], [0], [1], [0, 0, 1, 1], [], []>} : vector<81x32xbf16>, vector<32x64xbf16>, vector<81x64xf32> -> vector<81x64xf32>
    %107 = arith.addf %99, %106 : vector<81x64xf32>
    %c2_93 = arith.constant 2 : index
    %c0_94 = arith.constant 0 : index
    %c0_95 = arith.constant 0 : index
    %108 = vector.load %arg2[%c2_93, %c0_94, %c0_95] : memref<4x81x100xbf16, #tpu.memory_space<vmem>>, vector<1x81x100xbf16>
    %109 = vector.shape_cast %108 : vector<1x81x100xbf16> to vector<81x100xbf16>
    %cst_96 = arith.constant dense<0.000000e+00> : vector<81x32xf32>
    %110 = tpu.matmul %109, %17, %cst_96 {dimension_numbers = #tpu.dot_dimension_numbers<[1], [0], [0], [1], [0, 0, 1, 1], [], []>} : vector<81x100xbf16>, vector<100x32xbf16>, vector<81x32xf32> -> vector<81x32xf32>
    %111 = arith.truncf %110 : vector<81x32xf32> to vector<81x32xbf16>
    %c9 = arith.constant 9 : index
    %c0_97 = arith.constant 0 : index
    %c0_98 = arith.constant 0 : index
    %112 = vector.load %arg6[%c9, %c0_97, %c0_98] : memref<16x32x64xbf16, #tpu.memory_space<vmem>>, vector<1x32x64xbf16>
    %113 = vector.shape_cast %112 : vector<1x32x64xbf16> to vector<32x64xbf16>
    %cst_99 = arith.constant dense<0.000000e+00> : vector<81x64xf32>
    %114 = tpu.matmul %111, %113, %cst_99 {dimension_numbers = #tpu.dot_dimension_numbers<[1], [0], [0], [1], [0, 0, 1, 1], [], []>} : vector<81x32xbf16>, vector<32x64xbf16>, vector<81x64xf32> -> vector<81x64xf32>
    %115 = arith.addf %107, %114 : vector<81x64xf32>
    %c3_100 = arith.constant 3 : index
    %c0_101 = arith.constant 0 : index
    %c0_102 = arith.constant 0 : index
    %116 = vector.load %arg2[%c3_100, %c0_101, %c0_102] : memref<4x81x100xbf16, #tpu.memory_space<vmem>>, vector<1x81x100xbf16>
    %117 = vector.shape_cast %116 : vector<1x81x100xbf16> to vector<81x100xbf16>
    %cst_103 = arith.constant dense<0.000000e+00> : vector<81x32xf32>
    %118 = tpu.matmul %117, %9, %cst_103 {dimension_numbers = #tpu.dot_dimension_numbers<[1], [0], [0], [1], [0, 0, 1, 1], [], []>} : vector<81x100xbf16>, vector<100x32xbf16>, vector<81x32xf32> -> vector<81x32xf32>
    %119 = arith.truncf %118 : vector<81x32xf32> to vector<81x32xbf16>
    %c10 = arith.constant 10 : index
    %c0_104 = arith.constant 0 : index
    %c0_105 = arith.constant 0 : index
    %120 = vector.load %arg6[%c10, %c0_104, %c0_105] : memref<16x32x64xbf16, #tpu.memory_space<vmem>>, vector<1x32x64xbf16>
    %121 = vector.shape_cast %120 : vector<1x32x64xbf16> to vector<32x64xbf16>
    %cst_106 = arith.constant dense<0.000000e+00> : vector<81x64xf32>
    %122 = tpu.matmul %119, %121, %cst_106 {dimension_numbers = #tpu.dot_dimension_numbers<[1], [0], [0], [1], [0, 0, 1, 1], [], []>} : vector<81x32xbf16>, vector<32x64xbf16>, vector<81x64xf32> -> vector<81x64xf32>
    %123 = arith.addf %115, %122 : vector<81x64xf32>
    %c3_107 = arith.constant 3 : index
    %c0_108 = arith.constant 0 : index
    %c0_109 = arith.constant 0 : index
    %124 = vector.load %arg2[%c3_107, %c0_108, %c0_109] : memref<4x81x100xbf16, #tpu.memory_space<vmem>>, vector<1x81x100xbf16>
    %125 = vector.shape_cast %124 : vector<1x81x100xbf16> to vector<81x100xbf16>
    %cst_110 = arith.constant dense<0.000000e+00> : vector<81x32xf32>
    %126 = tpu.matmul %125, %17, %cst_110 {dimension_numbers = #tpu.dot_dimension_numbers<[1], [0], [0], [1], [0, 0, 1, 1], [], []>} : vector<81x100xbf16>, vector<100x32xbf16>, vector<81x32xf32> -> vector<81x32xf32>
    %127 = arith.truncf %126 : vector<81x32xf32> to vector<81x32xbf16>
    %c11 = arith.constant 11 : index
    %c0_111 = arith.constant 0 : index
    %c0_112 = arith.constant 0 : index
    %128 = vector.load %arg6[%c11, %c0_111, %c0_112] : memref<16x32x64xbf16, #tpu.memory_space<vmem>>, vector<1x32x64xbf16>
    %129 = vector.shape_cast %128 : vector<1x32x64xbf16> to vector<32x64xbf16>
    %cst_113 = arith.constant dense<0.000000e+00> : vector<81x64xf32>
    %130 = tpu.matmul %127, %129, %cst_113 {dimension_numbers = #tpu.dot_dimension_numbers<[1], [0], [0], [1], [0, 0, 1, 1], [], []>} : vector<81x32xbf16>, vector<32x64xbf16>, vector<81x64xf32> -> vector<81x64xf32>
    %131 = arith.addf %123, %130 : vector<81x64xf32>
    %c2_114 = arith.constant 2 : index
    %c0_115 = arith.constant 0 : index
    %c0_116 = arith.constant 0 : index
    %132 = vector.load %arg2[%c2_114, %c0_115, %c0_116] : memref<4x81x100xbf16, #tpu.memory_space<vmem>>, vector<1x81x100xbf16>
    %133 = vector.shape_cast %132 : vector<1x81x100xbf16> to vector<81x100xbf16>
    %cst_117 = arith.constant dense<0.000000e+00> : vector<81x32xf32>
    %134 = tpu.matmul %133, %25, %cst_117 {dimension_numbers = #tpu.dot_dimension_numbers<[1], [0], [0], [1], [0, 0, 1, 1], [], []>} : vector<81x100xbf16>, vector<100x32xbf16>, vector<81x32xf32> -> vector<81x32xf32>
    %135 = arith.truncf %134 : vector<81x32xf32> to vector<81x32xbf16>
    %c12 = arith.constant 12 : index
    %c0_118 = arith.constant 0 : index
    %c0_119 = arith.constant 0 : index
    %136 = vector.load %arg6[%c12, %c0_118, %c0_119] : memref<16x32x64xbf16, #tpu.memory_space<vmem>>, vector<1x32x64xbf16>
    %137 = vector.shape_cast %136 : vector<1x32x64xbf16> to vector<32x64xbf16>
    %cst_120 = arith.constant dense<0.000000e+00> : vector<81x64xf32>
    %138 = tpu.matmul %135, %137, %cst_120 {dimension_numbers = #tpu.dot_dimension_numbers<[1], [0], [0], [1], [0, 0, 1, 1], [], []>} : vector<81x32xbf16>, vector<32x64xbf16>, vector<81x64xf32> -> vector<81x64xf32>
    %139 = arith.addf %131, %138 : vector<81x64xf32>
    %c2_121 = arith.constant 2 : index
    %c0_122 = arith.constant 0 : index
    %c0_123 = arith.constant 0 : index
    %140 = vector.load %arg2[%c2_121, %c0_122, %c0_123] : memref<4x81x100xbf16, #tpu.memory_space<vmem>>, vector<1x81x100xbf16>
    %141 = vector.shape_cast %140 : vector<1x81x100xbf16> to vector<81x100xbf16>
    %cst_124 = arith.constant dense<0.000000e+00> : vector<81x32xf32>
    %142 = tpu.matmul %141, %33, %cst_124 {dimension_numbers = #tpu.dot_dimension_numbers<[1], [0], [0], [1], [0, 0, 1, 1], [], []>} : vector<81x100xbf16>, vector<100x32xbf16>, vector<81x32xf32> -> vector<81x32xf32>
    %143 = arith.truncf %142 : vector<81x32xf32> to vector<81x32xbf16>
    %c13 = arith.constant 13 : index
    %c0_125 = arith.constant 0 : index
    %c0_126 = arith.constant 0 : index
    %144 = vector.load %arg6[%c13, %c0_125, %c0_126] : memref<16x32x64xbf16, #tpu.memory_space<vmem>>, vector<1x32x64xbf16>
    %145 = vector.shape_cast %144 : vector<1x32x64xbf16> to vector<32x64xbf16>
    %cst_127 = arith.constant dense<0.000000e+00> : vector<81x64xf32>
    %146 = tpu.matmul %143, %145, %cst_127 {dimension_numbers = #tpu.dot_dimension_numbers<[1], [0], [0], [1], [0, 0, 1, 1], [], []>} : vector<81x32xbf16>, vector<32x64xbf16>, vector<81x64xf32> -> vector<81x64xf32>
    %147 = arith.addf %139, %146 : vector<81x64xf32>
    %c3_128 = arith.constant 3 : index
    %c0_129 = arith.constant 0 : index
    %c0_130 = arith.constant 0 : index
    %148 = vector.load %arg2[%c3_128, %c0_129, %c0_130] : memref<4x81x100xbf16, #tpu.memory_space<vmem>>, vector<1x81x100xbf16>
    %149 = vector.shape_cast %148 : vector<1x81x100xbf16> to vector<81x100xbf16>
    %cst_131 = arith.constant dense<0.000000e+00> : vector<81x32xf32>
    %150 = tpu.matmul %149, %25, %cst_131 {dimension_numbers = #tpu.dot_dimension_numbers<[1], [0], [0], [1], [0, 0, 1, 1], [], []>} : vector<81x100xbf16>, vector<100x32xbf16>, vector<81x32xf32> -> vector<81x32xf32>
    %151 = arith.truncf %150 : vector<81x32xf32> to vector<81x32xbf16>
    %c14 = arith.constant 14 : index
    %c0_132 = arith.constant 0 : index
    %c0_133 = arith.constant 0 : index
    %152 = vector.load %arg6[%c14, %c0_132, %c0_133] : memref<16x32x64xbf16, #tpu.memory_space<vmem>>, vector<1x32x64xbf16>
    %153 = vector.shape_cast %152 : vector<1x32x64xbf16> to vector<32x64xbf16>
    %cst_134 = arith.constant dense<0.000000e+00> : vector<81x64xf32>
    %154 = tpu.matmul %151, %153, %cst_134 {dimension_numbers = #tpu.dot_dimension_numbers<[1], [0], [0], [1], [0, 0, 1, 1], [], []>} : vector<81x32xbf16>, vector<32x64xbf16>, vector<81x64xf32> -> vector<81x64xf32>
    %155 = arith.addf %147, %154 : vector<81x64xf32>
    %c3_135 = arith.constant 3 : index
    %c0_136 = arith.constant 0 : index
    %c0_137 = arith.constant 0 : index
    %156 = vector.load %arg2[%c3_135, %c0_136, %c0_137] : memref<4x81x100xbf16, #tpu.memory_space<vmem>>, vector<1x81x100xbf16>
    %157 = vector.shape_cast %156 : vector<1x81x100xbf16> to vector<81x100xbf16>
    %cst_138 = arith.constant dense<0.000000e+00> : vector<81x32xf32>
    %158 = tpu.matmul %157, %33, %cst_138 {dimension_numbers = #tpu.dot_dimension_numbers<[1], [0], [0], [1], [0, 0, 1, 1], [], []>} : vector<81x100xbf16>, vector<100x32xbf16>, vector<81x32xf32> -> vector<81x32xf32>
    %159 = arith.truncf %158 : vector<81x32xf32> to vector<81x32xbf16>
    %c15 = arith.constant 15 : index
    %c0_139 = arith.constant 0 : index
    %c0_140 = arith.constant 0 : index
    %160 = vector.load %arg6[%c15, %c0_139, %c0_140] : memref<16x32x64xbf16, #tpu.memory_space<vmem>>, vector<1x32x64xbf16>
    %161 = vector.shape_cast %160 : vector<1x32x64xbf16> to vector<32x64xbf16>
    %cst_141 = arith.constant dense<0.000000e+00> : vector<81x64xf32>
    %162 = tpu.matmul %159, %161, %cst_141 {dimension_numbers = #tpu.dot_dimension_numbers<[1], [0], [0], [1], [0, 0, 1, 1], [], []>} : vector<81x32xbf16>, vector<32x64xbf16>, vector<81x64xf32> -> vector<81x64xf32>
    %163 = arith.addf %155, %162 : vector<81x64xf32>
    %164 = vector.broadcast %34 : vector<1x64xf32> to vector<81x64xf32>
    %165 = arith.addf %163, %164 : vector<81x64xf32>
    %cst_142 = arith.constant 0.000000e+00 : f32
    %166 = vector.broadcast %cst_142 : f32 to vector<81x64xf32>
    %167 = arith.maximumf %165, %166 : vector<81x64xf32>
    %168 = arith.truncf %167 : vector<81x64xf32> to vector<81x64xbf16>
    %c0_143 = arith.constant 0 : index
    %c0_144 = arith.constant 0 : index
    %169 = vector.load %arg9[%c0_143, %c0_144] : memref<1x32xf32, #tpu.memory_space<vmem>>, vector<1x32xf32>
    %cst_145 = arith.constant 0.000000e+00 : f32
    %170 = vector.broadcast %cst_145 : f32 to vector<49x32xf32>
    %c0_146 = arith.constant 0 : index
    %c0_147 = arith.constant 0 : index
    %c0_148 = arith.constant 0 : index
    %171 = vector.load %arg3[%c0_146, %c0_147, %c0_148] : memref<9x49x81xbf16, #tpu.memory_space<vmem>>, vector<1x49x81xbf16>
    %172 = vector.shape_cast %171 : vector<1x49x81xbf16> to vector<49x81xbf16>
    %cst_149 = arith.constant dense<0.000000e+00> : vector<49x64xf32>
    %173 = tpu.matmul %172, %168, %cst_149 {dimension_numbers = #tpu.dot_dimension_numbers<[1], [0], [0], [1], [0, 0, 1, 1], [], []>} : vector<49x81xbf16>, vector<81x64xbf16>, vector<49x64xf32> -> vector<49x64xf32>
    %174 = arith.truncf %173 : vector<49x64xf32> to vector<49x64xbf16>
    %c0_150 = arith.constant 0 : index
    %c0_151 = arith.constant 0 : index
    %c0_152 = arith.constant 0 : index
    %175 = vector.load %arg8[%c0_150, %c0_151, %c0_152] : memref<9x64x32xbf16, #tpu.memory_space<vmem>>, vector<1x64x32xbf16>
    %176 = vector.shape_cast %175 : vector<1x64x32xbf16> to vector<64x32xbf16>
    %cst_153 = arith.constant dense<0.000000e+00> : vector<49x32xf32>
    %177 = tpu.matmul %174, %176, %cst_153 {dimension_numbers = #tpu.dot_dimension_numbers<[1], [0], [0], [1], [0, 0, 1, 1], [], []>} : vector<49x64xbf16>, vector<64x32xbf16>, vector<49x32xf32> -> vector<49x32xf32>
    %178 = arith.addf %170, %177 : vector<49x32xf32>
    %c1_154 = arith.constant 1 : index
    %c0_155 = arith.constant 0 : index
    %c0_156 = arith.constant 0 : index
    %179 = vector.load %arg3[%c1_154, %c0_155, %c0_156] : memref<9x49x81xbf16, #tpu.memory_space<vmem>>, vector<1x49x81xbf16>
    %180 = vector.shape_cast %179 : vector<1x49x81xbf16> to vector<49x81xbf16>
    %cst_157 = arith.constant dense<0.000000e+00> : vector<49x64xf32>
    %181 = tpu.matmul %180, %168, %cst_157 {dimension_numbers = #tpu.dot_dimension_numbers<[1], [0], [0], [1], [0, 0, 1, 1], [], []>} : vector<49x81xbf16>, vector<81x64xbf16>, vector<49x64xf32> -> vector<49x64xf32>
    %182 = arith.truncf %181 : vector<49x64xf32> to vector<49x64xbf16>
    %c1_158 = arith.constant 1 : index
    %c0_159 = arith.constant 0 : index
    %c0_160 = arith.constant 0 : index
    %183 = vector.load %arg8[%c1_158, %c0_159, %c0_160] : memref<9x64x32xbf16, #tpu.memory_space<vmem>>, vector<1x64x32xbf16>
    %184 = vector.shape_cast %183 : vector<1x64x32xbf16> to vector<64x32xbf16>
    %cst_161 = arith.constant dense<0.000000e+00> : vector<49x32xf32>
    %185 = tpu.matmul %182, %184, %cst_161 {dimension_numbers = #tpu.dot_dimension_numbers<[1], [0], [0], [1], [0, 0, 1, 1], [], []>} : vector<49x64xbf16>, vector<64x32xbf16>, vector<49x32xf32> -> vector<49x32xf32>
    %186 = arith.addf %178, %185 : vector<49x32xf32>
    %c2_162 = arith.constant 2 : index
    %c0_163 = arith.constant 0 : index
    %c0_164 = arith.constant 0 : index
    %187 = vector.load %arg3[%c2_162, %c0_163, %c0_164] : memref<9x49x81xbf16, #tpu.memory_space<vmem>>, vector<1x49x81xbf16>
    %188 = vector.shape_cast %187 : vector<1x49x81xbf16> to vector<49x81xbf16>
    %cst_165 = arith.constant dense<0.000000e+00> : vector<49x64xf32>
    %189 = tpu.matmul %188, %168, %cst_165 {dimension_numbers = #tpu.dot_dimension_numbers<[1], [0], [0], [1], [0, 0, 1, 1], [], []>} : vector<49x81xbf16>, vector<81x64xbf16>, vector<49x64xf32> -> vector<49x64xf32>
    %190 = arith.truncf %189 : vector<49x64xf32> to vector<49x64xbf16>
    %c2_166 = arith.constant 2 : index
    %c0_167 = arith.constant 0 : index
    %c0_168 = arith.constant 0 : index
    %191 = vector.load %arg8[%c2_166, %c0_167, %c0_168] : memref<9x64x32xbf16, #tpu.memory_space<vmem>>, vector<1x64x32xbf16>
    %192 = vector.shape_cast %191 : vector<1x64x32xbf16> to vector<64x32xbf16>
    %cst_169 = arith.constant dense<0.000000e+00> : vector<49x32xf32>
    %193 = tpu.matmul %190, %192, %cst_169 {dimension_numbers = #tpu.dot_dimension_numbers<[1], [0], [0], [1], [0, 0, 1, 1], [], []>} : vector<49x64xbf16>, vector<64x32xbf16>, vector<49x32xf32> -> vector<49x32xf32>
    %194 = arith.addf %186, %193 : vector<49x32xf32>
    %c3_170 = arith.constant 3 : index
    %c0_171 = arith.constant 0 : index
    %c0_172 = arith.constant 0 : index
    %195 = vector.load %arg3[%c3_170, %c0_171, %c0_172] : memref<9x49x81xbf16, #tpu.memory_space<vmem>>, vector<1x49x81xbf16>
    %196 = vector.shape_cast %195 : vector<1x49x81xbf16> to vector<49x81xbf16>
    %cst_173 = arith.constant dense<0.000000e+00> : vector<49x64xf32>
    %197 = tpu.matmul %196, %168, %cst_173 {dimension_numbers = #tpu.dot_dimension_numbers<[1], [0], [0], [1], [0, 0, 1, 1], [], []>} : vector<49x81xbf16>, vector<81x64xbf16>, vector<49x64xf32> -> vector<49x64xf32>
    %198 = arith.truncf %197 : vector<49x64xf32> to vector<49x64xbf16>
    %c3_174 = arith.constant 3 : index
    %c0_175 = arith.constant 0 : index
    %c0_176 = arith.constant 0 : index
    %199 = vector.load %arg8[%c3_174, %c0_175, %c0_176] : memref<9x64x32xbf16, #tpu.memory_space<vmem>>, vector<1x64x32xbf16>
    %200 = vector.shape_cast %199 : vector<1x64x32xbf16> to vector<64x32xbf16>
    %cst_177 = arith.constant dense<0.000000e+00> : vector<49x32xf32>
    %201 = tpu.matmul %198, %200, %cst_177 {dimension_numbers = #tpu.dot_dimension_numbers<[1], [0], [0], [1], [0, 0, 1, 1], [], []>} : vector<49x64xbf16>, vector<64x32xbf16>, vector<49x32xf32> -> vector<49x32xf32>
    %202 = arith.addf %194, %201 : vector<49x32xf32>
    %c4_178 = arith.constant 4 : index
    %c0_179 = arith.constant 0 : index
    %c0_180 = arith.constant 0 : index
    %203 = vector.load %arg3[%c4_178, %c0_179, %c0_180] : memref<9x49x81xbf16, #tpu.memory_space<vmem>>, vector<1x49x81xbf16>
    %204 = vector.shape_cast %203 : vector<1x49x81xbf16> to vector<49x81xbf16>
    %cst_181 = arith.constant dense<0.000000e+00> : vector<49x64xf32>
    %205 = tpu.matmul %204, %168, %cst_181 {dimension_numbers = #tpu.dot_dimension_numbers<[1], [0], [0], [1], [0, 0, 1, 1], [], []>} : vector<49x81xbf16>, vector<81x64xbf16>, vector<49x64xf32> -> vector<49x64xf32>
    %206 = arith.truncf %205 : vector<49x64xf32> to vector<49x64xbf16>
    %c4_182 = arith.constant 4 : index
    %c0_183 = arith.constant 0 : index
    %c0_184 = arith.constant 0 : index
    %207 = vector.load %arg8[%c4_182, %c0_183, %c0_184] : memref<9x64x32xbf16, #tpu.memory_space<vmem>>, vector<1x64x32xbf16>
    %208 = vector.shape_cast %207 : vector<1x64x32xbf16> to vector<64x32xbf16>
    %cst_185 = arith.constant dense<0.000000e+00> : vector<49x32xf32>
    %209 = tpu.matmul %206, %208, %cst_185 {dimension_numbers = #tpu.dot_dimension_numbers<[1], [0], [0], [1], [0, 0, 1, 1], [], []>} : vector<49x64xbf16>, vector<64x32xbf16>, vector<49x32xf32> -> vector<49x32xf32>
    %210 = arith.addf %202, %209 : vector<49x32xf32>
    %c5_186 = arith.constant 5 : index
    %c0_187 = arith.constant 0 : index
    %c0_188 = arith.constant 0 : index
    %211 = vector.load %arg3[%c5_186, %c0_187, %c0_188] : memref<9x49x81xbf16, #tpu.memory_space<vmem>>, vector<1x49x81xbf16>
    %212 = vector.shape_cast %211 : vector<1x49x81xbf16> to vector<49x81xbf16>
    %cst_189 = arith.constant dense<0.000000e+00> : vector<49x64xf32>
    %213 = tpu.matmul %212, %168, %cst_189 {dimension_numbers = #tpu.dot_dimension_numbers<[1], [0], [0], [1], [0, 0, 1, 1], [], []>} : vector<49x81xbf16>, vector<81x64xbf16>, vector<49x64xf32> -> vector<49x64xf32>
    %214 = arith.truncf %213 : vector<49x64xf32> to vector<49x64xbf16>
    %c5_190 = arith.constant 5 : index
    %c0_191 = arith.constant 0 : index
    %c0_192 = arith.constant 0 : index
    %215 = vector.load %arg8[%c5_190, %c0_191, %c0_192] : memref<9x64x32xbf16, #tpu.memory_space<vmem>>, vector<1x64x32xbf16>
    %216 = vector.shape_cast %215 : vector<1x64x32xbf16> to vector<64x32xbf16>
    %cst_193 = arith.constant dense<0.000000e+00> : vector<49x32xf32>
    %217 = tpu.matmul %214, %216, %cst_193 {dimension_numbers = #tpu.dot_dimension_numbers<[1], [0], [0], [1], [0, 0, 1, 1], [], []>} : vector<49x64xbf16>, vector<64x32xbf16>, vector<49x32xf32> -> vector<49x32xf32>
    %218 = arith.addf %210, %217 : vector<49x32xf32>
    %c6_194 = arith.constant 6 : index
    %c0_195 = arith.constant 0 : index
    %c0_196 = arith.constant 0 : index
    %219 = vector.load %arg3[%c6_194, %c0_195, %c0_196] : memref<9x49x81xbf16, #tpu.memory_space<vmem>>, vector<1x49x81xbf16>
    %220 = vector.shape_cast %219 : vector<1x49x81xbf16> to vector<49x81xbf16>
    %cst_197 = arith.constant dense<0.000000e+00> : vector<49x64xf32>
    %221 = tpu.matmul %220, %168, %cst_197 {dimension_numbers = #tpu.dot_dimension_numbers<[1], [0], [0], [1], [0, 0, 1, 1], [], []>} : vector<49x81xbf16>, vector<81x64xbf16>, vector<49x64xf32> -> vector<49x64xf32>
    %222 = arith.truncf %221 : vector<49x64xf32> to vector<49x64xbf16>
    %c6_198 = arith.constant 6 : index
    %c0_199 = arith.constant 0 : index
    %c0_200 = arith.constant 0 : index
    %223 = vector.load %arg8[%c6_198, %c0_199, %c0_200] : memref<9x64x32xbf16, #tpu.memory_space<vmem>>, vector<1x64x32xbf16>
    %224 = vector.shape_cast %223 : vector<1x64x32xbf16> to vector<64x32xbf16>
    %cst_201 = arith.constant dense<0.000000e+00> : vector<49x32xf32>
    %225 = tpu.matmul %222, %224, %cst_201 {dimension_numbers = #tpu.dot_dimension_numbers<[1], [0], [0], [1], [0, 0, 1, 1], [], []>} : vector<49x64xbf16>, vector<64x32xbf16>, vector<49x32xf32> -> vector<49x32xf32>
    %226 = arith.addf %218, %225 : vector<49x32xf32>
    %c7_202 = arith.constant 7 : index
    %c0_203 = arith.constant 0 : index
    %c0_204 = arith.constant 0 : index
    %227 = vector.load %arg3[%c7_202, %c0_203, %c0_204] : memref<9x49x81xbf16, #tpu.memory_space<vmem>>, vector<1x49x81xbf16>
    %228 = vector.shape_cast %227 : vector<1x49x81xbf16> to vector<49x81xbf16>
    %cst_205 = arith.constant dense<0.000000e+00> : vector<49x64xf32>
    %229 = tpu.matmul %228, %168, %cst_205 {dimension_numbers = #tpu.dot_dimension_numbers<[1], [0], [0], [1], [0, 0, 1, 1], [], []>} : vector<49x81xbf16>, vector<81x64xbf16>, vector<49x64xf32> -> vector<49x64xf32>
    %230 = arith.truncf %229 : vector<49x64xf32> to vector<49x64xbf16>
    %c7_206 = arith.constant 7 : index
    %c0_207 = arith.constant 0 : index
    %c0_208 = arith.constant 0 : index
    %231 = vector.load %arg8[%c7_206, %c0_207, %c0_208] : memref<9x64x32xbf16, #tpu.memory_space<vmem>>, vector<1x64x32xbf16>
    %232 = vector.shape_cast %231 : vector<1x64x32xbf16> to vector<64x32xbf16>
    %cst_209 = arith.constant dense<0.000000e+00> : vector<49x32xf32>
    %233 = tpu.matmul %230, %232, %cst_209 {dimension_numbers = #tpu.dot_dimension_numbers<[1], [0], [0], [1], [0, 0, 1, 1], [], []>} : vector<49x64xbf16>, vector<64x32xbf16>, vector<49x32xf32> -> vector<49x32xf32>
    %234 = arith.addf %226, %233 : vector<49x32xf32>
    %c8_210 = arith.constant 8 : index
    %c0_211 = arith.constant 0 : index
    %c0_212 = arith.constant 0 : index
    %235 = vector.load %arg3[%c8_210, %c0_211, %c0_212] : memref<9x49x81xbf16, #tpu.memory_space<vmem>>, vector<1x49x81xbf16>
    %236 = vector.shape_cast %235 : vector<1x49x81xbf16> to vector<49x81xbf16>
    %cst_213 = arith.constant dense<0.000000e+00> : vector<49x64xf32>
    %237 = tpu.matmul %236, %168, %cst_213 {dimension_numbers = #tpu.dot_dimension_numbers<[1], [0], [0], [1], [0, 0, 1, 1], [], []>} : vector<49x81xbf16>, vector<81x64xbf16>, vector<49x64xf32> -> vector<49x64xf32>
    %238 = arith.truncf %237 : vector<49x64xf32> to vector<49x64xbf16>
    %c8_214 = arith.constant 8 : index
    %c0_215 = arith.constant 0 : index
    %c0_216 = arith.constant 0 : index
    %239 = vector.load %arg8[%c8_214, %c0_215, %c0_216] : memref<9x64x32xbf16, #tpu.memory_space<vmem>>, vector<1x64x32xbf16>
    %240 = vector.shape_cast %239 : vector<1x64x32xbf16> to vector<64x32xbf16>
    %cst_217 = arith.constant dense<0.000000e+00> : vector<49x32xf32>
    %241 = tpu.matmul %238, %240, %cst_217 {dimension_numbers = #tpu.dot_dimension_numbers<[1], [0], [0], [1], [0, 0, 1, 1], [], []>} : vector<49x64xbf16>, vector<64x32xbf16>, vector<49x32xf32> -> vector<49x32xf32>
    %242 = arith.addf %234, %241 : vector<49x32xf32>
    %243 = vector.broadcast %169 : vector<1x32xf32> to vector<49x32xf32>
    %244 = arith.addf %242, %243 : vector<49x32xf32>
    %cst_218 = arith.constant 0.000000e+00 : f32
    %245 = vector.broadcast %cst_218 : f32 to vector<49x32xf32>
    %246 = arith.maximumf %244, %245 : vector<49x32xf32>
    %247 = arith.truncf %246 : vector<49x32xf32> to vector<49x32xbf16>
    %c0_219 = arith.constant 0 : index
    %c0_220 = arith.constant 0 : index
    %c0_221 = arith.constant 0 : index
    %248 = vector.load %arg10[%c0_219, %c0_220, %c0_221] : memref<1x49x32xbf16, #tpu.memory_space<vmem>>, vector<1x49x32xbf16>
    %249 = vector.shape_cast %248 : vector<1x49x32xbf16> to vector<49x32xbf16>
    %250 = vector.shape_cast %247 : vector<49x32xbf16> to vector<1x49x32xbf16>
    tpu.vector_store %arg10[%c0_219, %c0_220, %c0_221], %250 {strides = array<i32>} : memref<1x49x32xbf16, #tpu.memory_space<vmem>>, vector<1x49x32xbf16>,
    return
  }
  func.func @transform_0(%arg0: i32) -> (i32, i32, i32, i32) {
    %c0_i32 = arith.constant 0 : i32
    %c0_i32_0 = arith.constant 0 : i32
    %c0_i32_1 = arith.constant 0 : i32
    %c0_i32_2 = arith.constant 0 : i32
    return %arg0, %c0_i32, %c0_i32_0, %c0_i32_1 : i32, i32, i32, i32
  }
  func.func @transform_1(%arg0: i32) -> (i32, i32, i32) {
    %c0_i32 = arith.constant 0 : i32
    %c0_i32_0 = arith.constant 0 : i32
    %c0_i32_1 = arith.constant 0 : i32
    %c0_i32_2 = arith.constant 0 : i32
    return %c0_i32, %c0_i32_0, %c0_i32_1 : i32, i32, i32
  }
  func.func @transform_2(%arg0: i32) -> (i32, i32, i32) {
    %c0_i32 = arith.constant 0 : i32
    %c0_i32_0 = arith.constant 0 : i32
    %c0_i32_1 = arith.constant 0 : i32
    %c0_i32_2 = arith.constant 0 : i32
    return %c0_i32, %c0_i32_0, %c0_i32_1 : i32, i32, i32
  }
  func.func @transform_3(%arg0: i32) -> (i32, i32) {
    %c0_i32 = arith.constant 0 : i32
    %c0_i32_0 = arith.constant 0 : i32
    %c0_i32_1 = arith.constant 0 : i32
    return %c0_i32, %c0_i32_0 : i32, i32
  }
  func.func @transform_4(%arg0: i32) -> (i32, i32) {
    %c0_i32 = arith.constant 0 : i32
    %c0_i32_0 = arith.constant 0 : i32
    %c0_i32_1 = arith.constant 0 : i32
    return %c0_i32, %c0_i32_0 : i32, i32
  }
  func.func @transform_5(%arg0: i32) -> (i32, i32, i32) {
    %c0_i32 = arith.constant 0 : i32
    %c0_i32_0 = arith.constant 0 : i32
    %c0_i32_1 = arith.constant 0 : i32
    %c0_i32_2 = arith.constant 0 : i32
    return %c0_i32, %c0_i32_0, %c0_i32_1 : i32, i32, i32
  }
  func.func @transform_6(%arg0: i32) -> (i32, i32) {
    %c0_i32 = arith.constant 0 : i32
    %c0_i32_0 = arith.constant 0 : i32
    %c0_i32_1 = arith.constant 0 : i32
    return %c0_i32, %c0_i32_0 : i32, i32
  }
  func.func @transform_7(%arg0: i32) -> (i32, i32, i32) {
    %c0_i32 = arith.constant 0 : i32
    %c0_i32_0 = arith.constant 0 : i32
    %c0_i32_1 = arith.constant 0 : i32
    %c0_i32_2 = arith.constant 0 : i32
    return %c0_i32, %c0_i32_0, %c0_i32_1 : i32, i32, i32
  }
  func.func @transform_8(%arg0: i32) -> (i32, i32) {
    %c0_i32 = arith.constant 0 : i32
    %c0_i32_0 = arith.constant 0 : i32
    %c0_i32_1 = arith.constant 0 : i32
    return %c0_i32, %c0_i32_0 : i32, i32
  }
  func.func @transform_9(%arg0: i32) -> (i32, i32, i32) {
    %c0_i32 = arith.constant 0 : i32
    %c0_i32_0 = arith.constant 0 : i32
    %c0_i32_1 = arith.constant 0 : i32
    return %arg0, %c0_i32, %c0_i32_0 : i32, i32, i32
  }
}

module attributes {stable_mosaic.version = 11 : i64} {
  func.func @_head_kernel(%arg0: i32, %arg1: memref<2x1568xbf16, #tpu.memory_space<vmem>>, %arg2: memref<1568x512xbf16, #tpu.memory_space<vmem>>, %arg3: memref<1x512xf32, #tpu.memory_space<vmem>>, %arg4: memref<1x512xf32, #tpu.memory_space<vmem>>, %arg5: memref<1x1xf32, #tpu.memory_space<vmem>>, %arg6: memref<2x512xf32, #tpu.memory_space<vmem>>, %arg7: memref<2x1xf32, #tpu.memory_space<vmem>>) attributes {dimension_semantics = [#tpu.dimension_semantics<parallel>], iteration_bounds = array<i64: 1>, scalar_prefetch = 0 : i64, scratch_operands = 0 : i64, tpu.core_type = #tpu.core_type<tc>, window_params = [{transform_indices = @transform_0, window_bounds = array<i64: 2, 1568>}, {pipeline_mode = #tpu.pipeline_mode<synchronous>, transform_indices = @transform_1, window_bounds = array<i64: 1568, 512>}, {pipeline_mode = #tpu.pipeline_mode<synchronous>, transform_indices = @transform_2, window_bounds = array<i64: 1, 512>}, {pipeline_mode = #tpu.pipeline_mode<synchronous>, transform_indices = @transform_3, window_bounds = array<i64: 1, 512>}, {pipeline_mode = #tpu.pipeline_mode<synchronous>, transform_indices = @transform_4, window_bounds = array<i64: 1, 1>}, {transform_indices = @transform_5, window_bounds = array<i64: 2, 512>}, {transform_indices = @transform_6, window_bounds = array<i64: 2, 1>}]} {
    %c0 = arith.constant 0 : index
    %c0_0 = arith.constant 0 : index
    %0 = vector.load %arg1[%c0, %c0_0] : memref<2x1568xbf16, #tpu.memory_space<vmem>>, vector<2x1568xbf16>
    %c0_1 = arith.constant 0 : index
    %c0_2 = arith.constant 0 : index
    %1 = vector.load %arg2[%c0_1, %c0_2] : memref<1568x512xbf16, #tpu.memory_space<vmem>>, vector<1568x512xbf16>
    %cst = arith.constant dense<0.000000e+00> : vector<2x512xf32>
    %2 = tpu.matmul %0, %1, %cst {dimension_numbers = #tpu.dot_dimension_numbers<[1], [0], [0], [1], [0, 0, 1, 1], [], []>} : vector<2x1568xbf16>, vector<1568x512xbf16>, vector<2x512xf32> -> vector<2x512xf32>
    %c0_3 = arith.constant 0 : index
    %c0_4 = arith.constant 0 : index
    %3 = vector.load %arg3[%c0_3, %c0_4] : memref<1x512xf32, #tpu.memory_space<vmem>>, vector<1x512xf32>
    %4 = vector.broadcast %3 : vector<1x512xf32> to vector<2x512xf32>
    %5 = arith.addf %2, %4 : vector<2x512xf32>
    %cst_5 = arith.constant 0.000000e+00 : f32
    %6 = vector.broadcast %cst_5 : f32 to vector<2x512xf32>
    %7 = arith.maximumf %5, %6 : vector<2x512xf32>
    %c0_6 = arith.constant 0 : index
    %c0_7 = arith.constant 0 : index
    %8 = vector.load %arg6[%c0_6, %c0_7] : memref<2x512xf32, #tpu.memory_space<vmem>>, vector<2x512xf32>
    tpu.vector_store %arg6[%c0_6, %c0_7], %7 {strides = array<i32>} : memref<2x512xf32, #tpu.memory_space<vmem>>, vector<2x512xf32>,
    %c0_8 = arith.constant 0 : index
    %c0_9 = arith.constant 0 : index
    %9 = vector.load %arg4[%c0_8, %c0_9] : memref<1x512xf32, #tpu.memory_space<vmem>>, vector<1x512xf32>
    %10 = vector.broadcast %9 : vector<1x512xf32> to vector<2x512xf32>
    %11 = arith.mulf %7, %10 : vector<2x512xf32>
    %cst_10 = arith.constant dense<0.000000e+00> : vector<2xf32>
    %12 = vector.multi_reduction <add>, %11, %cst_10 [1] : vector<2x512xf32> to vector<2xf32>
    %13 = vector.shape_cast %12 : vector<2xf32> to vector<2x1xf32>
    %c0_11 = arith.constant 0 : index
    %c0_12 = arith.constant 0 : index
    %14 = vector.load %arg5[%c0_11, %c0_12] : memref<1x1xf32, #tpu.memory_space<vmem>>, vector<1x1xf32>
    %15 = vector.broadcast %14 : vector<1x1xf32> to vector<2x1xf32>
    %16 = arith.addf %13, %15 : vector<2x1xf32>
    %c0_13 = arith.constant 0 : index
    %c0_14 = arith.constant 0 : index
    %17 = vector.load %arg7[%c0_13, %c0_14] : memref<2x1xf32, #tpu.memory_space<vmem>>, vector<2x1xf32>
    tpu.vector_store %arg7[%c0_13, %c0_14], %16 {strides = array<i32>} : memref<2x1xf32, #tpu.memory_space<vmem>>, vector<2x1xf32>,
    return
  }
  func.func @transform_0(%arg0: i32) -> (i32, i32) {
    %c0_i32 = arith.constant 0 : i32
    %c0_i32_0 = arith.constant 0 : i32
    return %arg0, %c0_i32 : i32, i32
  }
  func.func @transform_1(%arg0: i32) -> (i32, i32) {
    %c0_i32 = arith.constant 0 : i32
    %c0_i32_0 = arith.constant 0 : i32
    %c0_i32_1 = arith.constant 0 : i32
    return %c0_i32, %c0_i32_0 : i32, i32
  }
  func.func @transform_2(%arg0: i32) -> (i32, i32) {
    %c0_i32 = arith.constant 0 : i32
    %c0_i32_0 = arith.constant 0 : i32
    %c0_i32_1 = arith.constant 0 : i32
    return %c0_i32, %c0_i32_0 : i32, i32
  }
  func.func @transform_3(%arg0: i32) -> (i32, i32) {
    %c0_i32 = arith.constant 0 : i32
    %c0_i32_0 = arith.constant 0 : i32
    %c0_i32_1 = arith.constant 0 : i32
    return %c0_i32, %c0_i32_0 : i32, i32
  }
  func.func @transform_4(%arg0: i32) -> (i32, i32) {
    %c0_i32 = arith.constant 0 : i32
    %c0_i32_0 = arith.constant 0 : i32
    %c0_i32_1 = arith.constant 0 : i32
    return %c0_i32, %c0_i32_0 : i32, i32
  }
  func.func @transform_5(%arg0: i32) -> (i32, i32) {
    %c0_i32 = arith.constant 0 : i32
    %c0_i32_0 = arith.constant 0 : i32
    return %arg0, %c0_i32 : i32, i32
  }
  func.func @transform_6(%arg0: i32) -> (i32, i32) {
    %c0_i32 = arith.constant 0 : i32
    %c0_i32_0 = arith.constant 0 : i32
    return %arg0, %c0_i32 : i32, i32
  }
}

</mosaic_0001>

<bundles_post_ra>
// kernel: actor_critic_cnn_forward.3
= control target key start
LH: loop header
LB: loop body
LE: loop exit
PB: predicated region body
PF: predicated region fallthrough
CT: control target
= control target key end

     0   :  { %s5563_s0 = inlined_call_operand.vmem [shape: bf16[2,1568], index: 0, kind: input, shape index: {}]   ;;  %s5564_s1 = inlined_call_operand.vmem [shape: bf16[1568,512], index: 1, kind: input, shape index: {}]   ;;  %s5565_s2 = inlined_call_operand.vmem [shape: f32[1,512], index: 2, kind: input, shape index: {}]   ;;  %s5566_s3 = inlined_call_operand.vmem [shape: f32[1,512], index: 3, kind: input, shape index: {}]   ;;  %s5567_s4 = inlined_call_operand.<no memory space> [shape: f32[1,1], index: 4, kind: input, shape index: {}]   ;;  %s5568_s5 = inlined_call_operand.hbm [shape: f32[2,512], index: 5, kind: output, shape index: {0}]   ;;  %s5569_s6 = inlined_call_operand.vmem [shape: f32[2,1], index: 6, kind: output, shape index: {1}]  }
   0x1   :  { %v12_v0 = vstv %s5567_s4 }
   0x2   :  { %13 = vst [vmem:[#allocation2] sm:$0x1] %v12_v0 }
   0x3   :  { %v3572_v1 = vld [vmem:[%s5564_s1 + $0xe4] ss:$16 sps:$4 sm:$0xff]   ;;  %v3576_v3 = vld [vmem:[%s5564_s1 + $0xe0] ss:$16 sps:$4 sm:$0xff]   ;;  %v422_v37 = vlaneseq  ;;  %v4184_v38 = vmov 1966171168  }
   0x4   :  { %v3574_v2 = vld [vmem:[%s5564_s1 + $0x2e4] ss:$16 sps:$4 sm:$0xff]   ;;  %2508 = vmatprep.subr.bf16.mxu0 %v3572_v1  ;;  %v3577_v4 = vld [vmem:[%s5564_s1 + $0x2e0] ss:$16 sps:$4 sm:$0xff]   ;;  %v446_v39 = vunpack.c.l.s4 %v4184_v38  ;;  %vm2504_vm0 = vcmask 261120  }
   0x5   :  { %2549 = vmatprep.subr.bf16.mxu1 %v3574_v2  ;;  %v3578_v5 = vld [vmem:[%s5564_s1 + $0xc4] ss:$16 sps:$4 sm:$0xff]   ;;  %2509 = vmatpush1.bf16.msra.mxu0 %v3576_v3  ;;  %v3582_v7 = vld [vmem:[%s5564_s1 + $0xc0] ss:$16 sps:$4 sm:$0xff]   ;;  %v4343_v43 = vshrl.u32 %v422_v37, 7 }
   0x6   :  { %2550 = vmatpush1.bf16.msra.mxu1 %v3577_v4  ;;  %v3580_v6 = vld [vmem:[%s5564_s1 + $0x2c4] ss:$16 sps:$4 sm:$0xff]   ;;  %2510 = vmatprep.subr.bf16.mxu0 %v3578_v5  ;;  %v3583_v8 = vld [vmem:[%s5564_s1 + $0x2c0] ss:$16 sps:$4 sm:$0xff]   ;;  %v447_v44 = vunpack.c.0.s8 %v446_v39 }
   0x7   :  { %2551 = vmatprep.subr.bf16.mxu1 %v3580_v6  ;;  %v3584_v9 = vld [vmem:[%s5564_s1 + $0xa4] ss:$16 sps:$4 sm:$0xff]   ;;  %v3588_v11 = vld [vmem:[%s5564_s1 + $0xa0] ss:$16 sps:$4 sm:$0xff]  }
   0x8   :  { %v3586_v10 = vld [vmem:[%s5564_s1 + $0x2a4] ss:$16 sps:$4 sm:$0xff]   ;;  %v3589_v12 = vld [vmem:[%s5564_s1 + $0x2a0] ss:$16 sps:$4 sm:$0xff]   ;;  %v4361_v50 = vsub.s32 %v447_v44, %v4343_v43 }
   0x9   :  { %2511 = vmatpush1.bf16.msra.mxu0 %v3582_v7  ;;  %v3590_v13 = vld [vmem:[%s5564_s1 + $0x84] ss:$16 sps:$4 sm:$0xff]   ;;  %v3594_v15 = vld [vmem:[%s5564_s1 + $0x80] ss:$16 sps:$4 sm:$0xff]  }
   0xa   :  { %2552 = vmatpush1.bf16.msra.mxu1 %v3583_v8  ;;  %2512 = vmatprep.subr.bf16.mxu0 %v3584_v9  ;;  %v3592_v14 = vld [vmem:[%s5564_s1 + $0x284] ss:$16 sps:$4 sm:$0xff]   ;;  %v3595_v16 = vld [vmem:[%s5564_s1 + $0x280] ss:$16 sps:$4 sm:$0xff]  }
   0xb   :  { %2553 = vmatprep.subr.bf16.mxu1 %v3586_v10  ;;  %v3596_v17 = vld [vmem:[%s5564_s1 + $0x64] ss:$16 sps:$4 sm:$0xff]   ;;  %v3600_v19 = vld [vmem:[%s5564_s1 + $0x60] ss:$16 sps:$4 sm:$0xff]  }
   0xc   :  { %v3598_v18 = vld [vmem:[%s5564_s1 + $0x264] ss:$16 sps:$4 sm:$0xff]   ;;  %v3601_v20 = vld [vmem:[%s5564_s1 + $0x260] ss:$16 sps:$4 sm:$0xff]  }
   0xd   :  { %2513 = vmatpush1.bf16.msra.mxu0 %v3588_v11  ;;  %v3602_v21 = vld [vmem:[%s5564_s1 + $0x44] ss:$16 sps:$4 sm:$0xff]   ;;  %v3606_v23 = vld [vmem:[%s5564_s1 + $0x40] ss:$16 sps:$4 sm:$0xff]  }
   0xe   :  { %2554 = vmatpush1.bf16.msra.mxu1 %v3589_v12  ;;  %2514 = vmatprep.subr.bf16.mxu0 %v3590_v13  ;;  %v3604_v22 = vld [vmem:[%s5564_s1 + $0x244] ss:$16 sps:$4 sm:$0xff]   ;;  %v3607_v24 = vld [vmem:[%s5564_s1 + $0x240] ss:$16 sps:$4 sm:$0xff]  }
   0xf   :  { %2555 = vmatprep.subr.bf16.mxu1 %v3592_v14  ;;  %v3608_v25 = vld [vmem:[%s5564_s1 + $0x24] ss:$16 sps:$4 sm:$0xff]   ;;  %v3612_v27 = vld [vmem:[%s5564_s1 + $0x20] ss:$16 sps:$4 sm:$0xff]  }
  0x10   :  { %v3610_v26 = vld [vmem:[%s5564_s1 + $0x224] ss:$16 sps:$4 sm:$0xff]   ;;  %v3613_v28 = vld [vmem:[%s5564_s1 + $0x220] ss:$16 sps:$4 sm:$0xff]  }
  0x11   :  { %2515 = vmatpush1.bf16.msra.mxu0 %v3594_v15  ;;  %v3614_v29 = vld [vmem:[%s5564_s1 + $0x4] ss:$16 sps:$4 sm:$0xff]   ;;  %v3618_v31 = vld [vmem:[%s5564_s1] ss:$16 sps:$4 sm:$0xff]  }
  0x12   :  { %2556 = vmatpush1.bf16.msra.mxu1 %v3595_v16  ;;  %2516 = vmatprep.subr.bf16.mxu0 %v3596_v17  ;;  %v3616_v30 = vld [vmem:[%s5564_s1 + $0x204] ss:$16 sps:$4 sm:$0xff]   ;;  %v3619_v32 = vld [vmem:[%s5564_s1 + $0x200] ss:$16 sps:$4 sm:$0xff]  }
  0x13   :  { %2557 = vmatprep.subr.bf16.mxu1 %v3598_v18  ;;  %v3620_v33 = vld [vmem:[%s5564_s1 + $0x1e4] ss:$16 sps:$4 sm:$0xff]   ;;  %v3624_v35 = vld [vmem:[%s5564_s1 + $0x1e0] ss:$16 sps:$4 sm:$0xff]  }
  0x14   :  { %v3622_v34 = vld [vmem:[%s5564_s1 + $0x3e4] ss:$16 sps:$4 sm:$0xff]   ;;  %v3625_v36 = vld [vmem:[%s5564_s1 + $0x3e0] ss:$16 sps:$4 sm:$0xff]  }
  0x15   :  { %2517 = vmatpush1.bf16.msra.mxu0 %v3600_v19  ;;  %v3626_v40 = vld [vmem:[%s5564_s1 + $0x1c4] ss:$16 sps:$4 sm:$0xff]   ;;  %v3630_v42 = vld [vmem:[%s5564_s1 + $0x1c0] ss:$16 sps:$4 sm:$0xff]  }
  0x16   :  { %2558 = vmatpush1.bf16.msra.mxu1 %v3601_v20  ;;  %2518 = vmatprep.subr.bf16.mxu0 %v3602_v21  ;;  %v3628_v41 = vld [vmem:[%s5564_s1 + $0x3c4] ss:$16 sps:$4 sm:$0xff]   ;;  %v3631_v45 = vld [vmem:[%s5564_s1 + $0x3c0] ss:$16 sps:$4 sm:$0xff]  }
  0x17   :  { %2559 = vmatprep.subr.bf16.mxu1 %v3604_v22  ;;  %v3632_v46 = vld [vmem:[%s5564_s1 + $0x1a4] ss:$16 sps:$4 sm:$0xff]   ;;  %v3636_v48 = vld [vmem:[%s5564_s1 + $0x1a0] ss:$16 sps:$4 sm:$0xff]  }
  0x18   :  { %v3634_v47 = vld [vmem:[%s5564_s1 + $0x3a4] ss:$16 sps:$4 sm:$0xff]   ;;  %v3637_v49 = vld [vmem:[%s5564_s1 + $0x3a0] ss:$16 sps:$4 sm:$0xff]  }
  0x19   :  { %2519 = vmatpush1.bf16.msra.mxu0 %v3606_v23  ;;  %v3638_v51 = vld [vmem:[%s5564_s1 + $0x184] ss:$16 sps:$4 sm:$0xff]   ;;  %v3642_v54 = vld [vmem:[%s5564_s1 + $0x180] ss:$16 sps:$4 sm:$0xff]  }
  0x1a   :  { %2560 = vmatpush1.bf16.msra.mxu1 %v3607_v24  ;;  %2520 = vmatprep.subr.bf16.mxu0 %v3608_v25  ;;  %v3640_v52 = vld [vmem:[%s5564_s1 + $0x384] ss:$16 sps:$4 sm:$0xff]   ;;  %v3643_v56 = vld [vmem:[%s5564_s1 + $0x380] ss:$16 sps:$4 sm:$0xff]  }
  0x1b   :  { %2561 = vmatprep.subr.bf16.mxu1 %v3610_v26  ;;  %v26_v53 = vld [vmem:[%s5563_s0] sm:$0xff] }
  0x1c   :  { %v451_v55 = vrot.slane %v26_v53, %v4361_v50  ;;  %v3644_v57 = vld [vmem:[%s5564_s1 + $0x164] ss:$16 sps:$4 sm:$0xff]   ;;  %v3648_v60 = vld [vmem:[%s5564_s1 + $0x160] ss:$16 sps:$4 sm:$0xff]   ;;  %v444_v2 = vcombine.high %v26_v53, %v26_v53 }
  0x1d   :  { %2521 = vmatpush1.bf16.msra.mxu0 %v3612_v27  ;;  %v3646_v58 = vld [vmem:[%s5564_s1 + $0x364] ss:$16 sps:$4 sm:$0xff]   ;;  %v3649_v62 = vld [vmem:[%s5564_s1 + $0x360] ss:$16 sps:$4 sm:$0xff]  }
  0x1e   :  { %2562 = vmatpush1.bf16.msra.mxu1 %v3613_v28  ;;  %2522 = vmatprep.subr.bf16.mxu0 %v3614_v29  ;;  %v459_v59 = vcombine.high %v451_v55, %v451_v55  ;;  %v3650_v63 = vld [vmem:[%s5564_s1 + $0x144] ss:$16 sps:$4 sm:$0xff]   ;;  %v3654_v3 = vld [vmem:[%s5564_s1 + $0x140] ss:$16 sps:$4 sm:$0xff]   ;;  %v4419_v7 = vrot.slane %v444_v2, %v4361_v50  ;;  %v4439_v14 = vrot.slane %v451_v55, %v4361_v50 }
  0x1f   :  { %2563 = vmatprep.subr.bf16.mxu1 %v3616_v30  ;;  %v3652_v0 = vld [vmem:[%s5564_s1 + $0x344] ss:$16 sps:$4 sm:$0xff]   ;;  %v3655_v4 = vld [vmem:[%s5564_s1 + $0x340] ss:$16 sps:$4 sm:$0xff]  }
  0x20   :  { %v4389_v61 = vrot.slane %v459_v59, %v4361_v50  ;;  %v3656_v5 = vld [vmem:[%s5564_s1 + $0x124] ss:$16 sps:$4 sm:$0xff]   ;;  %v3660_v8 = vld [vmem:[%s5564_s1 + $0x120] ss:$16 sps:$4 sm:$0xff]   ;;  %v460_v12 = vcombine.high %v4419_v7, %v4419_v7  ;;  %v4455_v19 = vcombine.high %v4439_v14, %v4439_v14 }
  0x21   :  { %2523 = vmatpush1.bf16.msra.mxu0 %v3618_v31  ;;  %v3658_v6 = vld [vmem:[%s5564_s1 + $0x324] ss:$16 sps:$4 sm:$0xff]   ;;  %v3661_v9 = vld [vmem:[%s5564_s1 + $0x320] ss:$16 sps:$4 sm:$0xff]  }
  0x22   :  { %2564 = vmatpush1.bf16.msra.mxu1 %v3619_v32  ;;  %2524 = vmatprep.subr.bf16.mxu0 %v3620_v33  ;;  %v4402_v1 = vcombine.high %v4389_v61, %v4389_v61  ;;  %v3662_v10 = vld [vmem:[%s5564_s1 + $0x104] ss:$16 sps:$4 sm:$0xff]   ;;  %v3666_v13 = vld [vmem:[%s5564_s1 + $0x100] ss:$16 sps:$4 sm:$0xff]   ;;  %v4451_v18 = vrot.slane %v460_v12, %v4361_v50 }
  0x23   :  { %2565 = vmatprep.subr.bf16.mxu1 %v3622_v34  ;;  %2540 = vmatprep.mubr.bf16.mxu0 %v4389_v61  ;;  %v3664_v11 = vld [vmem:[%s5564_s1 + $0x304] ss:$16 sps:$4 sm:$0xff]   ;;  %v3667_v15 = vld [vmem:[%s5564_s1 + $0x300] ss:$16 sps:$4 sm:$0xff]  }
  0x24   :  { %2581 = vmatprep.mubr.bf16.mxu1 %v4402_v1  ;;  %v3670_v16 = vld [vmem:[%s5564_s1 + $0x4e4] ss:$16 sps:$4 sm:$0xff]   ;;  %v3668_v20 = vld [vmem:[%s5564_s1 + $0x4e0] ss:$16 sps:$4 sm:$0xff]   ;;  %v4471_v24 = vcombine.high %v4451_v18, %v4451_v18 }
  0x25   :  { %2525 = vmatpush2.bf16.msra.mxu0 %v3624_v35  ;;  %v3673_v17 = vld [vmem:[%s5564_s1 + $0x6e4] ss:$16 sps:$4 sm:$0xff]   ;;  %v3671_v21 = vld [vmem:[%s5564_s1 + $0x6e0] ss:$16 sps:$4 sm:$0xff]  }
  0x26   :  { %2566 = vmatpush2.bf16.msra.mxu1 %v3625_v36  ;;  %2526 = vmatprep.subr.bf16.mxu0 %v3626_v40  ;;  %v3676_v22 = vld [vmem:[%s5564_s1 + $0x4c4] ss:$16 sps:$4 sm:$0xff]   ;;  %v3674_v25 = vld [vmem:[%s5564_s1 + $0x4c0] ss:$16 sps:$4 sm:$0xff]  }
  0x27   :  { %2567 = vmatprep.subr.bf16.mxu1 %v3628_v41  ;;  %v3679_v23 = vld [vmem:[%s5564_s1 + $0x6c4] ss:$16 sps:$4 sm:$0xff]   ;;  %v3677_v26 = vld [vmem:[%s5564_s1 + $0x6c0] ss:$16 sps:$4 sm:$0xff]  }
  0x28   :  { %v3682_v27 = vld [vmem:[%s5564_s1 + $0x4a4] ss:$16 sps:$4 sm:$0xff]   ;;  %v3680_v29 = vld [vmem:[%s5564_s1 + $0x4a0] ss:$16 sps:$4 sm:$0xff]  }
  0x29   :  { %2527 = vmatpush2.bf16.msra.mxu0 %v3630_v42  ;;  %v3685_v28 = vld [vmem:[%s5564_s1 + $0x6a4] ss:$16 sps:$4 sm:$0xff]   ;;  %v3683_v30 = vld [vmem:[%s5564_s1 + $0x6a0] ss:$16 sps:$4 sm:$0xff]  }
  0x2a   :  { %2568 = vmatpush2.bf16.msra.mxu1 %v3631_v45  ;;  %2528 = vmatprep.subr.bf16.mxu0 %v3632_v46  ;;  %v3688_v31 = vld [vmem:[%s5564_s1 + $0x484] ss:$16 sps:$4 sm:$0xff]   ;;  %v3686_v33 = vld [vmem:[%s5564_s1 + $0x480] ss:$16 sps:$4 sm:$0xff]  }
  0x2b   :  { %2569 = vmatprep.subr.bf16.mxu1 %v3634_v47  ;;  %v3691_v32 = vld [vmem:[%s5564_s1 + $0x684] ss:$16 sps:$4 sm:$0xff]   ;;  %v3689_v34 = vld [vmem:[%s5564_s1 + $0x680] ss:$16 sps:$4 sm:$0xff]  }
  0x2c   :  { %v3694_v35 = vld [vmem:[%s5564_s1 + $0x464] ss:$16 sps:$4 sm:$0xff]   ;;  %v3692_v37 = vld [vmem:[%s5564_s1 + $0x460] ss:$16 sps:$4 sm:$0xff]  }
  0x2d   :  { %2529 = vmatpush2.bf16.msra.mxu0 %v3636_v48  ;;  %v3697_v36 = vld [vmem:[%s5564_s1 + $0x664] ss:$16 sps:$4 sm:$0xff]   ;;  %v3695_v38 = vld [vmem:[%s5564_s1 + $0x660] ss:$16 sps:$4 sm:$0xff]  }
  0x2e   :  { %2570 = vmatpush2.bf16.msra.mxu1 %v3637_v49  ;;  %2530 = vmatprep.subr.bf16.mxu0 %v3638_v51  ;;  %v3700_v39 = vld [vmem:[%s5564_s1 + $0x444] ss:$16 sps:$4 sm:$0xff]   ;;  %v3698_v41 = vld [vmem:[%s5564_s1 + $0x440] ss:$16 sps:$4 sm:$0xff]  }
  0x2f   :  { %2571 = vmatprep.subr.bf16.mxu1 %v3640_v52  ;;  %v3703_v40 = vld [vmem:[%s5564_s1 + $0x644] ss:$16 sps:$4 sm:$0xff]   ;;  %v3701_v42 = vld [vmem:[%s5564_s1 + $0x640] ss:$16 sps:$4 sm:$0xff]  }
  0x30   :  { %v3706_v44 = vld [vmem:[%s5564_s1 + $0x424] ss:$16 sps:$4 sm:$0xff]   ;;  %v3704_v46 = vld [vmem:[%s5564_s1 + $0x420] ss:$16 sps:$4 sm:$0xff]  }
  0x31   :  { %2531 = vmatpush2.bf16.msra.mxu0 %v3642_v54  ;;  %v3709_v45 = vld [vmem:[%s5564_s1 + $0x624] ss:$16 sps:$4 sm:$0xff]   ;;  %v3707_v47 = vld [vmem:[%s5564_s1 + $0x620] ss:$16 sps:$4 sm:$0xff]  }
  0x32   :  { %2572 = vmatpush2.bf16.msra.mxu1 %v3643_v56  ;;  %2532 = vmatprep.subr.bf16.mxu0 %v3644_v57  ;;  %v3712_v48 = vld [vmem:[%s5564_s1 + $0x404] ss:$16 sps:$4 sm:$0xff]   ;;  %v3710_v51 = vld [vmem:[%s5564_s1 + $0x400] ss:$16 sps:$4 sm:$0xff]  }
  0x33   :  { %2573 = vmatprep.subr.bf16.mxu1 %v3646_v58  ;;  %v3715_v49 = vld [vmem:[%s5564_s1 + $0x604] ss:$16 sps:$4 sm:$0xff]   ;;  %v3713_v52 = vld [vmem:[%s5564_s1 + $0x600] ss:$16 sps:$4 sm:$0xff]  }
  0x34   :  { %v3718_v53 = vld [vmem:[%s5564_s1 + $0x5e4] ss:$16 sps:$4 sm:$0xff]   ;;  %v3716_v55 = vld [vmem:[%s5564_s1 + $0x5e0] ss:$16 sps:$4 sm:$0xff]  }
  0x35   :  { %2533 = vmatpush2.bf16.msra.mxu0 %v3648_v60  ;;  %v3721_v54 = vld [vmem:[%s5564_s1 + $0x7e4] ss:$16 sps:$4 sm:$0xff]   ;;  %v3719_v56 = vld [vmem:[%s5564_s1 + $0x7e0] ss:$16 sps:$4 sm:$0xff]  }
  0x36   :  { %2574 = vmatpush2.bf16.msra.mxu1 %v3649_v62  ;;  %2534 = vmatprep.subr.bf16.mxu0 %v3650_v63  ;;  %v3724_v57 = vld [vmem:[%s5564_s1 + $0x5c4] ss:$16 sps:$4 sm:$0xff]   ;;  %v3722_v59 = vld [vmem:[%s5564_s1 + $0x5c0] ss:$16 sps:$4 sm:$0xff]  }
  0x37   :  { %2575 = vmatprep.subr.bf16.mxu1 %v3652_v0  ;;  %v3727_v58 = vld [vmem:[%s5564_s1 + $0x7c4] ss:$16 sps:$4 sm:$0xff]   ;;  %v3725_v60 = vld [vmem:[%s5564_s1 + $0x7c0] ss:$16 sps:$4 sm:$0xff]  }
  0x38   :  { %v3730_v62 = vld [vmem:[%s5564_s1 + $0x5a4] ss:$16 sps:$4 sm:$0xff]   ;;  %v3728_v0 = vld [vmem:[%s5564_s1 + $0x5a0] ss:$16 sps:$4 sm:$0xff]  }
  0x39   :  { %2535 = vmatpush2.bf16.msra.mxu0 %v3654_v3  ;;  %v3733_v63 = vld [vmem:[%s5564_s1 + $0x7a4] ss:$16 sps:$4 sm:$0xff]   ;;  %v3731_v2 = vld [vmem:[%s5564_s1 + $0x7a0] ss:$16 sps:$4 sm:$0xff]  }
  0x3a   :  { %2576 = vmatpush2.bf16.msra.mxu1 %v3655_v4  ;;  %2536 = vmatprep.subr.bf16.mxu0 %v3656_v5  ;;  %v3736_v3 = vld [vmem:[%s5564_s1 + $0x584] ss:$16 sps:$4 sm:$0xff]   ;;  %v3734_v5 = vld [vmem:[%s5564_s1 + $0x580] ss:$16 sps:$4 sm:$0xff]  }
  0x3b   :  { %2577 = vmatprep.subr.bf16.mxu1 %v3658_v6  ;;  %v3739_v4 = vld [vmem:[%s5564_s1 + $0x784] ss:$16 sps:$4 sm:$0xff]   ;;  %v3737_v6 = vld [vmem:[%s5564_s1 + $0x780] ss:$16 sps:$4 sm:$0xff]  }
  0x3c   :  { %v3748_v12 = vld [vmem:[%s5564_s1 + $0x544] ss:$16 sps:$4 sm:$0xff]  }
  0x3d   :  { %2537 = vmatpush2.bf16.msra.mxu0 %v3660_v8  ;;  %v3742_v8 = vld [vmem:[%s5564_s1 + $0x564] ss:$16 sps:$4 sm:$0xff]  }
  0x3e   :  { %2578 = vmatpush2.bf16.msra.mxu1 %v3661_v9  ;;  %2538 = vmatprep.subr.bf16.mxu0 %v3662_v10  ;;  %v3745_v9 = vld [vmem:[%s5564_s1 + $0x764] ss:$16 sps:$4 sm:$0xff]   ;;  %v3740_v10 = vld [vmem:[%s5564_s1 + $0x560] ss:$16 sps:$4 sm:$0xff]  }
  0x3f   :  { %2579 = vmatprep.subr.bf16.mxu1 %v3664_v11  ;;  %v3743_v11 = vld [vmem:[%s5564_s1 + $0x760] ss:$16 sps:$4 sm:$0xff]  }
  0x41   :  { %2539 = vmatpush2.bf16.msra.mxu0 %v3666_v13  ;;  %v3751_v13 = vld [vmem:[%s5564_s1 + $0x744] ss:$16 sps:$4 sm:$0xff]  }
  0x42   :  { %2580 = vmatpush2.bf16.msra.mxu1 %v3667_v15  ;;  %2590 = vmatprep.subr.bf16.mxu0 %v3670_v16  ;;  %v3746_v15 = vld [vmem:[%s5564_s1 + $0x540] ss:$16 sps:$4 sm:$0xff]  }
  0x43   :  { %2631 = vmatprep.subr.bf16.mxu1 %v3673_v17  ;;  %v3749_v16 = vld [vmem:[%s5564_s1 + $0x740] ss:$16 sps:$4 sm:$0xff]   ;;  %v3754_v17 = vld [vmem:[%s5564_s1 + $0x524] ss:$16 sps:$4 sm:$0xff]  }
  0x44   :  { %2541 = vmatmul.mubr.bf16.vlgmr.msra.gmra.mxu0 %v4439_v14 }
  0x45   :  { %2582 = vmatmul.mubr.bf16.vlgmr.msra.gmra.mxu1 %v4455_v19  ;;  %2591 = vmatpush1.bf16.msra.mxu0 %v3668_v20  ;;  %v3757_v20 = vld [vmem:[%s5564_s1 + $0x724] ss:$16 sps:$4 sm:$0xff]  }
  0x46   :  { %2632 = vmatpush1.bf16.msra.mxu1 %v3671_v21  ;;  %2592 = vmatprep.subr.bf16.mxu0 %v3676_v22  ;;  %v3752_v21 = vld [vmem:[%s5564_s1 + $0x520] ss:$16 sps:$4 sm:$0xff]  }
  0x47   :  { %2633 = vmatprep.subr.bf16.mxu1 %v3679_v23  ;;  %2622 = vmatprep.mubr.bf16.mxu0 %v4451_v18  ;;  %v3755_v22 = vld [vmem:[%s5564_s1 + $0x720] ss:$16 sps:$4 sm:$0xff]   ;;  %v3760_v23 = vld [vmem:[%s5564_s1 + $0x504] ss:$16 sps:$4 sm:$0xff]  }
  0x48   :  { %2663 = vmatprep.mubr.bf16.mxu1 %v4471_v24 }
  0x49   :  { %2593 = vmatpush1.bf16.msra.mxu0 %v3674_v25  ;;  %v3763_v25 = vld [vmem:[%s5564_s1 + $0x704] ss:$16 sps:$4 sm:$0xff]  }
  0x4a   :  { %2634 = vmatpush1.bf16.msra.mxu1 %v3677_v26  ;;  %2594 = vmatprep.subr.bf16.mxu0 %v3682_v27  ;;  %v3758_v26 = vld [vmem:[%s5564_s1 + $0x500] ss:$16 sps:$4 sm:$0xff]   ;;  %v4650_v27 = vrot.slane %v4419_v7, %v4361_v50 }
  0x4b   :  { %2635 = vmatprep.subr.bf16.mxu1 %v3685_v28  ;;  %v3761_v28 = vld [vmem:[%s5564_s1 + $0x700] ss:$16 sps:$4 sm:$0xff]  }
  0x4c   :  { %v4663_v7 = vcombine.high %v4650_v27, %v4650_v27 }
  0x4d   :  { %2595 = vmatpush1.bf16.msra.mxu0 %v3680_v29  ;;  %v3767_v29 = vld [vmem:[%s5564_s1 + $0x8e4] ss:$16 sps:$4 sm:$0xff]  }
  0x4e   :  { %2636 = vmatpush1.bf16.msra.mxu1 %v3683_v30  ;;  %2596 = vmatprep.subr.bf16.mxu0 %v3688_v31  ;;  %v3770_v30 = vld [vmem:[%s5564_s1 + $0xae4] ss:$16 sps:$4 sm:$0xff]   ;;  %v3765_v31 = vld [vmem:[%s5564_s1 + $0x8e0] ss:$16 sps:$4 sm:$0xff]  }
  0x4f   :  { %2637 = vmatprep.subr.bf16.mxu1 %v3691_v32  ;;  %v3768_v32 = vld [vmem:[%s5564_s1 + $0xae0] ss:$16 sps:$4 sm:$0xff]  }
  0x51   :  { %2597 = vmatpush1.bf16.msra.mxu0 %v3686_v33  ;;  %v4674_v33 = vld [vmem:[%s5563_s0 + $0x8] sm:$0x1f] }
  0x52   :  { %2638 = vmatpush1.bf16.msra.mxu1 %v3689_v34  ;;  %2598 = vmatprep.subr.bf16.mxu0 %v3694_v35  ;;  %v3773_v34 = vld [vmem:[%s5564_s1 + $0x8c4] ss:$16 sps:$4 sm:$0xff]  }
  0x53   :  { %2639 = vmatprep.subr.bf16.mxu1 %v3697_v36  ;;  %v3776_v35 = vld [vmem:[%s5564_s1 + $0xac4] ss:$16 sps:$4 sm:$0xff]   ;;  %v4684_v36 = vrot.slane %v4674_v33, %v4361_v50 }
  0x55   :  { %2599 = vmatpush1.bf16.msra.mxu0 %v3692_v37  ;;  %v508_v37 = vcombine.high %v4684_v36, %v4684_v36 }
  0x56   :  { %2640 = vmatpush1.bf16.msra.mxu1 %v3695_v38  ;;  %2600 = vmatprep.subr.bf16.mxu0 %v3700_v39  ;;  %v3771_v38 = vld [vmem:[%s5564_s1 + $0x8c0] ss:$16 sps:$4 sm:$0xff]  }
  0x57   :  { %2641 = vmatprep.subr.bf16.mxu1 %v3703_v40  ;;  %v3774_v39 = vld [vmem:[%s5564_s1 + $0xac0] ss:$16 sps:$4 sm:$0xff]   ;;  %v3779_v40 = vld [vmem:[%s5564_s1 + $0x8a4] ss:$16 sps:$4 sm:$0xff]  }
  0x59   :  { %2601 = vmatpush1.bf16.msra.mxu0 %v3698_v41  ;;  %v3782_v41 = vld [vmem:[%s5564_s1 + $0xaa4] ss:$16 sps:$4 sm:$0xff]  }
  0x5a   :  { %2642 = vmatpush1.bf16.msra.mxu1 %v3701_v42  ;;  %2602 = vmatprep.subr.bf16.mxu0 %v3706_v44  ;;  %v4703_v42 = vrot.slane %v508_v37, %v4361_v50  ;;  %v3846_v37 = vld [vmem:[%s5564_s1 + $0xb40] ss:$16 sps:$4 sm:$0xff]  }
  0x5b   :  { %2643 = vmatprep.subr.bf16.mxu1 %v3709_v45  ;;  %v3777_v45 = vld [vmem:[%s5564_s1 + $0x8a0] ss:$16 sps:$4 sm:$0xff]  }
  0x5c   :  { %v4708_v44 = vcombine.high %v4703_v42, %v4703_v42 }
  0x5d   :  { %2603 = vmatpush1.bf16.msra.mxu0 %v3704_v46  ;;  %v3780_v46 = vld [vmem:[%s5564_s1 + $0xaa0] ss:$16 sps:$4 sm:$0xff]  }
  0x5e   :  { %2644 = vmatpush1.bf16.msra.mxu1 %v3707_v47  ;;  %2604 = vmatprep.subr.bf16.mxu0 %v3712_v48  ;;  %v3785_v47 = vld [vmem:[%s5564_s1 + $0x884] ss:$16 sps:$4 sm:$0xff]  }
  0x5f   :  { %2645 = vmatprep.subr.bf16.mxu1 %v3715_v49  ;;  %v3788_v48 = vld [vmem:[%s5564_s1 + $0xa84] ss:$16 sps:$4 sm:$0xff]   ;;  %v3783_v49 = vld [vmem:[%s5564_s1 + $0x880] ss:$16 sps:$4 sm:$0xff]  }
  0x61   :  { %2605 = vmatpush1.bf16.msra.mxu0 %v3710_v51  ;;  %v3786_v51 = vld [vmem:[%s5564_s1 + $0xa80] ss:$16 sps:$4 sm:$0xff]  }
  0x62   :  { %2646 = vmatpush1.bf16.msra.mxu1 %v3713_v52  ;;  %2606 = vmatprep.subr.bf16.mxu0 %v3718_v53  ;;  %v3791_v52 = vld [vmem:[%s5564_s1 + $0x864] ss:$16 sps:$4 sm:$0xff]  }
  0x63   :  { %2647 = vmatprep.subr.bf16.mxu1 %v3721_v54  ;;  %v3794_v53 = vld [vmem:[%s5564_s1 + $0xa64] ss:$16 sps:$4 sm:$0xff]   ;;  %v3789_v54 = vld [vmem:[%s5564_s1 + $0x860] ss:$16 sps:$4 sm:$0xff]  }
  0x65   :  { %2607 = vmatpush2.bf16.msra.mxu0 %v3716_v55  ;;  %v3792_v55 = vld [vmem:[%s5564_s1 + $0xa60] ss:$16 sps:$4 sm:$0xff]  }
  0x66   :  { %2648 = vmatpush2.bf16.msra.mxu1 %v3719_v56  ;;  %2608 = vmatprep.subr.bf16.mxu0 %v3724_v57  ;;  %v3797_v56 = vld [vmem:[%s5564_s1 + $0x844] ss:$16 sps:$4 sm:$0xff]  }
  0x67   :  { %2649 = vmatprep.subr.bf16.mxu1 %v3727_v58  ;;  %v3800_v57 = vld [vmem:[%s5564_s1 + $0xa44] ss:$16 sps:$4 sm:$0xff]   ;;  %v3795_v58 = vld [vmem:[%s5564_s1 + $0x840] ss:$16 sps:$4 sm:$0xff]  }
  0x69   :  { %2609 = vmatpush2.bf16.msra.mxu0 %v3722_v59  ;;  %v3798_v59 = vld [vmem:[%s5564_s1 + $0xa40] ss:$16 sps:$4 sm:$0xff]  }
  0x6a   :  { %2650 = vmatpush2.bf16.msra.mxu1 %v3725_v60  ;;  %2610 = vmatprep.subr.bf16.mxu0 %v3730_v62  ;;  %v3803_v60 = vld [vmem:[%s5564_s1 + $0x824] ss:$16 sps:$4 sm:$0xff]  }
  0x6b   :  { %2651 = vmatprep.subr.bf16.mxu1 %v3733_v63  ;;  %v3806_v62 = vld [vmem:[%s5564_s1 + $0xa24] ss:$16 sps:$4 sm:$0xff]   ;;  %v3801_v63 = vld [vmem:[%s5564_s1 + $0x820] ss:$16 sps:$4 sm:$0xff]  }
  0x6d   :  { %2611 = vmatpush2.bf16.msra.mxu0 %v3728_v0  ;;  %v3804_v0 = vld [vmem:[%s5564_s1 + $0xa20] ss:$16 sps:$4 sm:$0xff]  }
  0x6e   :  { %2652 = vmatpush2.bf16.msra.mxu1 %v3731_v2  ;;  %2612 = vmatprep.subr.bf16.mxu0 %v3736_v3  ;;  %v3809_v2 = vld [vmem:[%s5564_s1 + $0x804] ss:$16 sps:$4 sm:$0xff]  }
  0x6f   :  { %2653 = vmatprep.subr.bf16.mxu1 %v3739_v4  ;;  %v3812_v3 = vld [vmem:[%s5564_s1 + $0xa04] ss:$16 sps:$4 sm:$0xff]   ;;  %v3807_v4 = vld [vmem:[%s5564_s1 + $0x800] ss:$16 sps:$4 sm:$0xff]  }
  0x71   :  { %2613 = vmatpush2.bf16.msra.mxu0 %v3734_v5  ;;  %v3810_v5 = vld [vmem:[%s5564_s1 + $0xa00] ss:$16 sps:$4 sm:$0xff]  }
  0x72   :  { %2654 = vmatpush2.bf16.msra.mxu1 %v3737_v6  ;;  %2614 = vmatprep.subr.bf16.mxu0 %v3742_v8  ;;  %v3815_v6 = vld [vmem:[%s5564_s1 + $0x9e4] ss:$16 sps:$4 sm:$0xff]  }
  0x73   :  { %2655 = vmatprep.subr.bf16.mxu1 %v3745_v9  ;;  %v3818_v8 = vld [vmem:[%s5564_s1 + $0xbe4] ss:$16 sps:$4 sm:$0xff]   ;;  %v3813_v9 = vld [vmem:[%s5564_s1 + $0x9e0] ss:$16 sps:$4 sm:$0xff]  }
  0x75   :  { %2615 = vmatpush2.bf16.msra.mxu0 %v3740_v10  ;;  %v3816_v10 = vld [vmem:[%s5564_s1 + $0xbe0] ss:$16 sps:$4 sm:$0xff]  }
  0x76   :  { %2656 = vmatpush2.bf16.msra.mxu1 %v3743_v11  ;;  %2616 = vmatprep.subr.bf16.mxu0 %v3748_v12  ;;  %v3821_v11 = vld [vmem:[%s5564_s1 + $0x9c4] ss:$16 sps:$4 sm:$0xff]  }
  0x77   :  { %2657 = vmatprep.subr.bf16.mxu1 %v3751_v13  ;;  %v3824_v12 = vld [vmem:[%s5564_s1 + $0xbc4] ss:$16 sps:$4 sm:$0xff]   ;;  %v3819_v13 = vld [vmem:[%s5564_s1 + $0x9c0] ss:$16 sps:$4 sm:$0xff]  }
  0x79   :  { %2617 = vmatpush2.bf16.msra.mxu0 %v3746_v15  ;;  %v3822_v15 = vld [vmem:[%s5564_s1 + $0xbc0] ss:$16 sps:$4 sm:$0xff]  }
  0x7a   :  { %2658 = vmatpush2.bf16.msra.mxu1 %v3749_v16  ;;  %2618 = vmatprep.subr.bf16.mxu0 %v3754_v17  ;;  %v3827_v16 = vld [vmem:[%s5564_s1 + $0x9a4] ss:$16 sps:$4 sm:$0xff]  }
  0x7b   :  { %2659 = vmatprep.subr.bf16.mxu1 %v3757_v20  ;;  %v3830_v17 = vld [vmem:[%s5564_s1 + $0xba4] ss:$16 sps:$4 sm:$0xff]   ;;  %v3825_v20 = vld [vmem:[%s5564_s1 + $0x9a0] ss:$16 sps:$4 sm:$0xff]  }
  0x7d   :  { %2619 = vmatpush2.bf16.msra.mxu0 %v3752_v21  ;;  %v3828_v21 = vld [vmem:[%s5564_s1 + $0xba0] ss:$16 sps:$4 sm:$0xff]  }
  0x7e   :  { %2660 = vmatpush2.bf16.msra.mxu1 %v3755_v22  ;;  %2620 = vmatprep.subr.bf16.mxu0 %v3760_v23  ;;  %v3833_v22 = vld [vmem:[%s5564_s1 + $0x984] ss:$16 sps:$4 sm:$0xff]  }
  0x7f   :  { %2661 = vmatprep.subr.bf16.mxu1 %v3763_v25  ;;  %v3836_v23 = vld [vmem:[%s5564_s1 + $0xb84] ss:$16 sps:$4 sm:$0xff]   ;;  %v3831_v25 = vld [vmem:[%s5564_s1 + $0x980] ss:$16 sps:$4 sm:$0xff]  }
  0x81   :  { %2621 = vmatpush2.bf16.msra.mxu0 %v3758_v26  ;;  %v3834_v26 = vld [vmem:[%s5564_s1 + $0xb80] ss:$16 sps:$4 sm:$0xff]  }
  0x82   :  { %2662 = vmatpush2.bf16.msra.mxu1 %v3761_v28  ;;  %2672 = vmatprep.subr.bf16.mxu0 %v3767_v29  ;;  %v3839_v28 = vld [vmem:[%s5564_s1 + $0x964] ss:$16 sps:$4 sm:$0xff]  }
  0x83   :  { %2713 = vmatprep.subr.bf16.mxu1 %v3770_v30  ;;  %v3842_v29 = vld [vmem:[%s5564_s1 + $0xb64] ss:$16 sps:$4 sm:$0xff]   ;;  %v3837_v30 = vld [vmem:[%s5564_s1 + $0x960] ss:$16 sps:$4 sm:$0xff]  }
  0x84   :  { %2623 = vmatmul.mubr.bf16.vlgmr.msra.gmra.mxu0 %v4650_v27 }
  0x85   :  { %2664 = vmatmul.mubr.bf16.vlgmr.msra.gmra.mxu1 %v4663_v7  ;;  %2673 = vmatpush1.bf16.msra.mxu0 %v3765_v31  ;;  %v3840_v31 = vld [vmem:[%s5564_s1 + $0xb60] ss:$16 sps:$4 sm:$0xff]  }
  0x86   :  { %2714 = vmatpush1.bf16.msra.mxu1 %v3768_v32  ;;  %2674 = vmatprep.subr.bf16.mxu0 %v3773_v34  ;;  %v3845_v32 = vld [vmem:[%s5564_s1 + $0x944] ss:$16 sps:$4 sm:$0xff]  }
  0x87   :  { %2715 = vmatprep.subr.bf16.mxu1 %v3776_v35  ;;  %2704 = vmatprep.mubr.bf16.mxu0 %v4703_v42  ;;  %v3848_v34 = vld [vmem:[%s5564_s1 + $0xb44] ss:$16 sps:$4 sm:$0xff]   ;;  %v3843_v35 = vld [vmem:[%s5564_s1 + $0x940] ss:$16 sps:$4 sm:$0xff]  }
  0x88   :  { %2745 = vmatprep.mubr.bf16.mxu1 %v4708_v44 }
  0x89   :  { %2675 = vmatpush1.bf16.msra.mxu0 %v3771_v38  ;;  %v3851_v38 = vld [vmem:[%s5564_s1 + $0x924] ss:$16 sps:$4 sm:$0xff]  }
  0x8a   :  { %2716 = vmatpush1.bf16.msra.mxu1 %v3774_v39  ;;  %2676 = vmatprep.subr.bf16.mxu0 %v3779_v40  ;;  %v3854_v39 = vld [vmem:[%s5564_s1 + $0xb24] ss:$16 sps:$4 sm:$0xff]   ;;  %v3849_v40 = vld [vmem:[%s5564_s1 + $0x920] ss:$16 sps:$4 sm:$0xff]  }
  0x8b   :  { %2717 = vmatprep.subr.bf16.mxu1 %v3782_v41  ;;  %v3852_v41 = vld [vmem:[%s5564_s1 + $0xb20] ss:$16 sps:$4 sm:$0xff]  }
  0x8d   :  { %2677 = vmatpush1.bf16.msra.mxu0 %v3777_v45  ;;  %v3857_v45 = vld [vmem:[%s5564_s1 + $0x904] ss:$16 sps:$4 sm:$0xff]  }
  0x8e   :  { %2718 = vmatpush1.bf16.msra.mxu1 %v3780_v46  ;;  %2678 = vmatprep.subr.bf16.mxu0 %v3785_v47  ;;  %v3860_v46 = vld [vmem:[%s5564_s1 + $0xb04] ss:$16 sps:$4 sm:$0xff]   ;;  %v3855_v47 = vld [vmem:[%s5564_s1 + $0x900] ss:$16 sps:$4 sm:$0xff]  }
  0x8f   :  { %2719 = vmatprep.subr.bf16.mxu1 %v3788_v48  ;;  %v4872_v48 = vrot.slane %v4684_v36, %v4361_v50  ;;  %v493_v36 = vcombine.high %v4674_v33, %v4674_v33  ;;  %v3873_v33 = vld [vmem:[%s5564_s1 + $0xcc] ss:$16 sps:$4 sm:$0xff]  }
  0x91   :  { %2679 = vmatpush1.bf16.msra.mxu0 %v3783_v49  ;;  %v3858_v49 = vld [vmem:[%s5564_s1 + $0xb00] ss:$16 sps:$4 sm:$0xff]  }
  0x92   :  { %2720 = vmatpush1.bf16.msra.mxu1 %v3786_v51  ;;  %2680 = vmatprep.subr.bf16.mxu0 %v3791_v52  ;;  %v3864_v51 = vld [vmem:[%s5564_s1 + $0xc24] ss:$16 sps:$4 sm:$0xff]   ;;  %v3867_v52 = vld [vmem:[%s5564_s1 + $0xec] ss:$16 sps:$4 sm:$0xff]  }
  0x93   :  { %2721 = vmatprep.subr.bf16.mxu1 %v3794_v53  ;;  %v4887_v53 = vcombine.high %v4872_v48, %v4872_v48 }
  0x95   :  { %2681 = vmatpush1.bf16.msra.mxu0 %v3789_v54  ;;  %v3862_v54 = vld [vmem:[%s5564_s1 + $0xc20] ss:$16 sps:$4 sm:$0xff]  }
  0x96   :  { %2722 = vmatpush1.bf16.msra.mxu1 %v3792_v55  ;;  %2682 = vmatprep.subr.bf16.mxu0 %v3797_v56  ;;  %v3865_v55 = vld [vmem:[%s5564_s1 + $0xe8] ss:$16 sps:$4 sm:$0xff]   ;;  %v3870_v56 = vld [vmem:[%s5564_s1 + $0xc04] ss:$16 sps:$4 sm:$0xff]  }
  0x97   :  { %2723 = vmatprep.subr.bf16.mxu1 %v3800_v57  ;;  %v507_v57 = vrot.slane %v493_v36, %v4361_v50  ;;  %v3937_v36 = vld [vmem:[%s5564_s1 + $0x3a8] ss:$16 sps:$4 sm:$0xff]  }
  0x99   :  { %2683 = vmatpush1.bf16.msra.mxu0 %v3795_v58  ;;  %v3868_v58 = vld [vmem:[%s5564_s1 + $0xc00] ss:$16 sps:$4 sm:$0xff]  }
  0x9a   :  { %2724 = vmatpush1.bf16.msra.mxu1 %v3798_v59  ;;  %2684 = vmatprep.subr.bf16.mxu0 %v3803_v60  ;;  %v3871_v59 = vld [vmem:[%s5564_s1 + $0xc8] ss:$16 sps:$4 sm:$0xff]   ;;  %v3876_v60 = vld [vmem:[%s5564_s1 + $0xac] ss:$16 sps:$4 sm:$0xff]  }
  0x9b   :  { %2725 = vmatprep.subr.bf16.mxu1 %v3806_v62  ;;  %v3879_v62 = vld [vmem:[%s5564_s1 + $0x2ec] ss:$16 sps:$4 sm:$0xff]  }
  0x9d   :  { %2685 = vmatpush1.bf16.msra.mxu0 %v3801_v63  ;;  %v4185_v63 = vmov 0  }
  0x9e   :  { %2726 = vmatpush1.bf16.msra.mxu1 %v3804_v0  ;;  %2686 = vmatprep.subr.bf16.mxu0 %v3809_v2  ;;  %v4919_v0 = vrot.slane %v507_v57, %v4361_v50  ;;  %v3874_v2 = vld [vmem:[%s5564_s1 + $0xa8] ss:$16 sps:$4 sm:$0xff]   ;;  %v3885_v50 = vld [vmem:[%s5564_s1 + $0x2cc] ss:$16 sps:$4 sm:$0xff]  }
  0x9f   :  { %2727 = vmatprep.subr.bf16.mxu1 %v3812_v3  ;;  %v3877_v3 = vld [vmem:[%s5564_s1 + $0x2e8] ss:$16 sps:$4 sm:$0xff]   ;;  %v3948_v57 = vld [vmem:[%s5564_s1 + $0x12c] ss:$16 sps:$4 sm:$0xff]  }
  0xa1   :  { %2687 = vmatpush1.bf16.msra.mxu0 %v3807_v4  ;;  %v3882_v4 = vld [vmem:[%s5564_s1 + $0x8c] ss:$16 sps:$4 sm:$0xff]  }
  0xa2   :  { %2728 = vmatpush1.bf16.msra.mxu1 %v3810_v5  ;;  %2688 = vmatprep.subr.bf16.mxu0 %v3815_v6  ;;  %v3883_v5 = vld [vmem:[%s5564_s1 + $0x2c8] ss:$16 sps:$4 sm:$0xff]   ;;  %v3888_v6 = vld [vmem:[%s5564_s1 + $0x6c] ss:$16 sps:$4 sm:$0xff]  }
  0xa3   :  { %2729 = vmatprep.subr.bf16.mxu1 %v3818_v8  ;;  %v3891_v8 = vld [vmem:[%s5564_s1 + $0x2ac] ss:$16 sps:$4 sm:$0xff]  }
  0xa5   :  { %2689 = vmatpush2.bf16.msra.mxu0 %v3813_v9  ;;  %v3886_v9 = vld [vmem:[%s5564_s1 + $0x68] ss:$16 sps:$4 sm:$0xff]  }
  0xa6   :  { %2730 = vmatpush2.bf16.msra.mxu1 %v3816_v10  ;;  %2690 = vmatprep.subr.bf16.mxu0 %v3821_v11  ;;  %v3889_v10 = vld [vmem:[%s5564_s1 + $0x2a8] ss:$16 sps:$4 sm:$0xff]   ;;  %v3894_v11 = vld [vmem:[%s5564_s1 + $0x4c] ss:$16 sps:$4 sm:$0xff]  }
  0xa7   :  { %2731 = vmatprep.subr.bf16.mxu1 %v3824_v12  ;;  %v3892_v12 = vld [vmem:[%s5564_s1 + $0x48] ss:$16 sps:$4 sm:$0xff]  }
  0xa9   :  { %2691 = vmatpush2.bf16.msra.mxu0 %v3819_v13  ;;  %v3895_v13 = vld [vmem:[%s5564_s1 + $0x288] ss:$16 sps:$4 sm:$0xff]  }
  0xaa   :  { %2732 = vmatpush2.bf16.msra.mxu1 %v3822_v15  ;;  %2692 = vmatprep.subr.bf16.mxu0 %v3827_v16  ;;  %v3900_v15 = vld [vmem:[%s5564_s1 + $0x2c] ss:$16 sps:$4 sm:$0xff]  }
  0xab   :  { %2733 = vmatprep.subr.bf16.mxu1 %v3830_v17  ;;  %v3903_v16 = vld [vmem:[%s5564_s1 + $0x26c] ss:$16 sps:$4 sm:$0xff]   ;;  %v3898_v17 = vld [vmem:[%s5564_s1 + $0x28] ss:$16 sps:$4 sm:$0xff]  }
  0xad   :  { %2693 = vmatpush2.bf16.msra.mxu0 %v3825_v20  ;;  %v3901_v20 = vld [vmem:[%s5564_s1 + $0x268] ss:$16 sps:$4 sm:$0xff]  }
  0xae   :  { %2734 = vmatpush2.bf16.msra.mxu1 %v3828_v21  ;;  %2694 = vmatprep.subr.bf16.mxu0 %v3833_v22  ;;  %v3906_v21 = vld [vmem:[%s5564_s1 + $0xc] ss:$16 sps:$4 sm:$0xff]  }
  0xaf   :  { %2735 = vmatprep.subr.bf16.mxu1 %v3836_v23  ;;  %v3909_v22 = vld [vmem:[%s5564_s1 + $0x24c] ss:$16 sps:$4 sm:$0xff]   ;;  %v3904_v23 = vld [vmem:[%s5564_s1 + $0x8] ss:$16 sps:$4 sm:$0xff]  }
  0xb1   :  { %2695 = vmatpush2.bf16.msra.mxu0 %v3831_v25  ;;  %v3907_v25 = vld [vmem:[%s5564_s1 + $0x248] ss:$16 sps:$4 sm:$0xff]  }
  0xb2   :  { %2736 = vmatpush2.bf16.msra.mxu1 %v3834_v26  ;;  %2696 = vmatprep.subr.bf16.mxu0 %v3839_v28  ;;  %v3912_v26 = vld [vmem:[%s5564_s1 + $0x1ec] ss:$16 sps:$4 sm:$0xff]  }
  0xb3   :  { %2737 = vmatprep.subr.bf16.mxu1 %v3842_v29  ;;  %v3915_v28 = vld [vmem:[%s5564_s1 + $0x22c] ss:$16 sps:$4 sm:$0xff]   ;;  %v3910_v29 = vld [vmem:[%s5564_s1 + $0x1e8] ss:$16 sps:$4 sm:$0xff]  }
  0xb5   :  { %2697 = vmatpush2.bf16.msra.mxu0 %v3837_v30  ;;  %v3913_v30 = vld [vmem:[%s5564_s1 + $0x228] ss:$16 sps:$4 sm:$0xff]  }
  0xb6   :  { %2738 = vmatpush2.bf16.msra.mxu1 %v3840_v31  ;;  %2698 = vmatprep.subr.bf16.mxu0 %v3845_v32  ;;  %v3918_v31 = vld [vmem:[%s5564_s1 + $0x1cc] ss:$16 sps:$4 sm:$0xff]  }
  0xb7   :  { %2739 = vmatprep.subr.bf16.mxu1 %v3848_v34  ;;  %v3921_v32 = vld [vmem:[%s5564_s1 + $0x20c] ss:$16 sps:$4 sm:$0xff]   ;;  %v3916_v34 = vld [vmem:[%s5564_s1 + $0x1c8] ss:$16 sps:$4 sm:$0xff]  }
  0xb9   :  { %2699 = vmatpush2.bf16.msra.mxu0 %v3843_v35  ;;  %v3919_v35 = vld [vmem:[%s5564_s1 + $0x208] ss:$16 sps:$4 sm:$0xff]  }
  0xba   :  { %2740 = vmatpush2.bf16.msra.mxu1 %v3846_v37  ;;  %2700 = vmatprep.subr.bf16.mxu0 %v3851_v38  ;;  %v3924_v37 = vld [vmem:[%s5564_s1 + $0x1ac] ss:$16 sps:$4 sm:$0xff]  }
  0xbb   :  { %2741 = vmatprep.subr.bf16.mxu1 %v3854_v39  ;;  %v3927_v38 = vld [vmem:[%s5564_s1 + $0x3ec] ss:$16 sps:$4 sm:$0xff]   ;;  %v3922_v39 = vld [vmem:[%s5564_s1 + $0x1a8] ss:$16 sps:$4 sm:$0xff]  }
  0xbd   :  { %2701 = vmatpush2.bf16.msra.mxu0 %v3849_v40  ;;  %v3925_v40 = vld [vmem:[%s5564_s1 + $0x3e8] ss:$16 sps:$4 sm:$0xff]  }
  0xbe   :  { %2742 = vmatpush2.bf16.msra.mxu1 %v3852_v41  ;;  %2702 = vmatprep.subr.bf16.mxu0 %v3857_v45  ;;  %v3930_v41 = vld [vmem:[%s5564_s1 + $0x18c] ss:$16 sps:$4 sm:$0xff]  }
  0xbf   :  { %2743 = vmatprep.subr.bf16.mxu1 %v3860_v46  ;;  %v3933_v45 = vld [vmem:[%s5564_s1 + $0x3cc] ss:$16 sps:$4 sm:$0xff]   ;;  %v3928_v46 = vld [vmem:[%s5564_s1 + $0x188] ss:$16 sps:$4 sm:$0xff]  }
  0xc1   :  { %2703 = vmatpush2.bf16.msra.mxu0 %v3855_v47  ;;  %v3931_v47 = vld [vmem:[%s5564_s1 + $0x3c8] ss:$16 sps:$4 sm:$0xff]  }
  0xc2   :  { %2744 = vmatpush2.bf16.msra.mxu1 %v3858_v49  ;;  %2766 = vmatprep.subr.bf16.mxu0 %v3864_v51  ;;  %v3936_v49 = vld [vmem:[%s5564_s1 + $0x16c] ss:$16 sps:$4 sm:$0xff]  }
  0xc3   :  { %2795 = vmatprep.subr.bf16.mxu1 %v3867_v52  ;;  %v3939_v51 = vld [vmem:[%s5564_s1 + $0x3ac] ss:$16 sps:$4 sm:$0xff]   ;;  %v3934_v52 = vld [vmem:[%s5564_s1 + $0x168] ss:$16 sps:$4 sm:$0xff]  }
  0xc4   :  { %2705 = vmatmul.mubr.bf16.vlgmr.msra.gmra.mxu0 %v4872_v48 }
  0xc5   :  { %2746 = vmatmul.mubr.bf16.vlgmr.msra.gmra.mxu1 %v4887_v53  ;;  %2767 = vmatpush1.bf16.msra.mxu0 %v3862_v54  ;;  %v3942_v54 = vld [vmem:[%s5564_s1 + $0x14c] ss:$16 sps:$4 sm:$0xff]  }
  0xc6   :  { %2796 = vmatpush1.bf16.msra.mxu1 %v3865_v55  ;;  %2768 = vmatprep.subr.bf16.mxu0 %v3870_v56  ;;  %v3945_v55 = vld [vmem:[%s5564_s1 + $0x38c] ss:$16 sps:$4 sm:$0xff]   ;;  %v3940_v56 = vld [vmem:[%s5564_s1 + $0x148] ss:$16 sps:$4 sm:$0xff]  }
  0xc7   :  { %2797 = vmatprep.subr.bf16.mxu1 %v3873_v33  ;;  %2786 = vmatprep.mubr.bf16.mxu0 %v4185_v63  ;;  %v3943_v33 = vld [vmem:[%s5564_s1 + $0x388] ss:$16 sps:$4 sm:$0xff]  }
  0xc8   :  { %2827 = vmatprep.mubr.bf16.mxu1 %v4389_v61  ;;  %v3880_v61 = vld [vmem:[%s5564_s1 + $0x88] ss:$16 sps:$4 sm:$0xff]  }
  0xc9   :  { %2769 = vmatpush1.bf16.msra.mxu0 %v3868_v58  ;;  %v3951_v58 = vld [vmem:[%s5564_s1 + $0x36c] ss:$16 sps:$4 sm:$0xff]  }
  0xca   :  { %2798 = vmatpush1.bf16.msra.mxu1 %v3871_v59  ;;  %2836 = vmatprep.subr.bf16.mxu0 %v3879_v62  ;;  %v3946_v59 = vld [vmem:[%s5564_s1 + $0x128] ss:$16 sps:$4 sm:$0xff]   ;;  %v3954_v62 = vld [vmem:[%s5564_s1 + $0x10c] ss:$16 sps:$4 sm:$0xff]  }
  0xcb   :  { %2799 = vmatprep.subr.bf16.mxu1 %v3876_v60  ;;  %v3949_v60 = vld [vmem:[%s5564_s1 + $0x368] ss:$16 sps:$4 sm:$0xff]  }
  0xcc   :  { %3565 = vmatmul.mubr.msk.bf16.vlgmr.msra.gmra.mxu0 %vm2504_vm0, %v4919_v0 }
  0xcd   :  { %2837 = vmatpush1.bf16.msra.mxu0 %v3877_v3  ;;  %2868 = vmatprep.mubr.bf16.mxu0 %v4402_v1  ;;  %v3897_v1 = vld [vmem:[%s5564_s1 + $0x28c] ss:$16 sps:$4 sm:$0xff]   ;;  %v3952_v3 = vld [vmem:[%s5564_s1 + $0x108] ss:$16 sps:$4 sm:$0xff]  }
  0xce   :  { %2800 = vmatpush1.bf16.msra.mxu1 %v3874_v2  ;;  %2838 = vmatprep.subr.bf16.mxu0 %v3885_v50  ;;  %v3957_v2 = vld [vmem:[%s5564_s1 + $0x34c] ss:$16 sps:$4 sm:$0xff]   ;;  %v5089_v50 = vld [vmem:[%s5565_s2] sm:$0xf] }
  0xcf   :  { %2801 = vmatprep.subr.bf16.mxu1 %v3882_v4  ;;  %v3955_v4 = vld [vmem:[%s5564_s1 + $0x348] ss:$16 sps:$4 sm:$0xff]  }
  0xd1   :  { %2839 = vmatpush1.bf16.msra.mxu0 %v3883_v5  ;;  %v3960_v5 = vld [vmem:[%s5564_s1 + $0x32c] ss:$16 sps:$4 sm:$0xff]  }
  0xd2   :  { %2802 = vmatpush1.bf16.msra.mxu1 %v3880_v61  ;;  %2840 = vmatprep.subr.bf16.mxu0 %v3891_v8  ;;  %v424_v61 = vsub.s32 0, %v4343_v43  ;;  %v428_v8 = vsub.s32 1, %v4343_v43 }
  0xd3   :  { %2803 = vmatprep.subr.bf16.mxu1 %v3888_v6  ;;  %v3963_v6 = vld [vmem:[%s5564_s1 + $0x4ec] ss:$16 sps:$4 sm:$0xff]  }
  0xd5   :  { %2841 = vmatpush1.bf16.msra.mxu0 %v3889_v10  ;;  %v425_v10 = vrot.slane %v5089_v50, %v424_v61 }
  0xd6   :  { %2804 = vmatpush1.bf16.msra.mxu1 %v3886_v9  ;;  %2842 = vmatprep.subr.bf16.mxu0 %v3897_v1  ;;  %v3958_v9 = vld [vmem:[%s5564_s1 + $0x328] ss:$16 sps:$4 sm:$0xff]   ;;  %v3966_v1 = vld [vmem:[%s5564_s1 + $0x30c] ss:$16 sps:$4 sm:$0xff]  }
  0xd7   :  { %2805 = vmatprep.subr.bf16.mxu1 %v3894_v11  ;;  %v3961_v11 = vld [vmem:[%s5564_s1 + $0x4e8] ss:$16 sps:$4 sm:$0xff]  }
  0xd9   :  { %2843 = vmatpush1.bf16.msra.mxu0 %v3895_v13  ;;  %v429_v13 = vrot.slane %v5089_v50, %v428_v8 }
  0xda   :  { %2806 = vmatpush1.bf16.msra.mxu1 %v3892_v12  ;;  %2844 = vmatprep.subr.bf16.mxu0 %v3903_v16  ;;  %v3969_v12 = vld [vmem:[%s5564_s1 + $0x4cc] ss:$16 sps:$4 sm:$0xff]  }
  0xdb   :  { %2807 = vmatprep.subr.bf16.mxu1 %v3900_v15 }
  0xdd   :  { %2845 = vmatpush1.bf16.msra.mxu0 %v3901_v20  ;;  %v3967_v20 = vld [vmem:[%s5564_s1 + $0x4c8] ss:$16 sps:$4 sm:$0xff]  }
  0xde   :  { %2808 = vmatpush1.bf16.msra.mxu1 %v3898_v17  ;;  %2846 = vmatprep.subr.bf16.mxu0 %v3909_v22  ;;  %v3964_v17 = vld [vmem:[%s5564_s1 + $0x308] ss:$16 sps:$4 sm:$0xff]  }
  0xdf   :  { %2809 = vmatprep.subr.bf16.mxu1 %v3906_v21 }
  0xe1   :  { %2847 = vmatpush1.bf16.msra.mxu0 %v3907_v25  ;;  %v3972_v25 = vld [vmem:[%s5564_s1 + $0x4ac] ss:$16 sps:$4 sm:$0xff]  }
  0xe2   :  { %2810 = vmatpush1.bf16.msra.mxu1 %v3904_v23  ;;  %2848 = vmatprep.subr.bf16.mxu0 %v3915_v28 }
  0xe3   :  { %2811 = vmatprep.subr.bf16.mxu1 %v3912_v26 }
  0xe5   :  { %2849 = vmatpush1.bf16.msra.mxu0 %v3913_v30 }
  0xe6   :  { %2812 = vmatpush2.bf16.msra.mxu1 %v3910_v29  ;;  %2850 = vmatprep.subr.bf16.mxu0 %v3921_v32 }
  0xe7   :  { %2813 = vmatprep.subr.bf16.mxu1 %v3918_v31 }
  0xe9   :  { %2851 = vmatpush1.bf16.msra.mxu0 %v3919_v35 }
  0xea   :  { %2814 = vmatpush2.bf16.msra.mxu1 %v3916_v34  ;;  %2852 = vmatprep.subr.bf16.mxu0 %v3927_v38 }
  0xeb   :  { %2815 = vmatprep.subr.bf16.mxu1 %v3924_v37 }
  0xed   :  { %2853 = vmatpush2.bf16.msra.mxu0 %v3925_v40 }
  0xee   :  { %2816 = vmatpush2.bf16.msra.mxu1 %v3922_v39  ;;  %2854 = vmatprep.subr.bf16.mxu0 %v3933_v45 }
  0xef   :  { %2817 = vmatprep.subr.bf16.mxu1 %v3930_v41 }
  0xf1   :  { %2855 = vmatpush2.bf16.msra.mxu0 %v3931_v47 }
  0xf2   :  { %2818 = vmatpush2.bf16.msra.mxu1 %v3928_v46  ;;  %2856 = vmatprep.subr.bf16.mxu0 %v3939_v51 }
  0xf3   :  { %2819 = vmatprep.subr.bf16.mxu1 %v3936_v49 }
  0xf5   :  { %2857 = vmatpush2.bf16.msra.mxu0 %v3937_v36 }
  0xf6   :  { %2820 = vmatpush2.bf16.msra.mxu1 %v3934_v52  ;;  %2858 = vmatprep.subr.bf16.mxu0 %v3945_v55 }
  0xf7   :  { %2821 = vmatprep.subr.bf16.mxu1 %v3942_v54 }
  0xf9   :  { %2859 = vmatpush2.bf16.msra.mxu0 %v3943_v33 }
  0xfa   :  { %2822 = vmatpush2.bf16.msra.mxu1 %v3940_v56  ;;  %2860 = vmatprep.subr.bf16.mxu0 %v3951_v58 }
  0xfb   :  { %2823 = vmatprep.subr.bf16.mxu1 %v3948_v57 }
  0xfd   :  { %2861 = vmatpush2.bf16.msra.mxu0 %v3949_v60 }
  0xfe   :  { %2824 = vmatpush2.bf16.msra.mxu1 %v3946_v59  ;;  %2862 = vmatprep.subr.bf16.mxu0 %v3957_v2 }
  0xff   :  { %2825 = vmatprep.subr.bf16.mxu1 %v3954_v62 }
 0x101   :  { %2863 = vmatpush2.bf16.msra.mxu0 %v3955_v4 }
 0x102   :  { %2826 = vmatpush2.bf16.msra.mxu1 %v3952_v3  ;;  %2864 = vmatprep.subr.bf16.mxu0 %v3960_v5 }
 0x103   :  { %2877 = vmatprep.subr.bf16.mxu1 %v3963_v6 }
 0x104   :  { %v2542_v15 = vpop.f32.mrf.mxu0 }
 0x105   :  { %v2583_v16 = vpop.f32.mrf.mxu1  ;;  %2828 = vmatmul.mubr.bf16.vlgmr.msra.gmra.mxu1 %v4439_v14  ;;  %v2543_v21 = vadd.f32 %v2542_v15, %v425_v10  ;;  %2865 = vmatpush2.bf16.msra.mxu0 %v3958_v9  ;;  %v3975_v14 = vld [vmem:[%s5564_s1 + $0x6ec] ss:$16 sps:$4 sm:$0xff]  }
 0x106   :  { %2878 = vmatpush1.bf16.msra.mxu1 %v3961_v11  ;;  %v2544_v22 = vpop.f32.mrf.mxu0  ;;  %2866 = vmatprep.subr.bf16.mxu0 %v3966_v1 }
 0x107   :  { %v2585_v23 = vpop.f32.mrf.mxu1  ;;  %2879 = vmatprep.subr.bf16.mxu1 %v3969_v12 }
 0x108   :  { %14 = vsyncpa [#allocation4], 0  ;;  %v5130_v26 = vadd.f32 %v2583_v16, %v2543_v21  ;;  %v2545_v28 = vadd.f32 %v2544_v22, %v429_v13  ;;  %2909 = vmatprep.mubr.bf16.mxu1 %v4451_v18  ;;  %v2546_v29 = vpop.f32.mrf.mxu0  ;;  %v3970_v32 = vld [vmem:[%s5564_s1 + $0x4a8] ss:$16 sps:$4 sm:$0xff]   ;;  %v3978_v18 = vld [vmem:[%s5564_s1 + $0x48c] ss:$16 sps:$4 sm:$0xff]  }
 0x109   :  { %v2587_v30 = vpop.f32.mrf.mxu1  ;;  %2867 = vmatpush2.bf16.msra.mxu0 %v3964_v17  ;;  %v3973_v34 = vld [vmem:[%s5564_s1 + $0x6e8] ss:$16 sps:$4 sm:$0xff]   ;;  %v3981_v38 = vld [vmem:[%s5564_s1 + $0x6cc] ss:$16 sps:$4 sm:$0xff]   ;;  %vm3135_vm1 = vcmask 1041408  }
 0x10a   :  { %v5133_v31 = vadd.f32 %v2585_v23, %v2545_v28  ;;  %2880 = vmatpush1.bf16.msra.mxu1 %v3967_v20  ;;  %v2547_v35 = vpop.f32.mrf.mxu0  ;;  %2918 = vmatprep.subr.bf16.mxu0 %v3975_v14  ;;  %v3976_v39 = vld [vmem:[%s5564_s1 + $0x488] ss:$16 sps:$4 sm:$0xff]   ;;  %v3984_v41 = vld [vmem:[%s5564_s1 + $0x46c] ss:$16 sps:$4 sm:$0xff]  }
 0x10b   :  { %v2588_v37 = vpop.f32.mrf.mxu1  ;;  %2881 = vmatprep.subr.bf16.mxu1 %v3972_v25  ;;  %v3979_v40 = vld [vmem:[%s5564_s1 + $0x6c8] ss:$16 sps:$4 sm:$0xff]   ;;  %v3990_v47 = vld [vmem:[%s5564_s1 + $0x44c] ss:$16 sps:$4 sm:$0xff]  }
 0x10c   :  { %2869 = vmatmul.mubr.bf16.vlgmr.msra.gmra.mxu0 %v4455_v19  ;;  %v3987_v19 = vld [vmem:[%s5564_s1 + $0x6ac] ss:$16 sps:$4 sm:$0xff]   ;;  %v3982_v45 = vld [vmem:[%s5564_s1 + $0x468] ss:$16 sps:$4 sm:$0xff]  }
 0x10d   :  { %2919 = vmatpush1.bf16.msra.mxu0 %v3973_v34  ;;  %2950 = vmatprep.mubr.bf16.mxu0 %v4471_v24  ;;  %v3985_v46 = vld [vmem:[%s5564_s1 + $0x6a8] ss:$16 sps:$4 sm:$0xff]   ;;  %v3993_v24 = vld [vmem:[%s5564_s1 + $0x68c] ss:$16 sps:$4 sm:$0xff]  }
 0x10e   :  { %2882 = vmatpush1.bf16.msra.mxu1 %v3970_v32  ;;  %2920 = vmatprep.subr.bf16.mxu0 %v3981_v38  ;;  %v3988_v49 = vld [vmem:[%s5564_s1 + $0x448] ss:$16 sps:$4 sm:$0xff]   ;;  %v3996_v52 = vld [vmem:[%s5564_s1 + $0x42c] ss:$16 sps:$4 sm:$0xff]  }
 0x10f   :  { %2883 = vmatprep.subr.bf16.mxu1 %v3978_v18  ;;  %v3991_v51 = vld [vmem:[%s5564_s1 + $0x688] ss:$16 sps:$4 sm:$0xff]   ;;  %v3999_v36 = vld [vmem:[%s5564_s1 + $0x66c] ss:$16 sps:$4 sm:$0xff]  }
 0x110   :  { %v3994_v54 = vld [vmem:[%s5564_s1 + $0x428] ss:$16 sps:$4 sm:$0xff]   ;;  %v4002_v56 = vld [vmem:[%s5564_s1 + $0x40c] ss:$16 sps:$4 sm:$0xff]  }
 0x111   :  { %2921 = vmatpush1.bf16.msra.mxu0 %v3979_v40  ;;  %v3997_v55 = vld [vmem:[%s5564_s1 + $0x668] ss:$16 sps:$4 sm:$0xff]   ;;  %v4005_v33 = vld [vmem:[%s5564_s1 + $0x64c] ss:$16 sps:$4 sm:$0xff]  }
 0x112   :  { %2884 = vmatpush1.bf16.msra.mxu1 %v3976_v39  ;;  %2922 = vmatprep.subr.bf16.mxu0 %v3987_v19  ;;  %v4000_v57 = vld [vmem:[%s5564_s1 + $0x408] ss:$16 sps:$4 sm:$0xff]   ;;  %v4008_v59 = vld [vmem:[%s5564_s1 + $0x5ec] ss:$16 sps:$4 sm:$0xff]  }
 0x113   :  { %2885 = vmatprep.subr.bf16.mxu1 %v3984_v41  ;;  %v4003_v58 = vld [vmem:[%s5564_s1 + $0x648] ss:$16 sps:$4 sm:$0xff]   ;;  %v4011_v60 = vld [vmem:[%s5564_s1 + $0x62c] ss:$16 sps:$4 sm:$0xff]  }
 0x114   :  { %v4006_v62 = vld [vmem:[%s5564_s1 + $0x5e8] ss:$16 sps:$4 sm:$0xff]   ;;  %v4014_v3 = vld [vmem:[%s5564_s1 + $0x5cc] ss:$16 sps:$4 sm:$0xff]  }
 0x115   :  { %2923 = vmatpush1.bf16.msra.mxu0 %v3985_v46  ;;  %v4009_v2 = vld [vmem:[%s5564_s1 + $0x628] ss:$16 sps:$4 sm:$0xff]   ;;  %v4017_v4 = vld [vmem:[%s5564_s1 + $0x60c] ss:$16 sps:$4 sm:$0xff]  }
 0x116   :  { %2886 = vmatpush1.bf16.msra.mxu1 %v3982_v45  ;;  %2924 = vmatprep.subr.bf16.mxu0 %v3993_v24  ;;  %v4012_v5 = vld [vmem:[%s5564_s1 + $0x5c8] ss:$16 sps:$4 sm:$0xff]   ;;  %v4020_v9 = vld [vmem:[%s5564_s1 + $0x5ac] ss:$16 sps:$4 sm:$0xff]  }
 0x117   :  { %2887 = vmatprep.subr.bf16.mxu1 %v3990_v47  ;;  %v4015_v6 = vld [vmem:[%s5564_s1 + $0x608] ss:$16 sps:$4 sm:$0xff]   ;;  %v4023_v10 = vld [vmem:[%s5564_s1 + $0x7ec] ss:$16 sps:$4 sm:$0xff]  }
 0x118   :  { %v4018_v11 = vld [vmem:[%s5564_s1 + $0x5a8] ss:$16 sps:$4 sm:$0xff]   ;;  %v4026_v12 = vld [vmem:[%s5564_s1 + $0x58c] ss:$16 sps:$4 sm:$0xff]  }
 0x119   :  { %2925 = vmatpush1.bf16.msra.mxu0 %v3991_v51  ;;  %v4021_v1 = vld [vmem:[%s5564_s1 + $0x7e8] ss:$16 sps:$4 sm:$0xff]   ;;  %v4029_v13 = vld [vmem:[%s5564_s1 + $0x7cc] ss:$16 sps:$4 sm:$0xff]  }
 0x11a   :  { %2888 = vmatpush1.bf16.msra.mxu1 %v3988_v49  ;;  %2926 = vmatprep.subr.bf16.mxu0 %v3999_v36  ;;  %v4024_v15 = vld [vmem:[%s5564_s1 + $0x588] ss:$16 sps:$4 sm:$0xff]   ;;  %v4032_v17 = vld [vmem:[%s5564_s1 + $0x56c] ss:$16 sps:$4 sm:$0xff]  }
 0x11b   :  { %2889 = vmatprep.subr.bf16.mxu1 %v3996_v52  ;;  %v4027_v16 = vld [vmem:[%s5564_s1 + $0x7c8] ss:$16 sps:$4 sm:$0xff]   ;;  %v4035_v20 = vld [vmem:[%s5564_s1 + $0x7ac] ss:$16 sps:$4 sm:$0xff]  }
 0x11c   :  { %v4030_v21 = vld [vmem:[%s5564_s1 + $0x568] ss:$16 sps:$4 sm:$0xff]   ;;  %v4038_v23 = vld [vmem:[%s5564_s1 + $0x54c] ss:$16 sps:$4 sm:$0xff]  }
 0x11d   :  { %2927 = vmatpush1.bf16.msra.mxu0 %v3997_v55  ;;  %v4033_v22 = vld [vmem:[%s5564_s1 + $0x7a8] ss:$16 sps:$4 sm:$0xff]   ;;  %v4041_v25 = vld [vmem:[%s5564_s1 + $0x78c] ss:$16 sps:$4 sm:$0xff]  }
 0x11e   :  { %2890 = vmatpush1.bf16.msra.mxu1 %v3994_v54  ;;  %2928 = vmatprep.subr.bf16.mxu0 %v4005_v33  ;;  %v4036_v14 = vld [vmem:[%s5564_s1 + $0x548] ss:$16 sps:$4 sm:$0xff]   ;;  %v4044_v29 = vld [vmem:[%s5564_s1 + $0x52c] ss:$16 sps:$4 sm:$0xff]  }
 0x11f   :  { %2891 = vmatprep.subr.bf16.mxu1 %v4002_v56  ;;  %v4039_v28 = vld [vmem:[%s5564_s1 + $0x788] ss:$16 sps:$4 sm:$0xff]   ;;  %v4047_v30 = vld [vmem:[%s5564_s1 + $0x76c] ss:$16 sps:$4 sm:$0xff]  }
 0x120   :  { %v4042_v32 = vld [vmem:[%s5564_s1 + $0x528] ss:$16 sps:$4 sm:$0xff]   ;;  %v4050_v35 = vld [vmem:[%s5564_s1 + $0x50c] ss:$16 sps:$4 sm:$0xff]  }
 0x121   :  { %2929 = vmatpush1.bf16.msra.mxu0 %v4003_v58  ;;  %v4045_v34 = vld [vmem:[%s5564_s1 + $0x768] ss:$16 sps:$4 sm:$0xff]   ;;  %v4053_v37 = vld [vmem:[%s5564_s1 + $0x74c] ss:$16 sps:$4 sm:$0xff]  }
 0x122   :  { %2892 = vmatpush1.bf16.msra.mxu1 %v4000_v57  ;;  %2930 = vmatprep.subr.bf16.mxu0 %v4011_v60  ;;  %v4048_v18 = vld [vmem:[%s5564_s1 + $0x508] ss:$16 sps:$4 sm:$0xff]   ;;  %v4056_v39 = vld [vmem:[%s5564_s1 + $0x72c] ss:$16 sps:$4 sm:$0xff]  }
 0x123   :  { %2893 = vmatprep.subr.bf16.mxu1 %v4008_v59  ;;  %v4051_v38 = vld [vmem:[%s5564_s1 + $0x748] ss:$16 sps:$4 sm:$0xff]   ;;  %v4059_v40 = vld [vmem:[%s5564_s1 + $0x8ec] ss:$16 sps:$4 sm:$0xff]  }
 0x124   :  { %v4054_v41 = vld [vmem:[%s5564_s1 + $0x728] ss:$16 sps:$4 sm:$0xff]   ;;  %v4062_v45 = vld [vmem:[%s5564_s1 + $0x70c] ss:$16 sps:$4 sm:$0xff]  }
 0x125   :  { %2931 = vmatpush1.bf16.msra.mxu0 %v4009_v2  ;;  %v4057_v19 = vld [vmem:[%s5564_s1 + $0x8e8] ss:$16 sps:$4 sm:$0xff]   ;;  %v4065_v46 = vld [vmem:[%s5564_s1 + $0x8cc] ss:$16 sps:$4 sm:$0xff]  }
 0x126   :  { %2894 = vmatpush2.bf16.msra.mxu1 %v4006_v62  ;;  %2932 = vmatprep.subr.bf16.mxu0 %v4017_v4  ;;  %v4060_v51 = vld [vmem:[%s5564_s1 + $0x708] ss:$16 sps:$4 sm:$0xff]  }
 0x127   :  { %2895 = vmatprep.subr.bf16.mxu1 %v4014_v3  ;;  %v4063_v52 = vld [vmem:[%s5564_s1 + $0x8c8] ss:$16 sps:$4 sm:$0xff]  }
 0x128   :  { %v4066_v59 = vld [vmem:[%s5564_s1 + $0x8a8] ss:$16 sps:$4 sm:$0xff]  }
 0x129   :  { %2933 = vmatpush1.bf16.msra.mxu0 %v4015_v6  ;;  %v4069_v60 = vld [vmem:[%s5564_s1 + $0xae8] ss:$16 sps:$4 sm:$0xff]  }
 0x12a   :  { %2896 = vmatpush2.bf16.msra.mxu1 %v4012_v5  ;;  %2934 = vmatprep.subr.bf16.mxu0 %v4023_v10  ;;  %v4072_v3 = vld [vmem:[%s5564_s1 + $0x888] ss:$16 sps:$4 sm:$0xff]   ;;  %v4080_v5 = vld [vmem:[%s5564_s1 + $0x86c] ss:$16 sps:$4 sm:$0xff]  }
 0x12b   :  { %2897 = vmatprep.subr.bf16.mxu1 %v4020_v9  ;;  %v4075_v4 = vld [vmem:[%s5564_s1 + $0xac8] ss:$16 sps:$4 sm:$0xff]   ;;  %v4086_v10 = vld [vmem:[%s5564_s1 + $0x84c] ss:$16 sps:$4 sm:$0xff]  }
 0x12c   :  { %v4078_v6 = vld [vmem:[%s5564_s1 + $0x868] ss:$16 sps:$4 sm:$0xff]  }
 0x12d   :  { %2935 = vmatpush2.bf16.msra.mxu0 %v4021_v1  ;;  %v4081_v9 = vld [vmem:[%s5564_s1 + $0xaa8] ss:$16 sps:$4 sm:$0xff]  }
 0x12e   :  { %2898 = vmatpush2.bf16.msra.mxu1 %v4018_v11  ;;  %2936 = vmatprep.subr.bf16.mxu0 %v4029_v13  ;;  %v4084_v11 = vld [vmem:[%s5564_s1 + $0x848] ss:$16 sps:$4 sm:$0xff]   ;;  %v4095_v13 = vld [vmem:[%s5564_s1 + $0xa6c] ss:$16 sps:$4 sm:$0xff]  }
 0x12f   :  { %2899 = vmatprep.subr.bf16.mxu1 %v4026_v12  ;;  %v4087_v1 = vld [vmem:[%s5564_s1 + $0xa88] ss:$16 sps:$4 sm:$0xff]   ;;  %v4092_v12 = vld [vmem:[%s5564_s1 + $0x82c] ss:$16 sps:$4 sm:$0xff]  }
 0x131   :  { %2937 = vmatpush2.bf16.msra.mxu0 %v4027_v16  ;;  %v4093_v16 = vld [vmem:[%s5564_s1 + $0xa68] ss:$16 sps:$4 sm:$0xff]  }
 0x132   :  { %2900 = vmatpush2.bf16.msra.mxu1 %v4024_v15  ;;  %2938 = vmatprep.subr.bf16.mxu0 %v4035_v20  ;;  %v4090_v15 = vld [vmem:[%s5564_s1 + $0x828] ss:$16 sps:$4 sm:$0xff]   ;;  %v4101_v20 = vld [vmem:[%s5564_s1 + $0xa4c] ss:$16 sps:$4 sm:$0xff]  }
 0x133   :  { %2901 = vmatprep.subr.bf16.mxu1 %v4032_v17  ;;  %v4098_v17 = vld [vmem:[%s5564_s1 + $0x80c] ss:$16 sps:$4 sm:$0xff]  }
 0x135   :  { %2939 = vmatpush2.bf16.msra.mxu0 %v4033_v22  ;;  %v4099_v22 = vld [vmem:[%s5564_s1 + $0xa48] ss:$16 sps:$4 sm:$0xff]  }
 0x136   :  { %2902 = vmatpush2.bf16.msra.mxu1 %v4030_v21  ;;  %2940 = vmatprep.subr.bf16.mxu0 %v4041_v25  ;;  %v4096_v21 = vld [vmem:[%s5564_s1 + $0x808] ss:$16 sps:$4 sm:$0xff]   ;;  %v4107_v25 = vld [vmem:[%s5564_s1 + $0xa2c] ss:$16 sps:$4 sm:$0xff]  }
 0x137   :  { %2903 = vmatprep.subr.bf16.mxu1 %v4038_v23  ;;  %v4104_v23 = vld [vmem:[%s5564_s1 + $0x9ec] ss:$16 sps:$4 sm:$0xff]  }
 0x139   :  { %2941 = vmatpush2.bf16.msra.mxu0 %v4039_v28  ;;  %v4105_v28 = vld [vmem:[%s5564_s1 + $0xa28] ss:$16 sps:$4 sm:$0xff]  }
 0x13a   :  { %2904 = vmatpush2.bf16.msra.mxu1 %v4036_v14  ;;  %2942 = vmatprep.subr.bf16.mxu0 %v4047_v30  ;;  %v4102_v14 = vld [vmem:[%s5564_s1 + $0x9e8] ss:$16 sps:$4 sm:$0xff]   ;;  %v4113_v30 = vld [vmem:[%s5564_s1 + $0xa0c] ss:$16 sps:$4 sm:$0xff]  }
 0x13b   :  { %2905 = vmatprep.subr.bf16.mxu1 %v4044_v29  ;;  %v4110_v29 = vld [vmem:[%s5564_s1 + $0x9cc] ss:$16 sps:$4 sm:$0xff]  }
 0x13d   :  { %2943 = vmatpush2.bf16.msra.mxu0 %v4045_v34  ;;  %v4111_v34 = vld [vmem:[%s5564_s1 + $0xa08] ss:$16 sps:$4 sm:$0xff]  }
 0x13e   :  { %2906 = vmatpush2.bf16.msra.mxu1 %v4042_v32  ;;  %2944 = vmatprep.subr.bf16.mxu0 %v4053_v37  ;;  %v4108_v32 = vld [vmem:[%s5564_s1 + $0x9c8] ss:$16 sps:$4 sm:$0xff]   ;;  %v4119_v37 = vld [vmem:[%s5564_s1 + $0xbec] ss:$16 sps:$4 sm:$0xff]  }
 0x13f   :  { %2907 = vmatprep.subr.bf16.mxu1 %v4050_v35  ;;  %v4116_v35 = vld [vmem:[%s5564_s1 + $0x9ac] ss:$16 sps:$4 sm:$0xff]  }
 0x141   :  { %2945 = vmatpush2.bf16.msra.mxu0 %v4051_v38  ;;  %v4117_v38 = vld [vmem:[%s5564_s1 + $0xbe8] ss:$16 sps:$4 sm:$0xff]  }
 0x142   :  { %2908 = vmatpush2.bf16.msra.mxu1 %v4048_v18  ;;  %2946 = vmatprep.subr.bf16.mxu0 %v4056_v39  ;;  %v4114_v18 = vld [vmem:[%s5564_s1 + $0x9a8] ss:$16 sps:$4 sm:$0xff]   ;;  %v4122_v39 = vld [vmem:[%s5564_s1 + $0x98c] ss:$16 sps:$4 sm:$0xff]  }
 0x143   :  { %2959 = vmatprep.subr.bf16.mxu1 %v4059_v40  ;;  %v4125_v40 = vld [vmem:[%s5564_s1 + $0xbcc] ss:$16 sps:$4 sm:$0xff]  }
 0x144   :  { %v2624_v47 = vpop.f32.mrf.mxu0 }
 0x145   :  { %v2665_v24 = vpop.f32.mrf.mxu1  ;;  %2910 = vmatmul.mubr.bf16.vlgmr.msra.gmra.mxu1 %v4650_v27  ;;  %v2625_v49 = vadd.f32 %v2624_v47, %v5130_v26  ;;  %2947 = vmatpush2.bf16.msra.mxu0 %v4054_v41  ;;  %v4068_v27 = vld [vmem:[%s5564_s1 + $0x8ac] ss:$16 sps:$4 sm:$0xff]   ;;  %v4120_v41 = vld [vmem:[%s5564_s1 + $0x988] ss:$16 sps:$4 sm:$0xff]  }
 0x146   :  { %2960 = vmatpush1.bf16.msra.mxu1 %v4057_v19  ;;  %v2626_v36 = vpop.f32.mrf.mxu0  ;;  %2948 = vmatprep.subr.bf16.mxu0 %v4062_v45  ;;  %v4071_v26 = vld [vmem:[%s5564_s1 + $0xaec] ss:$16 sps:$4 sm:$0xff]   ;;  %v4123_v19 = vld [vmem:[%s5564_s1 + $0xbc8] ss:$16 sps:$4 sm:$0xff]  }
 0x147   :  { %v2667_v54 = vpop.f32.mrf.mxu1  ;;  %2961 = vmatprep.subr.bf16.mxu1 %v4065_v46  ;;  %v5331_v55 = vadd.f32 %v2665_v24, %v2625_v49  ;;  %v2627_v56 = vadd.f32 %v2626_v36, %v5133_v31  ;;  %2991 = vmatprep.mubr.bf16.mxu1 %v4703_v42  ;;  %v4074_v42 = vld [vmem:[%s5564_s1 + $0x88c] ss:$16 sps:$4 sm:$0xff]   ;;  %v4126_v47 = vld [vmem:[%s5564_s1 + $0x968] ss:$16 sps:$4 sm:$0xff]  }
 0x148   :  { %v2628_v33 = vpop.f32.mrf.mxu0  ;;  %v4077_v31 = vld [vmem:[%s5564_s1 + $0xacc] ss:$16 sps:$4 sm:$0xff]   ;;  %v4129_v24 = vld [vmem:[%s5564_s1 + $0xba8] ss:$16 sps:$4 sm:$0xff]  }
 0x149   :  { %v2669_v57 = vpop.f32.mrf.mxu1  ;;  %v5335_v58 = vadd.f32 %v2667_v54, %v2627_v56  ;;  %2949 = vmatpush2.bf16.msra.mxu0 %v4060_v51  ;;  %v4128_v45 = vld [vmem:[%s5564_s1 + $0x96c] ss:$16 sps:$4 sm:$0xff]   ;;  %v4135_v36 = vld [vmem:[%s5564_s1 + $0xb88] ss:$16 sps:$4 sm:$0xff]  }
 0x14a   :  { %2962 = vmatpush1.bf16.msra.mxu1 %v4063_v52  ;;  %v2629_v62 = vpop.f32.mrf.mxu0  ;;  %3000 = vmatprep.subr.bf16.mxu0 %v4071_v26  ;;  %v4131_v46 = vld [vmem:[%s5564_s1 + $0xbac] ss:$16 sps:$4 sm:$0xff]   ;;  %v4132_v52 = vld [vmem:[%s5564_s1 + $0x948] ss:$16 sps:$4 sm:$0xff]  }
 0x14b   :  { %v2670_v2 = vpop.f32.mrf.mxu1  ;;  %2963 = vmatprep.subr.bf16.mxu1 %v4068_v27  ;;  %v4134_v49 = vld [vmem:[%s5564_s1 + $0x94c] ss:$16 sps:$4 sm:$0xff]   ;;  %v4138_v26 = vld [vmem:[%s5564_s1 + $0x928] ss:$16 sps:$4 sm:$0xff]  }
 0x14c   :  { %2951 = vmatmul.mubr.bf16.vlgmr.msra.gmra.mxu0 %v4663_v7  ;;  %v4083_v7 = vld [vmem:[%s5564_s1 + $0xaac] ss:$16 sps:$4 sm:$0xff]   ;;  %v4141_v56 = vld [vmem:[%s5564_s1 + $0xb68] ss:$16 sps:$4 sm:$0xff]  }
 0x14d   :  { %3001 = vmatpush1.bf16.msra.mxu0 %v4069_v60  ;;  %3032 = vmatprep.mubr.bf16.mxu0 %v4708_v44  ;;  %v4089_v44 = vld [vmem:[%s5564_s1 + $0xa8c] ss:$16 sps:$4 sm:$0xff]   ;;  %v4147_v60 = vld [vmem:[%s5564_s1 + $0xb48] ss:$16 sps:$4 sm:$0xff]  }
 0x14e   :  { %2964 = vmatpush1.bf16.msra.mxu1 %v4066_v59  ;;  %3002 = vmatprep.subr.bf16.mxu0 %v4077_v31  ;;  %v4137_v51 = vld [vmem:[%s5564_s1 + $0xb8c] ss:$16 sps:$4 sm:$0xff]   ;;  %v4144_v59 = vld [vmem:[%s5564_s1 + $0x908] ss:$16 sps:$4 sm:$0xff]  }
 0x14f   :  { %2965 = vmatprep.subr.bf16.mxu1 %v4074_v42  ;;  %v4140_v54 = vld [vmem:[%s5564_s1 + $0x92c] ss:$16 sps:$4 sm:$0xff]   ;;  %v4150_v42 = vld [vmem:[%s5564_s1 + $0xb28] ss:$16 sps:$4 sm:$0xff]  }
 0x150   :  { %v4143_v27 = vld [vmem:[%s5564_s1 + $0xb6c] ss:$16 sps:$4 sm:$0xff]   ;;  %v4153_v31 = vld [vmem:[%s5564_s1 + $0xc28] ss:$16 sps:$4 sm:$0xff]  }
 0x151   :  { %3003 = vmatpush1.bf16.msra.mxu0 %v4075_v4  ;;  %v4146_v33 = vld [vmem:[%s5564_s1 + $0x90c] ss:$16 sps:$4 sm:$0xff]  }
 0x152   :  { %2966 = vmatpush1.bf16.msra.mxu1 %v4072_v3  ;;  %3004 = vmatprep.subr.bf16.mxu0 %v4083_v7  ;;  %v4149_v57 = vld [vmem:[%s5564_s1 + $0xb4c] ss:$16 sps:$4 sm:$0xff]  }
 0x153   :  { %2967 = vmatprep.subr.bf16.mxu1 %v4080_v5  ;;  %v4152_v62 = vld [vmem:[%s5564_s1 + $0xb2c] ss:$16 sps:$4 sm:$0xff]  }
 0x154   :  { %v4155_v2 = vld [vmem:[%s5564_s1 + $0xc2c] ss:$16 sps:$4 sm:$0xff]  }
 0x155   :  { %3005 = vmatpush1.bf16.msra.mxu0 %v4081_v9  ;;  %v4158_v3 = vld [vmem:[%s5564_s1 + $0xb0c] ss:$16 sps:$4 sm:$0xff]   ;;  %v4156_v9 = vld [vmem:[%s5564_s1 + $0xb08] ss:$16 sps:$4 sm:$0xff]  }
 0x156   :  { %2968 = vmatpush1.bf16.msra.mxu1 %v4078_v6  ;;  %3006 = vmatprep.subr.bf16.mxu0 %v4089_v44  ;;  %v4161_v4 = vld [vmem:[%s5564_s1 + $0xc0c] ss:$16 sps:$4 sm:$0xff]  }
 0x157   :  { %2969 = vmatprep.subr.bf16.mxu1 %v4086_v10  ;;  %v4159_v10 = vld [vmem:[%s5564_s1 + $0xc08] ss:$16 sps:$4 sm:$0xff]   ;;  %s4187_s1 = smov [#allocation3]  }
 0x159   :  { %3007 = vmatpush1.bf16.msra.mxu0 %v4087_v1 }
 0x15a   :  { %2970 = vmatpush1.bf16.msra.mxu1 %v4084_v11  ;;  %3008 = vmatprep.subr.bf16.mxu0 %v4095_v13 }
 0x15b   :  { %2971 = vmatprep.subr.bf16.mxu1 %v4092_v12 }
 0x15d   :  { %3009 = vmatpush1.bf16.msra.mxu0 %v4093_v16 }
 0x15e   :  { %2972 = vmatpush1.bf16.msra.mxu1 %v4090_v15  ;;  %3010 = vmatprep.subr.bf16.mxu0 %v4101_v20 }
 0x15f   :  { %2973 = vmatprep.subr.bf16.mxu1 %v4098_v17  ;;  %v5532_v17 = vld [vmem:[%s5566_s3] sm:$0xf]  ;;  %s3161_s3 = sshll.u32 %s4187_s1, 4  ;;  %s3162_s3 = int_to_ptr.vmem [resolvable:$true] %s3161_s3 }
 0x160   :  { %s4162_s10 = scalar_lea.vmem %s3162_s3, 128  ;;  %p4167_p1 = scmp.lt.s32.totalorder %s3162_s3, %s3162_s3 }
 0x161   :  { %3011 = vmatpush1.bf16.msra.mxu0 %v4099_v22  ;;  %p4163_p0 = scmp.ne.s32.totalorder %s3162_s3, %s4162_s10  ;;  %p4168_p2 = scmp.lt.s32.totalorder %s4162_s10, %s4162_s10 }
 0x162   :  { %2974 = vmatpush1.bf16.msra.mxu1 %v4096_v21  ;;  %3012 = vmatprep.subr.bf16.mxu0 %v4107_v25  ;;  %v3118_v25 = vrot.slane %v5532_v17, %v428_v8 }
 0x163   :  { %2975 = vmatprep.subr.bf16.mxu1 %v4104_v23  ;;  %p4169_p3 = por %p4168_p2, %p4167_p1 }
 0x165   :  { %3013 = vmatpush1.bf16.msra.mxu0 %v4105_v28  ;;  %p4170_p4 = pnand %p4169_p3, %p4163_p0 }
 0x166   :  { %2976 = vmatpush2.bf16.msra.mxu1 %v4102_v14  ;;  %3014 = vmatprep.subr.bf16.mxu0 %v4113_v30 }
 0x167   :  { %2977 = vmatprep.subr.bf16.mxu1 %v4110_v29 }
 0x169   :  { %3015 = vmatpush1.bf16.msra.mxu0 %v4111_v34 }
 0x16a   :  { %2978 = vmatpush2.bf16.msra.mxu1 %v4108_v32  ;;  %3016 = vmatprep.subr.bf16.mxu0 %v4119_v37 }
 0x16b   :  { %2979 = vmatprep.subr.bf16.mxu1 %v4116_v35  ;;  %v432_v35 = vsub.s32 2, %v4343_v43 }
 0x16d   :  { %3017 = vmatpush2.bf16.msra.mxu0 %v4117_v38  ;;  %v433_v8 = vrot.slane %v5089_v50, %v432_v35 }
 0x16e   :  { %2980 = vmatpush2.bf16.msra.mxu1 %v4114_v18  ;;  %3018 = vmatprep.subr.bf16.mxu0 %v4125_v40  ;;  %v436_v18 = vsub.s32 3, %v4343_v43 }
 0x16f   :  { %2981 = vmatprep.subr.bf16.mxu1 %v4122_v39 }
 0x170   :  { %v437_v40 = vrot.slane %v5089_v50, %v436_v18 }
 0x171   :  { %3019 = vmatpush2.bf16.msra.mxu0 %v4123_v19 }
 0x172   :  { %2982 = vmatpush2.bf16.msra.mxu1 %v4120_v41  ;;  %3020 = vmatprep.subr.bf16.mxu0 %v4131_v46 }
 0x173   :  { %2983 = vmatprep.subr.bf16.mxu1 %v4128_v45 }
 0x175   :  { %3021 = vmatpush2.bf16.msra.mxu0 %v4129_v24 }
 0x176   :  { %2984 = vmatpush2.bf16.msra.mxu1 %v4126_v47  ;;  %3022 = vmatprep.subr.bf16.mxu0 %v4137_v51 }
 0x177   :  { %2985 = vmatprep.subr.bf16.mxu1 %v4134_v49 }
 0x179   :  { %3023 = vmatpush2.bf16.msra.mxu0 %v4135_v36 }
 0x17a   :  { %2986 = vmatpush2.bf16.msra.mxu1 %v4132_v52  ;;  %3024 = vmatprep.subr.bf16.mxu0 %v4143_v27 }
 0x17b   :  { %2987 = vmatprep.subr.bf16.mxu1 %v4140_v54 }
 0x17d   :  { %3025 = vmatpush2.bf16.msra.mxu0 %v4141_v56 }
 0x17e   :  { %2988 = vmatpush2.bf16.msra.mxu1 %v4138_v26  ;;  %3026 = vmatprep.subr.bf16.mxu0 %v4149_v57 }
 0x17f   :  { %2989 = vmatprep.subr.bf16.mxu1 %v4146_v33 }
 0x181   :  { %3027 = vmatpush2.bf16.msra.mxu0 %v4147_v60 }
 0x182   :  { %2990 = vmatpush2.bf16.msra.mxu1 %v4144_v59  ;;  %3028 = vmatprep.subr.bf16.mxu0 %v4152_v62 }
 0x183   :  { %3053 = vmatprep.subr.bf16.mxu1 %v4155_v2 }
 0x184   :  { %v2706_v5 = vpop.f32.mrf.mxu0 }
 0x185   :  { %v2747_v7 = vpop.f32.mrf.mxu1  ;;  %2992 = vmatmul.mubr.bf16.vlgmr.msra.gmra.mxu1 %v4872_v48  ;;  %v2707_v6 = vadd.f32 %v2706_v5, %v5331_v55  ;;  %3029 = vmatpush2.bf16.msra.mxu0 %v4150_v42 }
 0x186   :  { %3054 = vmatpush1.bf16.msra.mxu1 %v4153_v31  ;;  %v2708_v44 = vpop.f32.mrf.mxu0  ;;  %3030 = vmatprep.subr.bf16.mxu0 %v4158_v3 }
 0x187   :  { %v2749_v11 = vpop.f32.mrf.mxu1  ;;  %3055 = vmatprep.subr.bf16.mxu1 %v4161_v4  ;;  %v2748_v1 = vadd.f32 %v2747_v7, %v2707_v6  ;;  %v2709_v12 = vadd.f32 %v2708_v44, %v5335_v58  ;;  %3073 = vmatprep.mubr.bf16.mxu1 %v4185_v63  ;;  %v3114_v63 = vrot.slane %v5532_v17, %v424_v61  ;;  %v4186_v7 = vmov 1983009808  }
 0x188   :  { %v2710_v48 = vpop.f32.mrf.mxu0  ;;  %v3093_v6 = vunpack.c.l.s4 %v4186_v7 }
 0x189   :  { %v2751_v55 = vpop.f32.mrf.mxu1  ;;  %v2750_v13 = vadd.f32 %v2749_v11, %v2709_v12  ;;  %3031 = vmatpush2.bf16.msra.mxu0 %v4156_v9 }
 0x18a   :  { %3056 = vmatpush1.bf16.msra.mxu1 %v4159_v10  ;;  %v2711_v15 = vpop.f32.mrf.mxu0  ;;  %v3122_v55 = vrot.slane %v5532_v17, %v432_v35 }
 0x18b   :  { %v2752_v16 = vpop.f32.mrf.mxu1  ;;  %v3094_v15 = vunpack.c.0.s8 %v3093_v6 }
 0x18c   :  { %v2788_v20 = vpop.f32.mrf.mxu0  ;;  %3033 = vmatmul.mubr.bf16.vlgmr.msra.gmra.mxu0 %v4887_v53 }
 0x18d   :  { %3566 = vmatmul.mubr.msk.bf16.vlgmr.msra.gmra.mxu1 %vm2504_vm0, %v4919_v0  ;;  %v2789_v58 = vadd.f32 %v2788_v20, %v2748_v1 }
 0x18e   :  { %v2790_v21 = vpop.f32.mrf.mxu0 }
 0x18f   :  { %v3082_v22 = vmax.f32 %v2789_v58, 0.0  ;;  %v2791_v23 = vadd.f32 %v2790_v21, %v2750_v13  ;;  %v3126_v21 = vrot.slane %v5532_v17, %v436_v18 }
 0x190   :  { %v2792_v14 = vpop.f32.mrf.mxu0 }
 0x191   :  { %v3131_v28 = vmul.f32 %v3114_v63, %v3082_v22  ;;  %v3083_v29 = vmax.f32 %v2791_v23, 0.0 }
 0x192   :  { %v2793_v30 = vpop.f32.mrf.mxu0 }
 0x193   :  { %v5543_v53 = vcombine.low %v3082_v22, %v3083_v29  ;;  %v3132_v0 = vmul.f32 %v3118_v25, %v3083_v29  ;;  %v3136_v32 = vsel %vm3135_vm1, %v3131_v28, 0.0  ;;  %v3097_v28 = vsub.s32 %v3094_v15, %v4343_v43 }
 0x195   :  { %v3137_v34 = vsel %vm3135_vm1, %v3132_v0, 0.0  ;;  %v3098_v35 = vrot.slane %v5543_v53, %v3097_v28 }
 0x196   :  { %v3138_v61 = vadd.f32 %v3137_v34, %v3136_v32 }
 0x1c5   :  { %v2829_v37 = vpop.f32.mrf.mxu1 }
 0x1c6   :  { %v2830_v19 = vadd.f32 %v2829_v37, %v433_v8 }
 0x1c7   :  { %v2831_v38 = vpop.f32.mrf.mxu1 }
 0x1c8   :  { %v2832_v46 = vadd.f32 %v2831_v38, %v437_v40 }
 0x1c9   :  { %v2833_v39 = vpop.f32.mrf.mxu1 }
 0x1cb   :  { %v2834_v41 = vpop.f32.mrf.mxu1 }
 0x1cc   :  { %v2870_v45 = vpop.f32.mrf.mxu0 }
 0x1cd   :  { %v2871_v47 = vadd.f32 %v2870_v45, %v2830_v19 }
 0x1ce   :  { %v2872_v24 = vpop.f32.mrf.mxu0 }
 0x1cf   :  { %v2873_v49 = vadd.f32 %v2872_v24, %v2832_v46 }
 0x1d0   :  { %v2874_v51 = vpop.f32.mrf.mxu0 }
 0x1d2   :  { %v2875_v52 = vpop.f32.mrf.mxu0 }
 0x205   :  { %v2911_v36 = vpop.f32.mrf.mxu1 }
 0x206   :  { %v2912_v54 = vadd.f32 %v2911_v36, %v2871_v47 }
 0x207   :  { %v2913_v27 = vpop.f32.mrf.mxu1 }
 0x208   :  { %v2914_v26 = vadd.f32 %v2913_v27, %v2873_v49 }
 0x209   :  { %v2915_v56 = vpop.f32.mrf.mxu1 }
 0x20b   :  { %v2916_v33 = vpop.f32.mrf.mxu1 }
 0x20c   :  { %v2952_v57 = vpop.f32.mrf.mxu0 }
 0x20d   :  { %v2953_v31 = vadd.f32 %v2952_v57, %v2912_v54 }
 0x20e   :  { %v2954_v59 = vpop.f32.mrf.mxu0 }
 0x20f   :  { %v2955_v4 = vadd.f32 %v2954_v59, %v2914_v26 }
 0x210   :  { %v2956_v60 = vpop.f32.mrf.mxu0 }
 0x212   :  { %v2957_v62 = vpop.f32.mrf.mxu0 }
 0x245   :  { %v2993_v50 = vpop.f32.mrf.mxu1 }
 0x246   :  { %v2994_v5 = vadd.f32 %v2993_v50, %v2953_v31 }
 0x247   :  { %v2995_v2 = vpop.f32.mrf.mxu1 }
 0x248   :  { %v2996_v44 = vadd.f32 %v2995_v2, %v2955_v4 }
 0x249   :  { %v2997_v42 = vpop.f32.mrf.mxu1 }
 0x24b   :  { %v2998_v3 = vpop.f32.mrf.mxu1 }
 0x24c   :  { %v3034_v9 = vpop.f32.mrf.mxu0 }
 0x24d   :  { %v3075_v10 = vpop.f32.mrf.mxu1  ;;  %v3035_v11 = vadd.f32 %v3034_v9, %v2994_v5 }
 0x24e   :  { %v3036_v1 = vpop.f32.mrf.mxu0 }
 0x24f   :  { %v3077_v12 = vpop.f32.mrf.mxu1  ;;  %v3076_v48 = vadd.f32 %v3075_v10, %v3035_v11  ;;  %v3037_v13 = vadd.f32 %v3036_v1, %v2996_v44 }
 0x250   :  { %v3038_v16 = vpop.f32.mrf.mxu0 }
 0x251   :  { %v3079_v20 = vpop.f32.mrf.mxu1  ;;  %v3084_v58 = vmax.f32 %v3076_v48, 0.0  ;;  %v3078_v63 = vadd.f32 %v3077_v12, %v3037_v13 }
 0x252   :  { %v3039_v22 = vpop.f32.mrf.mxu0 }
 0x253   :  { %v3080_v23 = vpop.f32.mrf.mxu1  ;;  %v3133_v25 = vmul.f32 %v3122_v55, %v3084_v58  ;;  %v3085_v14 = vmax.f32 %v3078_v63, 0.0 }
 0x255   :  { %v3091_v29 = vcombine.low %v3084_v58, %v3085_v14  ;;  %v3134_v30 = vmul.f32 %v3126_v21, %v3085_v14  ;;  %v3139_v0 = vsel %vm3135_vm1, %v3133_v25, 0.0 }
 0x256   :  { %v3140_v32 = vadd.f32 %v3139_v0, %v3138_v61 }
 0x257   :  { %v3141_v34 = vsel %vm3135_vm1, %v3134_v30, 0.0  ;;  %v3105_v37 = vrot.slane %v3091_v29, %v3097_v28 }
 0x258   :  { %v3142_v38 = vadd.f32 %v3141_v34, %v3140_v32 }
 0x259   :  { %v3106_v8 = vcombine.low %v3098_v35, %v3105_v37 }
 0x25a   :  { %3143 = vadd.xlane.f32.xlu0 %v3142_v38 }
 0x25b   :  { %3108 = vst [vmem:[#allocation3] sm:$0xff] %v3106_v8 }
 0x25c   :  { %4173 = shalt.err (!%p4170_p4)
}
 0x25d   :  { %3164 = dma.vmem_to_hbm [thread:$0]  %s3162_s3, 128, %s5568_s5, [#allocation4]   ;;  %v3567_v43 = vld [vmem:[#allocation2] ss:$0 sm:$0xff]  ;;  %vm3153_vm2 = vcmask 1024  }
 0x2e3   :  { %v3144_v17 = vpop.xlane.xlu0 %3143 }
 0x2e4   :  { %v3152_v53 = vadd.f32 %v3567_v43, %v3144_v17 }
 0x2e6   :  { %3154 = vst.msk [vmem:[%s5569_s6] sm:$0x3] %vm3153_vm2, %v3152_v53 }
 0x2e7   :  { %4182 = dma.done.wait [#allocation4], 128  }
 0x2e8   :  { %4183 = vsyncadd [#allocation4], 4294967168 }
 0x2e9   :  { %3172 = vsyncpa [#allocation4], 1 }

// kernel: actor_critic_cnn_forward.2
= control target key start
LH: loop header
LB: loop body
LE: loop exit
PB: predicated region body
PF: predicated region fallthrough
CT: control target
= control target key end

     0   :  { %s9761_s30 = smov 0   ;;  %s11857_s0 = inlined_call_operand.vmem [shape: bf16[2,4,100,256], index: 0, kind: input, shape index: {}]   ;;  %s11858_s1 = inlined_call_operand.vmem [shape: bf16[4,81,100], index: 1, kind: input, shape index: {}]   ;;  %s11859_s2 = inlined_call_operand.vmem [shape: bf16[9,49,81], index: 2, kind: input, shape index: {}]   ;;  %s11860_s3 = inlined_call_operand.vmem [shape: bf16[256,32], index: 3, kind: input, shape index: {}]   ;;  %s11861_s4 = inlined_call_operand.vmem [shape: f32[1,32], index: 4, kind: input, shape index: {}]   ;;  %s11862_s5 = inlined_call_operand.vmem [shape: bf16[16,32,64], index: 5, kind: input, shape index: {}]   ;;  %s11863_s6 = inlined_call_operand.vmem [shape: f32[1,64], index: 6, kind: input, shape index: {}]   ;;  %s11864_s7 = inlined_call_operand.vmem [shape: bf16[9,64,32], index: 7, kind: input, shape index: {}]   ;;  %s11865_s8 = inlined_call_operand.vmem [shape: f32[1,32], index: 8, kind: input, shape index: {}]   ;;  %s11866_s9 = inlined_call_operand.vmem [shape: bf16[2,49,32], index: 9, kind: output, shape index: {}]  }
   0x1 LB: > { %s6982_s10 = sadd.s32 4294967295, %s9708_s30   ;;  %p6986_p0 = scmp.ge.s32.totalorder %s9708_s30, 1  ;;  %s9708_s30 = sphi %s9761_s30, %s19_s30  }
   0x2   : > { %p287_p1 = scmp.lt.s32.totalorder %s9708_s30, 3 }
   0x4   : > { %p288_p2 = pnand %p6986_p0, %p287_p1 }
   0x6   : > { %291 = sbr.rel (%p288_p2) target bundleno = 5988 (0x1764), region = 56 }
   0xb   : > { %v9477_v0 = vld [vmem:[%s11860_s3 + $0x78] sm:$0xff]   ;;  %v9780_v2 = vld [vmem:[%s11860_s3 + $0x70] sm:$0xff]   ;;  %p323_p3 = scmp.lt.s32.totalorder %s6982_s10, 1  ;;  %v9794_v4 = vld [vmem:[%s11860_s3 + $0x68] sm:$0xff]   ;;  %vm1264_vm0 = vcmask 818176   ;;  %vm1283_vm1 = vcmask 1041408  }
   0xc   : > { %v9775_v1 = vld [vmem:[%s11860_s3 + $0x38] sm:$0xff]   ;;  %7724 = vmatprep.subr.bf16.mxu0 %v9477_v0  ;;  %7782 = vmatprep.subr.bf16.mxu1 %v9477_v0  ;;  %v9787_v3 = vld [vmem:[%s11860_s3 + $0x30] sm:$0xff]   ;;  %v9803_v5 = vld [vmem:[%s11860_s3 + $0x28] sm:$0xff]   ;;  %vm1483_vm2 = vcmask 261120   ;;  %vm4900_vm3 = vcmask 662528   ;;  %vm4913_vm4 = vcmask 1040384  }
   0xd   : > { %7725 = vmatpush3.bf16.msra.mxu0 %v9775_v1  ;;  %7783 = vmatpush3.bf16.msra.mxu1 %v9775_v1  ;;  %s11916_s10 = smov (!%p323_p3, %s6982_s10), 1  ;;  %v9810_v6 = vld [vmem:[%s11860_s3 + $0x60] sm:$0xff]   ;;  %v9825_v8 = vld [vmem:[%s11860_s3 + $0x58] sm:$0xff]   ;;  %v9844_v10 = vld [vmem:[%s11860_s3 + $0x50] sm:$0xff]   ;;  %vm5134_vm5 = vcmask 523264   ;;  %vm6914_vm6 = vcmask 257024  }
   0xe   : > { %7726 = vmatprep.subr.bf16.mxu0 %v9780_v2  ;;  %7784 = vmatprep.subr.bf16.mxu1 %v9780_v2  ;;  %s9466_s25 = smul.u32 416, %s11916_s10  ;;  %v9818_v7 = vld [vmem:[%s11860_s3 + $0x20] sm:$0xff]   ;;  %v9837_v9 = vld [vmem:[%s11860_s3 + $0x18] sm:$0xff]   ;;  %v9853_v13 = vld [vmem:[%s11860_s3 + $0x10] sm:$0xff]   ;;  %vm6921_vm7 = vcmask 253952  }
   0xf   : > { %v9860_v14 = vld [vmem:[%s11860_s3 + $0x48] sm:$0xff]   ;;  %v9874_v16 = vld [vmem:[%s11860_s3 + $0x40] sm:$0xff]   ;;  %s9467_s26 = smul.u32 28, %s11916_s10  ;;  %vm6922_vm8 = vsmask.f32 256 }
  0x10   : > { %s9830_s13 = scalar_lea.vmem %s11857_s0, %s9466_s25  ;;  %v9867_v15 = vld [vmem:[%s11860_s3 + $0x8] sm:$0xff]   ;;  %v9881_v17 = vld [vmem:[%s11860_s3] sm:$0xff]   ;;  %vm6923_vm9 = vmand %vm6921_vm7, %vm6922_vm8 }
  0x11   : > { %7727 = vmatpush3.bf16.msra.mxu0 %v9787_v3  ;;  %7785 = vmatpush3.bf16.msra.mxu1 %v9787_v3  ;;  %v9495_v11 = vld [vmem:[%s9830_s13 + $0x4] ss:$8 sps:$4 sm:$0xff]   ;;  %v9493_v18 = vld [vmem:[%s9830_s13] ss:$8 sps:$4 sm:$0xff]   ;;  %v9499_v20 = vld [vmem:[%s9830_s13 + $0x14] ss:$8 sps:$4 sm:$0xff]   ;;  %s11838_s29 = scalar_lea.vmem %s11866_s9, %s9467_s26 }
  0x12   : > { %7728 = vmatprep.subr.bf16.mxu0 %v9794_v4  ;;  %7786 = vmatprep.subr.bf16.mxu1 %v9794_v4  ;;  %v9498_v12 = vld [vmem:[%s9830_s13 + $0x6c] ss:$8 sps:$4 sm:$0xff]   ;;  %v9496_v19 = vld [vmem:[%s9830_s13 + $0x68] ss:$8 sps:$4 sm:$0xff]   ;;  %v9501_v21 = vld [vmem:[%s9830_s13 + $0x7c] ss:$8 sps:$4 sm:$0xff]  }
  0x13   : > { %581 = vmatprep.mubr.bf16.mxu0 %v9495_v11  ;;  %770 = vmatprep.mubr.bf16.mxu1 %v9498_v12  ;;  %v9503_v22 = vld [vmem:[%s9830_s13 + $0x10] ss:$8 sps:$4 sm:$0xff]   ;;  %v9505_v24 = vld [vmem:[%s9830_s13 + $0x24] ss:$8 sps:$4 sm:$0xff]   ;;  %v9509_v26 = vld [vmem:[%s9830_s13 + $0x20] ss:$8 sps:$4 sm:$0xff]  }
  0x14   : > { %v9504_v23 = vld [vmem:[%s9830_s13 + $0x78] ss:$8 sps:$4 sm:$0xff]   ;;  %v9507_v25 = vld [vmem:[%s9830_s13 + $0x8c] ss:$8 sps:$4 sm:$0xff]   ;;  %v9510_v27 = vld [vmem:[%s9830_s13 + $0x88] ss:$8 sps:$4 sm:$0xff]  }
  0x15   : > { %7729 = vmatpush3.bf16.msra.mxu0 %v9803_v5  ;;  %7787 = vmatpush3.bf16.msra.mxu1 %v9803_v5  ;;  %v9511_v28 = vld [vmem:[%s9830_s13 + $0x34] ss:$8 sps:$4 sm:$0xff]   ;;  %v9515_v30 = vld [vmem:[%s9830_s13 + $0x30] ss:$8 sps:$4 sm:$0xff]   ;;  %v9517_v32 = vld [vmem:[%s9830_s13 + $0x44] ss:$8 sps:$4 sm:$0xff]  }
  0x16   : > { %7730 = vmatprep.subr.bf16.mxu0 %v9810_v6  ;;  %7788 = vmatprep.subr.bf16.mxu1 %v9810_v6  ;;  %v9513_v29 = vld [vmem:[%s9830_s13 + $0x9c] ss:$8 sps:$4 sm:$0xff]   ;;  %v9516_v31 = vld [vmem:[%s9830_s13 + $0x98] ss:$8 sps:$4 sm:$0xff]   ;;  %v9519_v33 = vld [vmem:[%s9830_s13 + $0xac] ss:$8 sps:$4 sm:$0xff]  }
  0x17   : > { %v9521_v34 = vld [vmem:[%s9830_s13 + $0x40] ss:$8 sps:$4 sm:$0xff]   ;;  %v9523_v36 = vld [vmem:[%s9830_s13 + $0x54] ss:$8 sps:$4 sm:$0xff]   ;;  %v9527_v40 = vld [vmem:[%s9830_s13 + $0x50] ss:$8 sps:$4 sm:$0xff]  }
  0x18   : > { %v9522_v35 = vld [vmem:[%s9830_s13 + $0xa8] ss:$8 sps:$4 sm:$0xff]   ;;  %v9525_v37 = vld [vmem:[%s9830_s13 + $0xbc] ss:$8 sps:$4 sm:$0xff]   ;;  %v9528_v41 = vld [vmem:[%s9830_s13 + $0xb8] ss:$8 sps:$4 sm:$0xff]  }
  0x19   : > { %7731 = vmatpush3.bf16.msra.mxu0 %v9818_v7  ;;  %7789 = vmatpush3.bf16.msra.mxu1 %v9818_v7  ;;  %v379_v38 = vld [vmem:[%s9830_s13 + $0x60] sm:$0x33]  ;;  %v7032_v39 = vld [vmem:[%s9830_s13 + $0xc8] sm:$0x33]  ;;  %v9535_v48 = vld [vmem:[%s9830_s13 + $0xd4] ss:$8 sps:$4 sm:$0xff]  }
  0x1a   : > { %7732 = vmatprep.subr.bf16.mxu0 %v9825_v8  ;;  %7790 = vmatprep.subr.bf16.mxu1 %v9825_v8  ;;  %v7003_v42 = vcombine.high %v379_v38, %v379_v38  ;;  %v7046_v43 = vcombine.high %v7032_v39, %v7032_v39  ;;  %v7002_v44 = vcombine.low %v379_v38, %v379_v38  ;;  %v9538_v46 = vld [vmem:[%s9830_s13 + $0x13c] ss:$8 sps:$4 sm:$0xff]   ;;  %v9536_v47 = vld [vmem:[%s9830_s13 + $0x138] ss:$8 sps:$4 sm:$0xff]   ;;  %v9541_v50 = vld [vmem:[%s9830_s13 + $0x14c] ss:$8 sps:$4 sm:$0xff]  }
  0x1b   : > { %v7045_v45 = vcombine.low %v7032_v39, %v7032_v39  ;;  %v9533_v49 = vld [vmem:[%s9830_s13 + $0xd0] ss:$8 sps:$4 sm:$0xff]   ;;  %v9539_v52 = vld [vmem:[%s9830_s13 + $0xe4] ss:$8 sps:$4 sm:$0xff]   ;;  %v9543_v53 = vld [vmem:[%s9830_s13 + $0xe0] ss:$8 sps:$4 sm:$0xff]  }
  0x1c   : > { %v9544_v51 = vld [vmem:[%s9830_s13 + $0x148] ss:$8 sps:$4 sm:$0xff]   ;;  %v9547_v54 = vld [vmem:[%s9830_s13 + $0x15c] ss:$8 sps:$4 sm:$0xff]   ;;  %v9550_v55 = vld [vmem:[%s9830_s13 + $0x158] ss:$8 sps:$4 sm:$0xff]  }
  0x1d   : > { %7733 = vmatpush3.bf16.msra.mxu0 %v9837_v9  ;;  %7791 = vmatpush3.bf16.msra.mxu1 %v9837_v9  ;;  %v9545_v56 = vld [vmem:[%s9830_s13 + $0xf4] ss:$8 sps:$4 sm:$0xff]   ;;  %v9549_v57 = vld [vmem:[%s9830_s13 + $0xf0] ss:$8 sps:$4 sm:$0xff]   ;;  %v9551_v60 = vld [vmem:[%s9830_s13 + $0x104] ss:$8 sps:$4 sm:$0xff]  }
  0x1e   : > { %7734 = vmatprep.subr.bf16.mxu0 %v9844_v10  ;;  %7792 = vmatprep.subr.bf16.mxu1 %v9844_v10  ;;  %v9553_v58 = vld [vmem:[%s9830_s13 + $0x16c] ss:$8 sps:$4 sm:$0xff]   ;;  %v9556_v59 = vld [vmem:[%s9830_s13 + $0x168] ss:$8 sps:$4 sm:$0xff]   ;;  %v9559_v62 = vld [vmem:[%s9830_s13 + $0x17c] ss:$8 sps:$4 sm:$0xff]  }
  0x1f   : > { %v9555_v61 = vld [vmem:[%s9830_s13 + $0x100] ss:$8 sps:$4 sm:$0xff]  }
  0x20   : > { %v9562_v63 = vld [vmem:[%s9830_s13 + $0x178] ss:$8 sps:$4 sm:$0xff]  }
  0x21   : > { %7735 = vmatpush3.bf16.msra.mxu0 %v9853_v13  ;;  %7793 = vmatpush3.bf16.msra.mxu1 %v9853_v13  ;;  %v9573_v12 = vld [vmem:[%s11858_s1] sm:$0xff]  }
  0x22   : > { %7736 = vmatprep.subr.bf16.mxu0 %v9860_v14  ;;  %7794 = vmatprep.subr.bf16.mxu1 %v9860_v14 }
  0x25   : > { %7737 = vmatpush3.bf16.msra.mxu0 %v9867_v15  ;;  %7795 = vmatpush3.bf16.msra.mxu1 %v9867_v15 }
  0x26   : > { %7738 = vmatprep.subr.bf16.mxu0 %v9874_v16  ;;  %7796 = vmatprep.subr.bf16.mxu1 %v9874_v16 }
  0x29   : > { %7739 = vmatpush3.bf16.msra.mxu0 %v9881_v17  ;;  %7797 = vmatpush3.bf16.msra.mxu1 %v9881_v17 }
  0x2a   : > { %7840 = vmatprep.subr.bf16.mxu0 %v9477_v0  ;;  %7898 = vmatprep.subr.bf16.mxu1 %v9477_v0  ;;  %v9557_v0 = vld [vmem:[%s9830_s13 + $0x114] ss:$8 sps:$4 sm:$0xff]  }
  0x2c   : > { %582 = vmatmul.mubr.bf16.vlgmr.msra.gmra.mxu0 %v9493_v18  ;;  %771 = vmatmul.mubr.bf16.vlgmr.msra.gmra.mxu1 %v9496_v19  ;;  %v9975_v19 = vld [vmem:[%s11861_s4] ss:$0 sm:$0xff] }
  0x2d   : > { %589 = vmatprep.mubr.bf16.mxu0 %v9499_v20  ;;  %778 = vmatprep.mubr.bf16.mxu1 %v9501_v21 }
  0x2e   : > { %7841 = vmatpush3.bf16.msra.mxu0 %v9775_v1  ;;  %7899 = vmatpush3.bf16.msra.mxu1 %v9775_v1  ;;  %v9561_v1 = vld [vmem:[%s9830_s13 + $0x110] ss:$8 sps:$4 sm:$0xff]  }
  0x2f   : > { %7842 = vmatprep.subr.bf16.mxu0 %v9780_v2  ;;  %7900 = vmatprep.subr.bf16.mxu1 %v9780_v2  ;;  %v9565_v2 = vld [vmem:[%s9830_s13 + $0x18c] ss:$8 sps:$4 sm:$0xff]  }
  0x32   : > { %7843 = vmatpush3.bf16.msra.mxu0 %v9787_v3  ;;  %7901 = vmatpush3.bf16.msra.mxu1 %v9787_v3  ;;  %v9568_v3 = vld [vmem:[%s9830_s13 + $0x188] ss:$8 sps:$4 sm:$0xff]  }
  0x33   : > { %7844 = vmatprep.subr.bf16.mxu0 %v9794_v4  ;;  %7902 = vmatprep.subr.bf16.mxu1 %v9794_v4  ;;  %v9563_v4 = vld [vmem:[%s9830_s13 + $0x124] ss:$8 sps:$4 sm:$0xff]  }
  0x34   : > { %590 = vmatmul.mubr.bf16.gmra.mxu0 %v9503_v22  ;;  %779 = vmatmul.mubr.bf16.gmra.mxu1 %v9504_v23 }
  0x35   : > { %597 = vmatprep.mubr.bf16.mxu0 %v9505_v24  ;;  %786 = vmatprep.mubr.bf16.mxu1 %v9507_v25 }
  0x36   : > { %7845 = vmatpush3.bf16.msra.mxu0 %v9803_v5  ;;  %7903 = vmatpush3.bf16.msra.mxu1 %v9803_v5  ;;  %v9567_v5 = vld [vmem:[%s9830_s13 + $0x120] ss:$8 sps:$4 sm:$0xff]  }
  0x37   : > { %7846 = vmatprep.subr.bf16.mxu0 %v9810_v6  ;;  %7904 = vmatprep.subr.bf16.mxu1 %v9810_v6  ;;  %v7086_v6 = vld [vmem:[%s9830_s13 + $0x198] sm:$0x33] }
  0x3a   : > { %7847 = vmatpush3.bf16.msra.mxu0 %v9818_v7  ;;  %7905 = vmatpush3.bf16.msra.mxu1 %v9818_v7  ;;  %v7100_v7 = vcombine.high %v7086_v6, %v7086_v6 }
  0x3b   : > { %7848 = vmatprep.subr.bf16.mxu0 %v9825_v8  ;;  %7906 = vmatprep.subr.bf16.mxu1 %v9825_v8  ;;  %v7099_v8 = vcombine.low %v7086_v6, %v7086_v6 }
  0x3c   : > { %598 = vmatmul.mubr.bf16.gmra.mxu0 %v9509_v26  ;;  %787 = vmatmul.mubr.bf16.gmra.mxu1 %v9510_v27 }
  0x3d   : > { %605 = vmatprep.mubr.bf16.mxu0 %v9511_v28  ;;  %794 = vmatprep.mubr.bf16.mxu1 %v9513_v29 }
  0x3e   : > { %7849 = vmatpush3.bf16.msra.mxu0 %v9837_v9  ;;  %7907 = vmatpush3.bf16.msra.mxu1 %v9837_v9  ;;  %v7059_v9 = vld [vmem:[%s9830_s13 + $0x130] sm:$0x33] }
  0x3f   : > { %7850 = vmatprep.subr.bf16.mxu0 %v9844_v10  ;;  %7908 = vmatprep.subr.bf16.mxu1 %v9844_v10  ;;  %v7073_v10 = vcombine.high %v7059_v9, %v7059_v9  ;;  %v7072_v11 = vcombine.low %v7059_v9, %v7059_v9 }
  0x42   : > { %7851 = vmatpush3.bf16.msra.mxu0 %v9853_v13  ;;  %7909 = vmatpush3.bf16.msra.mxu1 %v9853_v13 }
  0x43   : > { %7852 = vmatprep.subr.bf16.mxu0 %v9860_v14  ;;  %7910 = vmatprep.subr.bf16.mxu1 %v9860_v14 }
  0x44   : > { %606 = vmatmul.mubr.bf16.gmra.mxu0 %v9515_v30  ;;  %795 = vmatmul.mubr.bf16.gmra.mxu1 %v9516_v31 }
  0x45   : > { %613 = vmatprep.mubr.bf16.mxu0 %v9517_v32  ;;  %802 = vmatprep.mubr.bf16.mxu1 %v9519_v33 }
  0x46   : > { %7853 = vmatpush3.bf16.msra.mxu0 %v9867_v15  ;;  %7911 = vmatpush3.bf16.msra.mxu1 %v9867_v15 }
  0x47   : > { %7854 = vmatprep.subr.bf16.mxu0 %v9874_v16  ;;  %7912 = vmatprep.subr.bf16.mxu1 %v9874_v16 }
  0x4a   : > { %7855 = vmatpush3.bf16.msra.mxu0 %v9881_v17  ;;  %7913 = vmatpush3.bf16.msra.mxu1 %v9881_v17 }
  0x4c   : > { %614 = vmatmul.mubr.bf16.gmra.mxu0 %v9521_v34  ;;  %803 = vmatmul.mubr.bf16.gmra.mxu1 %v9522_v35 }
  0x4d   : > { %621 = vmatprep.mubr.bf16.mxu0 %v9523_v36  ;;  %810 = vmatprep.mubr.bf16.mxu1 %v9525_v37 }
  0x54   : > { %622 = vmatmul.mubr.bf16.gmra.mxu0 %v9527_v40  ;;  %811 = vmatmul.mubr.bf16.gmra.mxu1 %v9528_v41 }
  0x55   : > { %629 = vmatprep.mubr.bf16.mxu0 %v7003_v42  ;;  %818 = vmatprep.mubr.bf16.mxu1 %v7046_v43 }
  0x5c   : > { %630 = vmatmul.mubr.bf16.gmra.mxu0 %v7002_v44  ;;  %819 = vmatmul.mubr.bf16.gmra.mxu1 %v7045_v45 }
  0x5d   : > { %1148 = vmatprep.mubr.bf16.mxu1 %v9538_v46  ;;  %959 = vmatprep.mubr.bf16.mxu0 %v9535_v48 }
  0x64   : > { %1149 = vmatmul.mubr.bf16.vlgmr.msra.gmra.mxu1 %v9536_v47  ;;  %960 = vmatmul.mubr.bf16.vlgmr.msra.gmra.mxu0 %v9533_v49 }
  0x65   : > { %1156 = vmatprep.mubr.bf16.mxu1 %v9541_v50  ;;  %967 = vmatprep.mubr.bf16.mxu0 %v9539_v52 }
  0x6c   : > { %1157 = vmatmul.mubr.bf16.gmra.mxu1 %v9544_v51  ;;  %968 = vmatmul.mubr.bf16.gmra.mxu0 %v9543_v53 }
  0x6d   : > { %1164 = vmatprep.mubr.bf16.mxu1 %v9547_v54  ;;  %975 = vmatprep.mubr.bf16.mxu0 %v9545_v56 }
  0x74   : > { %1165 = vmatmul.mubr.bf16.gmra.mxu1 %v9550_v55  ;;  %976 = vmatmul.mubr.bf16.gmra.mxu0 %v9549_v57 }
  0x75   : > { %1172 = vmatprep.mubr.bf16.mxu1 %v9553_v58  ;;  %983 = vmatprep.mubr.bf16.mxu0 %v9551_v60 }
  0x7c   : > { %1173 = vmatmul.mubr.bf16.gmra.mxu1 %v9556_v59  ;;  %984 = vmatmul.mubr.bf16.gmra.mxu0 %v9555_v61 }
  0x7d   : > { %1180 = vmatprep.mubr.bf16.mxu1 %v9559_v62  ;;  %991 = vmatprep.mubr.bf16.mxu0 %v9557_v0 }
  0x84   : > { %1181 = vmatmul.mubr.bf16.gmra.mxu1 %v9562_v63  ;;  %992 = vmatmul.mubr.bf16.gmra.mxu0 %v9561_v1 }
  0x85   : > { %1188 = vmatprep.mubr.bf16.mxu1 %v9565_v2  ;;  %999 = vmatprep.mubr.bf16.mxu0 %v9563_v4 }
  0x8c   : > { %1189 = vmatmul.mubr.bf16.gmra.mxu1 %v9568_v3  ;;  %1000 = vmatmul.mubr.bf16.gmra.mxu0 %v9567_v5 }
  0x8d   : > { %1196 = vmatprep.mubr.bf16.mxu1 %v7100_v7  ;;  %1007 = vmatprep.mubr.bf16.mxu0 %v7073_v10 }
  0x94   : > { %1197 = vmatmul.mubr.bf16.gmra.mxu1 %v7099_v8  ;;  %1008 = vmatmul.mubr.bf16.gmra.mxu0 %v7072_v11 }
  0x95   : > { %8468 = vmatprep.mubr.msk.bf16.mxu0 %vm1264_vm0, %v9573_v12  ;;  %8494 = vmatprep.mubr.msk.bf16.mxu1 %vm1264_vm0, %v9573_v12 }
  0xec   : > { %v7740_v13 = vpop.f32.mrf.mxu0  ;;  %v7798_v14 = vpop.f32.mrf.mxu1 }
  0xee   : > { %v7741_v15 = vpop.f32.mrf.mxu0  ;;  %v7799_v16 = vpop.f32.mrf.mxu1 }
  0xef   : > { %v7742_v17 = vadd.f32 %v7741_v15, %v7740_v13  ;;  %v7800_v18 = vadd.f32 %v7799_v16, %v7798_v14 }
  0xf0   : > { %v7743_v20 = vpop.f32.mrf.mxu0  ;;  %v7801_v21 = vpop.f32.mrf.mxu1 }
  0xf1   : > { %v584_v22 = vadd.f32 %v7742_v17, %v9975_v19  ;;  %v773_v25 = vadd.f32 %v7800_v18, %v9975_v19 }
  0xf2   : > { %v7744_v23 = vpop.f32.mrf.mxu0  ;;  %v7802_v24 = vpop.f32.mrf.mxu1 }
  0xf3   : > { %v7745_v26 = vadd.f32 %v7744_v23, %v7743_v20  ;;  %v7803_v27 = vadd.f32 %v7802_v24, %v7801_v21  ;;  %v637_v30 = vmax.f32 %v584_v22, 0.0  ;;  %v826_v35 = vmax.f32 %v773_v25, 0.0 }
  0xf4   : > { %v7746_v28 = vpop.f32.mrf.mxu0  ;;  %v9979_v29 = vpop.f32.mrf.mxu1 }
  0xf5   : > { %v587_v31 = vadd.f32 %v7745_v26, %v9975_v19  ;;  %v776_v32 = vadd.f32 %v7803_v27, %v9975_v19 }
  0xf6   : > { %v7747_v33 = vpop.f32.mrf.mxu0  ;;  %v9983_v34 = vpop.f32.mrf.mxu1 }
  0xf7   : > { %v638_v36 = vmax.f32 %v587_v31, 0.0  ;;  %v827_v37 = vmax.f32 %v776_v32, 0.0  ;;  %v10007_v23 = vadd.f32 %v7747_v33, %v7746_v28 }
  0xf8   : > { %v9985_v38 = vpop.f32.mrf.mxu0  ;;  %v9987_v39 = vpop.f32.mrf.mxu1 }
  0xf9   : > { %v9989_v40 = vpack.c.bf16 %v638_v36, %v637_v30  ;;  %v9991_v41 = vpack.c.bf16 %v827_v37, %v826_v35 }
  0xfa   : > { %v9993_v42 = vpop.f32.mrf.mxu0  ;;  %v9995_v43 = vpop.f32.mrf.mxu1 }
  0xfb   : > { %11869 = vst [vmem:[#allocation2_spill] sm:$0xff] %v9989_v40 }
  0xfc   : > { %v7752_v44 = vpop.f32.mrf.mxu0  ;;  %v9997_v45 = vpop.f32.mrf.mxu1 }
  0xfe   : > { %v7753_v46 = vpop.f32.mrf.mxu0  ;;  %v9999_v47 = vpop.f32.mrf.mxu1 }
  0xff   : > { %v7754_v24 = vadd.f32 %v7753_v46, %v7752_v44 }
 0x100   : > { %v7755_v48 = vpop.f32.mrf.mxu0  ;;  %v10001_v49 = vpop.f32.mrf.mxu1 }
 0x102   : > { %v7756_v50 = vpop.f32.mrf.mxu0  ;;  %v10003_v51 = vpop.f32.mrf.mxu1 }
 0x104   : > { %v7758_v52 = vpop.f32.mrf.mxu0  ;;  %v7816_v53 = vpop.f32.mrf.mxu1 }
 0x106   : > { %v7759_v54 = vpop.f32.mrf.mxu0  ;;  %v7817_v55 = vpop.f32.mrf.mxu1 }
 0x107   : > { %v7760_v25 = vadd.f32 %v7759_v54, %v7758_v52  ;;  %v7757_v54 = vadd.f32 %v7756_v50, %v7755_v48 }
 0x108   : > { %v7761_v56 = vpop.f32.mrf.mxu0  ;;  %v7819_v57 = vpop.f32.mrf.mxu1 }
 0x10a   : > { %v7762_v58 = vpop.f32.mrf.mxu0  ;;  %v7820_v59 = vpop.f32.mrf.mxu1 }
 0x10b   : > { %v7763_v26 = vadd.f32 %v7762_v58, %v7761_v56  ;;  %v608_v56 = vadd.f32 %v7760_v25, %v9975_v19  ;;  %v7818_v58 = vadd.f32 %v7817_v55, %v7816_v53  ;;  %v7751_v53 = vadd.f32 %v9993_v42, %v9985_v38 }
 0x10c   : > { %v7764_v60 = vpop.f32.mrf.mxu0  ;;  %v7822_v61 = vpop.f32.mrf.mxu1  ;;  %v7812_v55 = vadd.f32 %v9999_v47, %v9997_v45  ;;  %v600_v45 = vadd.f32 %v7754_v24, %v9975_v19  ;;  %v603_v47 = vadd.f32 %v7757_v54, %v9975_v19  ;;  %v592_v25 = vadd.f32 %v10007_v23, %v9975_v19  ;;  %v9580_v54 = vld [vmem:[%s11862_s5 + $0x10] sm:$0xff]  }
 0x10e   : > { %v7765_v62 = vpop.f32.mrf.mxu0  ;;  %v7823_v63 = vpop.f32.mrf.mxu1 }
 0x10f   : > { %v7766_v15 = vadd.f32 %v7765_v62, %v7764_v60  ;;  %v7824_v60 = vadd.f32 %v7823_v63, %v7822_v61 }
 0x110   : > { %v7767_v0 = vpop.f32.mrf.mxu0  ;;  %v7825_v1 = vpop.f32.mrf.mxu1 }
 0x111   : > { %v616_v37 = vadd.f32 %v7766_v15, %v9975_v19 }
 0x112   : > { %v7768_v2 = vpop.f32.mrf.mxu0  ;;  %v7826_v3 = vpop.f32.mrf.mxu1 }
 0x113   : > { %v7769_v16 = vadd.f32 %v7768_v2, %v7767_v0  ;;  %v7827_v31 = vadd.f32 %v7826_v3, %v7825_v1  ;;  %v7821_v1 = vadd.f32 %v7820_v59, %v7819_v57  ;;  %v7815_v57 = vadd.f32 %v10003_v51, %v10001_v49 }
 0x114   : > { %v7770_v4 = vpop.f32.mrf.mxu0  ;;  %v7828_v5 = vpop.f32.mrf.mxu1  ;;  %v797_v49 = vadd.f32 %v7818_v58, %v9975_v19  ;;  %v643_v51 = vmax.f32 %v608_v56, 0.0  ;;  %v10129_v58 = vld [vmem:[%s11858_s1 + $0x18] sm:$0xff]  }
 0x115   : > { %v619_v62 = vadd.f32 %v7769_v16, %v9975_v19  ;;  %v808_v61 = vadd.f32 %v7827_v31, %v9975_v19  ;;  %v800_v59 = vadd.f32 %v7821_v1, %v9975_v19 }
 0x116   : > { %v7771_v6 = vpop.f32.mrf.mxu0  ;;  %v7829_v7 = vpop.f32.mrf.mxu1 }
 0x117   : > { %v7772_v10 = vadd.f32 %v7771_v6, %v7770_v4  ;;  %v7830_v17 = vadd.f32 %v7829_v7, %v7828_v5  ;;  %v611_v7 = vadd.f32 %v7763_v26, %v9975_v19  ;;  %v595_v26 = vadd.f32 %v7751_v53, %v9975_v19 }
 0x118   : > { %v7773_v8 = vpop.f32.mrf.mxu0  ;;  %v7831_v9 = vpop.f32.mrf.mxu1 }
 0x119   : > { %v624_v21 = vadd.f32 %v7772_v10, %v9975_v19  ;;  %v813_v0 = vadd.f32 %v7830_v17, %v9975_v19  ;;  %v646_v10 = vmax.f32 %v619_v62, 0.0  ;;  %v644_v15 = vmax.f32 %v611_v7, 0.0 }
 0x11a   : > { %v7774_v11 = vpop.f32.mrf.mxu0  ;;  %v7832_v12 = vpop.f32.mrf.mxu1 }
 0x11b   : > { %v7775_v13 = vadd.f32 %v7774_v11, %v7773_v8  ;;  %v7833_v14 = vadd.f32 %v7832_v12, %v7831_v9  ;;  %v647_v33 = vmax.f32 %v624_v21, 0.0  ;;  %v645_v8 = vmax.f32 %v616_v37, 0.0 }
 0x11c   : > { %v7776_v18 = vpop.f32.mrf.mxu0  ;;  %v7834_v20 = vpop.f32.mrf.mxu1  ;;  %v805_v9 = vadd.f32 %v7824_v60, %v9975_v19  ;;  %v836_v11 = vmax.f32 %v813_v0, 0.0  ;;  %v792_v21 = vadd.f32 %v7815_v57, %v9975_v19 }
 0x11d   : > { %v627_v22 = vadd.f32 %v7775_v13, %v9975_v19  ;;  %v816_v32 = vadd.f32 %v7833_v14, %v9975_v19  ;;  %v835_v13 = vmax.f32 %v808_v61, 0.0  ;;  %v10051_v17 = vpack.c.bf16 %v646_v10, %v645_v8 }
 0x11e   : > { %v7777_v27 = vpop.f32.mrf.mxu0  ;;  %v7835_v30 = vpop.f32.mrf.mxu1  ;;  %v834_v16 = vmax.f32 %v805_v9, 0.0  ;;  %v831_v23 = vmax.f32 %v792_v21, 0.0 }
 0x11f   : > { %v7778_v35 = vadd.f32 %v7777_v27, %v7776_v18  ;;  %v7836_v36 = vadd.f32 %v7835_v30, %v7834_v20  ;;  %v648_v44 = vmax.f32 %v627_v22, 0.0  ;;  %v837_v63 = vmax.f32 %v816_v32, 0.0 }
 0x120   : > { %v7837_v2 = vpop.f32.mrf.mxu1  ;;  %v7779_v28 = vpop.f32.mrf.mxu0  ;;  %v7806_v18 = vadd.f32 %v9983_v34, %v9979_v29  ;;  %v7809_v20 = vadd.f32 %v9995_v43, %v9987_v39  ;;  %v833_v22 = vmax.f32 %v800_v59, 0.0  ;;  %v10060_v24 = vpack.c.bf16 %v835_v13, %v834_v16 }
 0x121   : > { %v632_v46 = vadd.f32 %v7778_v35, %v9975_v19  ;;  %v821_v52 = vadd.f32 %v7836_v36, %v9975_v19  ;;  %v10019_v12 = vpack.c.bf16 %v648_v44, %v647_v33  ;;  %v10032_v14 = vpack.c.bf16 %v837_v63, %v836_v11  ;;  %v9579_v44 = vld [vmem:[%s11862_s5 + $0x18] sm:$0xff]  }
 0x122   : > { %v7838_v3 = vpop.f32.mrf.mxu1  ;;  %v7780_v4 = vpop.f32.mrf.mxu0  ;;  %v789_v27 = vadd.f32 %v7812_v55, %v9975_v19  ;;  %v641_v29 = vmax.f32 %v600_v45, 0.0  ;;  %v642_v34 = vmax.f32 %v603_v47, 0.0  ;;  %v832_v30 = vmax.f32 %v797_v49, 0.0  ;;  %v10151_v55 = vld [vmem:[%s11858_s1 + $0x28] ss:$0 sps:$4 sm:$0x11]  }
 0x123   : > { %v649_v5 = vmax.f32 %v632_v46, 0.0  ;;  %v838_v6 = vmax.f32 %v821_v52, 0.0  ;;  %v10068_v39 = vpack.c.bf16 %v644_v15, %v643_v51  ;;  %v784_v43 = vadd.f32 %v7809_v20, %v9975_v19  ;;  %v10106_v46 = vld [vmem:[%s11858_s1 + $0x8] sm:$0xff]   ;;  %v10113_v52 = vld [vmem:[%s11858_s1 + $0x10] sm:$0xff]   ;;  %v10134_v3 = vld [vmem:[%s11858_s1 + $0x20] sm:$0xff]  }
 0x124   : > { %v10073_v31 = vpack.c.bf16 %v833_v22, %v832_v30  ;;  %v781_v32 = vadd.f32 %v7806_v18, %v9975_v19  ;;  %v639_v35 = vmax.f32 %v592_v25, 0.0  ;;  %v640_v36 = vmax.f32 %v595_v26, 0.0  ;;  %v7914_v56 = vpop.f32.mrf.mxu1 }
 0x125   : > { %v10021_v48 = vpack.c.bf16 %v649_v5, %v649_v5  ;;  %v10023_v50 = vpack.c.bf16 %v838_v6, %v838_v6  ;;  %v830_v37 = vmax.f32 %v789_v27, 0.0  ;;  %v10078_v60 = vpack.c.bf16 %v642_v34, %v641_v29  ;;  %v7856_v5 = vpop.f32.mrf.mxu0 }
 0x126   : > { %v829_v62 = vmax.f32 %v784_v43, 0.0  ;;  %v828_v2 = vmax.f32 %v781_v32, 0.0  ;;  %v10086_v28 = vpack.c.bf16 %v640_v36, %v639_v35  ;;  %v7915_v1 = vpop.f32.mrf.mxu1 }
 0x127   : > { %9450 = vmatprep.subr.msk.bf16.mxu0 %vm1283_vm1, %v10021_v48  ;;  %9451 = vmatprep.subr.msk.bf16.mxu1 %vm1283_vm1, %v10023_v50  ;;  %v10040_v38 = vsel %vm1283_vm1, %v10021_v48, 0  ;;  %v10044_v42 = vsel %vm1283_vm1, %v10023_v50, 0  ;;  %v10082_v0 = vpack.c.bf16 %v831_v23, %v830_v37  ;;  %v7916_v4 = vadd.f32 %v7915_v1, %v7914_v56  ;;  %v7857_v8 = vpop.f32.mrf.mxu0 }
 0x128   : > { %8455 = vmatpush3.bf16.msra.mxu0 %v10040_v38  ;;  %8481 = vmatpush3.bf16.msra.mxu1 %v10044_v42  ;;  %v10090_v33 = vpack.c.bf16 %v829_v62, %v828_v2  ;;  %v7917_v61 = vpop.f32.mrf.mxu1  ;;  %v7858_v10 = vadd.f32 %v7857_v8, %v7856_v5 }
 0x129   : > { %8482 = vmatprep.subr.bf16.mxu1 %v10032_v14  ;;  %8456 = vmatprep.subr.bf16.mxu0 %v10019_v12  ;;  %v1151_v63 = vadd.f32 %v7916_v4, %v9975_v19  ;;  %v7859_v57 = vpop.f32.mrf.mxu0 }
 0x12a   : > { %v7918_v6 = vpop.f32.mrf.mxu1  ;;  %v962_v13 = vadd.f32 %v7858_v10, %v9975_v19 }
 0x12b   : > { %v7919_v7 = vadd.f32 %v7918_v6, %v7917_v61  ;;  %v1204_v11 = vmax.f32 %v1151_v63, 0.0  ;;  %v7860_v49 = vpop.f32.mrf.mxu0 }
 0x12c   : > { %8457 = vmatpush3.bf16.msra.mxu0 %v10019_v12  ;;  %8483 = vmatpush3.bf16.msra.mxu1 %v10032_v14  ;;  %v7920_v9 = vpop.f32.mrf.mxu1  ;;  %v7861_v15 = vadd.f32 %v7860_v49, %v7859_v57  ;;  %v1015_v22 = vmax.f32 %v962_v13, 0.0 }
 0x12d   : > { %8484 = vmatprep.subr.bf16.mxu1 %v10060_v24  ;;  %8458 = vmatprep.subr.bf16.mxu0 %v10051_v17  ;;  %v1154_v53 = vadd.f32 %v7919_v7, %v9975_v19  ;;  %v7862_v20 = vpop.f32.mrf.mxu0 }
 0x12e   : > { %v7921_v59 = vpop.f32.mrf.mxu1  ;;  %v965_v25 = vadd.f32 %v7861_v15, %v9975_v19 }
 0x12f   : > { %v1205_v45 = vmax.f32 %v1154_v53, 0.0  ;;  %v7922_v47 = vadd.f32 %v7921_v59, %v7920_v9  ;;  %v7863_v27 = vpop.f32.mrf.mxu0 }
 0x130   : > { %8459 = vmatpush3.bf16.msra.mxu0 %v10051_v17  ;;  %8485 = vmatpush3.bf16.msra.mxu1 %v10060_v24  ;;  %v7923_v51 = vpop.f32.mrf.mxu1  ;;  %v1016_v34 = vmax.f32 %v965_v25, 0.0  ;;  %v7864_v30 = vadd.f32 %v7863_v27, %v7862_v20 }
 0x131   : > { %8486 = vmatprep.subr.bf16.mxu1 %v10073_v31  ;;  %8460 = vmatprep.subr.bf16.mxu0 %v10068_v39  ;;  %v10154_v16 = vpack.c.bf16 %v1205_v45, %v1204_v11  ;;  %v1159_v18 = vadd.f32 %v7922_v47, %v9975_v19  ;;  %v7865_v32 = vpop.f32.mrf.mxu0 }
 0x132   : > { %v7924_v21 = vpop.f32.mrf.mxu1  ;;  %v10163_v36 = vpack.c.bf16 %v1016_v34, %v1015_v22  ;;  %v970_v37 = vadd.f32 %v7864_v30, %v9975_v19 }
 0x133   : > { %v7925_v26 = vadd.f32 %v7924_v21, %v7923_v51  ;;  %v1206_v43 = vmax.f32 %v1159_v18, 0.0 }
 0x134   : > { %8461 = vmatpush3.bf16.msra.mxu0 %v10068_v39  ;;  %8487 = vmatpush3.bf16.msra.mxu1 %v10073_v31  ;;  %v7926_v29 = vpop.f32.mrf.mxu1  ;;  %v1017_v5 = vmax.f32 %v970_v37, 0.0 }
 0x135   : > { %8488 = vmatprep.subr.bf16.mxu1 %v10082_v0  ;;  %8462 = vmatprep.subr.bf16.mxu0 %v10078_v60  ;;  %v1162_v23 = vadd.f32 %v7925_v26, %v9975_v19 }
 0x136   : > { %v7927_v35 = vpop.f32.mrf.mxu1 }
 0x137   : > { %v1207_v62 = vmax.f32 %v1162_v23, 0.0  ;;  %v7928_v2 = vadd.f32 %v7927_v35, %v7926_v29 }
 0x138   : > { %8463 = vmatpush3.bf16.msra.mxu0 %v10078_v60  ;;  %8489 = vmatpush3.bf16.msra.mxu1 %v10082_v0 }
 0x139   : > { %8490 = vmatprep.subr.bf16.mxu1 %v10090_v33  ;;  %8464 = vmatprep.subr.bf16.mxu0 %v10086_v28  ;;  %v10166_v1 = vpack.c.bf16 %v1207_v62, %v1206_v43  ;;  %v1167_v4 = vadd.f32 %v7928_v2, %v9975_v19 }
 0x13b   : > { %v1208_v53 = vmax.f32 %v1167_v4, 0.0 }
 0x13c   : > { %8465 = vmatpush3.bf16.msra.mxu0 %v10086_v28  ;;  %8491 = vmatpush3.bf16.msra.mxu1 %v10090_v33 }
 0x13d   : > { %8492 = vmatprep.subr.bf16.mxu1 %v9991_v41  ;;  %8466 = vmatprep.subr.bf16.mxu0 %v9989_v40 }
 0x140   : > { %8467 = vmatpush3.bf16.msra.mxu0 %v9989_v40  ;;  %8493 = vmatpush3.bf16.msra.mxu1 %v9991_v41 }
 0x141   : > { %8506 = vmatprep.subr.bf16.mxu0 %v9579_v44 }
 0x143   : > { %8469 = vmatmul.mubr.msk.bf16.vlgmr.msra.gmra.mxu0 %vm1264_vm0, %v10106_v46  ;;  %8495 = vmatmul.mubr.msk.bf16.vlgmr.msra.gmra.mxu1 %vm1264_vm0, %v10106_v46 }
 0x144   : > { %8498 = vmatprep.mubr.msk.bf16.mxu1 %vm1264_vm0, %v10113_v52  ;;  %8472 = vmatprep.mubr.msk.bf16.mxu0 %vm1264_vm0, %v10113_v52 }
 0x145   : > { %8507 = vmatpush3.bf16.msra.mxu0 %v9579_v44  ;;  %v7866_v44 = vpop.f32.mrf.mxu0 }
 0x146   : > { %8508 = vmatprep.subr.bf16.mxu0 %v9580_v54  ;;  %v7867_v56 = vadd.f32 %v7866_v44, %v7865_v32 }
 0x147   : > { %v7868_v61 = vpop.f32.mrf.mxu0 }
 0x148   : > { %v973_v6 = vadd.f32 %v7867_v56, %v9975_v19 }
 0x149   : > { %8509 = vmatpush3.bf16.msra.mxu0 %v9580_v54  ;;  %v7929_v54 = vpop.f32.mrf.mxu1  ;;  %v7869_v8 = vpop.f32.mrf.mxu0 }
 0x14a   : > { %9452 = vmatprep.subr.msk.bf16.mxu0 %vm1283_vm1, %v10021_v48  ;;  %v1018_v10 = vmax.f32 %v973_v6, 0.0  ;;  %v7870_v11 = vadd.f32 %v7869_v8, %v7868_v61 }
 0x14b   : > { %8499 = vmatmul.mubr.msk.bf16.gmra.mxu1 %vm1264_vm0, %v10129_v58  ;;  %8473 = vmatmul.mubr.msk.bf16.gmra.mxu0 %vm1264_vm0, %v10129_v58  ;;  %v7930_v63 = vpop.f32.mrf.mxu1  ;;  %v7871_v59 = vpop.f32.mrf.mxu0 }
 0x14c   : > { %8502 = vmatprep.mubr.msk.bf16.mxu1 %vm1264_vm0, %v10134_v3  ;;  %8476 = vmatprep.mubr.msk.bf16.mxu0 %vm1264_vm0, %v10134_v3  ;;  %v7931_v7 = vadd.f32 %v7930_v63, %v7929_v54  ;;  %v10171_v45 = vpack.c.bf16 %v1018_v10, %v1017_v5  ;;  %v978_v47 = vadd.f32 %v7870_v11, %v9975_v19 }
 0x14d   : > { %v7932_v9 = vpop.f32.mrf.mxu1  ;;  %v7872_v15 = vpop.f32.mrf.mxu0 }
 0x14e   : > { %v1170_v57 = vadd.f32 %v7931_v7, %v9975_v19  ;;  %v7873_v20 = vadd.f32 %v7872_v15, %v7871_v59  ;;  %v1019_v27 = vmax.f32 %v978_v47, 0.0 }
 0x14f   : > { %v7933_v13 = vpop.f32.mrf.mxu1  ;;  %v7874_v25 = vpop.f32.mrf.mxu0 }
 0x150   : > { %v1209_v49 = vmax.f32 %v1170_v57, 0.0  ;;  %v7934_v51 = vadd.f32 %v7933_v13, %v7932_v9  ;;  %v981_v29 = vadd.f32 %v7873_v20, %v9975_v19 }
 0x151   : > { %v7935_v18 = vpop.f32.mrf.mxu1  ;;  %v7875_v30 = vpop.f32.mrf.mxu0 }
 0x152   : > { %v10174_v21 = vpack.c.bf16 %v1209_v49, %v1208_v53  ;;  %v1175_v22 = vadd.f32 %v7934_v51, %v9975_v19  ;;  %v1020_v23 = vmax.f32 %v981_v29, 0.0  ;;  %v7876_v32 = vadd.f32 %v7875_v30, %v7874_v25 }
 0x153   : > { %8503 = vmatmul.mubr.msk.bf16.gmra.mxu1 %vm1264_vm0, %v10151_v55  ;;  %8477 = vmatmul.mubr.msk.bf16.gmra.mxu0 %vm1264_vm0, %v10151_v55  ;;  %v7936_v26 = vpop.f32.mrf.mxu1  ;;  %v7877_v62 = vpop.f32.mrf.mxu0 }
 0x154   : > { %v7937_v34 = vadd.f32 %v7936_v26, %v7935_v18  ;;  %v1210_v35 = vmax.f32 %v1175_v22, 0.0  ;;  %v10179_v44 = vpack.c.bf16 %v1020_v23, %v1019_v27  ;;  %v986_v54 = vadd.f32 %v7876_v32, %v9975_v19 }
 0x155   : > { %v7938_v43 = vpop.f32.mrf.mxu1  ;;  %v7878_v61 = vpop.f32.mrf.mxu0 }
 0x156   : > { %v1178_v37 = vadd.f32 %v7937_v34, %v9975_v19  ;;  %v7879_v5 = vadd.f32 %v7878_v61, %v7877_v62  ;;  %v1021_v10 = vmax.f32 %v986_v54, 0.0 }
 0x157   : > { %v7939_v2 = vpop.f32.mrf.mxu1  ;;  %v7880_v8 = vpop.f32.mrf.mxu0 }
 0x158   : > { %v1211_v56 = vmax.f32 %v1178_v37, 0.0  ;;  %v7940_v4 = vadd.f32 %v7939_v2, %v7938_v43  ;;  %v989_v11 = vadd.f32 %v7879_v5, %v9975_v19 }
 0x159   : > { %v7941_v63 = vpop.f32.mrf.mxu1  ;;  %v7881_v57 = vpop.f32.mrf.mxu0 }
 0x15a   : > { %v10182_v6 = vpack.c.bf16 %v1211_v56, %v1210_v35  ;;  %v1183_v7 = vadd.f32 %v7940_v4, %v9975_v19  ;;  %v1022_v13 = vmax.f32 %v989_v11, 0.0  ;;  %v7882_v47 = vadd.f32 %v7881_v57, %v7880_v8 }
 0x15b   : > { %v7942_v9 = vpop.f32.mrf.mxu1  ;;  %v7883_v15 = vpop.f32.mrf.mxu0 }
 0x15c   : > { %v7943_v53 = vadd.f32 %v7942_v9, %v7941_v63  ;;  %v1212_v49 = vmax.f32 %v1183_v7, 0.0  ;;  %v10187_v20 = vpack.c.bf16 %v1022_v13, %v1021_v10  ;;  %v994_v22 = vadd.f32 %v7882_v47, %v9975_v19 }
 0x15d   : > { %v7944_v59 = vpop.f32.mrf.mxu1  ;;  %v7884_v27 = vpop.f32.mrf.mxu0 }
 0x15e   : > { %v1186_v51 = vadd.f32 %v7943_v53, %v9975_v19  ;;  %v7885_v34 = vadd.f32 %v7884_v27, %v7883_v15  ;;  %v1023_v35 = vmax.f32 %v994_v22, 0.0 }
 0x15f   : > { %v7945_v18 = vpop.f32.mrf.mxu1  ;;  %v7886_v23 = vpop.f32.mrf.mxu0 }
 0x160   : > { %v1213_v25 = vmax.f32 %v1186_v51, 0.0  ;;  %v7946_v26 = vadd.f32 %v7945_v18, %v7944_v59  ;;  %v997_v37 = vadd.f32 %v7885_v34, %v9975_v19  ;;  %v9581_v34 = vld [vmem:[%s11862_s5 + $0x8] sm:$0xff]  }
 0x161   : > { %v7947_v29 = vpop.f32.mrf.mxu1  ;;  %v7887_v2 = vpop.f32.mrf.mxu0  ;;  %8522 = vmatprep.subr.bf16.mxu1 %v9581_v34 }
 0x162   : > { %v10190_v30 = vpack.c.bf16 %v1213_v25, %v1212_v49  ;;  %v1191_v43 = vadd.f32 %v7946_v26, %v9975_v19  ;;  %v1024_v56 = vmax.f32 %v997_v37, 0.0  ;;  %v7888_v4 = vadd.f32 %v7887_v2, %v7886_v23  ;;  %8523 = vmatpush3.bf16.msra.mxu1 %v9581_v34  ;;  %v9583_v23 = vld [vmem:[%s11862_s5 + $0x28] sm:$0xff]  }
 0x163   : > { %v7948_v32 = vpop.f32.mrf.mxu1  ;;  %v7889_v5 = vpop.f32.mrf.mxu0 }
 0x164   : > { %v7949_v62 = vadd.f32 %v7948_v32, %v7947_v29  ;;  %v1214_v61 = vmax.f32 %v1191_v43, 0.0  ;;  %v10195_v8 = vpack.c.bf16 %v1024_v56, %v1023_v35  ;;  %v1002_v9 = vadd.f32 %v7888_v4, %v9975_v19  ;;  %v9582_v43 = vld [vmem:[%s11862_s5] sm:$0xff]  }
 0x165   : > { %v7950_v54 = vpop.f32.mrf.mxu1  ;;  %v7890_v53 = vpop.f32.mrf.mxu0  ;;  %8524 = vmatprep.subr.bf16.mxu1 %v9582_v43 }
 0x166   : > { %v1194_v63 = vadd.f32 %v7949_v62, %v9975_v19  ;;  %v7891_v59 = vadd.f32 %v7890_v53, %v7889_v5  ;;  %v1025_v51 = vmax.f32 %v1002_v9, 0.0  ;;  %8525 = vmatpush3.bf16.msra.mxu1 %v9582_v43 }
 0x167   : > { %v7951_v7 = vpop.f32.mrf.mxu1  ;;  %v7892_v47 = vpop.f32.mrf.mxu0  ;;  %8564 = vmatprep.subr.bf16.mxu1 %v9583_v23 }
 0x168   : > { %v1215_v10 = vmax.f32 %v1194_v63, 0.0  ;;  %v10198_v11 = vadd.f32 %v7951_v7, %v7950_v54  ;;  %v1005_v15 = vadd.f32 %v7891_v59, %v9975_v19 }
 0x169   : > { %v7953_v57 = vpop.f32.mrf.mxu1  ;;  %v7893_v18 = vpop.f32.mrf.mxu0 }
 0x16a   : > { %v10200_v13 = vpack.c.bf16 %v1215_v10, %v1214_v61  ;;  %v1026_v22 = vmax.f32 %v1005_v15, 0.0  ;;  %v10203_v25 = vadd.f32 %v7893_v18, %v7892_v47  ;;  %v9584_v10 = vld [vmem:[%s11862_s5 + $0x20] sm:$0xff]  }
 0x16b   : > { %v7954_v49 = vpop.f32.mrf.mxu1  ;;  %v7895_v26 = vpop.f32.mrf.mxu0 }
 0x16c   : > { %v10205_v27 = vpack.c.bf16 %v1026_v22, %v1025_v51 }
 0x16d   : > { %v7896_v29 = vpop.f32.mrf.mxu0 }
 0x203   : > { %v8470_v32 = vpop.f32.mrf.mxu0  ;;  %v8496_v35 = vpop.f32.mrf.mxu1 }
 0x205   : > { %v1321_v37 = vpop.f32.mrf.mxu0  ;;  %v1414_v62 = vpop.f32.mrf.mxu1 }
 0x207   : > { %v8471_v2 = vpop.f32.mrf.mxu0  ;;  %v8497_v54 = vpop.f32.mrf.mxu1 }
 0x208   : > { %v1368_v56 = vpack.c.bf16 %v8471_v2, %v8470_v32  ;;  %v1461_v7 = vpack.c.bf16 %v8497_v54, %v8496_v35 }
 0x209   : > { %v1324_v4 = vpop.f32.mrf.mxu0  ;;  %v1417_v61 = vpop.f32.mrf.mxu1 }
 0x20a   : > { %v1367_v63 = vpack.c.bf16 %v1324_v4, %v1321_v37  ;;  %v1460_v5 = vpack.c.bf16 %v1417_v61, %v1414_v62  ;;  %v10239_v4 = vld [vmem:[%s11858_s1 + $0x2c] sm:$0xff]  }
 0x20b   : > { %v8500_v9 = vpop.f32.mrf.mxu1  ;;  %v8474_v53 = vpop.f32.mrf.mxu0 }
 0x20c   : > { %8510 = vmatprep.mubr.msk.bf16.mxu0 %vm1483_vm2, %v1460_v5  ;;  %8526 = vmatprep.mubr.msk.bf16.mxu1 %vm1483_vm2, %v1367_v63  ;;  %v9591_v5 = vld [vmem:[%s11862_s5 + $0x38] sm:$0xff]  }
 0x20d   : > { %8511 = vmatmul.mubr.msk.bf16.vlgmr.msra.gmra.mxu0 %vm1483_vm2, %v1461_v7  ;;  %8527 = vmatmul.mubr.msk.bf16.vlgmr.msra.gmra.mxu1 %vm1483_vm2, %v1368_v56  ;;  %v1430_v57 = vpop.f32.mrf.mxu1  ;;  %v1337_v59 = vpop.f32.mrf.mxu0  ;;  %v10258_v7 = vld [vmem:[%s11858_s1 + $0x34] sm:$0xff]  }
 0x20e   : > { %8539 = vmatpush3.bf16.msra.mxu0 %v10040_v38  ;;  %8565 = vmatpush3.bf16.msra.mxu1 %v9583_v23 }
 0x20f   : > { %8540 = vmatprep.subr.bf16.mxu0 %v10019_v12  ;;  %8566 = vmatprep.subr.bf16.mxu1 %v9584_v10  ;;  %v8501_v47 = vpop.f32.mrf.mxu1  ;;  %v8475_v49 = vpop.f32.mrf.mxu0 }
 0x210   : > { %v1370_v15 = vpack.c.bf16 %v8475_v49, %v8474_v53  ;;  %v1463_v29 = vpack.c.bf16 %v8501_v47, %v8500_v9  ;;  %v10264_v9 = vld [vmem:[%s11858_s1 + $0x3c] sm:$0xff]   ;;  %v10275_v53 = vld [vmem:[%s11858_s1 + $0x44] sm:$0xff]   ;;  %v10294_v49 = vld [vmem:[%s11858_s1 + $0x54] ss:$0 sps:$4 sm:$0x11]  }
 0x211   : > { %v1433_v51 = vpop.f32.mrf.mxu1  ;;  %v1340_v18 = vpop.f32.mrf.mxu0 }
 0x212   : > { %8541 = vmatpush3.bf16.msra.mxu0 %v10019_v12  ;;  %8567 = vmatpush3.bf16.msra.mxu1 %v9584_v10  ;;  %v1462_v22 = vpack.c.bf16 %v1433_v51, %v1430_v57  ;;  %v1369_v26 = vpack.c.bf16 %v1340_v18, %v1337_v59  ;;  %v1010_v10 = vadd.f32 %v10203_v25, %v9975_v19  ;;  %v10280_v57 = vld [vmem:[%s11858_s1 + $0x4c] sm:$0xff]  }
 0x213   : > { %8542 = vmatprep.subr.bf16.mxu0 %v10051_v17  ;;  %9453 = vmatprep.subr.msk.bf16.mxu1 %vm1283_vm1, %v10023_v50  ;;  %v8504_v34 = vpop.f32.mrf.mxu1  ;;  %v8478_v43 = vpop.f32.mrf.mxu0  ;;  %v9592_v25 = vld [vmem:[%s11862_s5 + $0x30] sm:$0xff]  }
 0x214   : > { %8514 = vmatprep.mubr.msk.bf16.mxu0 %vm1483_vm2, %v1462_v22  ;;  %8530 = vmatprep.mubr.msk.bf16.mxu1 %vm1483_vm2, %v1369_v26  ;;  %v1372_v2 = vpack.c.bf16 %v8478_v43, %v8478_v43  ;;  %v1465_v63 = vpack.c.bf16 %v8504_v34, %v8504_v34  ;;  %v1027_v59 = vmax.f32 %v1010_v10, 0.0 }
 0x215   : > { %v1446_v23 = vpop.f32.mrf.mxu1  ;;  %8515 = vmatmul.mubr.msk.bf16.gmra.mxu0 %vm1483_vm2, %v1463_v29  ;;  %v1353_v32 = vpop.f32.mrf.mxu0  ;;  %8531 = vmatmul.mubr.msk.bf16.gmra.mxu1 %vm1483_vm2, %v1370_v15 }
 0x216   : > { %8543 = vmatpush3.bf16.msra.mxu0 %v10051_v17  ;;  %v10286_v47 = vpack.c.bf16 %v1027_v59, %v1027_v59 }
 0x217   : > { %8544 = vmatprep.subr.bf16.mxu0 %v10068_v39  ;;  %v8505_v35 = vpop.f32.mrf.mxu1  ;;  %v8479_v37 = vpop.f32.mrf.mxu0 }
 0x219   : > { %v1449_v62 = vpop.f32.mrf.mxu1  ;;  %v1356_v54 = vpop.f32.mrf.mxu0 }
 0x21a   : > { %8545 = vmatpush3.bf16.msra.mxu0 %v10068_v39  ;;  %v1464_v56 = vpack.c.bf16 %v1449_v62, %v1446_v23  ;;  %v1371_v61 = vpack.c.bf16 %v1356_v54, %v1353_v32 }
 0x21b   : > { %8546 = vmatprep.subr.bf16.mxu0 %v10078_v60 }
 0x21c   : > { %8518 = vmatprep.mubr.msk.bf16.mxu0 %vm1483_vm2, %v1464_v56  ;;  %8534 = vmatprep.mubr.msk.bf16.mxu1 %vm1483_vm2, %v1371_v61 }
 0x21d   : > { %8519 = vmatmul.mubr.msk.bf16.gmra.mxu0 %vm1483_vm2, %v1465_v63  ;;  %8535 = vmatmul.mubr.msk.bf16.gmra.mxu1 %vm1483_vm2, %v1372_v2 }
 0x21e   : > { %8547 = vmatpush3.bf16.msra.mxu0 %v10078_v60  ;;  %8552 = vmatprep.mubr.msk.bf16.mxu0 %vm1264_vm0, %v10239_v4 }
 0x21f   : > { %8548 = vmatprep.subr.bf16.mxu0 %v10086_v28 }
 0x222   : > { %8549 = vmatpush3.bf16.msra.mxu0 %v10086_v28 }
 0x223   : > { %8550 = vmatprep.subr.bf16.mxu0 %v9989_v40 }
 0x226   : > { %8551 = vmatpush3.bf16.msra.mxu0 %v9989_v40 }
 0x227   : > { %8606 = vmatprep.subr.bf16.mxu0 %v9591_v5 }
 0x229   : > { %8553 = vmatmul.mubr.msk.bf16.vlgmr.msra.gmra.mxu0 %vm1264_vm0, %v10258_v7 }
 0x22a   : > { %8556 = vmatprep.mubr.msk.bf16.mxu0 %vm1264_vm0, %v10264_v9  ;;  %8607 = vmatpush3.bf16.msra.mxu0 %v9591_v5 }
 0x22b   : > { %8608 = vmatprep.subr.bf16.mxu0 %v9592_v25 }
 0x22e   : > { %8609 = vmatpush3.bf16.msra.mxu0 %v9592_v25 }
 0x22f   : > { %9454 = vmatprep.subr.msk.bf16.mxu0 %vm1283_vm1, %v10286_v47 }
 0x231   : > { %8557 = vmatmul.mubr.msk.bf16.gmra.mxu0 %vm1264_vm0, %v10275_v53 }
 0x232   : > { %8560 = vmatprep.mubr.msk.bf16.mxu0 %vm1264_vm0, %v10280_v57 }
 0x239   : > { %8561 = vmatmul.mubr.msk.bf16.gmra.mxu0 %vm1264_vm0, %v10294_v49 }
 0x2cd   : > { %v8512_v51 = vpop.f32.mrf.mxu0  ;;  %v8528_v15 = vpop.f32.mrf.mxu1 }
 0x2ce   : > { %v10300_v18 = vadd.f32 %v8528_v15, %v8512_v51 }
 0x2cf   : > { %v1536_v22 = vpop.f32.mrf.mxu0  ;;  %v1646_v26 = vpop.f32.mrf.mxu1 }
 0x2d0   : > { %v10302_v29 = vadd.f32 %v1646_v26, %v1536_v22 }
 0x2d1   : > { %v8513_v34 = vpop.f32.mrf.mxu0  ;;  %v8529_v43 = vpop.f32.mrf.mxu1 }
 0x2d2   : > { %v10304_v23 = vadd.f32 %v8529_v43, %v8513_v34 }
 0x2d3   : > { %v10306_v32 = vpop.f32.mrf.mxu0  ;;  %v10308_v35 = vpop.f32.mrf.mxu1 }
 0x2d4   : > { %11870 = vst [vmem:[#allocation3_spill] sm:$0xff] %v10306_v32  ;;  %11871 = vst [vmem:[#allocation4_spill] sm:$0xff] %v10308_v35 }
 0x2d5   : > { %v8516_v37 = vpop.f32.mrf.mxu0  ;;  %v8532_v62 = vpop.f32.mrf.mxu1 }
 0x2d6   : > { %v10310_v2 = vadd.f32 %v8532_v62, %v8516_v37 }
 0x2d7   : > { %v1552_v54 = vpop.f32.mrf.mxu0  ;;  %v1662_v56 = vpop.f32.mrf.mxu1 }
 0x2d8   : > { %v10312_v61 = vadd.f32 %v1662_v56, %v1552_v54 }
 0x2d9   : > { %v8517_v63 = vpop.f32.mrf.mxu0  ;;  %v8533_v5 = vpop.f32.mrf.mxu1 }
 0x2da   : > { %v10314_v10 = vadd.f32 %v8533_v5, %v8517_v63 }
 0x2db   : > { %v10316_v59 = vpop.f32.mrf.mxu0  ;;  %v10318_v25 = vpop.f32.mrf.mxu1 }
 0x2dc   : > { %11872 = vst [vmem:[#allocation5_spill] sm:$0xff] %v10316_v59  ;;  %11873 = vst [vmem:[#allocation6_spill] sm:$0xff] %v10318_v25 }
 0x2dd   : > { %v8520_v51 = vpop.f32.mrf.mxu0  ;;  %v8536_v15 = vpop.f32.mrf.mxu1 }
 0x2de   : > { %v10320_v22 = vadd.f32 %v8536_v15, %v8520_v51 }
 0x2df   : > { %v1568_v26 = vpop.f32.mrf.mxu0  ;;  %v1678_v34 = vpop.f32.mrf.mxu1 }
 0x2e0   : > { %v10322_v43 = vadd.f32 %v1678_v34, %v1568_v26 }
 0x2e1   : > { %v8521_v37 = vpop.f32.mrf.mxu0  ;;  %v8537_v62 = vpop.f32.mrf.mxu1 }
 0x2e3   : > { %v10324_v54 = vpop.f32.mrf.mxu0 }
 0x2e4   : > { %11874 = vst [vmem:[#allocation7_spill] sm:$0xff] %v10324_v54 }
 0x2e9   : > { %v8554_v56 = vpop.f32.mrf.mxu0 }
 0x2eb   : > { %v1784_v35 = vpop.f32.mrf.mxu0 }
 0x2ed   : > { %v8555_v63 = vpop.f32.mrf.mxu0 }
 0x2ee   : > { %v1831_v59 = vpack.c.bf16 %v8555_v63, %v8554_v56  ;;  %v1199_v56 = vadd.f32 %v10198_v11, %v9975_v19  ;;  %v9594_v63 = vld [vmem:[%s11862_s5 + $0x40] sm:$0xff]   ;;  %v10369_v19 = vpop.f32.mrf.mxu1 }
 0x2ef   : > { %v1787_v5 = vpop.f32.mrf.mxu0  ;;  %11875 = vst [vmem:[#allocation8_spill] sm:$0xff] %v10369_v19 }
 0x2f0   : > { %v1830_v32 = vpack.c.bf16 %v1787_v5, %v1784_v35  ;;  %v1216_v5 = vmax.f32 %v1199_v56, 0.0 }
 0x2f1   : > { %v8558_v40 = vpop.f32.mrf.mxu0 }
 0x2f2   : > { %8568 = vmatprep.mubr.msk.bf16.mxu1 %vm1483_vm2, %v1830_v32 }
 0x2f3   : > { %v1800_v25 = vpop.f32.mrf.mxu0  ;;  %8569 = vmatmul.mubr.msk.bf16.vlgmr.msra.gmra.mxu1 %vm1483_vm2, %v1831_v59 }
 0x2f4   : > { %8581 = vmatpush3.bf16.msra.mxu1 %v10044_v42 }
 0x2f5   : > { %8582 = vmatprep.subr.bf16.mxu1 %v10032_v14  ;;  %v8559_v51 = vpop.f32.mrf.mxu0 }
 0x2f6   : > { %v1833_v34 = vpack.c.bf16 %v8559_v51, %v8558_v40  ;;  %v9593_v40 = vld [vmem:[%s11862_s5 + $0x48] sm:$0xff]   ;;  %v10359_v51 = vpack.c.bf16 %v1216_v5, %v1216_v5 }
 0x2f7   : > { %v1803_v15 = vpop.f32.mrf.mxu0 }
 0x2f8   : > { %v1832_v26 = vpack.c.bf16 %v1803_v15, %v1800_v25  ;;  %8583 = vmatpush3.bf16.msra.mxu1 %v10032_v14 }
 0x2f9   : > { %8584 = vmatprep.subr.bf16.mxu1 %v10060_v24  ;;  %v8562_v35 = vpop.f32.mrf.mxu0 }
 0x2fa   : > { %8572 = vmatprep.mubr.msk.bf16.mxu1 %vm1483_vm2, %v1832_v26  ;;  %v1835_v25 = vpack.c.bf16 %v8562_v35, %v8562_v35 }
 0x2fb   : > { %v1816_v37 = vpop.f32.mrf.mxu0  ;;  %8573 = vmatmul.mubr.msk.bf16.gmra.mxu1 %vm1483_vm2, %v1833_v34 }
 0x2fc   : > { %8585 = vmatpush3.bf16.msra.mxu1 %v10060_v24 }
 0x2fd   : > { %8586 = vmatprep.subr.bf16.mxu1 %v10073_v31  ;;  %v8563_v32 = vpop.f32.mrf.mxu0 }
 0x2ff   : > { %v1819_v59 = vpop.f32.mrf.mxu0 }
 0x300   : > { %v1834_v62 = vpack.c.bf16 %v1819_v59, %v1816_v37  ;;  %8587 = vmatpush3.bf16.msra.mxu1 %v10073_v31 }
 0x301   : > { %8588 = vmatprep.subr.bf16.mxu1 %v10082_v0 }
 0x302   : > { %8576 = vmatprep.mubr.msk.bf16.mxu1 %vm1483_vm2, %v1834_v62 }
 0x303   : > { %8577 = vmatmul.mubr.msk.bf16.gmra.mxu1 %vm1483_vm2, %v1835_v25 }
 0x304   : > { %8589 = vmatpush3.bf16.msra.mxu1 %v10082_v0  ;;  %8594 = vmatprep.mubr.msk.bf16.mxu1 %vm1264_vm0, %v10239_v4 }
 0x305   : > { %8590 = vmatprep.subr.bf16.mxu1 %v10090_v33 }
 0x308   : > { %8591 = vmatpush3.bf16.msra.mxu1 %v10090_v33 }
 0x309   : > { %8592 = vmatprep.subr.bf16.mxu1 %v9991_v41 }
 0x30c   : > { %8593 = vmatpush3.bf16.msra.mxu1 %v9991_v41 }
 0x30d   : > { %8648 = vmatprep.subr.bf16.mxu1 %v9593_v40 }
 0x30f   : > { %8595 = vmatmul.mubr.msk.bf16.vlgmr.msra.gmra.mxu1 %vm1264_vm0, %v10258_v7 }
 0x310   : > { %8649 = vmatpush3.bf16.msra.mxu1 %v9593_v40  ;;  %8598 = vmatprep.mubr.msk.bf16.mxu1 %vm1264_vm0, %v10264_v9 }
 0x311   : > { %8650 = vmatprep.subr.bf16.mxu1 %v9594_v63 }
 0x314   : > { %8651 = vmatpush3.bf16.msra.mxu1 %v9594_v63 }
 0x315   : > { %9455 = vmatprep.subr.msk.bf16.mxu1 %vm1283_vm1, %v10359_v51 }
 0x317   : > { %8599 = vmatmul.mubr.msk.bf16.gmra.mxu1 %vm1264_vm0, %v10275_v53 }
 0x318   : > { %8602 = vmatprep.mubr.msk.bf16.mxu1 %vm1264_vm0, %v10280_v57 }
 0x31f   : > { %8603 = vmatmul.mubr.msk.bf16.gmra.mxu1 %vm1264_vm0, %v10294_v49 }
 0x3b3   : > { %v8570_v11 = vpop.f32.mrf.mxu1 }
 0x3b4   : > { %v10372_v15 = vadd.f32 %v8570_v11, %v10300_v18 }
 0x3b5   : > { %v1905_v26 = vpop.f32.mrf.mxu1 }
 0x3b6   : > { %v10375_v34 = vadd.f32 %v1905_v26, %v10302_v29 }
 0x3b7   : > { %v8571_v35 = vpop.f32.mrf.mxu1 }
 0x3b8   : > { %v10378_v37 = vadd.f32 %v8571_v35, %v10304_v23 }
 0x3b9   : > { %v10380_v32 = vpop.f32.mrf.mxu1 }
 0x3ba   : > { %11876 = vst [vmem:[#allocation9_spill] sm:$0xff] %v10380_v32 }
 0x3bb   : > { %v8574_v59 = vpop.f32.mrf.mxu1 }
 0x3bc   : > { %v10383_v62 = vadd.f32 %v8574_v59, %v10310_v2 }
 0x3bd   : > { %v1921_v25 = vpop.f32.mrf.mxu1 }
 0x3be   : > { %v10386_v40 = vadd.f32 %v1921_v25, %v10312_v61 }
 0x3bf   : > { %v8575_v18 = vpop.f32.mrf.mxu1 }
 0x3c0   : > { %v10389_v56 = vadd.f32 %v8575_v18, %v10314_v10 }
 0x3c1   : > { %v10391_v29 = vpop.f32.mrf.mxu1 }
 0x3c2   : > { %11877 = vst [vmem:[#allocation10_spill] sm:$0xff] %v10391_v29 }
 0x3c3   : > { %v8578_v63 = vpop.f32.mrf.mxu1 }
 0x3c4   : > { %v10394_v23 = vadd.f32 %v8578_v63, %v10320_v22  ;;  %v10405_v22 = vsel %vm1283_vm1, %v10286_v47, 0 }
 0x3c5   : > { %v1937_v5 = vpop.f32.mrf.mxu1 }
 0x3c6   : > { %v10397_v11 = vadd.f32 %v1937_v5, %v10322_v43 }
 0x3c7   : > { %v8579_v2 = vpop.f32.mrf.mxu1 }
 0x3c9   : > { %v10399_v26 = vpop.f32.mrf.mxu1 }
 0x3ca   : > { %11878 = vst [vmem:[#allocation11_spill] sm:$0xff] %v10399_v26 }
 0x3cf   : > { %v8596_v35 = vpop.f32.mrf.mxu1 }
 0x3d1   : > { %v1996_v61 = vpop.f32.mrf.mxu1 }
 0x3d3   : > { %v8597_v59 = vpop.f32.mrf.mxu1 }
 0x3d4   : > { %v2043_v10 = vpack.c.bf16 %v8597_v59, %v8596_v35 }
 0x3d5   : > { %v1999_v25 = vpop.f32.mrf.mxu1 }
 0x3d6   : > { %v2042_v32 = vpack.c.bf16 %v1999_v25, %v1996_v61 }
 0x3d7   : > { %v8600_v18 = vpop.f32.mrf.mxu1 }
 0x3d8   : > { %8610 = vmatprep.mubr.msk.bf16.mxu0 %vm1483_vm2, %v2042_v32 }
 0x3d9   : > { %v2012_v29 = vpop.f32.mrf.mxu1  ;;  %8611 = vmatmul.mubr.msk.bf16.vlgmr.msra.gmra.mxu0 %vm1483_vm2, %v2043_v10  ;;  %v10423_v10 = vld [vmem:[%s11858_s1] sm:$0xff]  }
 0x3da   : > { %8623 = vmatpush3.bf16.msra.mxu0 %v10405_v22 }
 0x3db   : > { %8624 = vmatprep.subr.bf16.mxu0 %v10205_v27  ;;  %v8601_v43 = vpop.f32.mrf.mxu1 }
 0x3dc   : > { %v2045_v2 = vpack.c.bf16 %v8601_v43, %v8600_v18  ;;  %v9595_v18 = vld [vmem:[%s11862_s5 + $0x58] sm:$0xff]   ;;  %v9596_v43 = vld [vmem:[%s11862_s5 + $0x50] sm:$0xff]  }
 0x3dd   : > { %v2015_v63 = vpop.f32.mrf.mxu1 }
 0x3de   : > { %v2044_v5 = vpack.c.bf16 %v2015_v63, %v2012_v29  ;;  %8625 = vmatpush3.bf16.msra.mxu0 %v10205_v27 }
 0x3df   : > { %8626 = vmatprep.subr.bf16.mxu0 %v10195_v8  ;;  %v8604_v32 = vpop.f32.mrf.mxu1 }
 0x3e0   : > { %8614 = vmatprep.mubr.msk.bf16.mxu0 %vm1483_vm2, %v2044_v5  ;;  %v2047_v29 = vpack.c.bf16 %v8604_v32, %v8604_v32 }
 0x3e1   : > { %v2028_v35 = vpop.f32.mrf.mxu1  ;;  %8615 = vmatmul.mubr.msk.bf16.gmra.mxu0 %vm1483_vm2, %v2045_v2 }
 0x3e2   : > { %8627 = vmatpush3.bf16.msra.mxu0 %v10195_v8 }
 0x3e3   : > { %8628 = vmatprep.subr.bf16.mxu0 %v10187_v20  ;;  %v8605_v61 = vpop.f32.mrf.mxu1 }
 0x3e5   : > { %v2031_v59 = vpop.f32.mrf.mxu1 }
 0x3e6   : > { %v2046_v25 = vpack.c.bf16 %v2031_v59, %v2028_v35  ;;  %8629 = vmatpush3.bf16.msra.mxu0 %v10187_v20 }
 0x3e7   : > { %8630 = vmatprep.subr.bf16.mxu0 %v10179_v44 }
 0x3e8   : > { %8618 = vmatprep.mubr.msk.bf16.mxu0 %vm1483_vm2, %v2046_v25 }
 0x3e9   : > { %8619 = vmatmul.mubr.msk.bf16.gmra.mxu0 %vm1483_vm2, %v2047_v29 }
 0x3ea   : > { %8631 = vmatpush3.bf16.msra.mxu0 %v10179_v44  ;;  %8636 = vmatprep.mubr.msk.bf16.mxu0 %vm1264_vm0, %v10423_v10 }
 0x3eb   : > { %8632 = vmatprep.subr.bf16.mxu0 %v10171_v45 }
 0x3ee   : > { %8633 = vmatpush3.bf16.msra.mxu0 %v10171_v45 }
 0x3ef   : > { %8634 = vmatprep.subr.bf16.mxu0 %v10163_v36 }
 0x3f2   : > { %8635 = vmatpush3.bf16.msra.mxu0 %v10163_v36 }
 0x3f3   : > { %8690 = vmatprep.subr.bf16.mxu0 %v9595_v18 }
 0x3f5   : > { %8637 = vmatmul.mubr.msk.bf16.vlgmr.msra.gmra.mxu0 %vm1264_vm0, %v10106_v46 }
 0x3f6   : > { %8691 = vmatpush3.bf16.msra.mxu0 %v9595_v18  ;;  %8640 = vmatprep.mubr.msk.bf16.mxu0 %vm1264_vm0, %v10113_v52 }
 0x3f7   : > { %8692 = vmatprep.subr.bf16.mxu0 %v9596_v43 }
 0x3fa   : > { %8693 = vmatpush3.bf16.msra.mxu0 %v9596_v43 }
 0x3fb   : > { %9456 = vmatprep.subr.msk.bf16.mxu0 %vm1283_vm1, %v10286_v47 }
 0x3fd   : > { %8641 = vmatmul.mubr.msk.bf16.gmra.mxu0 %vm1264_vm0, %v10129_v58 }
 0x3fe   : > { %8644 = vmatprep.mubr.msk.bf16.mxu0 %vm1264_vm0, %v10134_v3 }
 0x405   : > { %8645 = vmatmul.mubr.msk.bf16.gmra.mxu0 %vm1264_vm0, %v10151_v55 }
 0x499   : > { %v8612_v63 = vpop.f32.mrf.mxu0 }
 0x49a   : > { %v10450_v5 = vadd.f32 %v8612_v63, %v10372_v15 }
 0x49b   : > { %v2117_v2 = vpop.f32.mrf.mxu0 }
 0x49c   : > { %v10453_v32 = vadd.f32 %v2117_v2, %v10375_v34 }
 0x49d   : > { %v8613_v35 = vpop.f32.mrf.mxu0 }
 0x49e   : > { %v10456_v61 = vadd.f32 %v8613_v35, %v10378_v37 }
 0x49f   : > { %v10458_v59 = vpop.f32.mrf.mxu0 }
 0x4a0   : > { %11879 = vst [vmem:[#allocation12_spill] sm:$0xff] %v10458_v59 }
 0x4a1   : > { %v8616_v25 = vpop.f32.mrf.mxu0 }
 0x4a2   : > { %v10461_v29 = vadd.f32 %v8616_v25, %v10383_v62 }
 0x4a3   : > { %v2133_v18 = vpop.f32.mrf.mxu0 }
 0x4a4   : > { %v10464_v43 = vadd.f32 %v2133_v18, %v10386_v40 }
 0x4a5   : > { %v8617_v15 = vpop.f32.mrf.mxu0 }
 0x4a6   : > { %v10467_v63 = vadd.f32 %v8617_v15, %v10389_v56 }
 0x4a7   : > { %v10469_v34 = vpop.f32.mrf.mxu0 }
 0x4a8   : > { %11880 = vst [vmem:[#allocation13_spill] sm:$0xff] %v10469_v34 }
 0x4a9   : > { %v8620_v2 = vpop.f32.mrf.mxu0 }
 0x4aa   : > { %v10472_v37 = vadd.f32 %v8620_v2, %v10394_v23  ;;  %v10483_v23 = vsel %vm1283_vm1, %v10359_v51, 0 }
 0x4ab   : > { %v2149_v35 = vpop.f32.mrf.mxu0 }
 0x4ac   : > { %v10475_v59 = vadd.f32 %v2149_v35, %v10397_v11 }
 0x4ad   : > { %v8621_v62 = vpop.f32.mrf.mxu0 }
 0x4af   : > { %v10477_v25 = vpop.f32.mrf.mxu0 }
 0x4b5   : > { %v8638_v26 = vpop.f32.mrf.mxu0 }
 0x4b7   : > { %v2211_v40 = vpop.f32.mrf.mxu0 }
 0x4b9   : > { %v8639_v18 = vpop.f32.mrf.mxu0 }
 0x4ba   : > { %v2258_v56 = vpack.c.bf16 %v8639_v18, %v8638_v26 }
 0x4bb   : > { %v2214_v19 = vpop.f32.mrf.mxu0 }
 0x4bc   : > { %v2257_v54 = vpack.c.bf16 %v2214_v19, %v2211_v40 }
 0x4bd   : > { %v8642_v15 = vpop.f32.mrf.mxu0 }
 0x4be   : > { %8652 = vmatprep.mubr.msk.bf16.mxu1 %vm1483_vm2, %v2257_v54 }
 0x4bf   : > { %v2227_v34 = vpop.f32.mrf.mxu0  ;;  %8653 = vmatmul.mubr.msk.bf16.vlgmr.msra.gmra.mxu1 %vm1483_vm2, %v2258_v56  ;;  %v9597_v56 = vld [vmem:[%s11862_s5 + $0x68] sm:$0xff]  }
 0x4c0   : > { %8665 = vmatpush3.bf16.msra.mxu1 %v10483_v23 }
 0x4c1   : > { %8666 = vmatprep.subr.bf16.mxu1 %v10200_v13  ;;  %v8643_v11 = vpop.f32.mrf.mxu0 }
 0x4c2   : > { %v2260_v19 = vpack.c.bf16 %v8643_v11, %v8642_v15  ;;  %v9598_v15 = vld [vmem:[%s11862_s5 + $0x60] sm:$0xff]  }
 0x4c3   : > { %v2230_v2 = vpop.f32.mrf.mxu0 }
 0x4c4   : > { %v2259_v35 = vpack.c.bf16 %v2230_v2, %v2227_v34  ;;  %8667 = vmatpush3.bf16.msra.mxu1 %v10200_v13 }
 0x4c5   : > { %8668 = vmatprep.subr.bf16.mxu1 %v10190_v30  ;;  %v8646_v54 = vpop.f32.mrf.mxu0 }
 0x4c6   : > { %8656 = vmatprep.mubr.msk.bf16.mxu1 %vm1483_vm2, %v2259_v35  ;;  %v2262_v34 = vpack.c.bf16 %v8646_v54, %v8646_v54 }
 0x4c7   : > { %v2243_v26 = vpop.f32.mrf.mxu0  ;;  %8657 = vmatmul.mubr.msk.bf16.gmra.mxu1 %vm1483_vm2, %v2260_v19 }
 0x4c8   : > { %8669 = vmatpush3.bf16.msra.mxu1 %v10190_v30 }
 0x4c9   : > { %8670 = vmatprep.subr.bf16.mxu1 %v10182_v6  ;;  %v8647_v62 = vpop.f32.mrf.mxu0 }
 0x4cb   : > { %v2246_v40 = vpop.f32.mrf.mxu0 }
 0x4cc   : > { %v2261_v18 = vpack.c.bf16 %v2246_v40, %v2243_v26  ;;  %8671 = vmatpush3.bf16.msra.mxu1 %v10182_v6 }
 0x4cd   : > { %8672 = vmatprep.subr.bf16.mxu1 %v10174_v21 }
 0x4ce   : > { %8660 = vmatprep.mubr.msk.bf16.mxu1 %vm1483_vm2, %v2261_v18 }
 0x4cf   : > { %8661 = vmatmul.mubr.msk.bf16.gmra.mxu1 %vm1483_vm2, %v2262_v34 }
 0x4d0   : > { %8673 = vmatpush3.bf16.msra.mxu1 %v10174_v21  ;;  %8678 = vmatprep.mubr.msk.bf16.mxu1 %vm1264_vm0, %v10423_v10 }
 0x4d1   : > { %8674 = vmatprep.subr.bf16.mxu1 %v10166_v1 }
 0x4d4   : > { %8675 = vmatpush3.bf16.msra.mxu1 %v10166_v1 }
 0x4d5   : > { %8676 = vmatprep.subr.bf16.mxu1 %v10154_v16 }
 0x4d8   : > { %8677 = vmatpush3.bf16.msra.mxu1 %v10154_v16 }
 0x4d9   : > { %8732 = vmatprep.subr.bf16.mxu1 %v9597_v56 }
 0x4db   : > { %8679 = vmatmul.mubr.msk.bf16.vlgmr.msra.gmra.mxu1 %vm1264_vm0, %v10106_v46 }
 0x4dc   : > { %8733 = vmatpush3.bf16.msra.mxu1 %v9597_v56  ;;  %8682 = vmatprep.mubr.msk.bf16.mxu1 %vm1264_vm0, %v10113_v52 }
 0x4dd   : > { %8734 = vmatprep.subr.bf16.mxu1 %v9598_v15 }
 0x4e0   : > { %8735 = vmatpush3.bf16.msra.mxu1 %v9598_v15 }
 0x4e1   : > { %9457 = vmatprep.subr.msk.bf16.mxu1 %vm1283_vm1, %v10359_v51 }
 0x4e3   : > { %8683 = vmatmul.mubr.msk.bf16.gmra.mxu1 %vm1264_vm0, %v10129_v58 }
 0x4e4   : > { %8686 = vmatprep.mubr.msk.bf16.mxu1 %vm1264_vm0, %v10134_v3 }
 0x4eb   : > { %8687 = vmatmul.mubr.msk.bf16.gmra.mxu1 %vm1264_vm0, %v10151_v55 }
 0x57f   : > { %v8654_v10 = vpop.f32.mrf.mxu1 }
 0x580   : > { %v10523_v46 = vadd.f32 %v8654_v10, %v10450_v5 }
 0x581   : > { %v2332_v11 = vpop.f32.mrf.mxu1 }
 0x582   : > { %v10526_v52 = vadd.f32 %v2332_v11, %v10453_v32 }
 0x583   : > { %v8655_v2 = vpop.f32.mrf.mxu1 }
 0x584   : > { %v10529_v35 = vadd.f32 %v8655_v2, %v10456_v61 }
 0x585   : > { %v10531_v19 = vpop.f32.mrf.mxu1 }
 0x587   : > { %v8658_v58 = vpop.f32.mrf.mxu1 }
 0x588   : > { %v10534_v3 = vadd.f32 %v8658_v58, %v10461_v29 }
 0x589   : > { %v2348_v54 = vpop.f32.mrf.mxu1 }
 0x58a   : > { %v10537_v55 = vadd.f32 %v2348_v54, %v10464_v43 }
 0x58b   : > { %v8659_v5 = vpop.f32.mrf.mxu1 }
 0x58c   : > { %v10540_v26 = vadd.f32 %v8659_v5, %v10467_v63 }
 0x58d   : > { %v10542_v32 = vpop.f32.mrf.mxu1 }
 0x58e   : > { %11881 = vst [vmem:[#allocation14_spill] sm:$0xff] %v10542_v32 }
 0x58f   : > { %v8662_v62 = vpop.f32.mrf.mxu1 }
 0x590   : > { %v10545_v61 = vadd.f32 %v8662_v62, %v10472_v37 }
 0x591   : > { %v2364_v40 = vpop.f32.mrf.mxu1 }
 0x592   : > { %v10548_v18 = vadd.f32 %v2364_v40, %v10475_v59 }
 0x593   : > { %v8663_v29 = vpop.f32.mrf.mxu1 }
 0x595   : > { %v10550_v34 = vpop.f32.mrf.mxu1 }
 0x59b   : > { %v8680_v56 = vpop.f32.mrf.mxu1 }
 0x59d   : > { %v2426_v43 = vpop.f32.mrf.mxu1 }
 0x59f   : > { %v8681_v15 = vpop.f32.mrf.mxu1 }
 0x5a0   : > { %v2473_v63 = vpack.c.bf16 %v8681_v15, %v8680_v56 }
 0x5a1   : > { %v2429_v10 = vpop.f32.mrf.mxu1 }
 0x5a2   : > { %v2472_v11 = vpack.c.bf16 %v2429_v10, %v2426_v43  ;;  %v9599_v10 = vld [vmem:[%s11862_s5 + $0x78] sm:$0xff]  }
 0x5a3   : > { %v8684_v2 = vpop.f32.mrf.mxu1 }
 0x5a4   : > { %8694 = vmatprep.mubr.msk.bf16.mxu0 %vm1483_vm2, %v2472_v11  ;;  %v9600_v11 = vld [vmem:[%s11862_s5 + $0x70] sm:$0xff]  }
 0x5a5   : > { %v2442_v58 = vpop.f32.mrf.mxu1  ;;  %8695 = vmatmul.mubr.msk.bf16.vlgmr.msra.gmra.mxu0 %vm1483_vm2, %v2473_v63 }
 0x5a6   : > { %8707 = vmatpush3.bf16.msra.mxu0 %v10405_v22 }
 0x5a7   : > { %8708 = vmatprep.subr.bf16.mxu0 %v10205_v27  ;;  %v8685_v59 = vpop.f32.mrf.mxu1 }
 0x5a8   : > { %v2475_v5 = vpack.c.bf16 %v8685_v59, %v8684_v2 }
 0x5a9   : > { %v2445_v37 = vpop.f32.mrf.mxu1 }
 0x5aa   : > { %v2474_v54 = vpack.c.bf16 %v2445_v37, %v2442_v58  ;;  %8709 = vmatpush3.bf16.msra.mxu0 %v10205_v27 }
 0x5ab   : > { %8710 = vmatprep.subr.bf16.mxu0 %v10195_v8  ;;  %v8688_v62 = vpop.f32.mrf.mxu1 }
 0x5ac   : > { %8698 = vmatprep.mubr.msk.bf16.mxu0 %vm1483_vm2, %v2474_v54  ;;  %v2477_v15 = vpack.c.bf16 %v8688_v62, %v8688_v62 }
 0x5ad   : > { %v2458_v40 = vpop.f32.mrf.mxu1  ;;  %8699 = vmatmul.mubr.msk.bf16.gmra.mxu0 %vm1483_vm2, %v2475_v5 }
 0x5ae   : > { %8711 = vmatpush3.bf16.msra.mxu0 %v10195_v8 }
 0x5af   : > { %8712 = vmatprep.subr.bf16.mxu0 %v10187_v20  ;;  %v8689_v29 = vpop.f32.mrf.mxu1 }
 0x5b1   : > { %v2461_v56 = vpop.f32.mrf.mxu1 }
 0x5b2   : > { %v2476_v43 = vpack.c.bf16 %v2461_v56, %v2458_v40  ;;  %8713 = vmatpush3.bf16.msra.mxu0 %v10187_v20 }
 0x5b3   : > { %8714 = vmatprep.subr.bf16.mxu0 %v10179_v44 }
 0x5b4   : > { %8702 = vmatprep.mubr.msk.bf16.mxu0 %vm1483_vm2, %v2476_v43 }
 0x5b5   : > { %8703 = vmatmul.mubr.msk.bf16.gmra.mxu0 %vm1483_vm2, %v2477_v15 }
 0x5b6   : > { %8715 = vmatpush3.bf16.msra.mxu0 %v10179_v44  ;;  %8720 = vmatprep.mubr.msk.bf16.mxu0 %vm1264_vm0, %v10239_v4 }
 0x5b7   : > { %8716 = vmatprep.subr.bf16.mxu0 %v10171_v45 }
 0x5ba   : > { %8717 = vmatpush3.bf16.msra.mxu0 %v10171_v45 }
 0x5bb   : > { %8718 = vmatprep.subr.bf16.mxu0 %v10163_v36 }
 0x5be   : > { %8719 = vmatpush3.bf16.msra.mxu0 %v10163_v36 }
 0x5bf   : > { %8774 = vmatprep.subr.bf16.mxu0 %v9599_v10 }
 0x5c1   : > { %8721 = vmatmul.mubr.msk.bf16.vlgmr.msra.gmra.mxu0 %vm1264_vm0, %v10258_v7 }
 0x5c2   : > { %8775 = vmatpush3.bf16.msra.mxu0 %v9599_v10  ;;  %8724 = vmatprep.mubr.msk.bf16.mxu0 %vm1264_vm0, %v10264_v9 }
 0x5c3   : > { %8776 = vmatprep.subr.bf16.mxu0 %v9600_v11 }
 0x5c6   : > { %8777 = vmatpush3.bf16.msra.mxu0 %v9600_v11 }
 0x5c7   : > { %9458 = vmatprep.subr.msk.bf16.mxu0 %vm1283_vm1, %v10021_v48 }
 0x5c9   : > { %8725 = vmatmul.mubr.msk.bf16.gmra.mxu0 %vm1264_vm0, %v10275_v53 }
 0x5ca   : > { %8728 = vmatprep.mubr.msk.bf16.mxu0 %vm1264_vm0, %v10280_v57 }
 0x5d1   : > { %8729 = vmatmul.mubr.msk.bf16.gmra.mxu0 %vm1264_vm0, %v10294_v49 }
 0x665   : > { %v8696_v63 = vpop.f32.mrf.mxu0 }
 0x666   : > { %v10592_v2 = vadd.f32 %v8696_v63, %v10523_v46 }
 0x667   : > { %v2547_v58 = vpop.f32.mrf.mxu0 }
 0x668   : > { %v10595_v59 = vadd.f32 %v2547_v58, %v10526_v52 }
 0x669   : > { %v8697_v37 = vpop.f32.mrf.mxu0 }
 0x66a   : > { %v10598_v54 = vadd.f32 %v8697_v37, %v10529_v35 }
 0x66b   : > { %v10600_v5 = vpop.f32.mrf.mxu0 }
 0x66c   : > { %11882 = vst [vmem:[#allocation15_spill] sm:$0xff] %v10600_v5 }
 0x66d   : > { %v8700_v62 = vpop.f32.mrf.mxu0 }
 0x66e   : > { %v10603_v40 = vadd.f32 %v8700_v62, %v10534_v3 }
 0x66f   : > { %v2563_v29 = vpop.f32.mrf.mxu0 }
 0x670   : > { %v10606_v56 = vadd.f32 %v2563_v29, %v10537_v55 }
 0x671   : > { %v8701_v46 = vpop.f32.mrf.mxu0 }
 0x672   : > { %v10609_v43 = vadd.f32 %v8701_v46, %v10540_v26 }
 0x673   : > { %v10611_v52 = vpop.f32.mrf.mxu0 }
 0x674   : > { %11883 = vst [vmem:[#allocation16_spill] sm:$0xff] %v10611_v52 }
 0x675   : > { %v8704_v15 = vpop.f32.mrf.mxu0 }
 0x676   : > { %v10614_v35 = vadd.f32 %v8704_v15, %v10545_v61 }
 0x677   : > { %v2579_v10 = vpop.f32.mrf.mxu0 }
 0x678   : > { %v10617_v11 = vadd.f32 %v2579_v10, %v10548_v18 }
 0x679   : > { %v8705_v3 = vpop.f32.mrf.mxu0 }
 0x67b   : > { %v10619_v63 = vpop.f32.mrf.mxu0 }
 0x681   : > { %v8722_v58 = vpop.f32.mrf.mxu0 }
 0x683   : > { %v2638_v55 = vpop.f32.mrf.mxu0 }
 0x685   : > { %v8723_v37 = vpop.f32.mrf.mxu0 }
 0x686   : > { %v2685_v26 = vpack.c.bf16 %v8723_v37, %v8722_v58 }
 0x687   : > { %v2641_v62 = vpop.f32.mrf.mxu0 }
 0x688   : > { %v2684_v29 = vpack.c.bf16 %v2641_v62, %v2638_v55 }
 0x689   : > { %v8726_v46 = vpop.f32.mrf.mxu0 }
 0x68a   : > { %8736 = vmatprep.mubr.msk.bf16.mxu1 %vm1483_vm2, %v2684_v29  ;;  %v9601_v29 = vld [vmem:[%s11862_s5 + $0x88] sm:$0xff]  }
 0x68b   : > { %v2654_v52 = vpop.f32.mrf.mxu0  ;;  %8737 = vmatmul.mubr.msk.bf16.vlgmr.msra.gmra.mxu1 %vm1483_vm2, %v2685_v26  ;;  %v9602_v26 = vld [vmem:[%s11862_s5 + $0x80] sm:$0xff]  }
 0x68c   : > { %8749 = vmatpush3.bf16.msra.mxu1 %v10483_v23 }
 0x68d   : > { %8750 = vmatprep.subr.bf16.mxu1 %v10200_v13  ;;  %v8727_v61 = vpop.f32.mrf.mxu0 }
 0x68e   : > { %v2687_v10 = vpack.c.bf16 %v8727_v61, %v8726_v46 }
 0x68f   : > { %v2657_v18 = vpop.f32.mrf.mxu0 }
 0x690   : > { %v2686_v15 = vpack.c.bf16 %v2657_v18, %v2654_v52  ;;  %8751 = vmatpush3.bf16.msra.mxu1 %v10200_v13 }
 0x691   : > { %8752 = vmatprep.subr.bf16.mxu1 %v10190_v30  ;;  %v8730_v3 = vpop.f32.mrf.mxu0 }
 0x692   : > { %8740 = vmatprep.mubr.msk.bf16.mxu1 %vm1483_vm2, %v2686_v15  ;;  %v2689_v52 = vpack.c.bf16 %v8730_v3, %v8730_v3 }
 0x693   : > { %v2670_v58 = vpop.f32.mrf.mxu0  ;;  %8741 = vmatmul.mubr.msk.bf16.gmra.mxu1 %vm1483_vm2, %v2687_v10 }
 0x694   : > { %8753 = vmatpush3.bf16.msra.mxu1 %v10190_v30 }
 0x695   : > { %8754 = vmatprep.subr.bf16.mxu1 %v10182_v6  ;;  %v8731_v55 = vpop.f32.mrf.mxu0 }
 0x697   : > { %v2673_v37 = vpop.f32.mrf.mxu0 }
 0x698   : > { %v2688_v62 = vpack.c.bf16 %v2673_v37, %v2670_v58  ;;  %8755 = vmatpush3.bf16.msra.mxu1 %v10182_v6 }
 0x699   : > { %8756 = vmatprep.subr.bf16.mxu1 %v10174_v21 }
 0x69a   : > { %8744 = vmatprep.mubr.msk.bf16.mxu1 %vm1483_vm2, %v2688_v62 }
 0x69b   : > { %8745 = vmatmul.mubr.msk.bf16.gmra.mxu1 %vm1483_vm2, %v2689_v52 }
 0x69c   : > { %8757 = vmatpush3.bf16.msra.mxu1 %v10174_v21  ;;  %8762 = vmatprep.mubr.msk.bf16.mxu1 %vm1264_vm0, %v10239_v4 }
 0x69d   : > { %8758 = vmatprep.subr.bf16.mxu1 %v10166_v1 }
 0x6a0   : > { %8759 = vmatpush3.bf16.msra.mxu1 %v10166_v1 }
 0x6a1   : > { %8760 = vmatprep.subr.bf16.mxu1 %v10154_v16 }
 0x6a4   : > { %8761 = vmatpush3.bf16.msra.mxu1 %v10154_v16 }
 0x6a5   : > { %8816 = vmatprep.subr.bf16.mxu1 %v9601_v29 }
 0x6a7   : > { %8763 = vmatmul.mubr.msk.bf16.vlgmr.msra.gmra.mxu1 %vm1264_vm0, %v10258_v7 }
 0x6a8   : > { %8817 = vmatpush3.bf16.msra.mxu1 %v9601_v29  ;;  %8766 = vmatprep.mubr.msk.bf16.mxu1 %vm1264_vm0, %v10264_v9 }
 0x6a9   : > { %8818 = vmatprep.subr.bf16.mxu1 %v9602_v26 }
 0x6ac   : > { %8819 = vmatpush3.bf16.msra.mxu1 %v9602_v26 }
 0x6ad   : > { %9459 = vmatprep.subr.msk.bf16.mxu1 %vm1283_vm1, %v10023_v50 }
 0x6af   : > { %8767 = vmatmul.mubr.msk.bf16.gmra.mxu1 %vm1264_vm0, %v10275_v53 }
 0x6b0   : > { %8770 = vmatprep.mubr.msk.bf16.mxu1 %vm1264_vm0, %v10280_v57 }
 0x6b7   : > { %8771 = vmatmul.mubr.msk.bf16.gmra.mxu1 %vm1264_vm0, %v10294_v49 }
 0x74b   : > { %v8738_v4 = vpop.f32.mrf.mxu1 }
 0x74c   : > { %v10661_v7 = vadd.f32 %v8738_v4, %v10592_v2 }
 0x74d   : > { %v2759_v46 = vpop.f32.mrf.mxu1 }
 0x74e   : > { %v10664_v9 = vadd.f32 %v2759_v46, %v10595_v59 }
 0x74f   : > { %v8739_v61 = vpop.f32.mrf.mxu1 }
 0x750   : > { %v10667_v18 = vadd.f32 %v8739_v61, %v10598_v54 }
 0x751   : > { %v10669_v15 = vpop.f32.mrf.mxu1 }
 0x752   : > { %11884 = vst [vmem:[#allocation17_spill] sm:$0xff] %v10669_v15 }
 0x753   : > { %v8742_v53 = vpop.f32.mrf.mxu1 }
 0x754   : > { %v10672_v57 = vadd.f32 %v8742_v53, %v10603_v40 }
 0x755   : > { %v2775_v10 = vpop.f32.mrf.mxu1 }
 0x756   : > { %v10675_v49 = vadd.f32 %v2775_v10, %v10606_v56 }
 0x757   : > { %v8743_v2 = vpop.f32.mrf.mxu1 }
 0x758   : > { %v10678_v3 = vadd.f32 %v8743_v2, %v10609_v43 }
 0x759   : > { %v10680_v59 = vpop.f32.mrf.mxu1 }
 0x75a   : > { %11885 = vst [vmem:[#allocation18_spill] sm:$0xff] %v10680_v59 }
 0x75b   : > { %v8746_v58 = vpop.f32.mrf.mxu1 }
 0x75c   : > { %v10683_v54 = vadd.f32 %v8746_v58, %v10614_v35 }
 0x75d   : > { %v2791_v55 = vpop.f32.mrf.mxu1 }
 0x75e   : > { %v10686_v37 = vadd.f32 %v2791_v55, %v10617_v11 }
 0x75f   : > { %v8747_v40 = vpop.f32.mrf.mxu1 }
 0x761   : > { %v10688_v62 = vpop.f32.mrf.mxu1 }
 0x767   : > { %v8764_v52 = vpop.f32.mrf.mxu1 }
 0x769   : > { %v2850_v56 = vpop.f32.mrf.mxu1 }
 0x76b   : > { %v8765_v29 = vpop.f32.mrf.mxu1 }
 0x76c   : > { %v2897_v43 = vpack.c.bf16 %v8765_v29, %v8764_v52 }
 0x76d   : > { %v2853_v26 = vpop.f32.mrf.mxu1 }
 0x76e   : > { %v2896_v4 = vpack.c.bf16 %v2853_v26, %v2850_v56  ;;  %v10704_v56 = vld [vmem:[%s11858_s1 + $0x58] sm:$0xff]   ;;  %v11886_v26 = vld [vmem:[#allocation2_spill] sm:$0xff] }
 0x76f   : > { %v8768_v46 = vpop.f32.mrf.mxu1 }
 0x770   : > { %8778 = vmatprep.mubr.msk.bf16.mxu0 %vm1483_vm2, %v2896_v4  ;;  %v9605_v4 = vld [vmem:[%s11862_s5 + $0x98] sm:$0xff]  }
 0x771   : > { %v2866_v61 = vpop.f32.mrf.mxu1  ;;  %8779 = vmatmul.mubr.msk.bf16.vlgmr.msra.gmra.mxu0 %vm1483_vm2, %v2897_v43  ;;  %v10721_v43 = vld [vmem:[%s11858_s1 + $0x60] sm:$0xff]  }
 0x772   : > { %8791 = vmatpush3.bf16.msra.mxu0 %v10040_v38 }
 0x773   : > { %8792 = vmatprep.subr.bf16.mxu0 %v10019_v12  ;;  %v8769_v35 = vpop.f32.mrf.mxu1 }
 0x774   : > { %v2899_v10 = vpack.c.bf16 %v8769_v35, %v8768_v46  ;;  %v10727_v46 = vld [vmem:[%s11858_s1 + $0x68] sm:$0xff]   ;;  %v10739_v35 = vld [vmem:[%s11858_s1 + $0x70] sm:$0xff]  }
 0x775   : > { %v2869_v11 = vpop.f32.mrf.mxu1 }
 0x776   : > { %v2898_v53 = vpack.c.bf16 %v2869_v11, %v2866_v61  ;;  %8793 = vmatpush3.bf16.msra.mxu0 %v10019_v12  ;;  %v9606_v61 = vld [vmem:[%s11862_s5 + $0x90] sm:$0xff]   ;;  %v10744_v11 = vld [vmem:[%s11858_s1 + $0x78] sm:$0xff]  }
 0x777   : > { %8794 = vmatprep.subr.bf16.mxu0 %v10051_v17  ;;  %v8772_v2 = vpop.f32.mrf.mxu1 }
 0x778   : > { %8782 = vmatprep.mubr.msk.bf16.mxu0 %vm1483_vm2, %v2898_v53  ;;  %v2901_v29 = vpack.c.bf16 %v8772_v2, %v8772_v2  ;;  %v10755_v53 = vld [vmem:[%s11858_s1 + $0x80] ss:$0 sps:$4 sm:$0x11]  }
 0x779   : > { %v2882_v58 = vpop.f32.mrf.mxu1  ;;  %8783 = vmatmul.mubr.msk.bf16.gmra.mxu0 %vm1483_vm2, %v2899_v10 }
 0x77a   : > { %8795 = vmatpush3.bf16.msra.mxu0 %v10051_v17 }
 0x77b   : > { %8796 = vmatprep.subr.bf16.mxu0 %v10068_v39  ;;  %v8773_v55 = vpop.f32.mrf.mxu1 }
 0x77d   : > { %v2885_v40 = vpop.f32.mrf.mxu1 }
 0x77e   : > { %v2900_v52 = vpack.c.bf16 %v2885_v40, %v2882_v58  ;;  %8797 = vmatpush3.bf16.msra.mxu0 %v10068_v39 }
 0x77f   : > { %8798 = vmatprep.subr.bf16.mxu0 %v10078_v60 }
 0x780   : > { %8786 = vmatprep.mubr.msk.bf16.mxu0 %vm1483_vm2, %v2900_v52 }
 0x781   : > { %8787 = vmatmul.mubr.msk.bf16.gmra.mxu0 %vm1483_vm2, %v2901_v29 }
 0x782   : > { %8799 = vmatpush3.bf16.msra.mxu0 %v10078_v60  ;;  %8804 = vmatprep.mubr.msk.bf16.mxu0 %vm1264_vm0, %v10704_v56 }
 0x783   : > { %8800 = vmatprep.subr.bf16.mxu0 %v10086_v28 }
 0x786   : > { %8801 = vmatpush3.bf16.msra.mxu0 %v10086_v28 }
 0x787   : > { %8802 = vmatprep.subr.bf16.mxu0 %v11886_v26 }
 0x78a   : > { %8803 = vmatpush3.bf16.msra.mxu0 %v11886_v26 }
 0x78b   : > { %8858 = vmatprep.subr.bf16.mxu0 %v9605_v4 }
 0x78d   : > { %8805 = vmatmul.mubr.msk.bf16.vlgmr.msra.gmra.mxu0 %vm1264_vm0, %v10721_v43 }
 0x78e   : > { %8859 = vmatpush3.bf16.msra.mxu0 %v9605_v4  ;;  %8808 = vmatprep.mubr.msk.bf16.mxu0 %vm1264_vm0, %v10727_v46 }
 0x78f   : > { %8860 = vmatprep.subr.bf16.mxu0 %v9606_v61 }
 0x792   : > { %8861 = vmatpush3.bf16.msra.mxu0 %v9606_v61 }
 0x793   : > { %9460 = vmatprep.subr.msk.bf16.mxu0 %vm1283_vm1, %v10021_v48 }
 0x795   : > { %8809 = vmatmul.mubr.msk.bf16.gmra.mxu0 %vm1264_vm0, %v10739_v35 }
 0x796   : > { %8812 = vmatprep.mubr.msk.bf16.mxu0 %vm1264_vm0, %v10744_v11 }
 0x79d   : > { %8813 = vmatmul.mubr.msk.bf16.gmra.mxu0 %vm1264_vm0, %v10755_v53 }
 0x831   : > { %v8780_v10 = vpop.f32.mrf.mxu0 }
 0x832   : > { %v10760_v2 = vadd.f32 %v8780_v10, %v10661_v7 }
 0x833   : > { %v2971_v58 = vpop.f32.mrf.mxu0 }
 0x834   : > { %v10763_v48 = vadd.f32 %v2971_v58, %v10664_v9 }
 0x835   : > { %v8781_v55 = vpop.f32.mrf.mxu0 }
 0x836   : > { %v10766_v40 = vadd.f32 %v8781_v55, %v10667_v18 }
 0x837   : > { %v10768_v52 = vpop.f32.mrf.mxu0 }
 0x838   : > { %11887 = vst [vmem:[#allocation2_spill] sm:$0xff] %v10768_v52 }
 0x839   : > { %v8784_v29 = vpop.f32.mrf.mxu0 }
 0x83a   : > { %v10771_v4 = vadd.f32 %v8784_v29, %v10672_v57 }
 0x83b   : > { %v2987_v61 = vpop.f32.mrf.mxu0 }
 0x83c   : > { %v10774_v59 = vadd.f32 %v2987_v61, %v10675_v49 }
 0x83d   : > { %v8785_v7 = vpop.f32.mrf.mxu0 }
 0x83e   : > { %v10777_v10 = vadd.f32 %v8785_v7, %v10678_v3 }
 0x83f   : > { %v10779_v9 = vpop.f32.mrf.mxu0 }
 0x840   : > { %11888 = vst [vmem:[#allocation19_spill] sm:$0xff] %v10779_v9 }
 0x841   : > { %v8788_v58 = vpop.f32.mrf.mxu0 }
 0x842   : > { %v10782_v18 = vadd.f32 %v8788_v58, %v10683_v54 }
 0x843   : > { %v3003_v55 = vpop.f32.mrf.mxu0 }
 0x844   : > { %v10785_v32 = vadd.f32 %v3003_v55, %v10686_v37 }
 0x845   : > { %v8789_v57 = vpop.f32.mrf.mxu0 }
 0x847   : > { %v10787_v29 = vpop.f32.mrf.mxu0 }
 0x84d   : > { %v8806_v52 = vpop.f32.mrf.mxu0 }
 0x84f   : > { %v3120_v49 = vpop.f32.mrf.mxu0 }
 0x851   : > { %v8807_v61 = vpop.f32.mrf.mxu0 }
 0x852   : > { %v3167_v3 = vpack.c.bf16 %v8807_v61, %v8806_v52  ;;  %v9611_v61 = vld [vmem:[%s11862_s5 + $0xa8] sm:$0xff]  }
 0x853   : > { %v3123_v15 = vpop.f32.mrf.mxu0 }
 0x854   : > { %v3166_v5 = vpack.c.bf16 %v3123_v15, %v3120_v49 }
 0x855   : > { %v8810_v7 = vpop.f32.mrf.mxu0 }
 0x856   : > { %8820 = vmatprep.mubr.msk.bf16.mxu1 %vm1483_vm2, %v3166_v5 }
 0x857   : > { %v3136_v9 = vpop.f32.mrf.mxu0  ;;  %8821 = vmatmul.mubr.msk.bf16.vlgmr.msra.gmra.mxu1 %vm1483_vm2, %v3167_v3  ;;  %v9612_v3 = vld [vmem:[%s11862_s5 + $0xa0] sm:$0xff]  }
 0x858   : > { %8833 = vmatpush3.bf16.msra.mxu1 %v10044_v42 }
 0x859   : > { %8834 = vmatprep.subr.bf16.mxu1 %v10032_v14  ;;  %v8811_v54 = vpop.f32.mrf.mxu0 }
 0x85a   : > { %v3169_v55 = vpack.c.bf16 %v8811_v54, %v8810_v7 }
 0x85b   : > { %v3139_v37 = vpop.f32.mrf.mxu0 }
 0x85c   : > { %v3168_v58 = vpack.c.bf16 %v3139_v37, %v3136_v9  ;;  %8835 = vmatpush3.bf16.msra.mxu1 %v10032_v14 }
 0x85d   : > { %8836 = vmatprep.subr.bf16.mxu1 %v10060_v24  ;;  %v8814_v15 = vpop.f32.mrf.mxu0 }
 0x85e   : > { %8824 = vmatprep.mubr.msk.bf16.mxu1 %vm1483_vm2, %v3168_v58  ;;  %v3171_v9 = vpack.c.bf16 %v8814_v15, %v8814_v15 }
 0x85f   : > { %v3152_v52 = vpop.f32.mrf.mxu0  ;;  %8825 = vmatmul.mubr.msk.bf16.gmra.mxu1 %vm1483_vm2, %v3169_v55 }
 0x860   : > { %8837 = vmatpush3.bf16.msra.mxu1 %v10060_v24 }
 0x861   : > { %8838 = vmatprep.subr.bf16.mxu1 %v10073_v31  ;;  %v8815_v5 = vpop.f32.mrf.mxu0 }
 0x863   : > { %v3155_v57 = vpop.f32.mrf.mxu0 }
 0x864   : > { %v3170_v49 = vpack.c.bf16 %v3155_v57, %v3152_v52  ;;  %8839 = vmatpush3.bf16.msra.mxu1 %v10073_v31 }
 0x865   : > { %8840 = vmatprep.subr.bf16.mxu1 %v10082_v0 }
 0x866   : > { %8828 = vmatprep.mubr.msk.bf16.mxu1 %vm1483_vm2, %v3170_v49 }
 0x867   : > { %8829 = vmatmul.mubr.msk.bf16.gmra.mxu1 %vm1483_vm2, %v3171_v9 }
 0x868   : > { %8841 = vmatpush3.bf16.msra.mxu1 %v10082_v0  ;;  %8846 = vmatprep.mubr.msk.bf16.mxu1 %vm1264_vm0, %v10704_v56 }
 0x869   : > { %8842 = vmatprep.subr.bf16.mxu1 %v10090_v33 }
 0x86c   : > { %8843 = vmatpush3.bf16.msra.mxu1 %v10090_v33 }
 0x86d   : > { %8844 = vmatprep.subr.bf16.mxu1 %v9991_v41 }
 0x870   : > { %8845 = vmatpush3.bf16.msra.mxu1 %v9991_v41 }
 0x871   : > { %8900 = vmatprep.subr.bf16.mxu1 %v9611_v61 }
 0x873   : > { %8847 = vmatmul.mubr.msk.bf16.vlgmr.msra.gmra.mxu1 %vm1264_vm0, %v10721_v43 }
 0x874   : > { %8901 = vmatpush3.bf16.msra.mxu1 %v9611_v61  ;;  %8850 = vmatprep.mubr.msk.bf16.mxu1 %vm1264_vm0, %v10727_v46 }
 0x875   : > { %8902 = vmatprep.subr.bf16.mxu1 %v9612_v3 }
 0x878   : > { %8903 = vmatpush3.bf16.msra.mxu1 %v9612_v3 }
 0x879   : > { %9461 = vmatprep.subr.msk.bf16.mxu1 %vm1283_vm1, %v10023_v50 }
 0x87b   : > { %8851 = vmatmul.mubr.msk.bf16.gmra.mxu1 %vm1264_vm0, %v10739_v35 }
 0x87c   : > { %8854 = vmatprep.mubr.msk.bf16.mxu1 %vm1264_vm0, %v10744_v11 }
 0x883   : > { %8855 = vmatmul.mubr.msk.bf16.gmra.mxu1 %vm1264_vm0, %v10755_v53 }
 0x917   : > { %v8822_v7 = vpop.f32.mrf.mxu1 }
 0x918   : > { %v10829_v54 = vadd.f32 %v8822_v7, %v10760_v2 }
 0x919   : > { %v3241_v37 = vpop.f32.mrf.mxu1 }
 0x91a   : > { %v10832_v58 = vadd.f32 %v3241_v37, %v10763_v48 }
 0x91b   : > { %v8823_v55 = vpop.f32.mrf.mxu1 }
 0x91c   : > { %v10835_v50 = vadd.f32 %v8823_v55, %v10766_v40 }
 0x91d   : > { %v10837_v15 = vpop.f32.mrf.mxu1 }
 0x91e   : > { %11889 = vst [vmem:[#allocation20_spill] sm:$0xff] %v10837_v15 }
 0x91f   : > { %v8826_v52 = vpop.f32.mrf.mxu1 }
 0x920   : > { %v10840_v5 = vadd.f32 %v8826_v52, %v10771_v4 }
 0x921   : > { %v3257_v57 = vpop.f32.mrf.mxu1 }
 0x922   : > { %v10843_v49 = vadd.f32 %v3257_v57, %v10774_v59 }
 0x923   : > { %v8827_v2 = vpop.f32.mrf.mxu1 }
 0x924   : > { %v10846_v9 = vadd.f32 %v8827_v2, %v10777_v10 }
 0x925   : > { %v10848_v48 = vpop.f32.mrf.mxu1 }
 0x926   : > { %11890 = vst [vmem:[#allocation21_spill] sm:$0xff] %v10848_v48 }
 0x927   : > { %v8830_v61 = vpop.f32.mrf.mxu1 }
 0x928   : > { %v10851_v40 = vadd.f32 %v8830_v61, %v10782_v18 }
 0x929   : > { %v3273_v3 = vpop.f32.mrf.mxu1 }
 0x92a   : > { %v10854_v7 = vadd.f32 %v3273_v3, %v10785_v32 }
 0x92b   : > { %v8831_v4 = vpop.f32.mrf.mxu1 }
 0x92d   : > { %v10856_v37 = vpop.f32.mrf.mxu1 }
 0x933   : > { %v8848_v55 = vpop.f32.mrf.mxu1 }
 0x935   : > { %v3332_v59 = vpop.f32.mrf.mxu1 }
 0x937   : > { %v8849_v52 = vpop.f32.mrf.mxu1 }
 0x938   : > { %v3379_v10 = vpack.c.bf16 %v8849_v52, %v8848_v55  ;;  %v10912_v52 = vld [vmem:[%s11858_s1 + $0xa4] sm:$0xff]  }
 0x939   : > { %v3335_v57 = vpop.f32.mrf.mxu1 }
 0x93a   : > { %v3378_v15 = vpack.c.bf16 %v3335_v57, %v3332_v59  ;;  %v10923_v57 = vld [vmem:[%s11858_s1 + $0xac] ss:$0 sps:$4 sm:$0x11]  }
 0x93b   : > { %v8852_v2 = vpop.f32.mrf.mxu1 }
 0x93c   : > { %8862 = vmatprep.mubr.msk.bf16.mxu0 %vm1483_vm2, %v3378_v15 }
 0x93d   : > { %v3348_v48 = vpop.f32.mrf.mxu1  ;;  %8863 = vmatmul.mubr.msk.bf16.vlgmr.msra.gmra.mxu0 %vm1483_vm2, %v3379_v10 }
 0x93e   : > { %8875 = vmatpush3.bf16.msra.mxu0 %v10040_v38 }
 0x93f   : > { %8876 = vmatprep.subr.bf16.mxu0 %v10019_v12  ;;  %v8853_v32 = vpop.f32.mrf.mxu1 }
 0x940   : > { %v3381_v3 = vpack.c.bf16 %v8853_v32, %v8852_v2 }
 0x941   : > { %v3351_v18 = vpop.f32.mrf.mxu1 }
 0x942   : > { %v3380_v61 = vpack.c.bf16 %v3351_v18, %v3348_v48  ;;  %8877 = vmatpush3.bf16.msra.mxu0 %v10019_v12  ;;  %v10872_v12 = vld [vmem:[%s11858_s1 + $0x84] sm:$0xff]  }
 0x943   : > { %8878 = vmatprep.subr.bf16.mxu0 %v10051_v17  ;;  %v8856_v4 = vpop.f32.mrf.mxu1 }
 0x944   : > { %8866 = vmatprep.mubr.msk.bf16.mxu0 %vm1483_vm2, %v3380_v61  ;;  %v3383_v48 = vpack.c.bf16 %v8856_v4, %v8856_v4 }
 0x945   : > { %v3364_v55 = vpop.f32.mrf.mxu1  ;;  %8867 = vmatmul.mubr.msk.bf16.gmra.mxu0 %vm1483_vm2, %v3381_v3 }
 0x946   : > { %8879 = vmatpush3.bf16.msra.mxu0 %v10051_v17  ;;  %v9615_v17 = vld [vmem:[%s11862_s5 + $0xb8] sm:$0xff]  }
 0x947   : > { %8880 = vmatprep.subr.bf16.mxu0 %v10068_v39  ;;  %v8857_v38 = vpop.f32.mrf.mxu1 }
 0x949   : > { %v3367_v15 = vpop.f32.mrf.mxu1 }
 0x94a   : > { %v3382_v59 = vpack.c.bf16 %v3367_v15, %v3364_v55  ;;  %8881 = vmatpush3.bf16.msra.mxu0 %v10068_v39  ;;  %v10889_v39 = vld [vmem:[%s11858_s1 + $0x8c] sm:$0xff]  }
 0x94b   : > { %8882 = vmatprep.subr.bf16.mxu0 %v10078_v60 }
 0x94c   : > { %8870 = vmatprep.mubr.msk.bf16.mxu0 %vm1483_vm2, %v3382_v59 }
 0x94d   : > { %8871 = vmatmul.mubr.msk.bf16.gmra.mxu0 %vm1483_vm2, %v3383_v48 }
 0x94e   : > { %8883 = vmatpush3.bf16.msra.mxu0 %v10078_v60  ;;  %8888 = vmatprep.mubr.msk.bf16.mxu0 %vm1264_vm0, %v10872_v12  ;;  %v10895_v60 = vld [vmem:[%s11858_s1 + $0x94] sm:$0xff]  }
 0x94f   : > { %8884 = vmatprep.subr.bf16.mxu0 %v10086_v28 }
 0x952   : > { %8885 = vmatpush3.bf16.msra.mxu0 %v10086_v28  ;;  %v9616_v28 = vld [vmem:[%s11862_s5 + $0xb0] sm:$0xff]  }
 0x953   : > { %8886 = vmatprep.subr.bf16.mxu0 %v11886_v26 }
 0x956   : > { %8887 = vmatpush3.bf16.msra.mxu0 %v11886_v26  ;;  %v10907_v26 = vld [vmem:[%s11858_s1 + $0x9c] sm:$0xff]  }
 0x957   : > { %8942 = vmatprep.subr.bf16.mxu0 %v9615_v17 }
 0x959   : > { %8889 = vmatmul.mubr.msk.bf16.vlgmr.msra.gmra.mxu0 %vm1264_vm0, %v10889_v39 }
 0x95a   : > { %8943 = vmatpush3.bf16.msra.mxu0 %v9615_v17  ;;  %8892 = vmatprep.mubr.msk.bf16.mxu0 %vm1264_vm0, %v10895_v60 }
 0x95b   : > { %8944 = vmatprep.subr.bf16.mxu0 %v9616_v28 }
 0x95e   : > { %8945 = vmatpush3.bf16.msra.mxu0 %v9616_v28 }
 0x95f   : > { %9462 = vmatprep.subr.msk.bf16.mxu0 %vm1283_vm1, %v10286_v47 }
 0x961   : > { %8893 = vmatmul.mubr.msk.bf16.gmra.mxu0 %vm1264_vm0, %v10907_v26 }
 0x962   : > { %8896 = vmatprep.mubr.msk.bf16.mxu0 %vm1264_vm0, %v10912_v52 }
 0x969   : > { %8897 = vmatmul.mubr.msk.bf16.gmra.mxu0 %vm1264_vm0, %v10923_v57 }
 0x9fd   : > { %v8864_v10 = vpop.f32.mrf.mxu0 }
 0x9fe   : > { %v10928_v2 = vadd.f32 %v8864_v10, %v10829_v54 }
 0x9ff   : > { %v3453_v32 = vpop.f32.mrf.mxu0 }
 0xa00   : > { %v10931_v18 = vadd.f32 %v3453_v32, %v10832_v58 }
 0xa01   : > { %v8865_v61 = vpop.f32.mrf.mxu0 }
 0xa02   : > { %v10934_v3 = vadd.f32 %v8865_v61, %v10835_v50 }
 0xa03   : > { %v10936_v4 = vpop.f32.mrf.mxu0 }
 0xa04   : > { %11891 = vst [vmem:[#allocation22_spill] sm:$0xff] %v10936_v4 }
 0xa05   : > { %v8868_v55 = vpop.f32.mrf.mxu0 }
 0xa06   : > { %v10939_v38 = vadd.f32 %v8868_v55, %v10840_v5 }
 0xa07   : > { %v3469_v15 = vpop.f32.mrf.mxu0 }
 0xa08   : > { %v10942_v59 = vadd.f32 %v3469_v15, %v10843_v49 }
 0xa09   : > { %v8869_v54 = vpop.f32.mrf.mxu0 }
 0xa0a   : > { %v10945_v48 = vadd.f32 %v8869_v54, %v10846_v9 }
 0xa0b   : > { %v10947_v58 = vpop.f32.mrf.mxu0 }
 0xa0c   : > { %11892 = vst [vmem:[#allocation23_spill] sm:$0xff] %v10947_v58 }
 0xa0d   : > { %v8872_v17 = vpop.f32.mrf.mxu0 }
 0xa0e   : > { %v10950_v50 = vadd.f32 %v8872_v17, %v10851_v40 }
 0xa0f   : > { %v3485_v28 = vpop.f32.mrf.mxu0 }
 0xa10   : > { %v10953_v10 = vadd.f32 %v3485_v28, %v10854_v7 }
 0xa11   : > { %v8873_v5 = vpop.f32.mrf.mxu0 }
 0xa13   : > { %v10955_v32 = vpop.f32.mrf.mxu0 }
 0xa19   : > { %v8890_v61 = vpop.f32.mrf.mxu0 }
 0xa1b   : > { %v3602_v49 = vpop.f32.mrf.mxu0 }
 0xa1d   : > { %v8891_v55 = vpop.f32.mrf.mxu0 }
 0xa1e   : > { %v3649_v9 = vpack.c.bf16 %v8891_v55, %v8890_v61 }
 0xa1f   : > { %v3605_v15 = vpop.f32.mrf.mxu0 }
 0xa20   : > { %v3648_v4 = vpack.c.bf16 %v3605_v15, %v3602_v49 }
 0xa21   : > { %v8894_v54 = vpop.f32.mrf.mxu0 }
 0xa22   : > { %8904 = vmatprep.mubr.msk.bf16.mxu1 %vm1483_vm2, %v3648_v4 }
 0xa23   : > { %v3618_v58 = vpop.f32.mrf.mxu0  ;;  %8905 = vmatmul.mubr.msk.bf16.vlgmr.msra.gmra.mxu1 %vm1483_vm2, %v3649_v9 }
 0xa24   : > { %8917 = vmatpush3.bf16.msra.mxu1 %v10044_v42 }
 0xa25   : > { %8918 = vmatprep.subr.bf16.mxu1 %v10032_v14  ;;  %v8895_v40 = vpop.f32.mrf.mxu0 }
 0xa26   : > { %v3651_v28 = vpack.c.bf16 %v8895_v40, %v8894_v54 }
 0xa27   : > { %v3621_v7 = vpop.f32.mrf.mxu0 }
 0xa28   : > { %v3650_v17 = vpack.c.bf16 %v3621_v7, %v3618_v58  ;;  %8919 = vmatpush3.bf16.msra.mxu1 %v10032_v14  ;;  %v9621_v14 = vld [vmem:[%s11862_s5 + $0xc8] sm:$0xff]  }
 0xa29   : > { %8920 = vmatprep.subr.bf16.mxu1 %v10060_v24  ;;  %v8898_v5 = vpop.f32.mrf.mxu0 }
 0xa2a   : > { %8908 = vmatprep.mubr.msk.bf16.mxu1 %vm1483_vm2, %v3650_v17  ;;  %v3653_v58 = vpack.c.bf16 %v8898_v5, %v8898_v5 }
 0xa2b   : > { %v3634_v61 = vpop.f32.mrf.mxu0  ;;  %8909 = vmatmul.mubr.msk.bf16.gmra.mxu1 %vm1483_vm2, %v3651_v28 }
 0xa2c   : > { %8921 = vmatpush3.bf16.msra.mxu1 %v10060_v24  ;;  %v9622_v24 = vld [vmem:[%s11862_s5 + $0xc0] sm:$0xff]  }
 0xa2d   : > { %8922 = vmatprep.subr.bf16.mxu1 %v10073_v31  ;;  %v8899_v42 = vpop.f32.mrf.mxu0 }
 0xa2f   : > { %v3637_v4 = vpop.f32.mrf.mxu0 }
 0xa30   : > { %v3652_v49 = vpack.c.bf16 %v3637_v4, %v3634_v61  ;;  %8923 = vmatpush3.bf16.msra.mxu1 %v10073_v31 }
 0xa31   : > { %8924 = vmatprep.subr.bf16.mxu1 %v10082_v0 }
 0xa32   : > { %8912 = vmatprep.mubr.msk.bf16.mxu1 %vm1483_vm2, %v3652_v49 }
 0xa33   : > { %8913 = vmatmul.mubr.msk.bf16.gmra.mxu1 %vm1483_vm2, %v3653_v58 }
 0xa34   : > { %8925 = vmatpush3.bf16.msra.mxu1 %v10082_v0  ;;  %8930 = vmatprep.mubr.msk.bf16.mxu1 %vm1264_vm0, %v10872_v12 }
 0xa35   : > { %8926 = vmatprep.subr.bf16.mxu1 %v10090_v33 }
 0xa38   : > { %8927 = vmatpush3.bf16.msra.mxu1 %v10090_v33 }
 0xa39   : > { %8928 = vmatprep.subr.bf16.mxu1 %v9991_v41 }
 0xa3c   : > { %8929 = vmatpush3.bf16.msra.mxu1 %v9991_v41 }
 0xa3d   : > { %8984 = vmatprep.subr.bf16.mxu1 %v9621_v14 }
 0xa3f   : > { %8931 = vmatmul.mubr.msk.bf16.vlgmr.msra.gmra.mxu1 %vm1264_vm0, %v10889_v39 }
 0xa40   : > { %8985 = vmatpush3.bf16.msra.mxu1 %v9621_v14  ;;  %8934 = vmatprep.mubr.msk.bf16.mxu1 %vm1264_vm0, %v10895_v60 }
 0xa41   : > { %8986 = vmatprep.subr.bf16.mxu1 %v9622_v24 }
 0xa44   : > { %8987 = vmatpush3.bf16.msra.mxu1 %v9622_v24 }
 0xa45   : > { %9463 = vmatprep.subr.msk.bf16.mxu1 %vm1283_vm1, %v10359_v51 }
 0xa47   : > { %8935 = vmatmul.mubr.msk.bf16.gmra.mxu1 %vm1264_vm0, %v10907_v26 }
 0xa48   : > { %8938 = vmatprep.mubr.msk.bf16.mxu1 %vm1264_vm0, %v10912_v52 }
 0xa4f   : > { %8939 = vmatmul.mubr.msk.bf16.gmra.mxu1 %vm1264_vm0, %v10923_v57 }
 0xae3   : > { %v8906_v41 = vpop.f32.mrf.mxu1 }
 0xae4   : > { %v10997_v31 = vadd.f32 %v8906_v41, %v10928_v2 }
 0xae5   : > { %v3723_v0 = vpop.f32.mrf.mxu1 }
 0xae6   : > { %v11000_v33 = vadd.f32 %v3723_v0, %v10931_v18 }
 0xae7   : > { %v8907_v55 = vpop.f32.mrf.mxu1 }
 0xae8   : > { %v11003_v15 = vadd.f32 %v8907_v55, %v10934_v3 }
 0xae9   : > { %v11005_v9 = vpop.f32.mrf.mxu1 }
 0xaeb   : > { %v8910_v54 = vpop.f32.mrf.mxu1 }
 0xaec   : > { %v11008_v40 = vadd.f32 %v8910_v54, %v10939_v38 }
 0xaed   : > { %v3739_v7 = vpop.f32.mrf.mxu1 }
 0xaee   : > { %v11011_v17 = vadd.f32 %v3739_v7, %v10942_v59 }
 0xaef   : > { %v8911_v2 = vpop.f32.mrf.mxu1 }
 0xaf0   : > { %v11014_v28 = vadd.f32 %v8911_v2, %v10945_v48 }
 0xaf1   : > { %v11016_v18 = vpop.f32.mrf.mxu1 }
 0xaf3   : > { %v8914_v5 = vpop.f32.mrf.mxu1 }
 0xaf4   : > { %v11019_v3 = vadd.f32 %v8914_v5, %v10950_v50 }
 0xaf5   : > { %v3755_v61 = vpop.f32.mrf.mxu1 }
 0xaf6   : > { %v11022_v42 = vadd.f32 %v3755_v61, %v10953_v10 }
 0xaf7   : > { %v8915_v38 = vpop.f32.mrf.mxu1 }
 0xaf9   : > { %v11024_v4 = vpop.f32.mrf.mxu1 }
 0xaff   : > { %v8932_v49 = vpop.f32.mrf.mxu1 }
 0xb01   : > { %v3814_v59 = vpop.f32.mrf.mxu1 }
 0xb03   : > { %v8933_v58 = vpop.f32.mrf.mxu1 }
 0xb04   : > { %v3861_v48 = vpack.c.bf16 %v8933_v58, %v8932_v49  ;;  %v9624_v58 = vld [vmem:[%s11862_s5 + $0xd0] sm:$0xff]  }
 0xb05   : > { %v3817_v14 = vpop.f32.mrf.mxu1 }
 0xb06   : > { %v3860_v24 = vpack.c.bf16 %v3817_v14, %v3814_v59  ;;  %v9623_v59 = vld [vmem:[%s11862_s5 + $0xd8] sm:$0xff]  }
 0xb07   : > { %v8936_v41 = vpop.f32.mrf.mxu1 }
 0xb08   : > { %8946 = vmatprep.mubr.msk.bf16.mxu0 %vm1483_vm2, %v3860_v24 }
 0xb09   : > { %v3830_v0 = vpop.f32.mrf.mxu1  ;;  %8947 = vmatmul.mubr.msk.bf16.vlgmr.msra.gmra.mxu0 %vm1483_vm2, %v3861_v48 }
 0xb0a   : > { %8959 = vmatpush3.bf16.msra.mxu0 %v10405_v22 }
 0xb0b   : > { %8960 = vmatprep.subr.bf16.mxu0 %v10205_v27  ;;  %v8937_v50 = vpop.f32.mrf.mxu1 }
 0xb0c   : > { %v3863_v54 = vpack.c.bf16 %v8937_v50, %v8936_v41 }
 0xb0d   : > { %v3833_v10 = vpop.f32.mrf.mxu1 }
 0xb0e   : > { %v3862_v55 = vpack.c.bf16 %v3833_v10, %v3830_v0  ;;  %8961 = vmatpush3.bf16.msra.mxu0 %v10205_v27 }
 0xb0f   : > { %8962 = vmatprep.subr.bf16.mxu0 %v10195_v8  ;;  %v8940_v7 = vpop.f32.mrf.mxu1 }
 0xb10   : > { %8950 = vmatprep.mubr.msk.bf16.mxu0 %vm1483_vm2, %v3862_v55  ;;  %v3865_v49 = vpack.c.bf16 %v8940_v7, %v8940_v7 }
 0xb11   : > { %v3846_v2 = vpop.f32.mrf.mxu1  ;;  %8951 = vmatmul.mubr.msk.bf16.gmra.mxu0 %vm1483_vm2, %v3863_v54 }
 0xb12   : > { %8963 = vmatpush3.bf16.msra.mxu0 %v10195_v8 }
 0xb13   : > { %8964 = vmatprep.subr.bf16.mxu0 %v10187_v20  ;;  %v8941_v5 = vpop.f32.mrf.mxu1 }
 0xb15   : > { %v3849_v61 = vpop.f32.mrf.mxu1 }
 0xb16   : > { %v3864_v38 = vpack.c.bf16 %v3849_v61, %v3846_v2  ;;  %8965 = vmatpush3.bf16.msra.mxu0 %v10187_v20 }
 0xb17   : > { %8966 = vmatprep.subr.bf16.mxu0 %v10179_v44 }
 0xb18   : > { %8954 = vmatprep.mubr.msk.bf16.mxu0 %vm1483_vm2, %v3864_v38 }
 0xb19   : > { %8955 = vmatmul.mubr.msk.bf16.gmra.mxu0 %vm1483_vm2, %v3865_v49 }
 0xb1a   : > { %8967 = vmatpush3.bf16.msra.mxu0 %v10179_v44  ;;  %8972 = vmatprep.mubr.msk.bf16.mxu0 %vm1264_vm0, %v10704_v56 }
 0xb1b   : > { %8968 = vmatprep.subr.bf16.mxu0 %v10171_v45 }
 0xb1e   : > { %8969 = vmatpush3.bf16.msra.mxu0 %v10171_v45 }
 0xb1f   : > { %8970 = vmatprep.subr.bf16.mxu0 %v10163_v36 }
 0xb22   : > { %8971 = vmatpush3.bf16.msra.mxu0 %v10163_v36 }
 0xb23   : > { %9026 = vmatprep.subr.bf16.mxu0 %v9623_v59 }
 0xb25   : > { %8973 = vmatmul.mubr.msk.bf16.vlgmr.msra.gmra.mxu0 %vm1264_vm0, %v10721_v43 }
 0xb26   : > { %9027 = vmatpush3.bf16.msra.mxu0 %v9623_v59  ;;  %8976 = vmatprep.mubr.msk.bf16.mxu0 %vm1264_vm0, %v10727_v46 }
 0xb27   : > { %9028 = vmatprep.subr.bf16.mxu0 %v9624_v58 }
 0xb2a   : > { %9029 = vmatpush3.bf16.msra.mxu0 %v9624_v58 }
 0xb2b   : > { %9464 = vmatprep.subr.msk.bf16.mxu0 %vm1283_vm1, %v10286_v47 }
 0xb2d   : > { %8977 = vmatmul.mubr.msk.bf16.gmra.mxu0 %vm1264_vm0, %v10739_v35 }
 0xb2e   : > { %8980 = vmatprep.mubr.msk.bf16.mxu0 %vm1264_vm0, %v10744_v11 }
 0xb35   : > { %8981 = vmatmul.mubr.msk.bf16.gmra.mxu0 %vm1264_vm0, %v10755_v53 }
 0xbc9   : > { %v8948_v14 = vpop.f32.mrf.mxu0 }
 0xbca   : > { %v11066_v24 = vadd.f32 %v8948_v14, %v10997_v31 }
 0xbcb   : > { %v3935_v48 = vpop.f32.mrf.mxu0 }
 0xbcc   : > { %v11069_v41 = vadd.f32 %v3935_v48, %v11000_v33 }
 0xbcd   : > { %v8949_v0 = vpop.f32.mrf.mxu0 }
 0xbce   : > { %v11072_v47 = vadd.f32 %v8949_v0, %v11003_v15 }
 0xbcf   : > { %v11074_v50 = vpop.f32.mrf.mxu0 }
 0xbd1   : > { %v8952_v10 = vpop.f32.mrf.mxu0 }
 0xbd2   : > { %v11077_v55 = vadd.f32 %v8952_v10, %v11008_v40 }
 0xbd3   : > { %v3951_v54 = vpop.f32.mrf.mxu0 }
 0xbd4   : > { %v11080_v7 = vadd.f32 %v3951_v54, %v11011_v17 }
 0xbd5   : > { %v8953_v31 = vpop.f32.mrf.mxu0 }
 0xbd6   : > { %v11083_v2 = vadd.f32 %v8953_v31, %v11014_v28 }
 0xbd7   : > { %v11085_v33 = vpop.f32.mrf.mxu0 }
 0xbd9   : > { %v8956_v5 = vpop.f32.mrf.mxu0 }
 0xbda   : > { %v11088_v15 = vadd.f32 %v8956_v5, %v11019_v3 }
 0xbdb   : > { %v3967_v61 = vpop.f32.mrf.mxu0 }
 0xbdc   : > { %v11091_v38 = vadd.f32 %v3967_v61, %v11022_v42 }
 0xbdd   : > { %v8957_v40 = vpop.f32.mrf.mxu0 }
 0xbdf   : > { %v11093_v49 = vpop.f32.mrf.mxu0 }
 0xbe5   : > { %v8974_v59 = vpop.f32.mrf.mxu0 }
 0xbe7   : > { %v4026_v17 = vpop.f32.mrf.mxu0 }
 0xbe9   : > { %v8975_v58 = vpop.f32.mrf.mxu0 }
 0xbea   : > { %v4073_v28 = vpack.c.bf16 %v8975_v58, %v8974_v59 }
 0xbeb   : > { %v4029_v14 = vpop.f32.mrf.mxu0 }
 0xbec   : > { %v4072_v48 = vpack.c.bf16 %v4029_v14, %v4026_v17  ;;  %v9625_v14 = vld [vmem:[%s11862_s5 + $0xe8] sm:$0xff]  }
 0xbed   : > { %v8978_v0 = vpop.f32.mrf.mxu0 }
 0xbee   : > { %8988 = vmatprep.mubr.msk.bf16.mxu1 %vm1483_vm2, %v4072_v48  ;;  %v9626_v48 = vld [vmem:[%s11862_s5 + $0xe0] sm:$0xff]  }
 0xbef   : > { %v4042_v10 = vpop.f32.mrf.mxu0  ;;  %8989 = vmatmul.mubr.msk.bf16.vlgmr.msra.gmra.mxu1 %vm1483_vm2, %v4073_v28 }
 0xbf0   : > { %9001 = vmatpush3.bf16.msra.mxu1 %v10483_v23 }
 0xbf1   : > { %9002 = vmatprep.subr.bf16.mxu1 %v10200_v13  ;;  %v8979_v3 = vpop.f32.mrf.mxu0 }
 0xbf2   : > { %v4075_v31 = vpack.c.bf16 %v8979_v3, %v8978_v0 }
 0xbf3   : > { %v4045_v42 = vpop.f32.mrf.mxu0 }
 0xbf4   : > { %v4074_v54 = vpack.c.bf16 %v4045_v42, %v4042_v10  ;;  %9003 = vmatpush3.bf16.msra.mxu1 %v10200_v13 }
 0xbf5   : > { %9004 = vmatprep.subr.bf16.mxu1 %v10190_v30  ;;  %v8982_v5 = vpop.f32.mrf.mxu0 }
 0xbf6   : > { %8992 = vmatprep.mubr.msk.bf16.mxu1 %vm1483_vm2, %v4074_v54  ;;  %v4077_v58 = vpack.c.bf16 %v8982_v5, %v8982_v5 }
 0xbf7   : > { %v4058_v61 = vpop.f32.mrf.mxu0  ;;  %8993 = vmatmul.mubr.msk.bf16.gmra.mxu1 %vm1483_vm2, %v4075_v31 }
 0xbf8   : > { %9005 = vmatpush3.bf16.msra.mxu1 %v10190_v30 }
 0xbf9   : > { %9006 = vmatprep.subr.bf16.mxu1 %v10182_v6  ;;  %v8983_v40 = vpop.f32.mrf.mxu0 }
 0xbfb   : > { %v4061_v59 = vpop.f32.mrf.mxu0 }
 0xbfc   : > { %v4076_v17 = vpack.c.bf16 %v4061_v59, %v4058_v61  ;;  %9007 = vmatpush3.bf16.msra.mxu1 %v10182_v6 }
 0xbfd   : > { %9008 = vmatprep.subr.bf16.mxu1 %v10174_v21 }
 0xbfe   : > { %8996 = vmatprep.mubr.msk.bf16.mxu1 %vm1483_vm2, %v4076_v17 }
 0xbff   : > { %8997 = vmatmul.mubr.msk.bf16.gmra.mxu1 %vm1483_vm2, %v4077_v58 }
 0xc00   : > { %9009 = vmatpush3.bf16.msra.mxu1 %v10174_v21  ;;  %9014 = vmatprep.mubr.msk.bf16.mxu1 %vm1264_vm0, %v10704_v56 }
 0xc01   : > { %9010 = vmatprep.subr.bf16.mxu1 %v10166_v1 }
 0xc04   : > { %9011 = vmatpush3.bf16.msra.mxu1 %v10166_v1 }
 0xc05   : > { %9012 = vmatprep.subr.bf16.mxu1 %v10154_v16 }
 0xc08   : > { %9013 = vmatpush3.bf16.msra.mxu1 %v10154_v16 }
 0xc09   : > { %9068 = vmatprep.subr.bf16.mxu1 %v9625_v14 }
 0xc0b   : > { %9015 = vmatmul.mubr.msk.bf16.vlgmr.msra.gmra.mxu1 %vm1264_vm0, %v10721_v43 }
 0xc0c   : > { %9069 = vmatpush3.bf16.msra.mxu1 %v9625_v14  ;;  %9018 = vmatprep.mubr.msk.bf16.mxu1 %vm1264_vm0, %v10727_v46 }
 0xc0d   : > { %9070 = vmatprep.subr.bf16.mxu1 %v9626_v48 }
 0xc10   : > { %9071 = vmatpush3.bf16.msra.mxu1 %v9626_v48 }
 0xc11   : > { %9465 = vmatprep.subr.msk.bf16.mxu1 %vm1283_vm1, %v10359_v51 }
 0xc13   : > { %9019 = vmatmul.mubr.msk.bf16.gmra.mxu1 %vm1264_vm0, %v10739_v35 }
 0xc14   : > { %9022 = vmatprep.mubr.msk.bf16.mxu1 %vm1264_vm0, %v10744_v11 }
 0xc1b   : > { %9023 = vmatmul.mubr.msk.bf16.gmra.mxu1 %vm1264_vm0, %v10755_v53 }
 0xcaf   : > { %v8990_v56 = vpop.f32.mrf.mxu1 }
 0xcb0   : > { %v11135_v43 = vadd.f32 %v8990_v56, %v11066_v24 }
 0xcb1   : > { %v4147_v28 = vpop.f32.mrf.mxu1 }
 0xcb2   : > { %v11138_v46 = vadd.f32 %v4147_v28, %v11069_v41 }
 0xcb3   : > { %v8991_v0 = vpop.f32.mrf.mxu1 }
 0xcb4   : > { %v11141_v51 = vadd.f32 %v8991_v0, %v11072_v47 }
 0xcb5   : > { %v11143_v10 = vpop.f32.mrf.mxu1 }
 0xcb7   : > { %v8994_v35 = vpop.f32.mrf.mxu1 }
 0xcb8   : > { %v11146_v11 = vadd.f32 %v8994_v35, %v11077_v55 }
 0xcb9   : > { %v4163_v3 = vpop.f32.mrf.mxu1 }
 0xcba   : > { %v11149_v53 = vadd.f32 %v4163_v3, %v11080_v7 }
 0xcbb   : > { %v8995_v24 = vpop.f32.mrf.mxu1 }
 0xcbc   : > { %v11152_v42 = vadd.f32 %v8995_v24, %v11083_v2 }
 0xcbd   : > { %v11154_v41 = vpop.f32.mrf.mxu1 }
 0xcbf   : > { %v8998_v54 = vpop.f32.mrf.mxu1 }
 0xcc0   : > { %v11157_v47 = vadd.f32 %v8998_v54, %v11088_v15 }
 0xcc1   : > { %v4179_v31 = vpop.f32.mrf.mxu1 }
 0xcc2   : > { %v11160_v5 = vadd.f32 %v4179_v31, %v11091_v38 }
 0xcc3   : > { %v8999_v55 = vpop.f32.mrf.mxu1 }
 0xcc5   : > { %v11162_v61 = vpop.f32.mrf.mxu1 }
 0xccb   : > { %v9016_v40 = vpop.f32.mrf.mxu1 }
 0xccd   : > { %v4238_v7 = vpop.f32.mrf.mxu1 }
 0xccf   : > { %v9017_v59 = vpop.f32.mrf.mxu1 }
 0xcd0   : > { %v4285_v2 = vpack.c.bf16 %v9017_v59, %v9016_v40 }
 0xcd1   : > { %v4241_v17 = vpop.f32.mrf.mxu1 }
 0xcd2   : > { %v4284_v58 = vpack.c.bf16 %v4241_v17, %v4238_v7 }
 0xcd3   : > { %v9020_v14 = vpop.f32.mrf.mxu1 }
 0xcd4   : > { %9030 = vmatprep.mubr.msk.bf16.mxu0 %vm1483_vm2, %v4284_v58 }
 0xcd5   : > { %v4254_v48 = vpop.f32.mrf.mxu1  ;;  %9031 = vmatmul.mubr.msk.bf16.vlgmr.msra.gmra.mxu0 %vm1483_vm2, %v4285_v2 }
 0xcd6   : > { %9043 = vmatpush3.bf16.msra.mxu0 %v10405_v22 }
 0xcd7   : > { %9044 = vmatprep.subr.bf16.mxu0 %v10205_v27  ;;  %v9021_v15 = vpop.f32.mrf.mxu1 }
 0xcd8   : > { %v4287_v28 = vpack.c.bf16 %v9021_v15, %v9020_v14 }
 0xcd9   : > { %v4257_v38 = vpop.f32.mrf.mxu1 }
 0xcda   : > { %v4286_v56 = vpack.c.bf16 %v4257_v38, %v4254_v48  ;;  %9045 = vmatpush3.bf16.msra.mxu0 %v10205_v27 }
 0xcdb   : > { %9046 = vmatprep.subr.bf16.mxu0 %v10195_v8  ;;  %v9024_v0 = vpop.f32.mrf.mxu1 }
 0xcdc   : > { %9034 = vmatprep.mubr.msk.bf16.mxu0 %vm1483_vm2, %v4286_v56  ;;  %v4289_v54 = vpack.c.bf16 %v9024_v0, %v9024_v0 }
 0xcdd   : > { %v4270_v35 = vpop.f32.mrf.mxu1  ;;  %9035 = vmatmul.mubr.msk.bf16.gmra.mxu0 %vm1483_vm2, %v4287_v28 }
 0xcde   : > { %9047 = vmatpush3.bf16.msra.mxu0 %v10195_v8 }
 0xcdf   : > { %9048 = vmatprep.subr.bf16.mxu0 %v10187_v20  ;;  %v9025_v22 = vpop.f32.mrf.mxu1 }
 0xce1   : > { %v4273_v3 = vpop.f32.mrf.mxu1 }
 0xce2   : > { %v4288_v24 = vpack.c.bf16 %v4273_v3, %v4270_v35  ;;  %9049 = vmatpush3.bf16.msra.mxu0 %v10187_v20 }
 0xce3   : > { %9050 = vmatprep.subr.bf16.mxu0 %v10179_v44 }
 0xce4   : > { %9038 = vmatprep.mubr.msk.bf16.mxu0 %vm1483_vm2, %v4288_v24 }
 0xce5   : > { %9039 = vmatmul.mubr.msk.bf16.gmra.mxu0 %vm1483_vm2, %v4289_v54 }
 0xce6   : > { %9051 = vmatpush3.bf16.msra.mxu0 %v10179_v44  ;;  %9056 = vmatprep.mubr.msk.bf16.mxu0 %vm1264_vm0, %v10872_v12  ;;  %v11894_v44 = vld [vmem:[#allocation8_spill] sm:$0xff] }
 0xce7   : > { %9052 = vmatprep.subr.bf16.mxu0 %v10171_v45 }
 0xcea   : > { %9053 = vmatpush3.bf16.msra.mxu0 %v10171_v45  ;;  %v11893_v45 = vld [vmem:[#allocation7_spill] sm:$0xff] }
 0xceb   : > { %9054 = vmatprep.subr.bf16.mxu0 %v10163_v36  ;;  %v1682_v20 = vadd.f32 %v11894_v44, %v11893_v45 }
 0xcee   : > { %9055 = vmatpush3.bf16.msra.mxu0 %v10163_v36  ;;  %v11895_v36 = vld [vmem:[#allocation11_spill] sm:$0xff] }
 0xcef   : > { %v1960_v27 = vadd.f32 %v11895_v36, %v1682_v20 }
 0xcf1   : > { %9057 = vmatmul.mubr.msk.bf16.vlgmr.msra.gmra.mxu0 %vm1264_vm0, %v10889_v39  ;;  %v2172_v40 = vadd.f32 %v10477_v25, %v1960_v27 }
 0xcf2   : > { %9060 = vmatprep.mubr.msk.bf16.mxu0 %vm1264_vm0, %v10895_v60 }
 0xcf3   : > { %v2387_v17 = vadd.f32 %v10550_v34, %v2172_v40 }
 0xcf5   : > { %v2602_v14 = vadd.f32 %v10619_v63, %v2387_v17 }
 0xcf9   : > { %9061 = vmatmul.mubr.msk.bf16.gmra.mxu0 %vm1264_vm0, %v10907_v26 }
 0xcfa   : > { %9064 = vmatprep.mubr.msk.bf16.mxu0 %vm1264_vm0, %v10912_v52 }
 0xd01   : > { %9065 = vmatmul.mubr.msk.bf16.gmra.mxu0 %vm1264_vm0, %v10923_v57 }
 0xd95   : > { %v9032_v8 = vpop.f32.mrf.mxu0 }
 0xd96   : > { %v11199_v31 = vadd.f32 %v9032_v8, %v11135_v43  ;;  %v2814_v43 = vadd.f32 %v10688_v62, %v2602_v14  ;;  %v11902_v14 = vld [vmem:[#allocation15_spill] sm:$0xff] }
 0xd97   : > { %v4359_v55 = vpop.f32.mrf.mxu0 }
 0xd98   : > { %v11203_v7 = vadd.f32 %v4359_v55, %v11138_v46  ;;  %v3026_v46 = vadd.f32 %v10787_v29, %v2814_v43  ;;  %v11903_v43 = vld [vmem:[#allocation10_spill] sm:$0xff] }
 0xd99   : > { %v9033_v59 = vpop.f32.mrf.mxu0 }
 0xd9a   : > { %v11207_v58 = vadd.f32 %v9033_v59, %v11141_v51  ;;  %v3296_v51 = vadd.f32 %v10856_v37, %v3026_v46  ;;  %v11904_v46 = vld [vmem:[#allocation17_spill] sm:$0xff] }
 0xd9b   : > { %v11209_v2 = vpop.f32.mrf.mxu0 }
 0xd9c   : > { %v3508_v63 = vadd.f32 %v10955_v32, %v3296_v51  ;;  %v11905_v51 = vld [vmem:[#allocation13_spill] sm:$0xff] }
 0xd9d   : > { %v9036_v48 = vpop.f32.mrf.mxu0 }
 0xd9e   : > { %v11214_v15 = vadd.f32 %v9036_v48, %v11146_v11  ;;  %v3778_v11 = vadd.f32 %v11024_v4, %v3508_v63 }
 0xd9f   : > { %v4375_v25 = vpop.f32.mrf.mxu0 }
 0xda0   : > { %v11218_v38 = vadd.f32 %v4375_v25, %v11149_v53  ;;  %v3990_v53 = vadd.f32 %v11093_v49, %v3778_v11 }
 0xda1   : > { %v9037_v34 = vpop.f32.mrf.mxu0 }
 0xda2   : > { %v11222_v56 = vadd.f32 %v9037_v34, %v11152_v42  ;;  %v4202_v42 = vadd.f32 %v11162_v61, %v3990_v53 }
 0xda3   : > { %v11224_v28 = vpop.f32.mrf.mxu0 }
 0xda5   : > { %v9040_v62 = vpop.f32.mrf.mxu0 }
 0xda6   : > { %v11229_v0 = vadd.f32 %v9040_v62, %v11157_v47  ;;  %v11906_v62 = vld [vmem:[#allocation2_spill] sm:$0xff] }
 0xda7   : > { %v4391_v29 = vpop.f32.mrf.mxu0 }
 0xda8   : > { %v11233_v35 = vadd.f32 %v4391_v29, %v11160_v5  ;;  %v11907_v29 = vld [vmem:[#allocation14_spill] sm:$0xff] }
 0xda9   : > { %v9041_v37 = vpop.f32.mrf.mxu0 }
 0xdaa   : > { %v11908_v37 = vld [vmem:[#allocation20_spill] sm:$0xff] }
 0xdab   : > { %v4394_v22 = vpop.f32.mrf.mxu0 }
 0xdac   : > { %v11236_v3 = vadd.f32 %v4394_v22, %v4202_v42  ;;  %v11909_v22 = vld [vmem:[#allocation16_spill] sm:$0xff] }
 0xdb1   : > { %v9058_v24 = vpop.f32.mrf.mxu0 }
 0xdb3   : > { %v4450_v32 = vpop.f32.mrf.mxu0 }
 0xdb5   : > { %v9059_v54 = vpop.f32.mrf.mxu0 }
 0xdb6   : > { %v4497_v44 = vpack.c.bf16 %v9059_v54, %v9058_v24  ;;  %v11911_v54 = vld [vmem:[#allocation18_spill] sm:$0xff] }
 0xdb7   : > { %v4453_v45 = vpop.f32.mrf.mxu0 }
 0xdb8   : > { %v4496_v4 = vpack.c.bf16 %v4453_v45, %v4450_v32 }
 0xdb9   : > { %v9062_v47 = vpop.f32.mrf.mxu0 }
 0xdba   : > { %9072 = vmatprep.mubr.msk.bf16.mxu1 %vm1483_vm2, %v4496_v4 }
 0xdbb   : > { %v4466_v20 = vpop.f32.mrf.mxu0  ;;  %9073 = vmatmul.mubr.msk.bf16.vlgmr.msra.gmra.mxu1 %vm1483_vm2, %v4497_v44 }
 0xdbc   : > { %9085 = vmatpush3.bf16.msra.mxu1 %v10483_v23 }
 0xdbd   : > { %9086 = vmatprep.subr.bf16.mxu1 %v10200_v13  ;;  %v9063_v49 = vpop.f32.mrf.mxu0 }
 0xdbe   : > { %v4499_v8 = vpack.c.bf16 %v9063_v49, %v9062_v47  ;;  %v11912_v47 = vld [vmem:[#allocation19_spill] sm:$0xff] }
 0xdbf   : > { %v4469_v5 = vpop.f32.mrf.mxu0 }
 0xdc0   : > { %v4498_v61 = vpack.c.bf16 %v4469_v5, %v4466_v20  ;;  %9087 = vmatpush3.bf16.msra.mxu1 %v10200_v13  ;;  %v11898_v13 = vld [vmem:[#allocation9_spill] sm:$0xff] }
 0xdc1   : > { %9088 = vmatprep.subr.bf16.mxu1 %v10190_v30  ;;  %v9066_v36 = vpop.f32.mrf.mxu0 }
 0xdc2   : > { %9076 = vmatprep.mubr.msk.bf16.mxu1 %vm1483_vm2, %v4498_v61  ;;  %v4501_v59 = vpack.c.bf16 %v9066_v36, %v9066_v36 }
 0xdc3   : > { %v4482_v27 = vpop.f32.mrf.mxu0  ;;  %9077 = vmatmul.mubr.msk.bf16.gmra.mxu1 %vm1483_vm2, %v4499_v8  ;;  %v11913_v8 = vld [vmem:[#allocation21_spill] sm:$0xff] }
 0xdc4   : > { %9089 = vmatpush3.bf16.msra.mxu1 %v10190_v30 }
 0xdc5   : > { %9090 = vmatprep.subr.bf16.mxu1 %v10182_v6  ;;  %v9067_v23 = vpop.f32.mrf.mxu0 }
 0xdc7   : > { %v4485_v55 = vpop.f32.mrf.mxu0 }
 0xdc8   : > { %v4500_v40 = vpack.c.bf16 %v4485_v55, %v4482_v27  ;;  %9091 = vmatpush3.bf16.msra.mxu1 %v10182_v6  ;;  %v11897_v6 = vld [vmem:[#allocation4_spill] sm:$0xff] }
 0xdc9   : > { %9092 = vmatprep.subr.bf16.mxu1 %v10174_v21 }
 0xdca   : > { %9080 = vmatprep.mubr.msk.bf16.mxu1 %vm1483_vm2, %v4500_v40  ;;  %v11914_v40 = vld [vmem:[#allocation23_spill] sm:$0xff] }
 0xdcb   : > { %9081 = vmatmul.mubr.msk.bf16.gmra.mxu1 %vm1483_vm2, %v4501_v59 }
 0xdcc   : > { %9093 = vmatpush3.bf16.msra.mxu1 %v10174_v21  ;;  %9098 = vmatprep.mubr.msk.bf16.mxu1 %vm1264_vm0, %v10872_v12  ;;  %v11896_v21 = vld [vmem:[#allocation3_spill] sm:$0xff] }
 0xdcd   : > { %9094 = vmatprep.subr.bf16.mxu1 %v10166_v1  ;;  %v1650_v30 = vadd.f32 %v11897_v6, %v11896_v21 }
 0xdcf   : > { %v1952_v12 = vadd.f32 %v11898_v13, %v1650_v30 }
 0xdd0   : > { %9095 = vmatpush3.bf16.msra.mxu1 %v10166_v1  ;;  %v9627_v1 = vld [vmem:[%s11862_s5 + $0xf8] sm:$0xff]  }
 0xdd1   : > { %9096 = vmatprep.subr.bf16.mxu1 %v10154_v16  ;;  %9110 = vmatprep.subr.bf16.mxu0 %v9627_v1 }
 0xdd2   : > { %9111 = vmatpush3.bf16.msra.mxu0 %v9627_v1 }
 0xdd4   : > { %9097 = vmatpush3.bf16.msra.mxu1 %v10154_v16  ;;  %v9628_v16 = vld [vmem:[%s11862_s5 + $0xf0] sm:$0xff]  }
 0xdd5   : > { %9112 = vmatprep.subr.bf16.mxu0 %v9628_v16 }
 0xdd6   : > { %9113 = vmatpush3.bf16.msra.mxu0 %v9628_v16 }
 0xdd7   : > { %9099 = vmatmul.mubr.msk.bf16.vlgmr.msra.gmra.mxu1 %vm1264_vm0, %v10889_v39  ;;  %v11899_v39 = vld [vmem:[#allocation12_spill] sm:$0xff] }
 0xdd8   : > { %9102 = vmatprep.mubr.msk.bf16.mxu1 %vm1264_vm0, %v10895_v60  ;;  %v2164_v60 = vadd.f32 %v11899_v39, %v1952_v12 }
 0xddf   : > { %9103 = vmatmul.mubr.msk.bf16.gmra.mxu1 %vm1264_vm0, %v10907_v26  ;;  %v2379_v26 = vadd.f32 %v10531_v19, %v2164_v60  ;;  %v11910_v19 = vld [vmem:[#allocation22_spill] sm:$0xff] }
 0xde0   : > { %9106 = vmatprep.mubr.msk.bf16.mxu1 %vm1264_vm0, %v10912_v52  ;;  %v11900_v52 = vld [vmem:[#allocation5_spill] sm:$0xff] }
 0xde1   : > { %v2594_v48 = vadd.f32 %v11902_v14, %v2379_v26 }
 0xde3   : > { %v2806_v34 = vadd.f32 %v11904_v46, %v2594_v48 }
 0xde5   : > { %v3018_v11 = vadd.f32 %v11906_v62, %v2806_v34 }
 0xde7   : > { %9107 = vmatmul.mubr.msk.bf16.gmra.mxu1 %vm1264_vm0, %v10923_v57  ;;  %v11901_v57 = vld [vmem:[#allocation6_spill] sm:$0xff]  ;;  %v3288_v42 = vadd.f32 %v11908_v37, %v3018_v11 }
 0xde8   : > { %v1666_v17 = vadd.f32 %v11901_v57, %v11900_v52  ;;  %v9630_v37 = vld [vmem:[%s11859_s2 + $0x1c] sm:$0xff]  }
 0xde9   : > { %v3500_v32 = vadd.f32 %v11910_v19, %v3288_v42  ;;  %9158 = vmatprep.mubr.msk.bf16.mxu1 %vm4900_vm3, %v9630_v37  ;;  %v9635_v37 = vld [vmem:[%s11864_s7 + $0x28] sm:$0xff]  }
 0xdea   : > { %v1956_v25 = vadd.f32 %v11903_v43, %v1666_v17 }
 0xdeb   : > { %v3770_v4 = vadd.f32 %v11005_v9, %v3500_v32 }
 0xdec   : > { %v2168_v63 = vadd.f32 %v11905_v51, %v1956_v25 }
 0xded   : > { %v3982_v49 = vadd.f32 %v11074_v50, %v3770_v4 }
 0xdee   : > { %v2383_v53 = vadd.f32 %v11907_v29, %v2168_v63 }
 0xdef   : > { %v4194_v27 = vadd.f32 %v11143_v10, %v3982_v49 }
 0xdf0   : > { %v2598_v24 = vadd.f32 %v11909_v22, %v2383_v53  ;;  %v9629_v53 = vld [vmem:[%s11859_s2] sm:$0xff]  }
 0xdf1   : > { %v4406_v1 = vadd.f32 %v11209_v2, %v4194_v27 }
 0xdf2   : > { %v2810_v45 = vadd.f32 %v11911_v54, %v2598_v24  ;;  %v7442_v24 = vld [vmem:[%s11863_s6] ss:$0 sm:$0xff] }
 0xdf4   : > { %v3022_v20 = vadd.f32 %v11912_v47, %v2810_v45 }
 0xdf6   : > { %v3292_v36 = vadd.f32 %v11913_v8, %v3022_v20 }
 0xdf8   : > { %v3504_v59 = vadd.f32 %v11914_v40, %v3292_v36 }
 0xdfa   : > { %v3774_v21 = vadd.f32 %v11016_v18, %v3504_v59 }
 0xe7b   : > { %v9074_v44 = vpop.f32.mrf.mxu1 }
 0xe7c   : > { %v4619_v5 = vadd.f32 %v9074_v44, %v11199_v31  ;;  %v3986_v31 = vadd.f32 %v11085_v33, %v3774_v21 }
 0xe7d   : > { %v4571_v61 = vpop.f32.mrf.mxu1 }
 0xe7e   : > { %v4617_v23 = vadd.f32 %v4571_v61, %v11203_v7  ;;  %v4198_v10 = vadd.f32 %v11154_v41, %v3986_v31 }
 0xe7f   : > { %v9075_v55 = vpop.f32.mrf.mxu1 }
 0xe80   : > { %v4620_v9 = vadd.f32 %v9075_v55, %v11207_v58  ;;  %v4410_v2 = vadd.f32 %v11224_v28, %v4198_v10 }
 0xe81   : > { %v4574_v16 = vpop.f32.mrf.mxu1 }
 0xe82   : > { %v4618_v50 = vadd.f32 %v4574_v16, %v4406_v1 }
 0xe83   : > { %v9078_v6 = vpop.f32.mrf.mxu1 }
 0xe84   : > { %v4623_v30 = vadd.f32 %v9078_v6, %v11214_v15 }
 0xe85   : > { %v4587_v13 = vpop.f32.mrf.mxu1 }
 0xe86   : > { %v11307_v7 = vadd.f32 %v4587_v13, %v11218_v38 }
 0xe87   : > { %v9079_v12 = vpop.f32.mrf.mxu1 }
 0xe88   : > { %v11311_v58 = vadd.f32 %v9079_v12, %v11222_v56 }
 0xe89   : > { %v4590_v39 = vpop.f32.mrf.mxu1 }
 0xe8a   : > { %v11313_v18 = vadd.f32 %v4590_v39, %v4410_v2 }
 0xe8b   : > { %v9082_v60 = vpop.f32.mrf.mxu1 }
 0xe8c   : > { %v11316_v33 = vadd.f32 %v9082_v60, %v11229_v0 }
 0xe8d   : > { %v4603_v15 = vpop.f32.mrf.mxu1 }
 0xe8e   : > { %v11319_v26 = vadd.f32 %v4603_v15, %v11233_v35 }
 0xe8f   : > { %v9083_v41 = vpop.f32.mrf.mxu1 }
 0xe91   : > { %v4606_v38 = vpop.f32.mrf.mxu1 }
 0xe92   : > { %v11322_v52 = vadd.f32 %v4606_v38, %v11236_v3 }
 0xe97   : > { %v9100_v28 = vpop.f32.mrf.mxu1 }
 0xe99   : > { %v4662_v57 = vpop.f32.mrf.mxu1 }
 0xe9b   : > { %v9101_v56 = vpop.f32.mrf.mxu1 }
 0xe9c   : > { %v4709_v48 = vpack.c.bf16 %v9101_v56, %v9100_v28 }
 0xe9d   : > { %v4665_v17 = vpop.f32.mrf.mxu1 }
 0xe9e   : > { %v4708_v14 = vpack.c.bf16 %v4665_v17, %v4662_v57 }
 0xe9f   : > { %v9104_v43 = vpop.f32.mrf.mxu1 }
 0xea0   : > { %9114 = vmatprep.mubr.msk.bf16.mxu0 %vm1483_vm2, %v4708_v14 }
 0xea1   : > { %v4678_v0 = vpop.f32.mrf.mxu1  ;;  %9115 = vmatmul.mubr.msk.bf16.vlgmr.msra.gmra.mxu0 %vm1483_vm2, %v4709_v48 }
 0xea3   : > { %v9105_v25 = vpop.f32.mrf.mxu1 }
 0xea4   : > { %v4711_v34 = vpack.c.bf16 %v9105_v25, %v9104_v43 }
 0xea5   : > { %v4681_v35 = vpop.f32.mrf.mxu1 }
 0xea6   : > { %v4710_v46 = vpack.c.bf16 %v4681_v35, %v4678_v0 }
 0xea7   : > { %v9108_v51 = vpop.f32.mrf.mxu1 }
 0xea8   : > { %9118 = vmatprep.mubr.msk.bf16.mxu0 %vm1483_vm2, %v4710_v46  ;;  %v4713_v29 = vpack.c.bf16 %v9108_v51, %v9108_v51  ;;  %v9641_v51 = vld [vmem:[%s11864_s7 + $0x18] sm:$0xff]  }
 0xea9   : > { %v4694_v3 = vpop.f32.mrf.mxu1  ;;  %9119 = vmatmul.mubr.msk.bf16.gmra.mxu0 %vm1483_vm2, %v4711_v34 }
 0xeab   : > { %v9109_v63 = vpop.f32.mrf.mxu1 }
 0xeac   : > { %v9632_v63 = vld [vmem:[%s11859_s2 + $0x24] sm:$0xff]  }
 0xead   : > { %v4697_v62 = vpop.f32.mrf.mxu1 }
 0xeae   : > { %v4712_v11 = vpack.c.bf16 %v4697_v62, %v4694_v3  ;;  %v9631_v3 = vld [vmem:[%s11859_s2 + $0x8] sm:$0xff]  }
 0xeaf   : > { %v9637_v62 = vld [vmem:[%s11859_s2 + $0x2c] sm:$0xff]  }
 0xeb0   : > { %9122 = vmatprep.mubr.msk.bf16.mxu0 %vm1483_vm2, %v4712_v11  ;;  %v9634_v11 = vld [vmem:[%s11864_s7 + $0x30] sm:$0xff]  }
 0xeb1   : > { %9123 = vmatmul.mubr.msk.bf16.gmra.mxu0 %vm1483_vm2, %v4713_v29  ;;  %v9639_v29 = vld [vmem:[%s11859_s2 + $0x10] sm:$0xff]  }
 0xeb2   : > { %9138 = vmatprep.mubr.msk.bf16.mxu0 %vm4900_vm3, %v9629_v53  ;;  %v9642_v53 = vld [vmem:[%s11864_s7 + $0x10] sm:$0xff]  }
 0xf61   : > { %v9116_v42 = vpop.f32.mrf.mxu0 }
 0xf62   : > { %v4831_v22 = vadd.f32 %v9116_v42, %v4619_v5  ;;  %v9638_v42 = vld [vmem:[%s11859_s2 + $0x34] ss:$0 sps:$4 sm:$0x11]  }
 0xf63   : > { %v4783_v19 = vpop.f32.mrf.mxu0 }
 0xf64   : > { %v4829_v32 = vadd.f32 %v4783_v19, %v4617_v23  ;;  %v4848_v45 = vadd.f32 %v7442_v24, %v4831_v22  ;;  %v9640_v22 = vld [vmem:[%s11859_s2 + $0x18] ss:$0 sps:$4 sm:$0x11]   ;;  %v9643_v19 = vld [vmem:[%s11864_s7 + $0x8] sm:$0xff]  }
 0xf65   : > { %v9117_v54 = vpop.f32.mrf.mxu0 }
 0xf66   : > { %v4832_v4 = vadd.f32 %v9117_v54, %v4620_v9  ;;  %v4846_v47 = vadd.f32 %v7442_v24, %v4829_v32  ;;  %v4859_v8 = vmax.f32 %v4848_v45, 0.0  ;;  %v9644_v32 = vld [vmem:[%s11864_s7] sm:$0xff]   ;;  %v9645_v54 = vld [vmem:[%s11864_s7 + $0x58] sm:$0xff]  }
 0xf67   : > { %v4786_v44 = vpop.f32.mrf.mxu0 }
 0xf68   : > { %v4849_v20 = vadd.f32 %v7442_v24, %v4832_v4  ;;  %v4830_v49 = vadd.f32 %v4786_v44, %v4618_v50  ;;  %v4857_v5 = vmax.f32 %v4846_v47, 0.0 }
 0xf69   : > { %v9120_v61 = vpop.f32.mrf.mxu0 }
 0xf6a   : > { %v4860_v36 = vmax.f32 %v4849_v20, 0.0  ;;  %v4847_v27 = vadd.f32 %v7442_v24, %v4830_v49  ;;  %v4835_v55 = vadd.f32 %v9120_v61, %v4623_v30 }
 0xf6b   : > { %v4799_v40 = vpop.f32.mrf.mxu0 }
 0xf6c   : > { %v11341_v59 = vpack.c.bf16 %v4860_v36, %v4859_v8  ;;  %v4858_v1 = vmax.f32 %v4847_v27, 0.0  ;;  %v4833_v16 = vadd.f32 %v4799_v40, %v11307_v7  ;;  %v4852_v9 = vadd.f32 %v7442_v24, %v4835_v55 }
 0xf6d   : > { %v9121_v23 = vpop.f32.mrf.mxu0 }
 0xf6e   : > { %v11344_v21 = vpack.c.bf16 %v4858_v1, %v4857_v5  ;;  %v4836_v6 = vadd.f32 %v9121_v23, %v11311_v58  ;;  %v4850_v31 = vadd.f32 %v7442_v24, %v4833_v16  ;;  %v4863_v30 = vmax.f32 %v4852_v9, 0.0  ;;  %v9646_v5 = vld [vmem:[%s11864_s7 + $0x50] sm:$0xff]  }
 0xf6f   : > { %v4802_v50 = vpop.f32.mrf.mxu0 }
 0xf70   : > { %v4853_v13 = vadd.f32 %v7442_v24, %v4836_v6  ;;  %v4834_v10 = vadd.f32 %v4802_v50, %v11313_v18  ;;  %v4861_v15 = vmax.f32 %v4850_v31, 0.0  ;;  %v9710_v18 = vmov 0   ;;  %v9647_v6 = vld [vmem:[%s11864_s7 + $0x48] sm:$0xff]  }
 0xf71   : > { %v9124_v12 = vpop.f32.mrf.mxu0  ;;  %v4915_v14 = vsel %vm4913_vm4, 65535, %v9710_v18  ;;  %v9656_v18 = vld [vmem:[%s11864_s7 + $0x60] sm:$0xff]  }
 0xf72   : > { %v4864_v2 = vmax.f32 %v4853_v13, 0.0  ;;  %v4851_v39 = vadd.f32 %v7442_v24, %v4834_v10  ;;  %v4839_v60 = vadd.f32 %v9124_v12, %v11316_v33 }
 0xf73   : > { %v4815_v7 = vpop.f32.mrf.mxu0 }
 0xf74   : > { %v11349_v41 = vpack.c.bf16 %v4864_v2, %v4863_v30  ;;  %v4862_v38 = vmax.f32 %v4851_v39, 0.0  ;;  %v4856_v28 = vadd.f32 %v7442_v24, %v4839_v60  ;;  %v4837_v58 = vadd.f32 %v4815_v7, %v11319_v26  ;;  %v9648_v60 = vld [vmem:[%s11864_s7 + $0x40] sm:$0xff]   ;;  %v9651_v7 = vld [vmem:[%s11864_s7 + $0x78] sm:$0xff]  }
 0xf75   : > { %v9125_v57 = vpop.f32.mrf.mxu0 }
 0xf76   : > { %v11352_v56 = vpack.c.bf16 %v4862_v38, %v4861_v15  ;;  %v4867_v17 = vmax.f32 %v4856_v28, 0.0  ;;  %v4854_v0 = vadd.f32 %v7442_v24, %v4837_v58  ;;  %v9649_v15 = vld [vmem:[%s11859_s2 + $0x38] sm:$0xff]   ;;  %v9650_v38 = vld [vmem:[%s11859_s2 + $0x40] sm:$0xff]   ;;  %v9653_v28 = vld [vmem:[%s11859_s2 + $0x48] sm:$0xff]  }
 0xf77   : > { %v4818_v48 = vpop.f32.mrf.mxu0  ;;  %v9652_v58 = vld [vmem:[%s11864_s7 + $0x70] sm:$0xff]   ;;  %v9655_v57 = vld [vmem:[%s11864_s7 + $0x68] sm:$0xff]  }
 0xf78   : > { %v4873_v43 = vpack.c.bf16 %v4867_v17, %v4867_v17  ;;  %v4838_v33 = vadd.f32 %v4818_v48, %v11322_v52  ;;  %v4865_v46 = vmax.f32 %v4854_v0, 0.0  ;;  %v9633_v52 = vld [vmem:[%s11864_s7 + $0x38] sm:$0xff]   ;;  %v9654_v17 = vld [vmem:[%s11859_s2 + $0x50] ss:$0 sps:$4 sm:$0x11]  }
 0xf7a   : > { %v11355_v25 = vand.u32 %v4915_v14, %v4873_v43  ;;  %v4855_v35 = vadd.f32 %v7442_v24, %v4838_v33  ;;  %v9636_v24 = vld [vmem:[%s11864_s7 + $0x20] sm:$0xff]  }
 0xf7c   : > { %v4866_v34 = vmax.f32 %v4855_v35, 0.0  ;;  %9126 = vmatprep.subr.bf16.mxu0 %v11355_v25  ;;  %9146 = vmatprep.subr.bf16.mxu1 %v11355_v25 }
 0xf7d   : > { %9127 = vmatpush3.bf16.msra.mxu0 %v11355_v25  ;;  %9147 = vmatpush3.bf16.msra.mxu1 %v11355_v25 }
 0xf7e   : > { %v11361_v26 = vpack.c.bf16 %v4866_v34, %v4865_v46 }
 0xf80   : > { %9128 = vmatprep.subr.bf16.mxu0 %v11361_v26  ;;  %9148 = vmatprep.subr.bf16.mxu1 %v11361_v26 }
 0xf81   : > { %9129 = vmatpush3.bf16.msra.mxu0 %v11361_v26  ;;  %9149 = vmatpush3.bf16.msra.mxu1 %v11361_v26 }
 0xf82   : > { %9130 = vmatprep.subr.bf16.mxu0 %v11349_v41  ;;  %9150 = vmatprep.subr.bf16.mxu1 %v11349_v41 }
 0xf85   : > { %9131 = vmatpush3.bf16.msra.mxu0 %v11349_v41  ;;  %9151 = vmatpush3.bf16.msra.mxu1 %v11349_v41 }
 0xf86   : > { %9132 = vmatprep.subr.bf16.mxu0 %v11352_v56  ;;  %9152 = vmatprep.subr.bf16.mxu1 %v11352_v56 }
 0xf89   : > { %9133 = vmatpush3.bf16.msra.mxu0 %v11352_v56  ;;  %9153 = vmatpush3.bf16.msra.mxu1 %v11352_v56 }
 0xf8a   : > { %9134 = vmatprep.subr.bf16.mxu0 %v11341_v59  ;;  %9154 = vmatprep.subr.bf16.mxu1 %v11341_v59 }
 0xf8d   : > { %9135 = vmatpush3.bf16.msra.mxu0 %v11341_v59  ;;  %9155 = vmatpush3.bf16.msra.mxu1 %v11341_v59 }
 0xf8e   : > { %9136 = vmatprep.subr.bf16.mxu0 %v11344_v21  ;;  %9156 = vmatprep.subr.bf16.mxu1 %v11344_v21 }
 0xf91   : > { %9137 = vmatpush3.bf16.msra.mxu0 %v11344_v21  ;;  %9157 = vmatpush3.bf16.msra.mxu1 %v11344_v21 }
 0xf92   : > { %9166 = vmatprep.subr.bf16.mxu0 %v9633_v52  ;;  %9182 = vmatprep.subr.bf16.mxu1 %v9641_v51 }
 0xf94   : > { %9139 = vmatmul.mubr.msk.bf16.vlgmr.msra.gmra.mxu0 %vm4900_vm3, %v9631_v3  ;;  %9159 = vmatmul.mubr.msk.bf16.vlgmr.msra.gmra.mxu1 %vm4900_vm3, %v9632_v63 }
 0xf95   : > { %9167 = vmatpush3.bf16.msra.mxu0 %v9633_v52  ;;  %9162 = vmatprep.mubr.msk.bf16.mxu1 %vm4900_vm3, %v9637_v62 }
 0xf96   : > { %9168 = vmatprep.subr.bf16.mxu0 %v9634_v11  ;;  %9142 = vmatprep.mubr.msk.bf16.mxu0 %vm4900_vm3, %v9639_v29 }
 0xf97   : > { %9183 = vmatpush3.bf16.msra.mxu1 %v9641_v51 }
 0xf98   : > { %9184 = vmatprep.subr.bf16.mxu1 %v9642_v53 }
 0xf99   : > { %9169 = vmatpush3.bf16.msra.mxu0 %v9634_v11 }
 0xf9a   : > { %9170 = vmatprep.subr.bf16.mxu0 %v9635_v37 }
 0xf9b   : > { %9185 = vmatpush3.bf16.msra.mxu1 %v9642_v53 }
 0xf9c   : > { %9163 = vmatmul.mubr.msk.bf16.gmra.mxu1 %vm4900_vm3, %v9638_v42  ;;  %9143 = vmatmul.mubr.msk.bf16.gmra.mxu0 %vm4900_vm3, %v9640_v22 }
 0xf9d   : > { %9171 = vmatpush3.bf16.msra.mxu0 %v9635_v37  ;;  %9186 = vmatprep.subr.bf16.mxu1 %v9643_v19 }
 0xf9e   : > { %9172 = vmatprep.subr.bf16.mxu0 %v9636_v24 }
 0xf9f   : > { %9187 = vmatpush3.bf16.msra.mxu1 %v9643_v19 }
 0xfa0   : > { %9188 = vmatprep.subr.bf16.mxu1 %v9644_v32 }
 0xfa1   : > { %9173 = vmatpush3.bf16.msra.mxu0 %v9636_v24 }
 0xfa2   : > { %9198 = vmatprep.subr.bf16.mxu0 %v11355_v25 }
 0xfa3   : > { %9189 = vmatpush3.bf16.msra.mxu1 %v9644_v32 }
 0xfa4   : > { %9218 = vmatprep.subr.bf16.mxu1 %v9645_v54 }
0x1054   : > { %v9140_v45 = vpop.f32.mrf.mxu0  ;;  %v9160_v4 = vpop.f32.mrf.mxu1 }
0x1056   : > { %v4953_v44 = vpop.f32.mrf.mxu0  ;;  %v5067_v47 = vpop.f32.mrf.mxu1 }
0x1058   : > { %v9141_v20 = vpop.f32.mrf.mxu0  ;;  %v9161_v49 = vpop.f32.mrf.mxu1 }
0x1059   : > { %v4984_v61 = vpack.c.bf16 %v9141_v20, %v9140_v45  ;;  %v5098_v40 = vpack.c.bf16 %v9161_v49, %v9160_v4 }
0x105a   : > { %v4956_v8 = vpop.f32.mrf.mxu0  ;;  %v5070_v36 = vpop.f32.mrf.mxu1 }
0x105b   : > { %v4983_v27 = vpack.c.bf16 %v4956_v8, %v4953_v44  ;;  %v5097_v55 = vpack.c.bf16 %v5070_v36, %v5067_v47 }
0x105c   : > { %v9164_v1 = vpop.f32.mrf.mxu1  ;;  %v9144_v16 = vpop.f32.mrf.mxu0 }
0x105d   : > { %9174 = vmatprep.mubr.msk.bf16.mxu0 %vm5134_vm5, %v5097_v55  ;;  %9190 = vmatprep.mubr.msk.bf16.mxu1 %vm5134_vm5, %v4983_v27  ;;  %v5100_v13 = vpack.c.bf16 %v9164_v1, %v9164_v1  ;;  %v4986_v12 = vpack.c.bf16 %v9144_v16, %v9144_v16  ;;  %v9657_v55 = vld [vmem:[%s11859_s2 + $0x54] sm:$0xff]   ;;  %v9661_v1 = vld [vmem:[%s11859_s2 + $0x64] sm:$0xff]  }
0x105e   : > { %9175 = vmatmul.mubr.msk.bf16.vlgmr.msra.gmra.mxu0 %vm5134_vm5, %v5098_v40  ;;  %9191 = vmatmul.mubr.msk.bf16.vlgmr.msra.gmra.mxu1 %vm5134_vm5, %v4984_v61  ;;  %v5083_v23 = vpop.f32.mrf.mxu1  ;;  %v4969_v9 = vpop.f32.mrf.mxu0  ;;  %v9659_v40 = vld [vmem:[%s11864_s7 + $0x98] sm:$0xff]   ;;  %v9660_v16 = vld [vmem:[%s11864_s7 + $0x90] sm:$0xff]  }
0x105f   : > { %9199 = vmatpush3.bf16.msra.mxu0 %v11355_v25  ;;  %9219 = vmatpush3.bf16.msra.mxu1 %v9645_v54 }
0x1060   : > { %9200 = vmatprep.subr.bf16.mxu0 %v11361_v26  ;;  %9220 = vmatprep.subr.bf16.mxu1 %v9646_v5  ;;  %v9165_v31 = vpop.f32.mrf.mxu1  ;;  %v9145_v50 = vpop.f32.mrf.mxu0 }
0x1062   : > { %v5086_v10 = vpop.f32.mrf.mxu1  ;;  %v4972_v30 = vpop.f32.mrf.mxu0 }
0x1063   : > { %9201 = vmatpush3.bf16.msra.mxu0 %v11361_v26  ;;  %9221 = vmatpush3.bf16.msra.mxu1 %v9646_v5  ;;  %v5099_v2 = vpack.c.bf16 %v5086_v10, %v5083_v23  ;;  %v4985_v39 = vpack.c.bf16 %v4972_v30, %v4969_v9  ;;  %v9658_v5 = vld [vmem:[%s11859_s2 + $0x5c] sm:$0xff]   ;;  %v9663_v23 = vld [vmem:[%s11864_s7 + $0x88] sm:$0xff]  }
0x1064   : > { %9202 = vmatprep.subr.bf16.mxu0 %v11349_v41  ;;  %9222 = vmatprep.subr.bf16.mxu1 %v9647_v6  ;;  %v9662_v9 = vld [vmem:[%s11859_s2 + $0x6c] ss:$0 sps:$4 sm:$0x11]  }
0x1065   : > { %9178 = vmatprep.mubr.msk.bf16.mxu0 %vm5134_vm5, %v5099_v2  ;;  %9194 = vmatprep.mubr.msk.bf16.mxu1 %vm5134_vm5, %v4985_v39 }
0x1066   : > { %9179 = vmatmul.mubr.msk.bf16.gmra.mxu0 %vm5134_vm5, %v5100_v13  ;;  %9195 = vmatmul.mubr.msk.bf16.gmra.mxu1 %vm5134_vm5, %v4986_v12 }
0x1067   : > { %9203 = vmatpush3.bf16.msra.mxu0 %v11349_v41  ;;  %9223 = vmatpush3.bf16.msra.mxu1 %v9647_v6  ;;  %v9664_v6 = vld [vmem:[%s11864_s7 + $0x80] sm:$0xff]  }
0x1068   : > { %9204 = vmatprep.subr.bf16.mxu0 %v11352_v56  ;;  %9224 = vmatprep.subr.bf16.mxu1 %v9648_v60 }
0x1069   : > { %9210 = vmatprep.mubr.msk.bf16.mxu0 %vm4900_vm3, %v9649_v15 }
0x106b   : > { %9205 = vmatpush3.bf16.msra.mxu0 %v11352_v56  ;;  %9225 = vmatpush3.bf16.msra.mxu1 %v9648_v60 }
0x106c   : > { %9206 = vmatprep.subr.bf16.mxu0 %v11341_v59  ;;  %9234 = vmatprep.subr.bf16.mxu1 %v11355_v25 }
0x106f   : > { %9207 = vmatpush3.bf16.msra.mxu0 %v11341_v59 }
0x1070   : > { %9208 = vmatprep.subr.bf16.mxu0 %v11344_v21 }
0x1073   : > { %9209 = vmatpush3.bf16.msra.mxu0 %v11344_v21 }
0x1074   : > { %9254 = vmatprep.subr.bf16.mxu0 %v9651_v7 }
0x1076   : > { %9211 = vmatmul.mubr.msk.bf16.vlgmr.msra.gmra.mxu0 %vm4900_vm3, %v9650_v38 }
0x1077   : > { %9255 = vmatpush3.bf16.msra.mxu0 %v9651_v7  ;;  %9214 = vmatprep.mubr.msk.bf16.mxu0 %vm4900_vm3, %v9653_v28 }
0x1078   : > { %9256 = vmatprep.subr.bf16.mxu0 %v9652_v58 }
0x107b   : > { %9257 = vmatpush3.bf16.msra.mxu0 %v9652_v58 }
0x107c   : > { %9258 = vmatprep.subr.bf16.mxu0 %v9655_v57 }
0x107e   : > { %9215 = vmatmul.mubr.msk.bf16.gmra.mxu0 %vm4900_vm3, %v9654_v17 }
0x107f   : > { %9259 = vmatpush3.bf16.msra.mxu0 %v9655_v57 }
0x1080   : > { %9260 = vmatprep.subr.bf16.mxu0 %v9656_v18 }
0x1083   : > { %9261 = vmatpush3.bf16.msra.mxu0 %v9656_v18 }
0x1084   : > { %9270 = vmatprep.subr.bf16.mxu0 %v11355_v25 }
0x111e   : > { %v9176_v14 = vpop.f32.mrf.mxu0  ;;  %v9192_v48 = vpop.f32.mrf.mxu1 }
0x111f   : > { %v11493_v43 = vadd.f32 %v9192_v48, %v9176_v14 }
0x1120   : > { %v5181_v0 = vpop.f32.mrf.mxu0  ;;  %v5281_v33 = vpop.f32.mrf.mxu1 }
0x1121   : > { %v11495_v35 = vadd.f32 %v5281_v33, %v5181_v0 }
0x1122   : > { %v9177_v46 = vpop.f32.mrf.mxu0  ;;  %v9193_v34 = vpop.f32.mrf.mxu1 }
0x1123   : > { %v11497_v52 = vadd.f32 %v9193_v34, %v9177_v46 }
0x1124   : > { %v5184_v51 = vpop.f32.mrf.mxu0  ;;  %v5284_v3 = vpop.f32.mrf.mxu1 }
0x1125   : > { %v11499_v63 = vadd.f32 %v5284_v3, %v5184_v51 }
0x1126   : > { %v9180_v62 = vpop.f32.mrf.mxu0  ;;  %v9196_v11 = vpop.f32.mrf.mxu1 }
0x1127   : > { %v11501_v29 = vadd.f32 %v9196_v11, %v9180_v62  ;;  %v9665_v62 = vld [vmem:[%s11859_s2 + $0x70] sm:$0xff]   ;;  %v9667_v11 = vld [vmem:[%s11864_s7 + $0xb8] sm:$0xff]  }
0x1128   : > { %v5197_v53 = vpop.f32.mrf.mxu0  ;;  %v5297_v37 = vpop.f32.mrf.mxu1 }
0x1129   : > { %v11503_v42 = vadd.f32 %v5297_v37, %v5197_v53  ;;  %v9669_v53 = vld [vmem:[%s11859_s2 + $0x80] sm:$0xff]   ;;  %v9668_v37 = vld [vmem:[%s11864_s7 + $0xb0] sm:$0xff]  }
0x112a   : > { %v9181_v22 = vpop.f32.mrf.mxu0  ;;  %v9197_v24 = vpop.f32.mrf.mxu1 }
0x112b   : > { %v9670_v22 = vld [vmem:[%s11859_s2 + $0x88] ss:$0 sps:$4 sm:$0x11]   ;;  %v9672_v24 = vld [vmem:[%s11864_s7 + $0xa0] sm:$0xff]  }
0x112c   : > { %v11505_v19 = vpop.f32.mrf.mxu0  ;;  %v5300_v31 = vpop.f32.mrf.mxu1 }
0x112d   : > { %v5301_v57 = vadd.f32 %v5300_v31, %v11505_v19 }
0x1136   : > { %v9212_v32 = vpop.f32.mrf.mxu0 }
0x1138   : > { %v5383_v54 = vpop.f32.mrf.mxu0 }
0x113a   : > { %v9213_v45 = vpop.f32.mrf.mxu0 }
0x113b   : > { %v5414_v47 = vpack.c.bf16 %v9213_v45, %v9212_v32 }
0x113c   : > { %v5386_v4 = vpop.f32.mrf.mxu0 }
0x113d   : > { %v5413_v44 = vpack.c.bf16 %v5386_v4, %v5383_v54 }
0x113e   : > { %v9216_v20 = vpop.f32.mrf.mxu0 }
0x113f   : > { %9226 = vmatprep.mubr.msk.bf16.mxu1 %vm5134_vm5, %v5413_v44  ;;  %v5416_v8 = vpack.c.bf16 %v9216_v20, %v9216_v20 }
0x1140   : > { %v5399_v49 = vpop.f32.mrf.mxu0  ;;  %9227 = vmatmul.mubr.msk.bf16.vlgmr.msra.gmra.mxu1 %vm5134_vm5, %v5414_v47 }
0x1141   : > { %9235 = vmatpush3.bf16.msra.mxu1 %v11355_v25 }
0x1142   : > { %9236 = vmatprep.subr.bf16.mxu1 %v11361_v26  ;;  %v9217_v61 = vpop.f32.mrf.mxu0 }
0x1144   : > { %v5402_v36 = vpop.f32.mrf.mxu0 }
0x1145   : > { %v5415_v27 = vpack.c.bf16 %v5402_v36, %v5399_v49  ;;  %9237 = vmatpush3.bf16.msra.mxu1 %v11361_v26 }
0x1146   : > { %9238 = vmatprep.subr.bf16.mxu1 %v11349_v41 }
0x1147   : > { %9230 = vmatprep.mubr.msk.bf16.mxu1 %vm5134_vm5, %v5415_v27 }
0x1148   : > { %9231 = vmatmul.mubr.msk.bf16.gmra.mxu1 %vm5134_vm5, %v5416_v8 }
0x1149   : > { %9239 = vmatpush3.bf16.msra.mxu1 %v11349_v41  ;;  %9246 = vmatprep.mubr.msk.bf16.mxu1 %vm4900_vm3, %v9657_v55 }
0x114a   : > { %9240 = vmatprep.subr.bf16.mxu1 %v11352_v56 }
0x114d   : > { %9241 = vmatpush3.bf16.msra.mxu1 %v11352_v56 }
0x114e   : > { %9242 = vmatprep.subr.bf16.mxu1 %v11341_v59 }
0x1151   : > { %9243 = vmatpush3.bf16.msra.mxu1 %v11341_v59 }
0x1152   : > { %9244 = vmatprep.subr.bf16.mxu1 %v11344_v21 }
0x1155   : > { %9245 = vmatpush3.bf16.msra.mxu1 %v11344_v21 }
0x1156   : > { %9290 = vmatprep.subr.bf16.mxu1 %v9659_v40 }
0x1158   : > { %9247 = vmatmul.mubr.msk.bf16.vlgmr.msra.gmra.mxu1 %vm4900_vm3, %v9658_v5 }
0x1159   : > { %9291 = vmatpush3.bf16.msra.mxu1 %v9659_v40  ;;  %9250 = vmatprep.mubr.msk.bf16.mxu1 %vm4900_vm3, %v9661_v1 }
0x115a   : > { %9292 = vmatprep.subr.bf16.mxu1 %v9660_v16 }
0x115d   : > { %9293 = vmatpush3.bf16.msra.mxu1 %v9660_v16 }
0x115e   : > { %9294 = vmatprep.subr.bf16.mxu1 %v9663_v23 }
0x1160   : > { %9251 = vmatmul.mubr.msk.bf16.gmra.mxu1 %vm4900_vm3, %v9662_v9 }
0x1161   : > { %9295 = vmatpush3.bf16.msra.mxu1 %v9663_v23 }
0x1162   : > { %9296 = vmatprep.subr.bf16.mxu1 %v9664_v6 }
0x1165   : > { %9297 = vmatpush3.bf16.msra.mxu1 %v9664_v6 }
0x1166   : > { %9306 = vmatprep.subr.bf16.mxu1 %v11355_v25 }
0x1200   : > { %v9228_v50 = vpop.f32.mrf.mxu1 }
0x1201   : > { %v11552_v13 = vadd.f32 %v9228_v50, %v11493_v43 }
0x1202   : > { %v5496_v10 = vpop.f32.mrf.mxu1 }
0x1203   : > { %v11555_v12 = vadd.f32 %v5496_v10, %v11495_v35 }
0x1204   : > { %v9229_v30 = vpop.f32.mrf.mxu1 }
0x1205   : > { %v11558_v2 = vadd.f32 %v9229_v30, %v11497_v52 }
0x1206   : > { %v5499_v39 = vpop.f32.mrf.mxu1 }
0x1207   : > { %v11561_v60 = vadd.f32 %v5499_v39, %v11499_v63  ;;  %v9675_v39 = vld [vmem:[%s11864_s7 + $0xd8] sm:$0xff]  }
0x1208   : > { %v9232_v15 = vpop.f32.mrf.mxu1 }
0x1209   : > { %v11564_v7 = vadd.f32 %v9232_v15, %v11501_v29  ;;  %v9666_v29 = vld [vmem:[%s11859_s2 + $0x78] sm:$0xff]  }
0x120a   : > { %v5512_v38 = vpop.f32.mrf.mxu1  ;;  %v9677_v15 = vld [vmem:[%s11859_s2 + $0x9c] sm:$0xff]  }
0x120b   : > { %v11567_v28 = vadd.f32 %v5512_v38, %v11503_v42  ;;  %v9671_v42 = vld [vmem:[%s11864_s7 + $0xa8] sm:$0xff]  }
0x120c   : > { %v9233_v58 = vpop.f32.mrf.mxu1  ;;  %v9679_v38 = vld [vmem:[%s11864_s7 + $0xc8] sm:$0xff]  }
0x120d   : > { %v9680_v58 = vld [vmem:[%s11864_s7 + $0xc0] sm:$0xff]  }
0x120e   : > { %v5515_v17 = vpop.f32.mrf.mxu1 }
0x120f   : > { %v11570_v18 = vadd.f32 %v5515_v17, %v5301_v57 }
0x1218   : > { %v9248_v14 = vpop.f32.mrf.mxu1 }
0x121a   : > { %v5605_v48 = vpop.f32.mrf.mxu1 }
0x121c   : > { %v9249_v43 = vpop.f32.mrf.mxu1 }
0x121d   : > { %v5636_v35 = vpack.c.bf16 %v9249_v43, %v9248_v14 }
0x121e   : > { %v5608_v0 = vpop.f32.mrf.mxu1 }
0x121f   : > { %v5635_v33 = vpack.c.bf16 %v5608_v0, %v5605_v48 }
0x1220   : > { %v9252_v46 = vpop.f32.mrf.mxu1 }
0x1221   : > { %9262 = vmatprep.mubr.msk.bf16.mxu0 %vm5134_vm5, %v5635_v33  ;;  %v5638_v51 = vpack.c.bf16 %v9252_v46, %v9252_v46 }
0x1222   : > { %v5621_v34 = vpop.f32.mrf.mxu1  ;;  %9263 = vmatmul.mubr.msk.bf16.vlgmr.msra.gmra.mxu0 %vm5134_vm5, %v5636_v35 }
0x1223   : > { %9271 = vmatpush3.bf16.msra.mxu0 %v11355_v25 }
0x1224   : > { %9272 = vmatprep.subr.bf16.mxu0 %v11361_v26  ;;  %v9253_v52 = vpop.f32.mrf.mxu1 }
0x1226   : > { %v5624_v3 = vpop.f32.mrf.mxu1 }
0x1227   : > { %v5637_v63 = vpack.c.bf16 %v5624_v3, %v5621_v34  ;;  %9273 = vmatpush3.bf16.msra.mxu0 %v11361_v26 }
0x1228   : > { %9274 = vmatprep.subr.bf16.mxu0 %v11349_v41 }
0x1229   : > { %9266 = vmatprep.mubr.msk.bf16.mxu0 %vm5134_vm5, %v5637_v63 }
0x122a   : > { %9267 = vmatmul.mubr.msk.bf16.gmra.mxu0 %vm5134_vm5, %v5638_v51 }
0x122b   : > { %9275 = vmatpush3.bf16.msra.mxu0 %v11349_v41  ;;  %9282 = vmatprep.mubr.msk.bf16.mxu0 %vm4900_vm3, %v9665_v62 }
0x122c   : > { %9276 = vmatprep.subr.bf16.mxu0 %v11352_v56 }
0x122f   : > { %9277 = vmatpush3.bf16.msra.mxu0 %v11352_v56 }
0x1230   : > { %9278 = vmatprep.subr.bf16.mxu0 %v11341_v59 }
0x1233   : > { %9279 = vmatpush3.bf16.msra.mxu0 %v11341_v59 }
0x1234   : > { %9280 = vmatprep.subr.bf16.mxu0 %v11344_v21 }
0x1237   : > { %9281 = vmatpush3.bf16.msra.mxu0 %v11344_v21 }
0x1238   : > { %9326 = vmatprep.subr.bf16.mxu0 %v9667_v11 }
0x123a   : > { %9283 = vmatmul.mubr.msk.bf16.vlgmr.msra.gmra.mxu0 %vm4900_vm3, %v9666_v29 }
0x123b   : > { %9327 = vmatpush3.bf16.msra.mxu0 %v9667_v11  ;;  %9286 = vmatprep.mubr.msk.bf16.mxu0 %vm4900_vm3, %v9669_v53 }
0x123c   : > { %9328 = vmatprep.subr.bf16.mxu0 %v9668_v37 }
0x123f   : > { %9329 = vmatpush3.bf16.msra.mxu0 %v9668_v37 }
0x1240   : > { %9330 = vmatprep.subr.bf16.mxu0 %v9671_v42 }
0x1242   : > { %9287 = vmatmul.mubr.msk.bf16.gmra.mxu0 %vm4900_vm3, %v9670_v22 }
0x1243   : > { %9331 = vmatpush3.bf16.msra.mxu0 %v9671_v42 }
0x1244   : > { %9332 = vmatprep.subr.bf16.mxu0 %v9672_v24 }
0x1247   : > { %9333 = vmatpush3.bf16.msra.mxu0 %v9672_v24 }
0x1248   : > { %9342 = vmatprep.subr.bf16.mxu0 %v11355_v25 }
0x12e2   : > { %v9264_v19 = vpop.f32.mrf.mxu0 }
0x12e3   : > { %v11617_v32 = vadd.f32 %v9264_v19, %v11552_v13 }
0x12e4   : > { %v5718_v54 = vpop.f32.mrf.mxu0 }
0x12e5   : > { %v11620_v45 = vadd.f32 %v5718_v54, %v11555_v12 }
0x12e6   : > { %v9265_v4 = vpop.f32.mrf.mxu0 }
0x12e7   : > { %v11623_v44 = vadd.f32 %v9265_v4, %v11558_v2  ;;  %v9673_v2 = vld [vmem:[%s11859_s2 + $0x8c] sm:$0xff]  }
0x12e8   : > { %v5721_v47 = vpop.f32.mrf.mxu0  ;;  %v9681_v4 = vld [vmem:[%s11859_s2 + $0xa8] sm:$0xff]  }
0x12e9   : > { %v11626_v20 = vadd.f32 %v5721_v47, %v11561_v60  ;;  %v9674_v60 = vld [vmem:[%s11859_s2 + $0x94] sm:$0xff]  }
0x12ea   : > { %v9268_v49 = vpop.f32.mrf.mxu0  ;;  %v9682_v47 = vld [vmem:[%s11859_s2 + $0xb0] sm:$0xff]  }
0x12eb   : > { %v11629_v61 = vadd.f32 %v9268_v49, %v11564_v7  ;;  %v9676_v7 = vld [vmem:[%s11864_s7 + $0xd0] sm:$0xff]  }
0x12ec   : > { %v5734_v8 = vpop.f32.mrf.mxu0  ;;  %v9684_v49 = vld [vmem:[%s11864_s7 + $0xf0] sm:$0xff]  }
0x12ed   : > { %v11632_v36 = vadd.f32 %v5734_v8, %v11567_v28  ;;  %v9678_v28 = vld [vmem:[%s11859_s2 + $0xa4] ss:$0 sps:$4 sm:$0x11]   ;;  %v9686_v8 = vld [vmem:[%s11859_s2 + $0xc0] ss:$0 sps:$4 sm:$0x11]  }
0x12ee   : > { %v9269_v27 = vpop.f32.mrf.mxu0 }
0x12f0   : > { %v5737_v55 = vpop.f32.mrf.mxu0 }
0x12f1   : > { %v11635_v40 = vadd.f32 %v5737_v55, %v11570_v18 }
0x12fa   : > { %v9284_v5 = vpop.f32.mrf.mxu0 }
0x12fc   : > { %v5827_v1 = vpop.f32.mrf.mxu0 }
0x12fe   : > { %v9285_v16 = vpop.f32.mrf.mxu0 }
0x12ff   : > { %v5858_v6 = vpack.c.bf16 %v9285_v16, %v9284_v5 }
0x1300   : > { %v5830_v23 = vpop.f32.mrf.mxu0 }
0x1301   : > { %v5857_v9 = vpack.c.bf16 %v5830_v23, %v5827_v1 }
0x1302   : > { %v9288_v31 = vpop.f32.mrf.mxu0 }
0x1303   : > { %9298 = vmatprep.mubr.msk.bf16.mxu1 %vm5134_vm5, %v5857_v9  ;;  %v5860_v10 = vpack.c.bf16 %v9288_v31, %v9288_v31 }
0x1304   : > { %v5843_v50 = vpop.f32.mrf.mxu0  ;;  %9299 = vmatmul.mubr.msk.bf16.vlgmr.msra.gmra.mxu1 %vm5134_vm5, %v5858_v6 }
0x1305   : > { %9307 = vmatpush3.bf16.msra.mxu1 %v11355_v25 }
0x1306   : > { %9308 = vmatprep.subr.bf16.mxu1 %v11361_v26  ;;  %v9289_v13 = vpop.f32.mrf.mxu0 }
0x1308   : > { %v5846_v12 = vpop.f32.mrf.mxu0 }
0x1309   : > { %v5859_v30 = vpack.c.bf16 %v5846_v12, %v5843_v50  ;;  %9309 = vmatpush3.bf16.msra.mxu1 %v11361_v26 }
0x130a   : > { %9310 = vmatprep.subr.bf16.mxu1 %v11349_v41 }
0x130b   : > { %9302 = vmatprep.mubr.msk.bf16.mxu1 %vm5134_vm5, %v5859_v30 }
0x130c   : > { %9303 = vmatmul.mubr.msk.bf16.gmra.mxu1 %vm5134_vm5, %v5860_v10 }
0x130d   : > { %9311 = vmatpush3.bf16.msra.mxu1 %v11349_v41  ;;  %9318 = vmatprep.mubr.msk.bf16.mxu1 %vm4900_vm3, %v9673_v2 }
0x130e   : > { %9312 = vmatprep.subr.bf16.mxu1 %v11352_v56 }
0x1311   : > { %9313 = vmatpush3.bf16.msra.mxu1 %v11352_v56 }
0x1312   : > { %9314 = vmatprep.subr.bf16.mxu1 %v11341_v59 }
0x1315   : > { %9315 = vmatpush3.bf16.msra.mxu1 %v11341_v59 }
0x1316   : > { %9316 = vmatprep.subr.bf16.mxu1 %v11344_v21 }
0x1319   : > { %9317 = vmatpush3.bf16.msra.mxu1 %v11344_v21 }
0x131a   : > { %9362 = vmatprep.subr.bf16.mxu1 %v9675_v39 }
0x131c   : > { %9319 = vmatmul.mubr.msk.bf16.vlgmr.msra.gmra.mxu1 %vm4900_vm3, %v9674_v60 }
0x131d   : > { %9363 = vmatpush3.bf16.msra.mxu1 %v9675_v39  ;;  %9322 = vmatprep.mubr.msk.bf16.mxu1 %vm4900_vm3, %v9677_v15 }
0x131e   : > { %9364 = vmatprep.subr.bf16.mxu1 %v9676_v7 }
0x1321   : > { %9365 = vmatpush3.bf16.msra.mxu1 %v9676_v7 }
0x1322   : > { %9366 = vmatprep.subr.bf16.mxu1 %v9679_v38 }
0x1324   : > { %9323 = vmatmul.mubr.msk.bf16.gmra.mxu1 %vm4900_vm3, %v9678_v28 }
0x1325   : > { %9367 = vmatpush3.bf16.msra.mxu1 %v9679_v38 }
0x1326   : > { %9368 = vmatprep.subr.bf16.mxu1 %v9680_v58 }
0x1329   : > { %9369 = vmatpush3.bf16.msra.mxu1 %v9680_v58 }
0x132a   : > { %9378 = vmatprep.subr.bf16.mxu1 %v11355_v25 }
0x13c4   : > { %v9300_v57 = vpop.f32.mrf.mxu1 }
0x13c5   : > { %v11682_v17 = vadd.f32 %v9300_v57, %v11617_v32 }
0x13c6   : > { %v5940_v18 = vpop.f32.mrf.mxu1 }
0x13c7   : > { %v11685_v14 = vadd.f32 %v5940_v18, %v11620_v45 }
0x13c8   : > { %v9301_v48 = vpop.f32.mrf.mxu1 }
0x13c9   : > { %v11688_v43 = vadd.f32 %v9301_v48, %v11623_v44  ;;  %v9683_v44 = vld [vmem:[%s11864_s7 + $0xf8] sm:$0xff]   ;;  %v9689_v48 = vld [vmem:[%s11859_s2 + $0xc4] sm:$0xff]  }
0x13ca   : > { %v5943_v0 = vpop.f32.mrf.mxu1 }
0x13cb   : > { %v11691_v33 = vadd.f32 %v5943_v0, %v11626_v20  ;;  %v9685_v20 = vld [vmem:[%s11859_s2 + $0xb8] sm:$0xff]  }
0x13cc   : > { %v9304_v35 = vpop.f32.mrf.mxu1  ;;  %v9691_v0 = vld [vmem:[%s11859_s2 + $0xd4] sm:$0xff]  }
0x13cd   : > { %v11694_v46 = vadd.f32 %v9304_v35, %v11629_v61  ;;  %v9687_v61 = vld [vmem:[%s11864_s7 + $0xe8] sm:$0xff]  }
0x13ce   : > { %v5956_v34 = vpop.f32.mrf.mxu1 }
0x13cf   : > { %v11697_v52 = vadd.f32 %v5956_v34, %v11632_v36  ;;  %v9688_v36 = vld [vmem:[%s11864_s7 + $0xe0] sm:$0xff]  }
0x13d0   : > { %v9305_v51 = vpop.f32.mrf.mxu1 }
0x13d2   : > { %v5959_v3 = vpop.f32.mrf.mxu1 }
0x13d3   : > { %v11700_v63 = vadd.f32 %v5959_v3, %v11635_v40 }
0x13dc   : > { %v9320_v62 = vpop.f32.mrf.mxu1 }
0x13de   : > { %v6049_v11 = vpop.f32.mrf.mxu1 }
0x13e0   : > { %v9321_v29 = vpop.f32.mrf.mxu1 }
0x13e1   : > { %v6080_v42 = vpack.c.bf16 %v9321_v29, %v9320_v62 }
0x13e2   : > { %v6052_v53 = vpop.f32.mrf.mxu1 }
0x13e3   : > { %v6079_v37 = vpack.c.bf16 %v6052_v53, %v6049_v11 }
0x13e4   : > { %v9324_v22 = vpop.f32.mrf.mxu1 }
0x13e5   : > { %9334 = vmatprep.mubr.msk.bf16.mxu0 %vm5134_vm5, %v6079_v37  ;;  %v6082_v32 = vpack.c.bf16 %v9324_v22, %v9324_v22 }
0x13e6   : > { %v6065_v24 = vpop.f32.mrf.mxu1  ;;  %9335 = vmatmul.mubr.msk.bf16.vlgmr.msra.gmra.mxu0 %vm5134_vm5, %v6080_v42 }
0x13e7   : > { %9343 = vmatpush3.bf16.msra.mxu0 %v11355_v25 }
0x13e8   : > { %9344 = vmatprep.subr.bf16.mxu0 %v11361_v26  ;;  %v9325_v19 = vpop.f32.mrf.mxu1 }
0x13ea   : > { %v6068_v54 = vpop.f32.mrf.mxu1 }
0x13eb   : > { %v6081_v45 = vpack.c.bf16 %v6068_v54, %v6065_v24  ;;  %9345 = vmatpush3.bf16.msra.mxu0 %v11361_v26 }
0x13ec   : > { %9346 = vmatprep.subr.bf16.mxu0 %v11349_v41 }
0x13ed   : > { %9338 = vmatprep.mubr.msk.bf16.mxu0 %vm5134_vm5, %v6081_v45 }
0x13ee   : > { %9339 = vmatmul.mubr.msk.bf16.gmra.mxu0 %vm5134_vm5, %v6082_v32 }
0x13ef   : > { %9347 = vmatpush3.bf16.msra.mxu0 %v11349_v41  ;;  %9354 = vmatprep.mubr.msk.bf16.mxu0 %vm4900_vm3, %v9681_v4 }
0x13f0   : > { %9348 = vmatprep.subr.bf16.mxu0 %v11352_v56 }
0x13f3   : > { %9349 = vmatpush3.bf16.msra.mxu0 %v11352_v56 }
0x13f4   : > { %9350 = vmatprep.subr.bf16.mxu0 %v11341_v59 }
0x13f7   : > { %9351 = vmatpush3.bf16.msra.mxu0 %v11341_v59 }
0x13f8   : > { %9352 = vmatprep.subr.bf16.mxu0 %v11344_v21 }
0x13fb   : > { %9353 = vmatpush3.bf16.msra.mxu0 %v11344_v21 }
0x13fc   : > { %9398 = vmatprep.subr.bf16.mxu0 %v9683_v44 }
0x13fe   : > { %9355 = vmatmul.mubr.msk.bf16.vlgmr.msra.gmra.mxu0 %vm4900_vm3, %v9682_v47 }
0x13ff   : > { %9399 = vmatpush3.bf16.msra.mxu0 %v9683_v44  ;;  %9358 = vmatprep.mubr.msk.bf16.mxu0 %vm4900_vm3, %v9685_v20 }
0x1400   : > { %9400 = vmatprep.subr.bf16.mxu0 %v9684_v49 }
0x1403   : > { %9401 = vmatpush3.bf16.msra.mxu0 %v9684_v49 }
0x1404   : > { %9402 = vmatprep.subr.bf16.mxu0 %v9687_v61 }
0x1406   : > { %9359 = vmatmul.mubr.msk.bf16.gmra.mxu0 %vm4900_vm3, %v9686_v8 }
0x1407   : > { %9403 = vmatpush3.bf16.msra.mxu0 %v9687_v61 }
0x1408   : > { %9404 = vmatprep.subr.bf16.mxu0 %v9688_v36 }
0x140b   : > { %9405 = vmatpush3.bf16.msra.mxu0 %v9688_v36 }
0x140c   : > { %9414 = vmatprep.subr.bf16.mxu0 %v11355_v25 }
0x14a6   : > { %v9336_v27 = vpop.f32.mrf.mxu0 }
0x14a7   : > { %v6194_v55 = vadd.f32 %v9336_v27, %v11682_v17  ;;  %v9693_v27 = vld [vmem:[%s11859_s2 + $0xe0] sm:$0xff]  }
0x14a8   : > { %v6162_v40 = vpop.f32.mrf.mxu0 }
0x14a9   : > { %v6192_v5 = vadd.f32 %v6162_v40, %v11685_v14 }
0x14aa   : > { %v9337_v1 = vpop.f32.mrf.mxu0 }
0x14ab   : > { %v6195_v16 = vadd.f32 %v9337_v1, %v11688_v43  ;;  %v9690_v43 = vld [vmem:[%s11859_s2 + $0xcc] sm:$0xff]  }
0x14ac   : > { %v6165_v23 = vpop.f32.mrf.mxu0 }
0x14ad   : > { %v6193_v9 = vadd.f32 %v6165_v23, %v11691_v33  ;;  %v9692_v33 = vld [vmem:[%s11859_s2 + $0xdc] ss:$0 sps:$4 sm:$0x11]  }
0x14ae   : > { %v9340_v6 = vpop.f32.mrf.mxu0 }
0x14af   : > { %v6198_v31 = vadd.f32 %v9340_v6, %v11694_v46 }
0x14b0   : > { %v6178_v50 = vpop.f32.mrf.mxu0 }
0x14b1   : > { %v6196_v13 = vadd.f32 %v6178_v50, %v11697_v52 }
0x14b2   : > { %v9341_v10 = vpop.f32.mrf.mxu0 }
0x14b4   : > { %v6181_v12 = vpop.f32.mrf.mxu0 }
0x14b5   : > { %v6197_v30 = vadd.f32 %v6181_v12, %v11700_v63 }
0x14be   : > { %v9356_v2 = vpop.f32.mrf.mxu0 }
0x14c0   : > { %v6271_v39 = vpop.f32.mrf.mxu0 }
0x14c2   : > { %v9357_v60 = vpop.f32.mrf.mxu0 }
0x14c3   : > { %v6302_v38 = vpack.c.bf16 %v9357_v60, %v9356_v2 }
0x14c4   : > { %v6274_v15 = vpop.f32.mrf.mxu0 }
0x14c5   : > { %v6301_v7 = vpack.c.bf16 %v6274_v15, %v6271_v39 }
0x14c6   : > { %v9360_v28 = vpop.f32.mrf.mxu0 }
0x14c7   : > { %9370 = vmatprep.mubr.msk.bf16.mxu1 %vm5134_vm5, %v6301_v7  ;;  %v6304_v17 = vpack.c.bf16 %v9360_v28, %v9360_v28 }
0x14c8   : > { %v6287_v58 = vpop.f32.mrf.mxu0  ;;  %9371 = vmatmul.mubr.msk.bf16.vlgmr.msra.gmra.mxu1 %vm5134_vm5, %v6302_v38 }
0x14c9   : > { %9379 = vmatpush3.bf16.msra.mxu1 %v11355_v25 }
0x14ca   : > { %9380 = vmatprep.subr.bf16.mxu1 %v11361_v26  ;;  %v9361_v57 = vpop.f32.mrf.mxu0 }
0x14cc   : > { %v6290_v18 = vpop.f32.mrf.mxu0 }
0x14cd   : > { %v6303_v14 = vpack.c.bf16 %v6290_v18, %v6287_v58  ;;  %9381 = vmatpush3.bf16.msra.mxu1 %v11361_v26 }
0x14ce   : > { %9382 = vmatprep.subr.bf16.mxu1 %v11349_v41 }
0x14cf   : > { %9374 = vmatprep.mubr.msk.bf16.mxu1 %vm5134_vm5, %v6303_v14 }
0x14d0   : > { %9375 = vmatmul.mubr.msk.bf16.gmra.mxu1 %vm5134_vm5, %v6304_v17 }
0x14d1   : > { %9383 = vmatpush3.bf16.msra.mxu1 %v11349_v41  ;;  %9390 = vmatprep.mubr.msk.bf16.mxu1 %vm4900_vm3, %v9689_v48 }
0x14d2   : > { %9384 = vmatprep.subr.bf16.mxu1 %v11352_v56 }
0x14d5   : > { %9385 = vmatpush3.bf16.msra.mxu1 %v11352_v56 }
0x14d6   : > { %9386 = vmatprep.subr.bf16.mxu1 %v11341_v59 }
0x14d9   : > { %9387 = vmatpush3.bf16.msra.mxu1 %v11341_v59 }
0x14da   : > { %9388 = vmatprep.subr.bf16.mxu1 %v11344_v21 }
0x14dd   : > { %9389 = vmatpush3.bf16.msra.mxu1 %v11344_v21 }
0x14e0   : > { %9391 = vmatmul.mubr.msk.bf16.vlgmr.msra.gmra.mxu1 %vm4900_vm3, %v9690_v43 }
0x14e1   : > { %9394 = vmatprep.mubr.msk.bf16.mxu1 %vm4900_vm3, %v9691_v0  ;;  %v7707_v0 = vld [vmem:[%s11865_s8] ss:$0 sm:$0xff] }
0x14e8   : > { %9395 = vmatmul.mubr.msk.bf16.gmra.mxu1 %vm4900_vm3, %v9692_v33 }
0x1588   : > { %v9372_v35 = vpop.f32.mrf.mxu1 }
0x1589   : > { %v6416_v46 = vadd.f32 %v9372_v35, %v6194_v55  ;;  %v9700_v55 = vld [vmem:[%s11864_s7 + $0x100] sm:$0xff]  }
0x158a   : > { %v6384_v34 = vpop.f32.mrf.mxu1 }
0x158b   : > { %v6414_v52 = vadd.f32 %v6384_v34, %v6192_v5 }
0x158c   : > { %v9373_v51 = vpop.f32.mrf.mxu1 }
0x158d   : > { %v6417_v3 = vadd.f32 %v9373_v51, %v6195_v16 }
0x158e   : > { %v6387_v63 = vpop.f32.mrf.mxu1 }
0x158f   : > { %v6415_v62 = vadd.f32 %v6387_v63, %v6193_v9 }
0x1590   : > { %v9376_v11 = vpop.f32.mrf.mxu1 }
0x1591   : > { %v6420_v29 = vadd.f32 %v9376_v11, %v6198_v31 }
0x1592   : > { %v6400_v53 = vpop.f32.mrf.mxu1 }
0x1593   : > { %v6418_v37 = vadd.f32 %v6400_v53, %v6196_v13 }
0x1594   : > { %v9377_v42 = vpop.f32.mrf.mxu1 }
0x1596   : > { %v6403_v22 = vpop.f32.mrf.mxu1 }
0x1597   : > { %v6419_v24 = vadd.f32 %v6403_v22, %v6197_v30 }
0x15a0   : > { %v9392_v19 = vpop.f32.mrf.mxu1 }
0x15a2   : > { %v6493_v32 = vpop.f32.mrf.mxu1 }
0x15a4   : > { %v9393_v54 = vpop.f32.mrf.mxu1 }
0x15a5   : > { %v6524_v44 = vpack.c.bf16 %v9393_v54, %v9392_v19 }
0x15a6   : > { %v6496_v45 = vpop.f32.mrf.mxu1 }
0x15a7   : > { %v6523_v4 = vpack.c.bf16 %v6496_v45, %v6493_v32 }
0x15a8   : > { %v9396_v47 = vpop.f32.mrf.mxu1 }
0x15a9   : > { %9406 = vmatprep.mubr.msk.bf16.mxu0 %vm5134_vm5, %v6523_v4  ;;  %v6526_v61 = vpack.c.bf16 %v9396_v47, %v9396_v47 }
0x15aa   : > { %v6509_v20 = vpop.f32.mrf.mxu1  ;;  %9407 = vmatmul.mubr.msk.bf16.vlgmr.msra.gmra.mxu0 %vm5134_vm5, %v6524_v44 }
0x15ab   : > { %9415 = vmatpush3.bf16.msra.mxu0 %v11355_v25  ;;  %v9694_v25 = vld [vmem:[%s11859_s2 + $0xe8] sm:$0xff]  }
0x15ac   : > { %9416 = vmatprep.subr.bf16.mxu0 %v11361_v26  ;;  %v9397_v49 = vpop.f32.mrf.mxu1 }
0x15ae   : > { %v6512_v8 = vpop.f32.mrf.mxu1 }
0x15af   : > { %v6525_v36 = vpack.c.bf16 %v6512_v8, %v6509_v20  ;;  %9417 = vmatpush3.bf16.msra.mxu0 %v11361_v26  ;;  %v9699_v26 = vld [vmem:[%s11864_s7 + $0x108] sm:$0xff]  }
0x15b0   : > { %9418 = vmatprep.subr.bf16.mxu0 %v11349_v41 }
0x15b1   : > { %9410 = vmatprep.mubr.msk.bf16.mxu0 %vm5134_vm5, %v6525_v36 }
0x15b2   : > { %9411 = vmatmul.mubr.msk.bf16.gmra.mxu0 %vm5134_vm5, %v6526_v61 }
0x15b3   : > { %9419 = vmatpush3.bf16.msra.mxu0 %v11349_v41  ;;  %9426 = vmatprep.mubr.msk.bf16.mxu0 %vm4900_vm3, %v9693_v27  ;;  %v9695_v41 = vld [vmem:[%s11859_s2 + $0xf0] sm:$0xff]   ;;  %v6924_v27 = vld [vmem:[%s11838_s29 + $0x18] sm:$0x1] }
0x15b4   : > { %9420 = vmatprep.subr.bf16.mxu0 %v11352_v56 }
0x15b7   : > { %9421 = vmatpush3.bf16.msra.mxu0 %v11352_v56  ;;  %v9697_v56 = vld [vmem:[%s11864_s7 + $0x118] sm:$0xff]  }
0x15b8   : > { %9422 = vmatprep.subr.bf16.mxu0 %v11341_v59  ;;  %9434 = vmatprep.subr.bf16.mxu1 %v9697_v56 }
0x15b9   : > { %9435 = vmatpush3.bf16.msra.mxu1 %v9697_v56 }
0x15bb   : > { %9423 = vmatpush3.bf16.msra.mxu0 %v11341_v59  ;;  %v9696_v59 = vld [vmem:[%s11859_s2 + $0xf8] ss:$0 sps:$4 sm:$0x11]  }
0x15bc   : > { %9424 = vmatprep.subr.bf16.mxu0 %v11344_v21 }
0x15bf   : > { %9425 = vmatpush3.bf16.msra.mxu0 %v11344_v21  ;;  %v9698_v21 = vld [vmem:[%s11864_s7 + $0x110] sm:$0xff]  }
0x15c0   : > { %9436 = vmatprep.subr.bf16.mxu1 %v9698_v21 }
0x15c1   : > { %9437 = vmatpush3.bf16.msra.mxu1 %v9698_v21 }
0x15c2   : > { %9427 = vmatmul.mubr.msk.bf16.vlgmr.msra.gmra.mxu0 %vm4900_vm3, %v9694_v25  ;;  %9438 = vmatprep.subr.bf16.mxu1 %v9699_v26 }
0x15c3   : > { %9430 = vmatprep.mubr.msk.bf16.mxu0 %vm4900_vm3, %v9695_v41 }
0x15c5   : > { %9439 = vmatpush3.bf16.msra.mxu1 %v9699_v26 }
0x15c6   : > { %9440 = vmatprep.subr.bf16.mxu1 %v9700_v55 }
0x15c9   : > { %9441 = vmatpush3.bf16.msra.mxu1 %v9700_v55 }
0x15ca   : > { %9431 = vmatmul.mubr.msk.bf16.gmra.mxu0 %vm4900_vm3, %v9696_v59 }
0x166a   : > { %v9408_v40 = vpop.f32.mrf.mxu0 }
0x166b   : > { %v6638_v5 = vadd.f32 %v9408_v40, %v6416_v46 }
0x166c   : > { %v6606_v1 = vpop.f32.mrf.mxu0 }
0x166d   : > { %v6636_v16 = vadd.f32 %v6606_v1, %v6414_v52 }
0x166e   : > { %v9409_v23 = vpop.f32.mrf.mxu0 }
0x166f   : > { %v6639_v9 = vadd.f32 %v9409_v23, %v6417_v3 }
0x1670   : > { %v6609_v6 = vpop.f32.mrf.mxu0 }
0x1671   : > { %v6637_v31 = vadd.f32 %v6609_v6, %v6415_v62 }
0x1672   : > { %v9412_v50 = vpop.f32.mrf.mxu0 }
0x1673   : > { %v6642_v13 = vadd.f32 %v9412_v50, %v6420_v29 }
0x1674   : > { %v6622_v10 = vpop.f32.mrf.mxu0 }
0x1675   : > { %v6640_v12 = vadd.f32 %v6622_v10, %v6418_v37 }
0x1676   : > { %v9413_v30 = vpop.f32.mrf.mxu0 }
0x1678   : > { %v6625_v2 = vpop.f32.mrf.mxu0 }
0x1679   : > { %v6641_v39 = vadd.f32 %v6625_v2, %v6419_v24 }
0x1682   : > { %v9428_v60 = vpop.f32.mrf.mxu0 }
0x1684   : > { %v6715_v15 = vpop.f32.mrf.mxu0 }
0x1686   : > { %v9429_v7 = vpop.f32.mrf.mxu0 }
0x1687   : > { %v6746_v58 = vpack.c.bf16 %v9429_v7, %v9428_v60 }
0x1688   : > { %v6718_v38 = vpop.f32.mrf.mxu0 }
0x1689   : > { %v6745_v28 = vpack.c.bf16 %v6718_v38, %v6715_v15 }
0x168a   : > { %v9432_v57 = vpop.f32.mrf.mxu0 }
0x168b   : > { %9442 = vmatprep.mubr.msk.bf16.mxu1 %vm5134_vm5, %v6745_v28  ;;  %v6748_v43 = vpack.c.bf16 %v9432_v57, %v9432_v57 }
0x168c   : > { %v6731_v17 = vpop.f32.mrf.mxu0  ;;  %9443 = vmatmul.mubr.msk.bf16.vlgmr.msra.gmra.mxu1 %vm5134_vm5, %v6746_v58 }
0x168e   : > { %v9433_v18 = vpop.f32.mrf.mxu0 }
0x1690   : > { %v6734_v14 = vpop.f32.mrf.mxu0 }
0x1691   : > { %v6747_v48 = vpack.c.bf16 %v6734_v14, %v6731_v17 }
0x1693   : > { %9446 = vmatprep.mubr.msk.bf16.mxu1 %vm5134_vm5, %v6747_v48 }
0x1694   : > { %9447 = vmatmul.mubr.msk.bf16.gmra.mxu1 %vm5134_vm5, %v6748_v43 }
0x174c   : > { %v9444_v33 = vpop.f32.mrf.mxu1 }
0x174d   : > { %v6860_v35 = vadd.f32 %v9444_v33, %v6638_v5 }
0x174e   : > { %v6828_v46 = vpop.f32.mrf.mxu1 }
0x174f   : > { %v6873_v34 = vadd.f32 %v7707_v0, %v6860_v35  ;;  %v6858_v52 = vadd.f32 %v6828_v46, %v6636_v16 }
0x1750   : > { %v9445_v51 = vpop.f32.mrf.mxu1 }
0x1751   : > { %v6880_v3 = vmax.f32 %v6873_v34, 0.0  ;;  %v6871_v63 = vadd.f32 %v7707_v0, %v6858_v52  ;;  %v6861_v62 = vadd.f32 %v9445_v51, %v6639_v9 }
0x1752   : > { %v6831_v11 = vpop.f32.mrf.mxu1 }
0x1753   : > { %v7719_v29 = vpack.c.bf16 %v6880_v3, %v6880_v3  ;;  %v6878_v53 = vmax.f32 %v6871_v63, 0.0  ;;  %v6874_v37 = vadd.f32 %v7707_v0, %v6861_v62  ;;  %v6859_v42 = vadd.f32 %v6831_v11, %v6637_v31 }
0x1754   : > { %v9448_v22 = vpop.f32.mrf.mxu1 }
0x1755   : > { %6917 = vst.msk [vmem:[%s11838_s29 + $0x8] sm:$0xf] %vm6914_vm6, %v7719_v29  ;;  %v7717_v24 = vpack.c.bf16 %v6878_v53, %v6878_v53  ;;  %v6881_v19 = vmax.f32 %v6874_v37, 0.0  ;;  %v6872_v32 = vadd.f32 %v7707_v0, %v6859_v42  ;;  %v6864_v54 = vadd.f32 %v9448_v22, %v6642_v13 }
0x1756   : > { %v6844_v45 = vpop.f32.mrf.mxu1 }
0x1757   : > { %6915 = vst.msk [vmem:[%s11838_s29] sm:$0xf] %vm6914_vm6, %v7717_v24  ;;  %v7720_v4 = vpack.c.bf16 %v6881_v19, %v6881_v19  ;;  %v6879_v44 = vmax.f32 %v6872_v32, 0.0  ;;  %v6877_v47 = vadd.f32 %v7707_v0, %v6864_v54  ;;  %v6862_v20 = vadd.f32 %v6844_v45, %v6640_v12 }
0x1758   : > { %v9449_v49 = vpop.f32.mrf.mxu1 }
0x1759   : > { %6918 = vst.msk [vmem:[%s11838_s29 + $0xc] sm:$0xf] %vm6914_vm6, %v7720_v4  ;;  %v7718_v61 = vpack.c.bf16 %v6879_v44, %v6879_v44  ;;  %v6884_v8 = vmax.f32 %v6877_v47, 0.0  ;;  %v6875_v36 = vadd.f32 %v7707_v0, %v6862_v20 }
0x175a   : > { %v6847_v25 = vpop.f32.mrf.mxu1 }
0x175b   : > { %6916 = vst.msk [vmem:[%s11838_s29 + $0x4] sm:$0xf] %vm6914_vm6, %v7718_v61  ;;  %v7723_v41 = vpack.c.bf16 %v6884_v8, %v6884_v8  ;;  %v6882_v59 = vmax.f32 %v6875_v36, 0.0  ;;  %v6863_v56 = vadd.f32 %v6847_v25, %v6641_v39 }
0x175d   : > { %v6925_v21 = vsel %vm6923_vm9, %v7723_v41, %v6924_v27  ;;  %v7721_v26 = vpack.c.bf16 %v6882_v59, %v6882_v59  ;;  %v6876_v55 = vadd.f32 %v7707_v0, %v6863_v56 }
0x175e   : > { %6926 = vst [vmem:[%s11838_s29 + $0x18] sm:$0x1] %v6925_v21 }
0x175f   : > { %6919 = vst.msk [vmem:[%s11838_s29 + $0x10] sm:$0xf] %vm6914_vm6, %v7721_v26  ;;  %v6883_v40 = vmax.f32 %v6876_v55, 0.0 }
0x1761   : > { %v7722_v5 = vpack.c.bf16 %v6883_v40, %v6883_v40 }
0x1763   : > { %6920 = vst.msk [vmem:[%s11838_s29 + $0x14] sm:$0xf] %vm6914_vm6, %v7722_v5 }
0x1764 PF: > { %s19_s30 = sadd.s32 1, %s9708_s30  }
0x1765   : > { %p16_p4 = scmp.ge.s32.totalorder %s19_s30, 4  }
0x1767   :  { %18 = sbr.rel (!%p16_p4) target bundleno = 1 (0x1), region = 123 }

</bundles_post_ra>
